<compile_context>
chip_gen: v7x
topology: tpu7x:2x2x1
jax: 0.10.0
libtpu: 0.0.40
codegen_flags: <defaults>
</compile_context>

<pallas_src>
import jax
import jax.numpy as jnp
from jax.experimental import pallas as pl
from jax.experimental.pallas import tpu as pltpu


# ---------------------------------------------------------------------------
# In-kernel helpers (operate on refs; traced inline inside the fused kernel).
# ---------------------------------------------------------------------------
def _conv5x5(xp_scr, w_ref, b_ref, y_scr, H, W, Cin, Cout):
    """Conv2d(k=5, pad=2, stride=1) from a padded VMEM scratch into y_scr."""
    acc = jnp.zeros((H * W, Cout), jnp.float32)
    for kh in range(5):
        for kw in range(5):
            patch = xp_scr[pl.ds(kh, H), pl.ds(kw, W), :]          # (H, W, Cin)
            acc = acc + jnp.dot(
                patch.reshape(H * W, Cin),
                w_ref[kh, kw],
                preferred_element_type=jnp.float32,
            )
    y_scr[...] = acc.reshape(H, W, Cout) + b_ref[...]              # + bias


def _maxpool2(y_scr, m_scr, H, W):
    """2x2 max pool (stride 2). Column pool via stride-2 sublane reads, row
    pool via stride-2 outer reads.  Returns the pooled (H//2, W//2, C) value."""
    m_scr[...] = jnp.maximum(
        y_scr[:, pl.ds(0, W // 2, 2), :],
        y_scr[:, pl.ds(1, W // 2, 2), :],
    )
    return jnp.maximum(
        m_scr[pl.ds(0, H // 2, 2), :, :],
        m_scr[pl.ds(1, H // 2, 2), :, :],
    )


# ---------------------------------------------------------------------------
# Fused whole-network kernel: one grid step == one image, end to end.
# ---------------------------------------------------------------------------
def _lighter_kernel(p1_ref, w1_ref, b1_ref, w2_ref, b2_ref, w3_ref, b3_ref,
                    fc1_ref, fc1b_ref, fc2_ref, fc2b_ref, o_ref,
                    y1_scr, m1_scr, xp2_scr, y2_scr, m2_scr, xp3_scr,
                    y3_scr, m3_scr, x3_scr):
    f32 = jnp.float32

    # ---- Layer 1: conv(3->32) as a single im2col matmul (K = 5*5*3 = 75) ----
    c1 = jnp.dot(p1_ref[0].reshape(32 * 32, 75), w1_ref[...],
                 preferred_element_type=f32)                       # (1024, 32)
    y1_scr[...] = c1.reshape(32, 32, 32) + b1_ref[...]

    # ---- Pool 1 -> (16,16,32), written into layer-2 padded input scratch ----
    xp2_scr[...] = jnp.zeros(xp2_scr.shape, f32)                   # halo zeros
    pooled1 = _maxpool2(y1_scr, m1_scr, 32, 32)
    xp2_scr[pl.ds(2, 16), pl.ds(2, 16), :] = pooled1

    # ---- Layer 2: conv(32->32) + pool -> (8,8,32) ---------------------------
    _conv5x5(xp2_scr, w2_ref, b2_ref, y2_scr, 16, 16, 32, 32)
    xp3_scr[...] = jnp.zeros(xp3_scr.shape, f32)
    pooled2 = _maxpool2(y2_scr, m2_scr, 16, 16)
    xp3_scr[pl.ds(2, 8), pl.ds(2, 8), :] = pooled2

    # ---- Layer 3: conv(32->64) + pool -> (4,4,64) ---------------------------
    _conv5x5(xp3_scr, w3_ref, b3_ref, y3_scr, 8, 8, 32, 64)
    x3_scr[...] = _maxpool2(y3_scr, m3_scr, 8, 8)                  # (4,4,64) NHWC

    # ---- FC1 (1024->64): 16 per-position dots; weights pre-permuted so the
    #      NHWC (h,w,c) order matches torch's NCHW flatten exactly. -----------
    h = jnp.zeros((1, 64), f32)
    for p in range(16):
        r, c = divmod(p, 4)
        h = h + jnp.dot(x3_scr[r, pl.ds(c, 1), :], fc1_ref[p],
                        preferred_element_type=f32)                # (1, 64)
    h = h + fc1b_ref[...]

    # ---- FC2 (64->10, padded to 128 lanes for a lane-dense store) -----------
    logits = jnp.dot(h, fc2_ref[...], preferred_element_type=f32) + fc2b_ref[...]
    o_ref[0] = logits.astype(o_ref.dtype)                          # (1, 128)


# ---------------------------------------------------------------------------
# Wrapper: layer-1 im2col + weight re-layout in XLA, one fused pallas_call.
# ---------------------------------------------------------------------------
def lighter_forward(x_nchw, params):
    f32 = jnp.float32
    N = x_nchw.shape[0]

    # NCHW -> NHWC, pad, and im2col for layer 1 (tiny tensors; done by XLA).
    x = jnp.transpose(x_nchw, (0, 2, 3, 1)).astype(f32)            # (N,32,32,3)
    xp = jnp.pad(x, ((0, 0), (2, 2), (2, 2), (0, 0)))              # (N,36,36,3)
    patches1 = jnp.concatenate(
        [xp[:, kh:kh + 32, kw:kw + 32, :] for kh in range(5) for kw in range(5)],
        axis=-1)                                                   # (N,32,32,75)

    w1r = params["w1"].reshape(75, 32)                             # (kh,kw,ci) rows
    b1 = params["b1"].reshape(1, 32)
    w2, b2 = params["w2"], params["b2"].reshape(1, 32)
    w3, b3 = params["w3"], params["b3"].reshape(1, 64)
    # fc1 rows are stored in torch NCHW-flatten order (c,h,w); permute once to
    # the kernel's NHWC (h,w,c) order -> (16, 64, 64) per-position blocks.
    fc1r = (params["fc1_w"].reshape(64, 4, 4, 64)
            .transpose(1, 2, 0, 3).reshape(16, 64, 64))
    fc1b = params["fc1_b"].reshape(1, 64)
    fc2w = jnp.pad(params["fc2_w"], ((0, 0), (0, 128 - 10)))       # (64,128)
    fc2b = jnp.pad(params["fc2_b"], (0, 128 - 10)).reshape(1, 128)

    out = pl.pallas_call(
        _lighter_kernel,
        out_shape=jax.ShapeDtypeStruct((N, 1, 128), f32),
        grid_spec=pltpu.PrefetchScalarGridSpec(
            num_scalar_prefetch=0,
            grid=(N,),
            in_specs=[
                pl.BlockSpec((1, 32, 32, 75), lambda n: (n, 0, 0, 0)),
                pl.BlockSpec((75, 32), lambda n: (0, 0)),
                pl.BlockSpec((1, 32), lambda n: (0, 0)),
                pl.BlockSpec((5, 5, 32, 32), lambda n: (0, 0, 0, 0)),
                pl.BlockSpec((1, 32), lambda n: (0, 0)),
                pl.BlockSpec((5, 5, 32, 64), lambda n: (0, 0, 0, 0)),
                pl.BlockSpec((1, 64), lambda n: (0, 0)),
                pl.BlockSpec((16, 64, 64), lambda n: (0, 0, 0)),
                pl.BlockSpec((1, 64), lambda n: (0, 0)),
                pl.BlockSpec((64, 128), lambda n: (0, 0)),
                pl.BlockSpec((1, 128), lambda n: (0, 0)),
            ],
            out_specs=pl.BlockSpec((1, 1, 128), lambda n: (n, 0, 0)),
            scratch_shapes=[
                pltpu.VMEM((32, 32, 32), f32),   # y1: conv1 output
                pltpu.VMEM((32, 16, 32), f32),   # m1: column-pooled conv1
                pltpu.VMEM((20, 20, 32), f32),   # xp2: padded layer-2 input
                pltpu.VMEM((16, 16, 32), f32),   # y2
                pltpu.VMEM((16, 8, 32), f32),    # m2
                pltpu.VMEM((12, 12, 32), f32),   # xp3: padded layer-3 input
                pltpu.VMEM((8, 8, 64), f32),     # y3
                pltpu.VMEM((8, 4, 64), f32),     # m3
                pltpu.VMEM((4, 4, 64), f32),     # x3: pooled layer-3 (NHWC)
            ],
        ),
        compiler_params=pltpu.CompilerParams(
            dimension_semantics=("parallel",)),
    )(patches1, w1r, b1, w2, b2, w3, b3, fc1r, fc1b, fc2w, fc2b)

    return out.reshape(N, 128)[:, :10]


# ---------------------------------------------------------------------------
# Parameter init (matches the torch module's shapes; fc weights stored with
# torch's input ordering so the wrapper permutation mirrors real checkpoints).
# ---------------------------------------------------------------------------
def init_params(key):
    ks = jax.random.split(key, 5)

    def conv_w(k, cin, cout):
        fan_in = 5 * 5 * cin
        return jax.random.normal(k, (5, 5, cin, cout), jnp.float32) / jnp.sqrt(fan_in)

    def lin_w(k, cin, cout):
        return jax.random.normal(k, (cin, cout), jnp.float32) / jnp.sqrt(cin)

    return {
        "w1": conv_w(ks[0], 3, 32),   "b1": jnp.zeros((32,), jnp.float32),
        "w2": conv_w(ks[1], 32, 32),  "b2": jnp.zeros((32,), jnp.float32),
        "w3": conv_w(ks[2], 32, 64),  "b3": jnp.zeros((64,), jnp.float32),
        "fc1_w": lin_w(ks[3], 1024, 64), "fc1_b": jnp.zeros((64,), jnp.float32),
        "fc2_w": lin_w(ks[4], 64, 10),   "fc2_b": jnp.zeros((10,), jnp.float32),
    }


if __name__ == "__main__":
    key = jax.random.PRNGKey(0)
    pkey, xkey = jax.random.split(key)
    params = init_params(pkey)
    # Linear(1024) forces 32x32x3 input (64 * 4 * 4 = 1024); small batch of 2.
    x = jax.random.normal(xkey, (2, 3, 32, 32), jnp.float32)

    fwd = jax.jit(lambda inp: lighter_forward(inp, params))
    out = jax.block_until_ready(fwd(x))
    assert out.shape == (2, 10) and out.dtype == jnp.float32
    print("KERNEL_OK")
</pallas_src>

<mosaic_0001>
module attributes {stable_mosaic.version = 11 : i64} {
  func.func @_lighter_kernel(%arg0: i32, %arg1: memref<1x32x32x75xf32, #tpu.memory_space<vmem>>, %arg2: memref<75x32xf32, #tpu.memory_space<vmem>>, %arg3: memref<1x32xf32, #tpu.memory_space<vmem>>, %arg4: memref<5x5x32x32xf32, #tpu.memory_space<vmem>>, %arg5: memref<1x32xf32, #tpu.memory_space<vmem>>, %arg6: memref<5x5x32x64xf32, #tpu.memory_space<vmem>>, %arg7: memref<1x64xf32, #tpu.memory_space<vmem>>, %arg8: memref<16x64x64xf32, #tpu.memory_space<vmem>>, %arg9: memref<1x64xf32, #tpu.memory_space<vmem>>, %arg10: memref<64x128xf32, #tpu.memory_space<vmem>>, %arg11: memref<1x128xf32, #tpu.memory_space<vmem>>, %arg12: memref<1x1x128xf32, #tpu.memory_space<vmem>>, %arg13: memref<32x32x32xf32, #tpu.memory_space<vmem>>, %arg14: memref<32x16x32xf32, #tpu.memory_space<vmem>>, %arg15: memref<20x20x32xf32, #tpu.memory_space<vmem>>, %arg16: memref<16x16x32xf32, #tpu.memory_space<vmem>>, %arg17: memref<16x8x32xf32, #tpu.memory_space<vmem>>, %arg18: memref<12x12x32xf32, #tpu.memory_space<vmem>>, %arg19: memref<8x8x64xf32, #tpu.memory_space<vmem>>, %arg20: memref<8x4x64xf32, #tpu.memory_space<vmem>>, %arg21: memref<4x4x64xf32, #tpu.memory_space<vmem>>) attributes {dimension_semantics = [#tpu.dimension_semantics<parallel>], iteration_bounds = array<i64: 2>, scalar_prefetch = 0 : i64, scratch_operands = 9 : i64, tpu.core_type = #tpu.core_type<tc>, window_params = [{transform_indices = @transform_0, window_bounds = array<i64: 1, 32, 32, 75>}, {pipeline_mode = #tpu.pipeline_mode<synchronous>, transform_indices = @transform_1, window_bounds = array<i64: 75, 32>}, {pipeline_mode = #tpu.pipeline_mode<synchronous>, transform_indices = @transform_2, window_bounds = array<i64: 1, 32>}, {pipeline_mode = #tpu.pipeline_mode<synchronous>, transform_indices = @transform_3, window_bounds = array<i64: 5, 5, 32, 32>}, {pipeline_mode = #tpu.pipeline_mode<synchronous>, transform_indices = @transform_4, window_bounds = array<i64: 1, 32>}, {pipeline_mode = #tpu.pipeline_mode<synchronous>, transform_indices = @transform_5, window_bounds = array<i64: 5, 5, 32, 64>}, {pipeline_mode = #tpu.pipeline_mode<synchronous>, transform_indices = @transform_6, window_bounds = array<i64: 1, 64>}, {pipeline_mode = #tpu.pipeline_mode<synchronous>, transform_indices = @transform_7, window_bounds = array<i64: 16, 64, 64>}, {pipeline_mode = #tpu.pipeline_mode<synchronous>, transform_indices = @transform_8, window_bounds = array<i64: 1, 64>}, {pipeline_mode = #tpu.pipeline_mode<synchronous>, transform_indices = @transform_9, window_bounds = array<i64: 64, 128>}, {pipeline_mode = #tpu.pipeline_mode<synchronous>, transform_indices = @transform_10, window_bounds = array<i64: 1, 128>}, {transform_indices = @transform_11, window_bounds = array<i64: 1, 1, 128>}]} {
    %c0 = arith.constant 0 : index
    %c0_0 = arith.constant 0 : index
    %c0_1 = arith.constant 0 : index
    %c0_2 = arith.constant 0 : index
    %0 = vector.load %arg1[%c0, %c0_0, %c0_1, %c0_2] : memref<1x32x32x75xf32, #tpu.memory_space<vmem>>, vector<1x32x32x75xf32>
    %1 = vector.shape_cast %0 : vector<1x32x32x75xf32> to vector<32x32x75xf32>
    %2 = vector.shape_cast %1 : vector<32x32x75xf32> to vector<1024x75xf32>
    %c0_3 = arith.constant 0 : index
    %c0_4 = arith.constant 0 : index
    %3 = vector.load %arg2[%c0_3, %c0_4] : memref<75x32xf32, #tpu.memory_space<vmem>>, vector<75x32xf32>
    %cst = arith.constant dense<0.000000e+00> : vector<1024x32xf32>
    %4 = tpu.matmul %2, %3, %cst {dimension_numbers = #tpu.dot_dimension_numbers<[1], [0], [0], [1], [0, 0, 1, 1], [], []>} : vector<1024x75xf32>, vector<75x32xf32>, vector<1024x32xf32> -> vector<1024x32xf32>
    %5 = vector.shape_cast %4 : vector<1024x32xf32> to vector<32x32x32xf32>
    %c0_5 = arith.constant 0 : index
    %c0_6 = arith.constant 0 : index
    %6 = vector.load %arg3[%c0_5, %c0_6] : memref<1x32xf32, #tpu.memory_space<vmem>>, vector<1x32xf32>
    %7 = vector.shape_cast %6 : vector<1x32xf32> to vector<1x1x32xf32>
    %8 = vector.broadcast %7 : vector<1x1x32xf32> to vector<32x32x32xf32>
    %9 = arith.addf %5, %8 : vector<32x32x32xf32>
    %c0_7 = arith.constant 0 : index
    %c0_8 = arith.constant 0 : index
    %c0_9 = arith.constant 0 : index
    %10 = vector.load %arg13[%c0_7, %c0_8, %c0_9] : memref<32x32x32xf32, #tpu.memory_space<vmem>>, vector<32x32x32xf32>
    tpu.vector_store %arg13[%c0_7, %c0_8, %c0_9], %9 {strides = array<i32>} : memref<32x32x32xf32, #tpu.memory_space<vmem>>, vector<32x32x32xf32>,
    %cst_10 = arith.constant 0.000000e+00 : f32
    %11 = vector.broadcast %cst_10 : f32 to vector<20x20x32xf32>
    %c0_11 = arith.constant 0 : index
    %c0_12 = arith.constant 0 : index
    %c0_13 = arith.constant 0 : index
    %12 = vector.load %arg15[%c0_11, %c0_12, %c0_13] : memref<20x20x32xf32, #tpu.memory_space<vmem>>, vector<20x20x32xf32>
    tpu.vector_store %arg15[%c0_11, %c0_12, %c0_13], %11 {strides = array<i32>} : memref<20x20x32xf32, #tpu.memory_space<vmem>>, vector<20x20x32xf32>,
    %c0_14 = arith.constant 0 : index
    %c0_15 = arith.constant 0 : index
    %c0_16 = arith.constant 0 : index
    %13 = tpu.strided_load %arg13[%c0_14, %c0_15, %c0_16] {strides = array<i32: 1, 2, 1>} : memref<32x32x32xf32, #tpu.memory_space<vmem>>, vector<32x16x32xf32>
    %c0_17 = arith.constant 0 : index
    %c1 = arith.constant 1 : index
    %c0_18 = arith.constant 0 : index
    %14 = tpu.strided_load %arg13[%c0_17, %c1, %c0_18] {strides = array<i32: 1, 2, 1>} : memref<32x32x32xf32, #tpu.memory_space<vmem>>, vector<32x16x32xf32>
    %15 = arith.maximumf %13, %14 : vector<32x16x32xf32>
    %c0_19 = arith.constant 0 : index
    %c0_20 = arith.constant 0 : index
    %c0_21 = arith.constant 0 : index
    %16 = vector.load %arg14[%c0_19, %c0_20, %c0_21] : memref<32x16x32xf32, #tpu.memory_space<vmem>>, vector<32x16x32xf32>
    tpu.vector_store %arg14[%c0_19, %c0_20, %c0_21], %15 {strides = array<i32>} : memref<32x16x32xf32, #tpu.memory_space<vmem>>, vector<32x16x32xf32>,
    %c0_22 = arith.constant 0 : index
    %c0_23 = arith.constant 0 : index
    %c0_24 = arith.constant 0 : index
    %17 = tpu.strided_load %arg14[%c0_22, %c0_23, %c0_24] {strides = array<i32: 2, 1, 1>} : memref<32x16x32xf32, #tpu.memory_space<vmem>>, vector<16x16x32xf32>
    %c1_25 = arith.constant 1 : index
    %c0_26 = arith.constant 0 : index
    %c0_27 = arith.constant 0 : index
    %18 = tpu.strided_load %arg14[%c1_25, %c0_26, %c0_27] {strides = array<i32: 2, 1, 1>} : memref<32x16x32xf32, #tpu.memory_space<vmem>>, vector<16x16x32xf32>
    %19 = arith.maximumf %17, %18 : vector<16x16x32xf32>
    %c2 = arith.constant 2 : index
    %c2_28 = arith.constant 2 : index
    %c0_29 = arith.constant 0 : index
    %20 = vector.load %arg15[%c2, %c2_28, %c0_29] : memref<20x20x32xf32, #tpu.memory_space<vmem>>, vector<16x16x32xf32>
    tpu.vector_store %arg15[%c2, %c2_28, %c0_29], %19 {strides = array<i32>} : memref<20x20x32xf32, #tpu.memory_space<vmem>>, vector<16x16x32xf32>,
    %cst_30 = arith.constant 0.000000e+00 : f32
    %21 = vector.broadcast %cst_30 : f32 to vector<256x32xf32>
    %c0_31 = arith.constant 0 : index
    %c0_32 = arith.constant 0 : index
    %c0_33 = arith.constant 0 : index
    %22 = vector.load %arg15[%c0_31, %c0_32, %c0_33] : memref<20x20x32xf32, #tpu.memory_space<vmem>>, vector<16x16x32xf32>
    %23 = vector.shape_cast %22 : vector<16x16x32xf32> to vector<256x32xf32>
    %c0_34 = arith.constant 0 : index
    %c0_35 = arith.constant 0 : index
    %c0_36 = arith.constant 0 : index
    %c0_37 = arith.constant 0 : index
    %24 = vector.load %arg4[%c0_34, %c0_35, %c0_36, %c0_37] : memref<5x5x32x32xf32, #tpu.memory_space<vmem>>, vector<1x1x32x32xf32>
    %25 = vector.shape_cast %24 : vector<1x1x32x32xf32> to vector<32x32xf32>
    %cst_38 = arith.constant dense<0.000000e+00> : vector<256x32xf32>
    %26 = tpu.matmul %23, %25, %cst_38 {dimension_numbers = #tpu.dot_dimension_numbers<[1], [0], [0], [1], [0, 0, 1, 1], [], []>} : vector<256x32xf32>, vector<32x32xf32>, vector<256x32xf32> -> vector<256x32xf32>
    %27 = arith.addf %21, %26 : vector<256x32xf32>
    %c0_39 = arith.constant 0 : index
    %c1_40 = arith.constant 1 : index
    %c0_41 = arith.constant 0 : index
    %28 = vector.load %arg15[%c0_39, %c1_40, %c0_41] : memref<20x20x32xf32, #tpu.memory_space<vmem>>, vector<16x16x32xf32>
    %29 = vector.shape_cast %28 : vector<16x16x32xf32> to vector<256x32xf32>
    %c0_42 = arith.constant 0 : index
    %c1_43 = arith.constant 1 : index
    %c0_44 = arith.constant 0 : index
    %c0_45 = arith.constant 0 : index
    %30 = vector.load %arg4[%c0_42, %c1_43, %c0_44, %c0_45] : memref<5x5x32x32xf32, #tpu.memory_space<vmem>>, vector<1x1x32x32xf32>
    %31 = vector.shape_cast %30 : vector<1x1x32x32xf32> to vector<32x32xf32>
    %cst_46 = arith.constant dense<0.000000e+00> : vector<256x32xf32>
    %32 = tpu.matmul %29, %31, %cst_46 {dimension_numbers = #tpu.dot_dimension_numbers<[1], [0], [0], [1], [0, 0, 1, 1], [], []>} : vector<256x32xf32>, vector<32x32xf32>, vector<256x32xf32> -> vector<256x32xf32>
    %33 = arith.addf %27, %32 : vector<256x32xf32>
    %c0_47 = arith.constant 0 : index
    %c2_48 = arith.constant 2 : index
    %c0_49 = arith.constant 0 : index
    %34 = vector.load %arg15[%c0_47, %c2_48, %c0_49] : memref<20x20x32xf32, #tpu.memory_space<vmem>>, vector<16x16x32xf32>
    %35 = vector.shape_cast %34 : vector<16x16x32xf32> to vector<256x32xf32>
    %c0_50 = arith.constant 0 : index
    %c2_51 = arith.constant 2 : index
    %c0_52 = arith.constant 0 : index
    %c0_53 = arith.constant 0 : index
    %36 = vector.load %arg4[%c0_50, %c2_51, %c0_52, %c0_53] : memref<5x5x32x32xf32, #tpu.memory_space<vmem>>, vector<1x1x32x32xf32>
    %37 = vector.shape_cast %36 : vector<1x1x32x32xf32> to vector<32x32xf32>
    %cst_54 = arith.constant dense<0.000000e+00> : vector<256x32xf32>
    %38 = tpu.matmul %35, %37, %cst_54 {dimension_numbers = #tpu.dot_dimension_numbers<[1], [0], [0], [1], [0, 0, 1, 1], [], []>} : vector<256x32xf32>, vector<32x32xf32>, vector<256x32xf32> -> vector<256x32xf32>
    %39 = arith.addf %33, %38 : vector<256x32xf32>
    %c0_55 = arith.constant 0 : index
    %c3 = arith.constant 3 : index
    %c0_56 = arith.constant 0 : index
    %40 = vector.load %arg15[%c0_55, %c3, %c0_56] : memref<20x20x32xf32, #tpu.memory_space<vmem>>, vector<16x16x32xf32>
    %41 = vector.shape_cast %40 : vector<16x16x32xf32> to vector<256x32xf32>
    %c0_57 = arith.constant 0 : index
    %c3_58 = arith.constant 3 : index
    %c0_59 = arith.constant 0 : index
    %c0_60 = arith.constant 0 : index
    %42 = vector.load %arg4[%c0_57, %c3_58, %c0_59, %c0_60] : memref<5x5x32x32xf32, #tpu.memory_space<vmem>>, vector<1x1x32x32xf32>
    %43 = vector.shape_cast %42 : vector<1x1x32x32xf32> to vector<32x32xf32>
    %cst_61 = arith.constant dense<0.000000e+00> : vector<256x32xf32>
    %44 = tpu.matmul %41, %43, %cst_61 {dimension_numbers = #tpu.dot_dimension_numbers<[1], [0], [0], [1], [0, 0, 1, 1], [], []>} : vector<256x32xf32>, vector<32x32xf32>, vector<256x32xf32> -> vector<256x32xf32>
    %45 = arith.addf %39, %44 : vector<256x32xf32>
    %c0_62 = arith.constant 0 : index
    %c4 = arith.constant 4 : index
    %c0_63 = arith.constant 0 : index
    %46 = vector.load %arg15[%c0_62, %c4, %c0_63] : memref<20x20x32xf32, #tpu.memory_space<vmem>>, vector<16x16x32xf32>
    %47 = vector.shape_cast %46 : vector<16x16x32xf32> to vector<256x32xf32>
    %c0_64 = arith.constant 0 : index
    %c4_65 = arith.constant 4 : index
    %c0_66 = arith.constant 0 : index
    %c0_67 = arith.constant 0 : index
    %48 = vector.load %arg4[%c0_64, %c4_65, %c0_66, %c0_67] : memref<5x5x32x32xf32, #tpu.memory_space<vmem>>, vector<1x1x32x32xf32>
    %49 = vector.shape_cast %48 : vector<1x1x32x32xf32> to vector<32x32xf32>
    %cst_68 = arith.constant dense<0.000000e+00> : vector<256x32xf32>
    %50 = tpu.matmul %47, %49, %cst_68 {dimension_numbers = #tpu.dot_dimension_numbers<[1], [0], [0], [1], [0, 0, 1, 1], [], []>} : vector<256x32xf32>, vector<32x32xf32>, vector<256x32xf32> -> vector<256x32xf32>
    %51 = arith.addf %45, %50 : vector<256x32xf32>
    %c1_69 = arith.constant 1 : index
    %c0_70 = arith.constant 0 : index
    %c0_71 = arith.constant 0 : index
    %52 = vector.load %arg15[%c1_69, %c0_70, %c0_71] : memref<20x20x32xf32, #tpu.memory_space<vmem>>, vector<16x16x32xf32>
    %53 = vector.shape_cast %52 : vector<16x16x32xf32> to vector<256x32xf32>
    %c1_72 = arith.constant 1 : index
    %c0_73 = arith.constant 0 : index
    %c0_74 = arith.constant 0 : index
    %c0_75 = arith.constant 0 : index
    %54 = vector.load %arg4[%c1_72, %c0_73, %c0_74, %c0_75] : memref<5x5x32x32xf32, #tpu.memory_space<vmem>>, vector<1x1x32x32xf32>
    %55 = vector.shape_cast %54 : vector<1x1x32x32xf32> to vector<32x32xf32>
    %cst_76 = arith.constant dense<0.000000e+00> : vector<256x32xf32>
    %56 = tpu.matmul %53, %55, %cst_76 {dimension_numbers = #tpu.dot_dimension_numbers<[1], [0], [0], [1], [0, 0, 1, 1], [], []>} : vector<256x32xf32>, vector<32x32xf32>, vector<256x32xf32> -> vector<256x32xf32>
    %57 = arith.addf %51, %56 : vector<256x32xf32>
    %c1_77 = arith.constant 1 : index
    %c1_78 = arith.constant 1 : index
    %c0_79 = arith.constant 0 : index
    %58 = vector.load %arg15[%c1_77, %c1_78, %c0_79] : memref<20x20x32xf32, #tpu.memory_space<vmem>>, vector<16x16x32xf32>
    %59 = vector.shape_cast %58 : vector<16x16x32xf32> to vector<256x32xf32>
    %c1_80 = arith.constant 1 : index
    %c1_81 = arith.constant 1 : index
    %c0_82 = arith.constant 0 : index
    %c0_83 = arith.constant 0 : index
    %60 = vector.load %arg4[%c1_80, %c1_81, %c0_82, %c0_83] : memref<5x5x32x32xf32, #tpu.memory_space<vmem>>, vector<1x1x32x32xf32>
    %61 = vector.shape_cast %60 : vector<1x1x32x32xf32> to vector<32x32xf32>
    %cst_84 = arith.constant dense<0.000000e+00> : vector<256x32xf32>
    %62 = tpu.matmul %59, %61, %cst_84 {dimension_numbers = #tpu.dot_dimension_numbers<[1], [0], [0], [1], [0, 0, 1, 1], [], []>} : vector<256x32xf32>, vector<32x32xf32>, vector<256x32xf32> -> vector<256x32xf32>
    %63 = arith.addf %57, %62 : vector<256x32xf32>
    %c1_85 = arith.constant 1 : index
    %c2_86 = arith.constant 2 : index
    %c0_87 = arith.constant 0 : index
    %64 = vector.load %arg15[%c1_85, %c2_86, %c0_87] : memref<20x20x32xf32, #tpu.memory_space<vmem>>, vector<16x16x32xf32>
    %65 = vector.shape_cast %64 : vector<16x16x32xf32> to vector<256x32xf32>
    %c1_88 = arith.constant 1 : index
    %c2_89 = arith.constant 2 : index
    %c0_90 = arith.constant 0 : index
    %c0_91 = arith.constant 0 : index
    %66 = vector.load %arg4[%c1_88, %c2_89, %c0_90, %c0_91] : memref<5x5x32x32xf32, #tpu.memory_space<vmem>>, vector<1x1x32x32xf32>
    %67 = vector.shape_cast %66 : vector<1x1x32x32xf32> to vector<32x32xf32>
    %cst_92 = arith.constant dense<0.000000e+00> : vector<256x32xf32>
    %68 = tpu.matmul %65, %67, %cst_92 {dimension_numbers = #tpu.dot_dimension_numbers<[1], [0], [0], [1], [0, 0, 1, 1], [], []>} : vector<256x32xf32>, vector<32x32xf32>, vector<256x32xf32> -> vector<256x32xf32>
    %69 = arith.addf %63, %68 : vector<256x32xf32>
    %c1_93 = arith.constant 1 : index
    %c3_94 = arith.constant 3 : index
    %c0_95 = arith.constant 0 : index
    %70 = vector.load %arg15[%c1_93, %c3_94, %c0_95] : memref<20x20x32xf32, #tpu.memory_space<vmem>>, vector<16x16x32xf32>
    %71 = vector.shape_cast %70 : vector<16x16x32xf32> to vector<256x32xf32>
    %c1_96 = arith.constant 1 : index
    %c3_97 = arith.constant 3 : index
    %c0_98 = arith.constant 0 : index
    %c0_99 = arith.constant 0 : index
    %72 = vector.load %arg4[%c1_96, %c3_97, %c0_98, %c0_99] : memref<5x5x32x32xf32, #tpu.memory_space<vmem>>, vector<1x1x32x32xf32>
    %73 = vector.shape_cast %72 : vector<1x1x32x32xf32> to vector<32x32xf32>
    %cst_100 = arith.constant dense<0.000000e+00> : vector<256x32xf32>
    %74 = tpu.matmul %71, %73, %cst_100 {dimension_numbers = #tpu.dot_dimension_numbers<[1], [0], [0], [1], [0, 0, 1, 1], [], []>} : vector<256x32xf32>, vector<32x32xf32>, vector<256x32xf32> -> vector<256x32xf32>
    %75 = arith.addf %69, %74 : vector<256x32xf32>
    %c1_101 = arith.constant 1 : index
    %c4_102 = arith.constant 4 : index
    %c0_103 = arith.constant 0 : index
    %76 = vector.load %arg15[%c1_101, %c4_102, %c0_103] : memref<20x20x32xf32, #tpu.memory_space<vmem>>, vector<16x16x32xf32>
    %77 = vector.shape_cast %76 : vector<16x16x32xf32> to vector<256x32xf32>
    %c1_104 = arith.constant 1 : index
    %c4_105 = arith.constant 4 : index
    %c0_106 = arith.constant 0 : index
    %c0_107 = arith.constant 0 : index
    %78 = vector.load %arg4[%c1_104, %c4_105, %c0_106, %c0_107] : memref<5x5x32x32xf32, #tpu.memory_space<vmem>>, vector<1x1x32x32xf32>
    %79 = vector.shape_cast %78 : vector<1x1x32x32xf32> to vector<32x32xf32>
    %cst_108 = arith.constant dense<0.000000e+00> : vector<256x32xf32>
    %80 = tpu.matmul %77, %79, %cst_108 {dimension_numbers = #tpu.dot_dimension_numbers<[1], [0], [0], [1], [0, 0, 1, 1], [], []>} : vector<256x32xf32>, vector<32x32xf32>, vector<256x32xf32> -> vector<256x32xf32>
    %81 = arith.addf %75, %80 : vector<256x32xf32>
    %c2_109 = arith.constant 2 : index
    %c0_110 = arith.constant 0 : index
    %c0_111 = arith.constant 0 : index
    %82 = vector.load %arg15[%c2_109, %c0_110, %c0_111] : memref<20x20x32xf32, #tpu.memory_space<vmem>>, vector<16x16x32xf32>
    %83 = vector.shape_cast %82 : vector<16x16x32xf32> to vector<256x32xf32>
    %c2_112 = arith.constant 2 : index
    %c0_113 = arith.constant 0 : index
    %c0_114 = arith.constant 0 : index
    %c0_115 = arith.constant 0 : index
    %84 = vector.load %arg4[%c2_112, %c0_113, %c0_114, %c0_115] : memref<5x5x32x32xf32, #tpu.memory_space<vmem>>, vector<1x1x32x32xf32>
    %85 = vector.shape_cast %84 : vector<1x1x32x32xf32> to vector<32x32xf32>
    %cst_116 = arith.constant dense<0.000000e+00> : vector<256x32xf32>
    %86 = tpu.matmul %83, %85, %cst_116 {dimension_numbers = #tpu.dot_dimension_numbers<[1], [0], [0], [1], [0, 0, 1, 1], [], []>} : vector<256x32xf32>, vector<32x32xf32>, vector<256x32xf32> -> vector<256x32xf32>
    %87 = arith.addf %81, %86 : vector<256x32xf32>
    %c2_117 = arith.constant 2 : index
    %c1_118 = arith.constant 1 : index
    %c0_119 = arith.constant 0 : index
    %88 = vector.load %arg15[%c2_117, %c1_118, %c0_119] : memref<20x20x32xf32, #tpu.memory_space<vmem>>, vector<16x16x32xf32>
    %89 = vector.shape_cast %88 : vector<16x16x32xf32> to vector<256x32xf32>
    %c2_120 = arith.constant 2 : index
    %c1_121 = arith.constant 1 : index
    %c0_122 = arith.constant 0 : index
    %c0_123 = arith.constant 0 : index
    %90 = vector.load %arg4[%c2_120, %c1_121, %c0_122, %c0_123] : memref<5x5x32x32xf32, #tpu.memory_space<vmem>>, vector<1x1x32x32xf32>
    %91 = vector.shape_cast %90 : vector<1x1x32x32xf32> to vector<32x32xf32>
    %cst_124 = arith.constant dense<0.000000e+00> : vector<256x32xf32>
    %92 = tpu.matmul %89, %91, %cst_124 {dimension_numbers = #tpu.dot_dimension_numbers<[1], [0], [0], [1], [0, 0, 1, 1], [], []>} : vector<256x32xf32>, vector<32x32xf32>, vector<256x32xf32> -> vector<256x32xf32>
    %93 = arith.addf %87, %92 : vector<256x32xf32>
    %c2_125 = arith.constant 2 : index
    %c2_126 = arith.constant 2 : index
    %c0_127 = arith.constant 0 : index
    %94 = vector.load %arg15[%c2_125, %c2_126, %c0_127] : memref<20x20x32xf32, #tpu.memory_space<vmem>>, vector<16x16x32xf32>
    %95 = vector.shape_cast %94 : vector<16x16x32xf32> to vector<256x32xf32>
    %c2_128 = arith.constant 2 : index
    %c2_129 = arith.constant 2 : index
    %c0_130 = arith.constant 0 : index
    %c0_131 = arith.constant 0 : index
    %96 = vector.load %arg4[%c2_128, %c2_129, %c0_130, %c0_131] : memref<5x5x32x32xf32, #tpu.memory_space<vmem>>, vector<1x1x32x32xf32>
    %97 = vector.shape_cast %96 : vector<1x1x32x32xf32> to vector<32x32xf32>
    %cst_132 = arith.constant dense<0.000000e+00> : vector<256x32xf32>
    %98 = tpu.matmul %95, %97, %cst_132 {dimension_numbers = #tpu.dot_dimension_numbers<[1], [0], [0], [1], [0, 0, 1, 1], [], []>} : vector<256x32xf32>, vector<32x32xf32>, vector<256x32xf32> -> vector<256x32xf32>
    %99 = arith.addf %93, %98 : vector<256x32xf32>
    %c2_133 = arith.constant 2 : index
    %c3_134 = arith.constant 3 : index
    %c0_135 = arith.constant 0 : index
    %100 = vector.load %arg15[%c2_133, %c3_134, %c0_135] : memref<20x20x32xf32, #tpu.memory_space<vmem>>, vector<16x16x32xf32>
    %101 = vector.shape_cast %100 : vector<16x16x32xf32> to vector<256x32xf32>
    %c2_136 = arith.constant 2 : index
    %c3_137 = arith.constant 3 : index
    %c0_138 = arith.constant 0 : index
    %c0_139 = arith.constant 0 : index
    %102 = vector.load %arg4[%c2_136, %c3_137, %c0_138, %c0_139] : memref<5x5x32x32xf32, #tpu.memory_space<vmem>>, vector<1x1x32x32xf32>
    %103 = vector.shape_cast %102 : vector<1x1x32x32xf32> to vector<32x32xf32>
    %cst_140 = arith.constant dense<0.000000e+00> : vector<256x32xf32>
    %104 = tpu.matmul %101, %103, %cst_140 {dimension_numbers = #tpu.dot_dimension_numbers<[1], [0], [0], [1], [0, 0, 1, 1], [], []>} : vector<256x32xf32>, vector<32x32xf32>, vector<256x32xf32> -> vector<256x32xf32>
    %105 = arith.addf %99, %104 : vector<256x32xf32>
    %c2_141 = arith.constant 2 : index
    %c4_142 = arith.constant 4 : index
    %c0_143 = arith.constant 0 : index
    %106 = vector.load %arg15[%c2_141, %c4_142, %c0_143] : memref<20x20x32xf32, #tpu.memory_space<vmem>>, vector<16x16x32xf32>
    %107 = vector.shape_cast %106 : vector<16x16x32xf32> to vector<256x32xf32>
    %c2_144 = arith.constant 2 : index
    %c4_145 = arith.constant 4 : index
    %c0_146 = arith.constant 0 : index
    %c0_147 = arith.constant 0 : index
    %108 = vector.load %arg4[%c2_144, %c4_145, %c0_146, %c0_147] : memref<5x5x32x32xf32, #tpu.memory_space<vmem>>, vector<1x1x32x32xf32>
    %109 = vector.shape_cast %108 : vector<1x1x32x32xf32> to vector<32x32xf32>
    %cst_148 = arith.constant dense<0.000000e+00> : vector<256x32xf32>
    %110 = tpu.matmul %107, %109, %cst_148 {dimension_numbers = #tpu.dot_dimension_numbers<[1], [0], [0], [1], [0, 0, 1, 1], [], []>} : vector<256x32xf32>, vector<32x32xf32>, vector<256x32xf32> -> vector<256x32xf32>
    %111 = arith.addf %105, %110 : vector<256x32xf32>
    %c3_149 = arith.constant 3 : index
    %c0_150 = arith.constant 0 : index
    %c0_151 = arith.constant 0 : index
    %112 = vector.load %arg15[%c3_149, %c0_150, %c0_151] : memref<20x20x32xf32, #tpu.memory_space<vmem>>, vector<16x16x32xf32>
    %113 = vector.shape_cast %112 : vector<16x16x32xf32> to vector<256x32xf32>
    %c3_152 = arith.constant 3 : index
    %c0_153 = arith.constant 0 : index
    %c0_154 = arith.constant 0 : index
    %c0_155 = arith.constant 0 : index
    %114 = vector.load %arg4[%c3_152, %c0_153, %c0_154, %c0_155] : memref<5x5x32x32xf32, #tpu.memory_space<vmem>>, vector<1x1x32x32xf32>
    %115 = vector.shape_cast %114 : vector<1x1x32x32xf32> to vector<32x32xf32>
    %cst_156 = arith.constant dense<0.000000e+00> : vector<256x32xf32>
    %116 = tpu.matmul %113, %115, %cst_156 {dimension_numbers = #tpu.dot_dimension_numbers<[1], [0], [0], [1], [0, 0, 1, 1], [], []>} : vector<256x32xf32>, vector<32x32xf32>, vector<256x32xf32> -> vector<256x32xf32>
    %117 = arith.addf %111, %116 : vector<256x32xf32>
    %c3_157 = arith.constant 3 : index
    %c1_158 = arith.constant 1 : index
    %c0_159 = arith.constant 0 : index
    %118 = vector.load %arg15[%c3_157, %c1_158, %c0_159] : memref<20x20x32xf32, #tpu.memory_space<vmem>>, vector<16x16x32xf32>
    %119 = vector.shape_cast %118 : vector<16x16x32xf32> to vector<256x32xf32>
    %c3_160 = arith.constant 3 : index
    %c1_161 = arith.constant 1 : index
    %c0_162 = arith.constant 0 : index
    %c0_163 = arith.constant 0 : index
    %120 = vector.load %arg4[%c3_160, %c1_161, %c0_162, %c0_163] : memref<5x5x32x32xf32, #tpu.memory_space<vmem>>, vector<1x1x32x32xf32>
    %121 = vector.shape_cast %120 : vector<1x1x32x32xf32> to vector<32x32xf32>
    %cst_164 = arith.constant dense<0.000000e+00> : vector<256x32xf32>
    %122 = tpu.matmul %119, %121, %cst_164 {dimension_numbers = #tpu.dot_dimension_numbers<[1], [0], [0], [1], [0, 0, 1, 1], [], []>} : vector<256x32xf32>, vector<32x32xf32>, vector<256x32xf32> -> vector<256x32xf32>
    %123 = arith.addf %117, %122 : vector<256x32xf32>
    %c3_165 = arith.constant 3 : index
    %c2_166 = arith.constant 2 : index
    %c0_167 = arith.constant 0 : index
    %124 = vector.load %arg15[%c3_165, %c2_166, %c0_167] : memref<20x20x32xf32, #tpu.memory_space<vmem>>, vector<16x16x32xf32>
    %125 = vector.shape_cast %124 : vector<16x16x32xf32> to vector<256x32xf32>
    %c3_168 = arith.constant 3 : index
    %c2_169 = arith.constant 2 : index
    %c0_170 = arith.constant 0 : index
    %c0_171 = arith.constant 0 : index
    %126 = vector.load %arg4[%c3_168, %c2_169, %c0_170, %c0_171] : memref<5x5x32x32xf32, #tpu.memory_space<vmem>>, vector<1x1x32x32xf32>
    %127 = vector.shape_cast %126 : vector<1x1x32x32xf32> to vector<32x32xf32>
    %cst_172 = arith.constant dense<0.000000e+00> : vector<256x32xf32>
    %128 = tpu.matmul %125, %127, %cst_172 {dimension_numbers = #tpu.dot_dimension_numbers<[1], [0], [0], [1], [0, 0, 1, 1], [], []>} : vector<256x32xf32>, vector<32x32xf32>, vector<256x32xf32> -> vector<256x32xf32>
    %129 = arith.addf %123, %128 : vector<256x32xf32>
    %c3_173 = arith.constant 3 : index
    %c3_174 = arith.constant 3 : index
    %c0_175 = arith.constant 0 : index
    %130 = vector.load %arg15[%c3_173, %c3_174, %c0_175] : memref<20x20x32xf32, #tpu.memory_space<vmem>>, vector<16x16x32xf32>
    %131 = vector.shape_cast %130 : vector<16x16x32xf32> to vector<256x32xf32>
    %c3_176 = arith.constant 3 : index
    %c3_177 = arith.constant 3 : index
    %c0_178 = arith.constant 0 : index
    %c0_179 = arith.constant 0 : index
    %132 = vector.load %arg4[%c3_176, %c3_177, %c0_178, %c0_179] : memref<5x5x32x32xf32, #tpu.memory_space<vmem>>, vector<1x1x32x32xf32>
    %133 = vector.shape_cast %132 : vector<1x1x32x32xf32> to vector<32x32xf32>
    %cst_180 = arith.constant dense<0.000000e+00> : vector<256x32xf32>
    %134 = tpu.matmul %131, %133, %cst_180 {dimension_numbers = #tpu.dot_dimension_numbers<[1], [0], [0], [1], [0, 0, 1, 1], [], []>} : vector<256x32xf32>, vector<32x32xf32>, vector<256x32xf32> -> vector<256x32xf32>
    %135 = arith.addf %129, %134 : vector<256x32xf32>
    %c3_181 = arith.constant 3 : index
    %c4_182 = arith.constant 4 : index
    %c0_183 = arith.constant 0 : index
    %136 = vector.load %arg15[%c3_181, %c4_182, %c0_183] : memref<20x20x32xf32, #tpu.memory_space<vmem>>, vector<16x16x32xf32>
    %137 = vector.shape_cast %136 : vector<16x16x32xf32> to vector<256x32xf32>
    %c3_184 = arith.constant 3 : index
    %c4_185 = arith.constant 4 : index
    %c0_186 = arith.constant 0 : index
    %c0_187 = arith.constant 0 : index
    %138 = vector.load %arg4[%c3_184, %c4_185, %c0_186, %c0_187] : memref<5x5x32x32xf32, #tpu.memory_space<vmem>>, vector<1x1x32x32xf32>
    %139 = vector.shape_cast %138 : vector<1x1x32x32xf32> to vector<32x32xf32>
    %cst_188 = arith.constant dense<0.000000e+00> : vector<256x32xf32>
    %140 = tpu.matmul %137, %139, %cst_188 {dimension_numbers = #tpu.dot_dimension_numbers<[1], [0], [0], [1], [0, 0, 1, 1], [], []>} : vector<256x32xf32>, vector<32x32xf32>, vector<256x32xf32> -> vector<256x32xf32>
    %141 = arith.addf %135, %140 : vector<256x32xf32>
    %c4_189 = arith.constant 4 : index
    %c0_190 = arith.constant 0 : index
    %c0_191 = arith.constant 0 : index
    %142 = vector.load %arg15[%c4_189, %c0_190, %c0_191] : memref<20x20x32xf32, #tpu.memory_space<vmem>>, vector<16x16x32xf32>
    %143 = vector.shape_cast %142 : vector<16x16x32xf32> to vector<256x32xf32>
    %c4_192 = arith.constant 4 : index
    %c0_193 = arith.constant 0 : index
    %c0_194 = arith.constant 0 : index
    %c0_195 = arith.constant 0 : index
    %144 = vector.load %arg4[%c4_192, %c0_193, %c0_194, %c0_195] : memref<5x5x32x32xf32, #tpu.memory_space<vmem>>, vector<1x1x32x32xf32>
    %145 = vector.shape_cast %144 : vector<1x1x32x32xf32> to vector<32x32xf32>
    %cst_196 = arith.constant dense<0.000000e+00> : vector<256x32xf32>
    %146 = tpu.matmul %143, %145, %cst_196 {dimension_numbers = #tpu.dot_dimension_numbers<[1], [0], [0], [1], [0, 0, 1, 1], [], []>} : vector<256x32xf32>, vector<32x32xf32>, vector<256x32xf32> -> vector<256x32xf32>
    %147 = arith.addf %141, %146 : vector<256x32xf32>
    %c4_197 = arith.constant 4 : index
    %c1_198 = arith.constant 1 : index
    %c0_199 = arith.constant 0 : index
    %148 = vector.load %arg15[%c4_197, %c1_198, %c0_199] : memref<20x20x32xf32, #tpu.memory_space<vmem>>, vector<16x16x32xf32>
    %149 = vector.shape_cast %148 : vector<16x16x32xf32> to vector<256x32xf32>
    %c4_200 = arith.constant 4 : index
    %c1_201 = arith.constant 1 : index
    %c0_202 = arith.constant 0 : index
    %c0_203 = arith.constant 0 : index
    %150 = vector.load %arg4[%c4_200, %c1_201, %c0_202, %c0_203] : memref<5x5x32x32xf32, #tpu.memory_space<vmem>>, vector<1x1x32x32xf32>
    %151 = vector.shape_cast %150 : vector<1x1x32x32xf32> to vector<32x32xf32>
    %cst_204 = arith.constant dense<0.000000e+00> : vector<256x32xf32>
    %152 = tpu.matmul %149, %151, %cst_204 {dimension_numbers = #tpu.dot_dimension_numbers<[1], [0], [0], [1], [0, 0, 1, 1], [], []>} : vector<256x32xf32>, vector<32x32xf32>, vector<256x32xf32> -> vector<256x32xf32>
    %153 = arith.addf %147, %152 : vector<256x32xf32>
    %c4_205 = arith.constant 4 : index
    %c2_206 = arith.constant 2 : index
    %c0_207 = arith.constant 0 : index
    %154 = vector.load %arg15[%c4_205, %c2_206, %c0_207] : memref<20x20x32xf32, #tpu.memory_space<vmem>>, vector<16x16x32xf32>
    %155 = vector.shape_cast %154 : vector<16x16x32xf32> to vector<256x32xf32>
    %c4_208 = arith.constant 4 : index
    %c2_209 = arith.constant 2 : index
    %c0_210 = arith.constant 0 : index
    %c0_211 = arith.constant 0 : index
    %156 = vector.load %arg4[%c4_208, %c2_209, %c0_210, %c0_211] : memref<5x5x32x32xf32, #tpu.memory_space<vmem>>, vector<1x1x32x32xf32>
    %157 = vector.shape_cast %156 : vector<1x1x32x32xf32> to vector<32x32xf32>
    %cst_212 = arith.constant dense<0.000000e+00> : vector<256x32xf32>
    %158 = tpu.matmul %155, %157, %cst_212 {dimension_numbers = #tpu.dot_dimension_numbers<[1], [0], [0], [1], [0, 0, 1, 1], [], []>} : vector<256x32xf32>, vector<32x32xf32>, vector<256x32xf32> -> vector<256x32xf32>
    %159 = arith.addf %153, %158 : vector<256x32xf32>
    %c4_213 = arith.constant 4 : index
    %c3_214 = arith.constant 3 : index
    %c0_215 = arith.constant 0 : index
    %160 = vector.load %arg15[%c4_213, %c3_214, %c0_215] : memref<20x20x32xf32, #tpu.memory_space<vmem>>, vector<16x16x32xf32>
    %161 = vector.shape_cast %160 : vector<16x16x32xf32> to vector<256x32xf32>
    %c4_216 = arith.constant 4 : index
    %c3_217 = arith.constant 3 : index
    %c0_218 = arith.constant 0 : index
    %c0_219 = arith.constant 0 : index
    %162 = vector.load %arg4[%c4_216, %c3_217, %c0_218, %c0_219] : memref<5x5x32x32xf32, #tpu.memory_space<vmem>>, vector<1x1x32x32xf32>
    %163 = vector.shape_cast %162 : vector<1x1x32x32xf32> to vector<32x32xf32>
    %cst_220 = arith.constant dense<0.000000e+00> : vector<256x32xf32>
    %164 = tpu.matmul %161, %163, %cst_220 {dimension_numbers = #tpu.dot_dimension_numbers<[1], [0], [0], [1], [0, 0, 1, 1], [], []>} : vector<256x32xf32>, vector<32x32xf32>, vector<256x32xf32> -> vector<256x32xf32>
    %165 = arith.addf %159, %164 : vector<256x32xf32>
    %c4_221 = arith.constant 4 : index
    %c4_222 = arith.constant 4 : index
    %c0_223 = arith.constant 0 : index
    %166 = vector.load %arg15[%c4_221, %c4_222, %c0_223] : memref<20x20x32xf32, #tpu.memory_space<vmem>>, vector<16x16x32xf32>
    %167 = vector.shape_cast %166 : vector<16x16x32xf32> to vector<256x32xf32>
    %c4_224 = arith.constant 4 : index
    %c4_225 = arith.constant 4 : index
    %c0_226 = arith.constant 0 : index
    %c0_227 = arith.constant 0 : index
    %168 = vector.load %arg4[%c4_224, %c4_225, %c0_226, %c0_227] : memref<5x5x32x32xf32, #tpu.memory_space<vmem>>, vector<1x1x32x32xf32>
    %169 = vector.shape_cast %168 : vector<1x1x32x32xf32> to vector<32x32xf32>
    %cst_228 = arith.constant dense<0.000000e+00> : vector<256x32xf32>
    %170 = tpu.matmul %167, %169, %cst_228 {dimension_numbers = #tpu.dot_dimension_numbers<[1], [0], [0], [1], [0, 0, 1, 1], [], []>} : vector<256x32xf32>, vector<32x32xf32>, vector<256x32xf32> -> vector<256x32xf32>
    %171 = arith.addf %165, %170 : vector<256x32xf32>
    %172 = vector.shape_cast %171 : vector<256x32xf32> to vector<16x16x32xf32>
    %c0_229 = arith.constant 0 : index
    %c0_230 = arith.constant 0 : index
    %173 = vector.load %arg5[%c0_229, %c0_230] : memref<1x32xf32, #tpu.memory_space<vmem>>, vector<1x32xf32>
    %174 = vector.shape_cast %173 : vector<1x32xf32> to vector<1x1x32xf32>
    %175 = vector.broadcast %174 : vector<1x1x32xf32> to vector<16x16x32xf32>
    %176 = arith.addf %172, %175 : vector<16x16x32xf32>
    %c0_231 = arith.constant 0 : index
    %c0_232 = arith.constant 0 : index
    %c0_233 = arith.constant 0 : index
    %177 = vector.load %arg16[%c0_231, %c0_232, %c0_233] : memref<16x16x32xf32, #tpu.memory_space<vmem>>, vector<16x16x32xf32>
    tpu.vector_store %arg16[%c0_231, %c0_232, %c0_233], %176 {strides = array<i32>} : memref<16x16x32xf32, #tpu.memory_space<vmem>>, vector<16x16x32xf32>,
    %cst_234 = arith.constant 0.000000e+00 : f32
    %178 = vector.broadcast %cst_234 : f32 to vector<12x12x32xf32>
    %c0_235 = arith.constant 0 : index
    %c0_236 = arith.constant 0 : index
    %c0_237 = arith.constant 0 : index
    %179 = vector.load %arg18[%c0_235, %c0_236, %c0_237] : memref<12x12x32xf32, #tpu.memory_space<vmem>>, vector<12x12x32xf32>
    tpu.vector_store %arg18[%c0_235, %c0_236, %c0_237], %178 {strides = array<i32>} : memref<12x12x32xf32, #tpu.memory_space<vmem>>, vector<12x12x32xf32>,
    %c0_238 = arith.constant 0 : index
    %c0_239 = arith.constant 0 : index
    %c0_240 = arith.constant 0 : index
    %180 = tpu.strided_load %arg16[%c0_238, %c0_239, %c0_240] {strides = array<i32: 1, 2, 1>} : memref<16x16x32xf32, #tpu.memory_space<vmem>>, vector<16x8x32xf32>
    %c0_241 = arith.constant 0 : index
    %c1_242 = arith.constant 1 : index
    %c0_243 = arith.constant 0 : index
    %181 = tpu.strided_load %arg16[%c0_241, %c1_242, %c0_243] {strides = array<i32: 1, 2, 1>} : memref<16x16x32xf32, #tpu.memory_space<vmem>>, vector<16x8x32xf32>
    %182 = arith.maximumf %180, %181 : vector<16x8x32xf32>
    %c0_244 = arith.constant 0 : index
    %c0_245 = arith.constant 0 : index
    %c0_246 = arith.constant 0 : index
    %183 = vector.load %arg17[%c0_244, %c0_245, %c0_246] : memref<16x8x32xf32, #tpu.memory_space<vmem>>, vector<16x8x32xf32>
    tpu.vector_store %arg17[%c0_244, %c0_245, %c0_246], %182 {strides = array<i32>} : memref<16x8x32xf32, #tpu.memory_space<vmem>>, vector<16x8x32xf32>,
    %c0_247 = arith.constant 0 : index
    %c0_248 = arith.constant 0 : index
    %c0_249 = arith.constant 0 : index
    %184 = tpu.strided_load %arg17[%c0_247, %c0_248, %c0_249] {strides = array<i32: 2, 1, 1>} : memref<16x8x32xf32, #tpu.memory_space<vmem>>, vector<8x8x32xf32>
    %c1_250 = arith.constant 1 : index
    %c0_251 = arith.constant 0 : index
    %c0_252 = arith.constant 0 : index
    %185 = tpu.strided_load %arg17[%c1_250, %c0_251, %c0_252] {strides = array<i32: 2, 1, 1>} : memref<16x8x32xf32, #tpu.memory_space<vmem>>, vector<8x8x32xf32>
    %186 = arith.maximumf %184, %185 : vector<8x8x32xf32>
    %c2_253 = arith.constant 2 : index
    %c2_254 = arith.constant 2 : index
    %c0_255 = arith.constant 0 : index
    %187 = vector.load %arg18[%c2_253, %c2_254, %c0_255] : memref<12x12x32xf32, #tpu.memory_space<vmem>>, vector<8x8x32xf32>
    tpu.vector_store %arg18[%c2_253, %c2_254, %c0_255], %186 {strides = array<i32>} : memref<12x12x32xf32, #tpu.memory_space<vmem>>, vector<8x8x32xf32>,
    %cst_256 = arith.constant 0.000000e+00 : f32
    %188 = vector.broadcast %cst_256 : f32 to vector<64x64xf32>
    %c0_257 = arith.constant 0 : index
    %c0_258 = arith.constant 0 : index
    %c0_259 = arith.constant 0 : index
    %189 = vector.load %arg18[%c0_257, %c0_258, %c0_259] : memref<12x12x32xf32, #tpu.memory_space<vmem>>, vector<8x8x32xf32>
    %190 = vector.shape_cast %189 : vector<8x8x32xf32> to vector<64x32xf32>
    %c0_260 = arith.constant 0 : index
    %c0_261 = arith.constant 0 : index
    %c0_262 = arith.constant 0 : index
    %c0_263 = arith.constant 0 : index
    %191 = vector.load %arg6[%c0_260, %c0_261, %c0_262, %c0_263] : memref<5x5x32x64xf32, #tpu.memory_space<vmem>>, vector<1x1x32x64xf32>
    %192 = vector.shape_cast %191 : vector<1x1x32x64xf32> to vector<32x64xf32>
    %cst_264 = arith.constant dense<0.000000e+00> : vector<64x64xf32>
    %193 = tpu.matmul %190, %192, %cst_264 {dimension_numbers = #tpu.dot_dimension_numbers<[1], [0], [0], [1], [0, 0, 1, 1], [], []>} : vector<64x32xf32>, vector<32x64xf32>, vector<64x64xf32> -> vector<64x64xf32>
    %194 = arith.addf %188, %193 : vector<64x64xf32>
    %c0_265 = arith.constant 0 : index
    %c1_266 = arith.constant 1 : index
    %c0_267 = arith.constant 0 : index
    %195 = vector.load %arg18[%c0_265, %c1_266, %c0_267] : memref<12x12x32xf32, #tpu.memory_space<vmem>>, vector<8x8x32xf32>
    %196 = vector.shape_cast %195 : vector<8x8x32xf32> to vector<64x32xf32>
    %c0_268 = arith.constant 0 : index
    %c1_269 = arith.constant 1 : index
    %c0_270 = arith.constant 0 : index
    %c0_271 = arith.constant 0 : index
    %197 = vector.load %arg6[%c0_268, %c1_269, %c0_270, %c0_271] : memref<5x5x32x64xf32, #tpu.memory_space<vmem>>, vector<1x1x32x64xf32>
    %198 = vector.shape_cast %197 : vector<1x1x32x64xf32> to vector<32x64xf32>
    %cst_272 = arith.constant dense<0.000000e+00> : vector<64x64xf32>
    %199 = tpu.matmul %196, %198, %cst_272 {dimension_numbers = #tpu.dot_dimension_numbers<[1], [0], [0], [1], [0, 0, 1, 1], [], []>} : vector<64x32xf32>, vector<32x64xf32>, vector<64x64xf32> -> vector<64x64xf32>
    %200 = arith.addf %194, %199 : vector<64x64xf32>
    %c0_273 = arith.constant 0 : index
    %c2_274 = arith.constant 2 : index
    %c0_275 = arith.constant 0 : index
    %201 = vector.load %arg18[%c0_273, %c2_274, %c0_275] : memref<12x12x32xf32, #tpu.memory_space<vmem>>, vector<8x8x32xf32>
    %202 = vector.shape_cast %201 : vector<8x8x32xf32> to vector<64x32xf32>
    %c0_276 = arith.constant 0 : index
    %c2_277 = arith.constant 2 : index
    %c0_278 = arith.constant 0 : index
    %c0_279 = arith.constant 0 : index
    %203 = vector.load %arg6[%c0_276, %c2_277, %c0_278, %c0_279] : memref<5x5x32x64xf32, #tpu.memory_space<vmem>>, vector<1x1x32x64xf32>
    %204 = vector.shape_cast %203 : vector<1x1x32x64xf32> to vector<32x64xf32>
    %cst_280 = arith.constant dense<0.000000e+00> : vector<64x64xf32>
    %205 = tpu.matmul %202, %204, %cst_280 {dimension_numbers = #tpu.dot_dimension_numbers<[1], [0], [0], [1], [0, 0, 1, 1], [], []>} : vector<64x32xf32>, vector<32x64xf32>, vector<64x64xf32> -> vector<64x64xf32>
    %206 = arith.addf %200, %205 : vector<64x64xf32>
    %c0_281 = arith.constant 0 : index
    %c3_282 = arith.constant 3 : index
    %c0_283 = arith.constant 0 : index
    %207 = vector.load %arg18[%c0_281, %c3_282, %c0_283] : memref<12x12x32xf32, #tpu.memory_space<vmem>>, vector<8x8x32xf32>
    %208 = vector.shape_cast %207 : vector<8x8x32xf32> to vector<64x32xf32>
    %c0_284 = arith.constant 0 : index
    %c3_285 = arith.constant 3 : index
    %c0_286 = arith.constant 0 : index
    %c0_287 = arith.constant 0 : index
    %209 = vector.load %arg6[%c0_284, %c3_285, %c0_286, %c0_287] : memref<5x5x32x64xf32, #tpu.memory_space<vmem>>, vector<1x1x32x64xf32>
    %210 = vector.shape_cast %209 : vector<1x1x32x64xf32> to vector<32x64xf32>
    %cst_288 = arith.constant dense<0.000000e+00> : vector<64x64xf32>
    %211 = tpu.matmul %208, %210, %cst_288 {dimension_numbers = #tpu.dot_dimension_numbers<[1], [0], [0], [1], [0, 0, 1, 1], [], []>} : vector<64x32xf32>, vector<32x64xf32>, vector<64x64xf32> -> vector<64x64xf32>
    %212 = arith.addf %206, %211 : vector<64x64xf32>
    %c0_289 = arith.constant 0 : index
    %c4_290 = arith.constant 4 : index
    %c0_291 = arith.constant 0 : index
    %213 = vector.load %arg18[%c0_289, %c4_290, %c0_291] : memref<12x12x32xf32, #tpu.memory_space<vmem>>, vector<8x8x32xf32>
    %214 = vector.shape_cast %213 : vector<8x8x32xf32> to vector<64x32xf32>
    %c0_292 = arith.constant 0 : index
    %c4_293 = arith.constant 4 : index
    %c0_294 = arith.constant 0 : index
    %c0_295 = arith.constant 0 : index
    %215 = vector.load %arg6[%c0_292, %c4_293, %c0_294, %c0_295] : memref<5x5x32x64xf32, #tpu.memory_space<vmem>>, vector<1x1x32x64xf32>
    %216 = vector.shape_cast %215 : vector<1x1x32x64xf32> to vector<32x64xf32>
    %cst_296 = arith.constant dense<0.000000e+00> : vector<64x64xf32>
    %217 = tpu.matmul %214, %216, %cst_296 {dimension_numbers = #tpu.dot_dimension_numbers<[1], [0], [0], [1], [0, 0, 1, 1], [], []>} : vector<64x32xf32>, vector<32x64xf32>, vector<64x64xf32> -> vector<64x64xf32>
    %218 = arith.addf %212, %217 : vector<64x64xf32>
    %c1_297 = arith.constant 1 : index
    %c0_298 = arith.constant 0 : index
    %c0_299 = arith.constant 0 : index
    %219 = vector.load %arg18[%c1_297, %c0_298, %c0_299] : memref<12x12x32xf32, #tpu.memory_space<vmem>>, vector<8x8x32xf32>
    %220 = vector.shape_cast %219 : vector<8x8x32xf32> to vector<64x32xf32>
    %c1_300 = arith.constant 1 : index
    %c0_301 = arith.constant 0 : index
    %c0_302 = arith.constant 0 : index
    %c0_303 = arith.constant 0 : index
    %221 = vector.load %arg6[%c1_300, %c0_301, %c0_302, %c0_303] : memref<5x5x32x64xf32, #tpu.memory_space<vmem>>, vector<1x1x32x64xf32>
    %222 = vector.shape_cast %221 : vector<1x1x32x64xf32> to vector<32x64xf32>
    %cst_304 = arith.constant dense<0.000000e+00> : vector<64x64xf32>
    %223 = tpu.matmul %220, %222, %cst_304 {dimension_numbers = #tpu.dot_dimension_numbers<[1], [0], [0], [1], [0, 0, 1, 1], [], []>} : vector<64x32xf32>, vector<32x64xf32>, vector<64x64xf32> -> vector<64x64xf32>
    %224 = arith.addf %218, %223 : vector<64x64xf32>
    %c1_305 = arith.constant 1 : index
    %c1_306 = arith.constant 1 : index
    %c0_307 = arith.constant 0 : index
    %225 = vector.load %arg18[%c1_305, %c1_306, %c0_307] : memref<12x12x32xf32, #tpu.memory_space<vmem>>, vector<8x8x32xf32>
    %226 = vector.shape_cast %225 : vector<8x8x32xf32> to vector<64x32xf32>
    %c1_308 = arith.constant 1 : index
    %c1_309 = arith.constant 1 : index
    %c0_310 = arith.constant 0 : index
    %c0_311 = arith.constant 0 : index
    %227 = vector.load %arg6[%c1_308, %c1_309, %c0_310, %c0_311] : memref<5x5x32x64xf32, #tpu.memory_space<vmem>>, vector<1x1x32x64xf32>
    %228 = vector.shape_cast %227 : vector<1x1x32x64xf32> to vector<32x64xf32>
    %cst_312 = arith.constant dense<0.000000e+00> : vector<64x64xf32>
    %229 = tpu.matmul %226, %228, %cst_312 {dimension_numbers = #tpu.dot_dimension_numbers<[1], [0], [0], [1], [0, 0, 1, 1], [], []>} : vector<64x32xf32>, vector<32x64xf32>, vector<64x64xf32> -> vector<64x64xf32>
    %230 = arith.addf %224, %229 : vector<64x64xf32>
    %c1_313 = arith.constant 1 : index
    %c2_314 = arith.constant 2 : index
    %c0_315 = arith.constant 0 : index
    %231 = vector.load %arg18[%c1_313, %c2_314, %c0_315] : memref<12x12x32xf32, #tpu.memory_space<vmem>>, vector<8x8x32xf32>
    %232 = vector.shape_cast %231 : vector<8x8x32xf32> to vector<64x32xf32>
    %c1_316 = arith.constant 1 : index
    %c2_317 = arith.constant 2 : index
    %c0_318 = arith.constant 0 : index
    %c0_319 = arith.constant 0 : index
    %233 = vector.load %arg6[%c1_316, %c2_317, %c0_318, %c0_319] : memref<5x5x32x64xf32, #tpu.memory_space<vmem>>, vector<1x1x32x64xf32>
    %234 = vector.shape_cast %233 : vector<1x1x32x64xf32> to vector<32x64xf32>
    %cst_320 = arith.constant dense<0.000000e+00> : vector<64x64xf32>
    %235 = tpu.matmul %232, %234, %cst_320 {dimension_numbers = #tpu.dot_dimension_numbers<[1], [0], [0], [1], [0, 0, 1, 1], [], []>} : vector<64x32xf32>, vector<32x64xf32>, vector<64x64xf32> -> vector<64x64xf32>
    %236 = arith.addf %230, %235 : vector<64x64xf32>
    %c1_321 = arith.constant 1 : index
    %c3_322 = arith.constant 3 : index
    %c0_323 = arith.constant 0 : index
    %237 = vector.load %arg18[%c1_321, %c3_322, %c0_323] : memref<12x12x32xf32, #tpu.memory_space<vmem>>, vector<8x8x32xf32>
    %238 = vector.shape_cast %237 : vector<8x8x32xf32> to vector<64x32xf32>
    %c1_324 = arith.constant 1 : index
    %c3_325 = arith.constant 3 : index
    %c0_326 = arith.constant 0 : index
    %c0_327 = arith.constant 0 : index
    %239 = vector.load %arg6[%c1_324, %c3_325, %c0_326, %c0_327] : memref<5x5x32x64xf32, #tpu.memory_space<vmem>>, vector<1x1x32x64xf32>
    %240 = vector.shape_cast %239 : vector<1x1x32x64xf32> to vector<32x64xf32>
    %cst_328 = arith.constant dense<0.000000e+00> : vector<64x64xf32>
    %241 = tpu.matmul %238, %240, %cst_328 {dimension_numbers = #tpu.dot_dimension_numbers<[1], [0], [0], [1], [0, 0, 1, 1], [], []>} : vector<64x32xf32>, vector<32x64xf32>, vector<64x64xf32> -> vector<64x64xf32>
    %242 = arith.addf %236, %241 : vector<64x64xf32>
    %c1_329 = arith.constant 1 : index
    %c4_330 = arith.constant 4 : index
    %c0_331 = arith.constant 0 : index
    %243 = vector.load %arg18[%c1_329, %c4_330, %c0_331] : memref<12x12x32xf32, #tpu.memory_space<vmem>>, vector<8x8x32xf32>
    %244 = vector.shape_cast %243 : vector<8x8x32xf32> to vector<64x32xf32>
    %c1_332 = arith.constant 1 : index
    %c4_333 = arith.constant 4 : index
    %c0_334 = arith.constant 0 : index
    %c0_335 = arith.constant 0 : index
    %245 = vector.load %arg6[%c1_332, %c4_333, %c0_334, %c0_335] : memref<5x5x32x64xf32, #tpu.memory_space<vmem>>, vector<1x1x32x64xf32>
    %246 = vector.shape_cast %245 : vector<1x1x32x64xf32> to vector<32x64xf32>
    %cst_336 = arith.constant dense<0.000000e+00> : vector<64x64xf32>
    %247 = tpu.matmul %244, %246, %cst_336 {dimension_numbers = #tpu.dot_dimension_numbers<[1], [0], [0], [1], [0, 0, 1, 1], [], []>} : vector<64x32xf32>, vector<32x64xf32>, vector<64x64xf32> -> vector<64x64xf32>
    %248 = arith.addf %242, %247 : vector<64x64xf32>
    %c2_337 = arith.constant 2 : index
    %c0_338 = arith.constant 0 : index
    %c0_339 = arith.constant 0 : index
    %249 = vector.load %arg18[%c2_337, %c0_338, %c0_339] : memref<12x12x32xf32, #tpu.memory_space<vmem>>, vector<8x8x32xf32>
    %250 = vector.shape_cast %249 : vector<8x8x32xf32> to vector<64x32xf32>
    %c2_340 = arith.constant 2 : index
    %c0_341 = arith.constant 0 : index
    %c0_342 = arith.constant 0 : index
    %c0_343 = arith.constant 0 : index
    %251 = vector.load %arg6[%c2_340, %c0_341, %c0_342, %c0_343] : memref<5x5x32x64xf32, #tpu.memory_space<vmem>>, vector<1x1x32x64xf32>
    %252 = vector.shape_cast %251 : vector<1x1x32x64xf32> to vector<32x64xf32>
    %cst_344 = arith.constant dense<0.000000e+00> : vector<64x64xf32>
    %253 = tpu.matmul %250, %252, %cst_344 {dimension_numbers = #tpu.dot_dimension_numbers<[1], [0], [0], [1], [0, 0, 1, 1], [], []>} : vector<64x32xf32>, vector<32x64xf32>, vector<64x64xf32> -> vector<64x64xf32>
    %254 = arith.addf %248, %253 : vector<64x64xf32>
    %c2_345 = arith.constant 2 : index
    %c1_346 = arith.constant 1 : index
    %c0_347 = arith.constant 0 : index
    %255 = vector.load %arg18[%c2_345, %c1_346, %c0_347] : memref<12x12x32xf32, #tpu.memory_space<vmem>>, vector<8x8x32xf32>
    %256 = vector.shape_cast %255 : vector<8x8x32xf32> to vector<64x32xf32>
    %c2_348 = arith.constant 2 : index
    %c1_349 = arith.constant 1 : index
    %c0_350 = arith.constant 0 : index
    %c0_351 = arith.constant 0 : index
    %257 = vector.load %arg6[%c2_348, %c1_349, %c0_350, %c0_351] : memref<5x5x32x64xf32, #tpu.memory_space<vmem>>, vector<1x1x32x64xf32>
    %258 = vector.shape_cast %257 : vector<1x1x32x64xf32> to vector<32x64xf32>
    %cst_352 = arith.constant dense<0.000000e+00> : vector<64x64xf32>
    %259 = tpu.matmul %256, %258, %cst_352 {dimension_numbers = #tpu.dot_dimension_numbers<[1], [0], [0], [1], [0, 0, 1, 1], [], []>} : vector<64x32xf32>, vector<32x64xf32>, vector<64x64xf32> -> vector<64x64xf32>
    %260 = arith.addf %254, %259 : vector<64x64xf32>
    %c2_353 = arith.constant 2 : index
    %c2_354 = arith.constant 2 : index
    %c0_355 = arith.constant 0 : index
    %261 = vector.load %arg18[%c2_353, %c2_354, %c0_355] : memref<12x12x32xf32, #tpu.memory_space<vmem>>, vector<8x8x32xf32>
    %262 = vector.shape_cast %261 : vector<8x8x32xf32> to vector<64x32xf32>
    %c2_356 = arith.constant 2 : index
    %c2_357 = arith.constant 2 : index
    %c0_358 = arith.constant 0 : index
    %c0_359 = arith.constant 0 : index
    %263 = vector.load %arg6[%c2_356, %c2_357, %c0_358, %c0_359] : memref<5x5x32x64xf32, #tpu.memory_space<vmem>>, vector<1x1x32x64xf32>
    %264 = vector.shape_cast %263 : vector<1x1x32x64xf32> to vector<32x64xf32>
    %cst_360 = arith.constant dense<0.000000e+00> : vector<64x64xf32>
    %265 = tpu.matmul %262, %264, %cst_360 {dimension_numbers = #tpu.dot_dimension_numbers<[1], [0], [0], [1], [0, 0, 1, 1], [], []>} : vector<64x32xf32>, vector<32x64xf32>, vector<64x64xf32> -> vector<64x64xf32>
    %266 = arith.addf %260, %265 : vector<64x64xf32>
    %c2_361 = arith.constant 2 : index
    %c3_362 = arith.constant 3 : index
    %c0_363 = arith.constant 0 : index
    %267 = vector.load %arg18[%c2_361, %c3_362, %c0_363] : memref<12x12x32xf32, #tpu.memory_space<vmem>>, vector<8x8x32xf32>
    %268 = vector.shape_cast %267 : vector<8x8x32xf32> to vector<64x32xf32>
    %c2_364 = arith.constant 2 : index
    %c3_365 = arith.constant 3 : index
    %c0_366 = arith.constant 0 : index
    %c0_367 = arith.constant 0 : index
    %269 = vector.load %arg6[%c2_364, %c3_365, %c0_366, %c0_367] : memref<5x5x32x64xf32, #tpu.memory_space<vmem>>, vector<1x1x32x64xf32>
    %270 = vector.shape_cast %269 : vector<1x1x32x64xf32> to vector<32x64xf32>
    %cst_368 = arith.constant dense<0.000000e+00> : vector<64x64xf32>
    %271 = tpu.matmul %268, %270, %cst_368 {dimension_numbers = #tpu.dot_dimension_numbers<[1], [0], [0], [1], [0, 0, 1, 1], [], []>} : vector<64x32xf32>, vector<32x64xf32>, vector<64x64xf32> -> vector<64x64xf32>
    %272 = arith.addf %266, %271 : vector<64x64xf32>
    %c2_369 = arith.constant 2 : index
    %c4_370 = arith.constant 4 : index
    %c0_371 = arith.constant 0 : index
    %273 = vector.load %arg18[%c2_369, %c4_370, %c0_371] : memref<12x12x32xf32, #tpu.memory_space<vmem>>, vector<8x8x32xf32>
    %274 = vector.shape_cast %273 : vector<8x8x32xf32> to vector<64x32xf32>
    %c2_372 = arith.constant 2 : index
    %c4_373 = arith.constant 4 : index
    %c0_374 = arith.constant 0 : index
    %c0_375 = arith.constant 0 : index
    %275 = vector.load %arg6[%c2_372, %c4_373, %c0_374, %c0_375] : memref<5x5x32x64xf32, #tpu.memory_space<vmem>>, vector<1x1x32x64xf32>
    %276 = vector.shape_cast %275 : vector<1x1x32x64xf32> to vector<32x64xf32>
    %cst_376 = arith.constant dense<0.000000e+00> : vector<64x64xf32>
    %277 = tpu.matmul %274, %276, %cst_376 {dimension_numbers = #tpu.dot_dimension_numbers<[1], [0], [0], [1], [0, 0, 1, 1], [], []>} : vector<64x32xf32>, vector<32x64xf32>, vector<64x64xf32> -> vector<64x64xf32>
    %278 = arith.addf %272, %277 : vector<64x64xf32>
    %c3_377 = arith.constant 3 : index
    %c0_378 = arith.constant 0 : index
    %c0_379 = arith.constant 0 : index
    %279 = vector.load %arg18[%c3_377, %c0_378, %c0_379] : memref<12x12x32xf32, #tpu.memory_space<vmem>>, vector<8x8x32xf32>
    %280 = vector.shape_cast %279 : vector<8x8x32xf32> to vector<64x32xf32>
    %c3_380 = arith.constant 3 : index
    %c0_381 = arith.constant 0 : index
    %c0_382 = arith.constant 0 : index
    %c0_383 = arith.constant 0 : index
    %281 = vector.load %arg6[%c3_380, %c0_381, %c0_382, %c0_383] : memref<5x5x32x64xf32, #tpu.memory_space<vmem>>, vector<1x1x32x64xf32>
    %282 = vector.shape_cast %281 : vector<1x1x32x64xf32> to vector<32x64xf32>
    %cst_384 = arith.constant dense<0.000000e+00> : vector<64x64xf32>
    %283 = tpu.matmul %280, %282, %cst_384 {dimension_numbers = #tpu.dot_dimension_numbers<[1], [0], [0], [1], [0, 0, 1, 1], [], []>} : vector<64x32xf32>, vector<32x64xf32>, vector<64x64xf32> -> vector<64x64xf32>
    %284 = arith.addf %278, %283 : vector<64x64xf32>
    %c3_385 = arith.constant 3 : index
    %c1_386 = arith.constant 1 : index
    %c0_387 = arith.constant 0 : index
    %285 = vector.load %arg18[%c3_385, %c1_386, %c0_387] : memref<12x12x32xf32, #tpu.memory_space<vmem>>, vector<8x8x32xf32>
    %286 = vector.shape_cast %285 : vector<8x8x32xf32> to vector<64x32xf32>
    %c3_388 = arith.constant 3 : index
    %c1_389 = arith.constant 1 : index
    %c0_390 = arith.constant 0 : index
    %c0_391 = arith.constant 0 : index
    %287 = vector.load %arg6[%c3_388, %c1_389, %c0_390, %c0_391] : memref<5x5x32x64xf32, #tpu.memory_space<vmem>>, vector<1x1x32x64xf32>
    %288 = vector.shape_cast %287 : vector<1x1x32x64xf32> to vector<32x64xf32>
    %cst_392 = arith.constant dense<0.000000e+00> : vector<64x64xf32>
    %289 = tpu.matmul %286, %288, %cst_392 {dimension_numbers = #tpu.dot_dimension_numbers<[1], [0], [0], [1], [0, 0, 1, 1], [], []>} : vector<64x32xf32>, vector<32x64xf32>, vector<64x64xf32> -> vector<64x64xf32>
    %290 = arith.addf %284, %289 : vector<64x64xf32>
    %c3_393 = arith.constant 3 : index
    %c2_394 = arith.constant 2 : index
    %c0_395 = arith.constant 0 : index
    %291 = vector.load %arg18[%c3_393, %c2_394, %c0_395] : memref<12x12x32xf32, #tpu.memory_space<vmem>>, vector<8x8x32xf32>
    %292 = vector.shape_cast %291 : vector<8x8x32xf32> to vector<64x32xf32>
    %c3_396 = arith.constant 3 : index
    %c2_397 = arith.constant 2 : index
    %c0_398 = arith.constant 0 : index
    %c0_399 = arith.constant 0 : index
    %293 = vector.load %arg6[%c3_396, %c2_397, %c0_398, %c0_399] : memref<5x5x32x64xf32, #tpu.memory_space<vmem>>, vector<1x1x32x64xf32>
    %294 = vector.shape_cast %293 : vector<1x1x32x64xf32> to vector<32x64xf32>
    %cst_400 = arith.constant dense<0.000000e+00> : vector<64x64xf32>
    %295 = tpu.matmul %292, %294, %cst_400 {dimension_numbers = #tpu.dot_dimension_numbers<[1], [0], [0], [1], [0, 0, 1, 1], [], []>} : vector<64x32xf32>, vector<32x64xf32>, vector<64x64xf32> -> vector<64x64xf32>
    %296 = arith.addf %290, %295 : vector<64x64xf32>
    %c3_401 = arith.constant 3 : index
    %c3_402 = arith.constant 3 : index
    %c0_403 = arith.constant 0 : index
    %297 = vector.load %arg18[%c3_401, %c3_402, %c0_403] : memref<12x12x32xf32, #tpu.memory_space<vmem>>, vector<8x8x32xf32>
    %298 = vector.shape_cast %297 : vector<8x8x32xf32> to vector<64x32xf32>
    %c3_404 = arith.constant 3 : index
    %c3_405 = arith.constant 3 : index
    %c0_406 = arith.constant 0 : index
    %c0_407 = arith.constant 0 : index
    %299 = vector.load %arg6[%c3_404, %c3_405, %c0_406, %c0_407] : memref<5x5x32x64xf32, #tpu.memory_space<vmem>>, vector<1x1x32x64xf32>
    %300 = vector.shape_cast %299 : vector<1x1x32x64xf32> to vector<32x64xf32>
    %cst_408 = arith.constant dense<0.000000e+00> : vector<64x64xf32>
    %301 = tpu.matmul %298, %300, %cst_408 {dimension_numbers = #tpu.dot_dimension_numbers<[1], [0], [0], [1], [0, 0, 1, 1], [], []>} : vector<64x32xf32>, vector<32x64xf32>, vector<64x64xf32> -> vector<64x64xf32>
    %302 = arith.addf %296, %301 : vector<64x64xf32>
    %c3_409 = arith.constant 3 : index
    %c4_410 = arith.constant 4 : index
    %c0_411 = arith.constant 0 : index
    %303 = vector.load %arg18[%c3_409, %c4_410, %c0_411] : memref<12x12x32xf32, #tpu.memory_space<vmem>>, vector<8x8x32xf32>
    %304 = vector.shape_cast %303 : vector<8x8x32xf32> to vector<64x32xf32>
    %c3_412 = arith.constant 3 : index
    %c4_413 = arith.constant 4 : index
    %c0_414 = arith.constant 0 : index
    %c0_415 = arith.constant 0 : index
    %305 = vector.load %arg6[%c3_412, %c4_413, %c0_414, %c0_415] : memref<5x5x32x64xf32, #tpu.memory_space<vmem>>, vector<1x1x32x64xf32>
    %306 = vector.shape_cast %305 : vector<1x1x32x64xf32> to vector<32x64xf32>
    %cst_416 = arith.constant dense<0.000000e+00> : vector<64x64xf32>
    %307 = tpu.matmul %304, %306, %cst_416 {dimension_numbers = #tpu.dot_dimension_numbers<[1], [0], [0], [1], [0, 0, 1, 1], [], []>} : vector<64x32xf32>, vector<32x64xf32>, vector<64x64xf32> -> vector<64x64xf32>
    %308 = arith.addf %302, %307 : vector<64x64xf32>
    %c4_417 = arith.constant 4 : index
    %c0_418 = arith.constant 0 : index
    %c0_419 = arith.constant 0 : index
    %309 = vector.load %arg18[%c4_417, %c0_418, %c0_419] : memref<12x12x32xf32, #tpu.memory_space<vmem>>, vector<8x8x32xf32>
    %310 = vector.shape_cast %309 : vector<8x8x32xf32> to vector<64x32xf32>
    %c4_420 = arith.constant 4 : index
    %c0_421 = arith.constant 0 : index
    %c0_422 = arith.constant 0 : index
    %c0_423 = arith.constant 0 : index
    %311 = vector.load %arg6[%c4_420, %c0_421, %c0_422, %c0_423] : memref<5x5x32x64xf32, #tpu.memory_space<vmem>>, vector<1x1x32x64xf32>
    %312 = vector.shape_cast %311 : vector<1x1x32x64xf32> to vector<32x64xf32>
    %cst_424 = arith.constant dense<0.000000e+00> : vector<64x64xf32>
    %313 = tpu.matmul %310, %312, %cst_424 {dimension_numbers = #tpu.dot_dimension_numbers<[1], [0], [0], [1], [0, 0, 1, 1], [], []>} : vector<64x32xf32>, vector<32x64xf32>, vector<64x64xf32> -> vector<64x64xf32>
    %314 = arith.addf %308, %313 : vector<64x64xf32>
    %c4_425 = arith.constant 4 : index
    %c1_426 = arith.constant 1 : index
    %c0_427 = arith.constant 0 : index
    %315 = vector.load %arg18[%c4_425, %c1_426, %c0_427] : memref<12x12x32xf32, #tpu.memory_space<vmem>>, vector<8x8x32xf32>
    %316 = vector.shape_cast %315 : vector<8x8x32xf32> to vector<64x32xf32>
    %c4_428 = arith.constant 4 : index
    %c1_429 = arith.constant 1 : index
    %c0_430 = arith.constant 0 : index
    %c0_431 = arith.constant 0 : index
    %317 = vector.load %arg6[%c4_428, %c1_429, %c0_430, %c0_431] : memref<5x5x32x64xf32, #tpu.memory_space<vmem>>, vector<1x1x32x64xf32>
    %318 = vector.shape_cast %317 : vector<1x1x32x64xf32> to vector<32x64xf32>
    %cst_432 = arith.constant dense<0.000000e+00> : vector<64x64xf32>
    %319 = tpu.matmul %316, %318, %cst_432 {dimension_numbers = #tpu.dot_dimension_numbers<[1], [0], [0], [1], [0, 0, 1, 1], [], []>} : vector<64x32xf32>, vector<32x64xf32>, vector<64x64xf32> -> vector<64x64xf32>
    %320 = arith.addf %314, %319 : vector<64x64xf32>
    %c4_433 = arith.constant 4 : index
    %c2_434 = arith.constant 2 : index
    %c0_435 = arith.constant 0 : index
    %321 = vector.load %arg18[%c4_433, %c2_434, %c0_435] : memref<12x12x32xf32, #tpu.memory_space<vmem>>, vector<8x8x32xf32>
    %322 = vector.shape_cast %321 : vector<8x8x32xf32> to vector<64x32xf32>
    %c4_436 = arith.constant 4 : index
    %c2_437 = arith.constant 2 : index
    %c0_438 = arith.constant 0 : index
    %c0_439 = arith.constant 0 : index
    %323 = vector.load %arg6[%c4_436, %c2_437, %c0_438, %c0_439] : memref<5x5x32x64xf32, #tpu.memory_space<vmem>>, vector<1x1x32x64xf32>
    %324 = vector.shape_cast %323 : vector<1x1x32x64xf32> to vector<32x64xf32>
    %cst_440 = arith.constant dense<0.000000e+00> : vector<64x64xf32>
    %325 = tpu.matmul %322, %324, %cst_440 {dimension_numbers = #tpu.dot_dimension_numbers<[1], [0], [0], [1], [0, 0, 1, 1], [], []>} : vector<64x32xf32>, vector<32x64xf32>, vector<64x64xf32> -> vector<64x64xf32>
    %326 = arith.addf %320, %325 : vector<64x64xf32>
    %c4_441 = arith.constant 4 : index
    %c3_442 = arith.constant 3 : index
    %c0_443 = arith.constant 0 : index
    %327 = vector.load %arg18[%c4_441, %c3_442, %c0_443] : memref<12x12x32xf32, #tpu.memory_space<vmem>>, vector<8x8x32xf32>
    %328 = vector.shape_cast %327 : vector<8x8x32xf32> to vector<64x32xf32>
    %c4_444 = arith.constant 4 : index
    %c3_445 = arith.constant 3 : index
    %c0_446 = arith.constant 0 : index
    %c0_447 = arith.constant 0 : index
    %329 = vector.load %arg6[%c4_444, %c3_445, %c0_446, %c0_447] : memref<5x5x32x64xf32, #tpu.memory_space<vmem>>, vector<1x1x32x64xf32>
    %330 = vector.shape_cast %329 : vector<1x1x32x64xf32> to vector<32x64xf32>
    %cst_448 = arith.constant dense<0.000000e+00> : vector<64x64xf32>
    %331 = tpu.matmul %328, %330, %cst_448 {dimension_numbers = #tpu.dot_dimension_numbers<[1], [0], [0], [1], [0, 0, 1, 1], [], []>} : vector<64x32xf32>, vector<32x64xf32>, vector<64x64xf32> -> vector<64x64xf32>
    %332 = arith.addf %326, %331 : vector<64x64xf32>
    %c4_449 = arith.constant 4 : index
    %c4_450 = arith.constant 4 : index
    %c0_451 = arith.constant 0 : index
    %333 = vector.load %arg18[%c4_449, %c4_450, %c0_451] : memref<12x12x32xf32, #tpu.memory_space<vmem>>, vector<8x8x32xf32>
    %334 = vector.shape_cast %333 : vector<8x8x32xf32> to vector<64x32xf32>
    %c4_452 = arith.constant 4 : index
    %c4_453 = arith.constant 4 : index
    %c0_454 = arith.constant 0 : index
    %c0_455 = arith.constant 0 : index
    %335 = vector.load %arg6[%c4_452, %c4_453, %c0_454, %c0_455] : memref<5x5x32x64xf32, #tpu.memory_space<vmem>>, vector<1x1x32x64xf32>
    %336 = vector.shape_cast %335 : vector<1x1x32x64xf32> to vector<32x64xf32>
    %cst_456 = arith.constant dense<0.000000e+00> : vector<64x64xf32>
    %337 = tpu.matmul %334, %336, %cst_456 {dimension_numbers = #tpu.dot_dimension_numbers<[1], [0], [0], [1], [0, 0, 1, 1], [], []>} : vector<64x32xf32>, vector<32x64xf32>, vector<64x64xf32> -> vector<64x64xf32>
    %338 = arith.addf %332, %337 : vector<64x64xf32>
    %339 = vector.shape_cast %338 : vector<64x64xf32> to vector<8x8x64xf32>
    %c0_457 = arith.constant 0 : index
    %c0_458 = arith.constant 0 : index
    %340 = vector.load %arg7[%c0_457, %c0_458] : memref<1x64xf32, #tpu.memory_space<vmem>>, vector<1x64xf32>
    %341 = vector.shape_cast %340 : vector<1x64xf32> to vector<1x1x64xf32>
    %342 = vector.broadcast %341 : vector<1x1x64xf32> to vector<8x8x64xf32>
    %343 = arith.addf %339, %342 : vector<8x8x64xf32>
    %c0_459 = arith.constant 0 : index
    %c0_460 = arith.constant 0 : index
    %c0_461 = arith.constant 0 : index
    %344 = vector.load %arg19[%c0_459, %c0_460, %c0_461] : memref<8x8x64xf32, #tpu.memory_space<vmem>>, vector<8x8x64xf32>
    tpu.vector_store %arg19[%c0_459, %c0_460, %c0_461], %343 {strides = array<i32>} : memref<8x8x64xf32, #tpu.memory_space<vmem>>, vector<8x8x64xf32>,
    %c0_462 = arith.constant 0 : index
    %c0_463 = arith.constant 0 : index
    %c0_464 = arith.constant 0 : index
    %345 = tpu.strided_load %arg19[%c0_462, %c0_463, %c0_464] {strides = array<i32: 1, 2, 1>} : memref<8x8x64xf32, #tpu.memory_space<vmem>>, vector<8x4x64xf32>
    %c0_465 = arith.constant 0 : index
    %c1_466 = arith.constant 1 : index
    %c0_467 = arith.constant 0 : index
    %346 = tpu.strided_load %arg19[%c0_465, %c1_466, %c0_467] {strides = array<i32: 1, 2, 1>} : memref<8x8x64xf32, #tpu.memory_space<vmem>>, vector<8x4x64xf32>
    %347 = arith.maximumf %345, %346 : vector<8x4x64xf32>
    %c0_468 = arith.constant 0 : index
    %c0_469 = arith.constant 0 : index
    %c0_470 = arith.constant 0 : index
    %348 = vector.load %arg20[%c0_468, %c0_469, %c0_470] : memref<8x4x64xf32, #tpu.memory_space<vmem>>, vector<8x4x64xf32>
    tpu.vector_store %arg20[%c0_468, %c0_469, %c0_470], %347 {strides = array<i32>} : memref<8x4x64xf32, #tpu.memory_space<vmem>>, vector<8x4x64xf32>,
    %c0_471 = arith.constant 0 : index
    %c0_472 = arith.constant 0 : index
    %c0_473 = arith.constant 0 : index
    %349 = tpu.strided_load %arg20[%c0_471, %c0_472, %c0_473] {strides = array<i32: 2, 1, 1>} : memref<8x4x64xf32, #tpu.memory_space<vmem>>, vector<4x4x64xf32>
    %c1_474 = arith.constant 1 : index
    %c0_475 = arith.constant 0 : index
    %c0_476 = arith.constant 0 : index
    %350 = tpu.strided_load %arg20[%c1_474, %c0_475, %c0_476] {strides = array<i32: 2, 1, 1>} : memref<8x4x64xf32, #tpu.memory_space<vmem>>, vector<4x4x64xf32>
    %351 = arith.maximumf %349, %350 : vector<4x4x64xf32>
    %c0_477 = arith.constant 0 : index
    %c0_478 = arith.constant 0 : index
    %c0_479 = arith.constant 0 : index
    %352 = vector.load %arg21[%c0_477, %c0_478, %c0_479] : memref<4x4x64xf32, #tpu.memory_space<vmem>>, vector<4x4x64xf32>
    tpu.vector_store %arg21[%c0_477, %c0_478, %c0_479], %351 {strides = array<i32>} : memref<4x4x64xf32, #tpu.memory_space<vmem>>, vector<4x4x64xf32>,
    %cst_480 = arith.constant 0.000000e+00 : f32
    %353 = vector.broadcast %cst_480 : f32 to vector<1x64xf32>
    %c0_481 = arith.constant 0 : index
    %c0_482 = arith.constant 0 : index
    %c0_483 = arith.constant 0 : index
    %354 = vector.load %arg21[%c0_481, %c0_482, %c0_483] : memref<4x4x64xf32, #tpu.memory_space<vmem>>, vector<1x1x64xf32>
    %355 = vector.shape_cast %354 : vector<1x1x64xf32> to vector<1x64xf32>
    %c0_484 = arith.constant 0 : index
    %c0_485 = arith.constant 0 : index
    %c0_486 = arith.constant 0 : index
    %356 = vector.load %arg8[%c0_484, %c0_485, %c0_486] : memref<16x64x64xf32, #tpu.memory_space<vmem>>, vector<1x64x64xf32>
    %357 = vector.shape_cast %356 : vector<1x64x64xf32> to vector<64x64xf32>
    %cst_487 = arith.constant dense<0.000000e+00> : vector<1x64xf32>
    %358 = tpu.matmul %355, %357, %cst_487 {dimension_numbers = #tpu.dot_dimension_numbers<[1], [0], [0], [1], [0, 0, 1, 1], [], []>} : vector<1x64xf32>, vector<64x64xf32>, vector<1x64xf32> -> vector<1x64xf32>
    %359 = arith.addf %353, %358 : vector<1x64xf32>
    %c0_488 = arith.constant 0 : index
    %c1_489 = arith.constant 1 : index
    %c0_490 = arith.constant 0 : index
    %360 = vector.load %arg21[%c0_488, %c1_489, %c0_490] : memref<4x4x64xf32, #tpu.memory_space<vmem>>, vector<1x1x64xf32>
    %361 = vector.shape_cast %360 : vector<1x1x64xf32> to vector<1x64xf32>
    %c1_491 = arith.constant 1 : index
    %c0_492 = arith.constant 0 : index
    %c0_493 = arith.constant 0 : index
    %362 = vector.load %arg8[%c1_491, %c0_492, %c0_493] : memref<16x64x64xf32, #tpu.memory_space<vmem>>, vector<1x64x64xf32>
    %363 = vector.shape_cast %362 : vector<1x64x64xf32> to vector<64x64xf32>
    %cst_494 = arith.constant dense<0.000000e+00> : vector<1x64xf32>
    %364 = tpu.matmul %361, %363, %cst_494 {dimension_numbers = #tpu.dot_dimension_numbers<[1], [0], [0], [1], [0, 0, 1, 1], [], []>} : vector<1x64xf32>, vector<64x64xf32>, vector<1x64xf32> -> vector<1x64xf32>
    %365 = arith.addf %359, %364 : vector<1x64xf32>
    %c0_495 = arith.constant 0 : index
    %c2_496 = arith.constant 2 : index
    %c0_497 = arith.constant 0 : index
    %366 = vector.load %arg21[%c0_495, %c2_496, %c0_497] : memref<4x4x64xf32, #tpu.memory_space<vmem>>, vector<1x1x64xf32>
    %367 = vector.shape_cast %366 : vector<1x1x64xf32> to vector<1x64xf32>
    %c2_498 = arith.constant 2 : index
    %c0_499 = arith.constant 0 : index
    %c0_500 = arith.constant 0 : index
    %368 = vector.load %arg8[%c2_498, %c0_499, %c0_500] : memref<16x64x64xf32, #tpu.memory_space<vmem>>, vector<1x64x64xf32>
    %369 = vector.shape_cast %368 : vector<1x64x64xf32> to vector<64x64xf32>
    %cst_501 = arith.constant dense<0.000000e+00> : vector<1x64xf32>
    %370 = tpu.matmul %367, %369, %cst_501 {dimension_numbers = #tpu.dot_dimension_numbers<[1], [0], [0], [1], [0, 0, 1, 1], [], []>} : vector<1x64xf32>, vector<64x64xf32>, vector<1x64xf32> -> vector<1x64xf32>
    %371 = arith.addf %365, %370 : vector<1x64xf32>
    %c0_502 = arith.constant 0 : index
    %c3_503 = arith.constant 3 : index
    %c0_504 = arith.constant 0 : index
    %372 = vector.load %arg21[%c0_502, %c3_503, %c0_504] : memref<4x4x64xf32, #tpu.memory_space<vmem>>, vector<1x1x64xf32>
    %373 = vector.shape_cast %372 : vector<1x1x64xf32> to vector<1x64xf32>
    %c3_505 = arith.constant 3 : index
    %c0_506 = arith.constant 0 : index
    %c0_507 = arith.constant 0 : index
    %374 = vector.load %arg8[%c3_505, %c0_506, %c0_507] : memref<16x64x64xf32, #tpu.memory_space<vmem>>, vector<1x64x64xf32>
    %375 = vector.shape_cast %374 : vector<1x64x64xf32> to vector<64x64xf32>
    %cst_508 = arith.constant dense<0.000000e+00> : vector<1x64xf32>
    %376 = tpu.matmul %373, %375, %cst_508 {dimension_numbers = #tpu.dot_dimension_numbers<[1], [0], [0], [1], [0, 0, 1, 1], [], []>} : vector<1x64xf32>, vector<64x64xf32>, vector<1x64xf32> -> vector<1x64xf32>
    %377 = arith.addf %371, %376 : vector<1x64xf32>
    %c1_509 = arith.constant 1 : index
    %c0_510 = arith.constant 0 : index
    %c0_511 = arith.constant 0 : index
    %378 = vector.load %arg21[%c1_509, %c0_510, %c0_511] : memref<4x4x64xf32, #tpu.memory_space<vmem>>, vector<1x1x64xf32>
    %379 = vector.shape_cast %378 : vector<1x1x64xf32> to vector<1x64xf32>
    %c4_512 = arith.constant 4 : index
    %c0_513 = arith.constant 0 : index
    %c0_514 = arith.constant 0 : index
    %380 = vector.load %arg8[%c4_512, %c0_513, %c0_514] : memref<16x64x64xf32, #tpu.memory_space<vmem>>, vector<1x64x64xf32>
    %381 = vector.shape_cast %380 : vector<1x64x64xf32> to vector<64x64xf32>
    %cst_515 = arith.constant dense<0.000000e+00> : vector<1x64xf32>
    %382 = tpu.matmul %379, %381, %cst_515 {dimension_numbers = #tpu.dot_dimension_numbers<[1], [0], [0], [1], [0, 0, 1, 1], [], []>} : vector<1x64xf32>, vector<64x64xf32>, vector<1x64xf32> -> vector<1x64xf32>
    %383 = arith.addf %377, %382 : vector<1x64xf32>
    %c1_516 = arith.constant 1 : index
    %c1_517 = arith.constant 1 : index
    %c0_518 = arith.constant 0 : index
    %384 = vector.load %arg21[%c1_516, %c1_517, %c0_518] : memref<4x4x64xf32, #tpu.memory_space<vmem>>, vector<1x1x64xf32>
    %385 = vector.shape_cast %384 : vector<1x1x64xf32> to vector<1x64xf32>
    %c5 = arith.constant 5 : index
    %c0_519 = arith.constant 0 : index
    %c0_520 = arith.constant 0 : index
    %386 = vector.load %arg8[%c5, %c0_519, %c0_520] : memref<16x64x64xf32, #tpu.memory_space<vmem>>, vector<1x64x64xf32>
    %387 = vector.shape_cast %386 : vector<1x64x64xf32> to vector<64x64xf32>
    %cst_521 = arith.constant dense<0.000000e+00> : vector<1x64xf32>
    %388 = tpu.matmul %385, %387, %cst_521 {dimension_numbers = #tpu.dot_dimension_numbers<[1], [0], [0], [1], [0, 0, 1, 1], [], []>} : vector<1x64xf32>, vector<64x64xf32>, vector<1x64xf32> -> vector<1x64xf32>
    %389 = arith.addf %383, %388 : vector<1x64xf32>
    %c1_522 = arith.constant 1 : index
    %c2_523 = arith.constant 2 : index
    %c0_524 = arith.constant 0 : index
    %390 = vector.load %arg21[%c1_522, %c2_523, %c0_524] : memref<4x4x64xf32, #tpu.memory_space<vmem>>, vector<1x1x64xf32>
    %391 = vector.shape_cast %390 : vector<1x1x64xf32> to vector<1x64xf32>
    %c6 = arith.constant 6 : index
    %c0_525 = arith.constant 0 : index
    %c0_526 = arith.constant 0 : index
    %392 = vector.load %arg8[%c6, %c0_525, %c0_526] : memref<16x64x64xf32, #tpu.memory_space<vmem>>, vector<1x64x64xf32>
    %393 = vector.shape_cast %392 : vector<1x64x64xf32> to vector<64x64xf32>
    %cst_527 = arith.constant dense<0.000000e+00> : vector<1x64xf32>
    %394 = tpu.matmul %391, %393, %cst_527 {dimension_numbers = #tpu.dot_dimension_numbers<[1], [0], [0], [1], [0, 0, 1, 1], [], []>} : vector<1x64xf32>, vector<64x64xf32>, vector<1x64xf32> -> vector<1x64xf32>
    %395 = arith.addf %389, %394 : vector<1x64xf32>
    %c1_528 = arith.constant 1 : index
    %c3_529 = arith.constant 3 : index
    %c0_530 = arith.constant 0 : index
    %396 = vector.load %arg21[%c1_528, %c3_529, %c0_530] : memref<4x4x64xf32, #tpu.memory_space<vmem>>, vector<1x1x64xf32>
    %397 = vector.shape_cast %396 : vector<1x1x64xf32> to vector<1x64xf32>
    %c7 = arith.constant 7 : index
    %c0_531 = arith.constant 0 : index
    %c0_532 = arith.constant 0 : index
    %398 = vector.load %arg8[%c7, %c0_531, %c0_532] : memref<16x64x64xf32, #tpu.memory_space<vmem>>, vector<1x64x64xf32>
    %399 = vector.shape_cast %398 : vector<1x64x64xf32> to vector<64x64xf32>
    %cst_533 = arith.constant dense<0.000000e+00> : vector<1x64xf32>
    %400 = tpu.matmul %397, %399, %cst_533 {dimension_numbers = #tpu.dot_dimension_numbers<[1], [0], [0], [1], [0, 0, 1, 1], [], []>} : vector<1x64xf32>, vector<64x64xf32>, vector<1x64xf32> -> vector<1x64xf32>
    %401 = arith.addf %395, %400 : vector<1x64xf32>
    %c2_534 = arith.constant 2 : index
    %c0_535 = arith.constant 0 : index
    %c0_536 = arith.constant 0 : index
    %402 = vector.load %arg21[%c2_534, %c0_535, %c0_536] : memref<4x4x64xf32, #tpu.memory_space<vmem>>, vector<1x1x64xf32>
    %403 = vector.shape_cast %402 : vector<1x1x64xf32> to vector<1x64xf32>
    %c8 = arith.constant 8 : index
    %c0_537 = arith.constant 0 : index
    %c0_538 = arith.constant 0 : index
    %404 = vector.load %arg8[%c8, %c0_537, %c0_538] : memref<16x64x64xf32, #tpu.memory_space<vmem>>, vector<1x64x64xf32>
    %405 = vector.shape_cast %404 : vector<1x64x64xf32> to vector<64x64xf32>
    %cst_539 = arith.constant dense<0.000000e+00> : vector<1x64xf32>
    %406 = tpu.matmul %403, %405, %cst_539 {dimension_numbers = #tpu.dot_dimension_numbers<[1], [0], [0], [1], [0, 0, 1, 1], [], []>} : vector<1x64xf32>, vector<64x64xf32>, vector<1x64xf32> -> vector<1x64xf32>
    %407 = arith.addf %401, %406 : vector<1x64xf32>
    %c2_540 = arith.constant 2 : index
    %c1_541 = arith.constant 1 : index
    %c0_542 = arith.constant 0 : index
    %408 = vector.load %arg21[%c2_540, %c1_541, %c0_542] : memref<4x4x64xf32, #tpu.memory_space<vmem>>, vector<1x1x64xf32>
    %409 = vector.shape_cast %408 : vector<1x1x64xf32> to vector<1x64xf32>
    %c9 = arith.constant 9 : index
    %c0_543 = arith.constant 0 : index
    %c0_544 = arith.constant 0 : index
    %410 = vector.load %arg8[%c9, %c0_543, %c0_544] : memref<16x64x64xf32, #tpu.memory_space<vmem>>, vector<1x64x64xf32>
    %411 = vector.shape_cast %410 : vector<1x64x64xf32> to vector<64x64xf32>
    %cst_545 = arith.constant dense<0.000000e+00> : vector<1x64xf32>
    %412 = tpu.matmul %409, %411, %cst_545 {dimension_numbers = #tpu.dot_dimension_numbers<[1], [0], [0], [1], [0, 0, 1, 1], [], []>} : vector<1x64xf32>, vector<64x64xf32>, vector<1x64xf32> -> vector<1x64xf32>
    %413 = arith.addf %407, %412 : vector<1x64xf32>
    %c2_546 = arith.constant 2 : index
    %c2_547 = arith.constant 2 : index
    %c0_548 = arith.constant 0 : index
    %414 = vector.load %arg21[%c2_546, %c2_547, %c0_548] : memref<4x4x64xf32, #tpu.memory_space<vmem>>, vector<1x1x64xf32>
    %415 = vector.shape_cast %414 : vector<1x1x64xf32> to vector<1x64xf32>
    %c10 = arith.constant 10 : index
    %c0_549 = arith.constant 0 : index
    %c0_550 = arith.constant 0 : index
    %416 = vector.load %arg8[%c10, %c0_549, %c0_550] : memref<16x64x64xf32, #tpu.memory_space<vmem>>, vector<1x64x64xf32>
    %417 = vector.shape_cast %416 : vector<1x64x64xf32> to vector<64x64xf32>
    %cst_551 = arith.constant dense<0.000000e+00> : vector<1x64xf32>
    %418 = tpu.matmul %415, %417, %cst_551 {dimension_numbers = #tpu.dot_dimension_numbers<[1], [0], [0], [1], [0, 0, 1, 1], [], []>} : vector<1x64xf32>, vector<64x64xf32>, vector<1x64xf32> -> vector<1x64xf32>
    %419 = arith.addf %413, %418 : vector<1x64xf32>
    %c2_552 = arith.constant 2 : index
    %c3_553 = arith.constant 3 : index
    %c0_554 = arith.constant 0 : index
    %420 = vector.load %arg21[%c2_552, %c3_553, %c0_554] : memref<4x4x64xf32, #tpu.memory_space<vmem>>, vector<1x1x64xf32>
    %421 = vector.shape_cast %420 : vector<1x1x64xf32> to vector<1x64xf32>
    %c11 = arith.constant 11 : index
    %c0_555 = arith.constant 0 : index
    %c0_556 = arith.constant 0 : index
    %422 = vector.load %arg8[%c11, %c0_555, %c0_556] : memref<16x64x64xf32, #tpu.memory_space<vmem>>, vector<1x64x64xf32>
    %423 = vector.shape_cast %422 : vector<1x64x64xf32> to vector<64x64xf32>
    %cst_557 = arith.constant dense<0.000000e+00> : vector<1x64xf32>
    %424 = tpu.matmul %421, %423, %cst_557 {dimension_numbers = #tpu.dot_dimension_numbers<[1], [0], [0], [1], [0, 0, 1, 1], [], []>} : vector<1x64xf32>, vector<64x64xf32>, vector<1x64xf32> -> vector<1x64xf32>
    %425 = arith.addf %419, %424 : vector<1x64xf32>
    %c3_558 = arith.constant 3 : index
    %c0_559 = arith.constant 0 : index
    %c0_560 = arith.constant 0 : index
    %426 = vector.load %arg21[%c3_558, %c0_559, %c0_560] : memref<4x4x64xf32, #tpu.memory_space<vmem>>, vector<1x1x64xf32>
    %427 = vector.shape_cast %426 : vector<1x1x64xf32> to vector<1x64xf32>
    %c12 = arith.constant 12 : index
    %c0_561 = arith.constant 0 : index
    %c0_562 = arith.constant 0 : index
    %428 = vector.load %arg8[%c12, %c0_561, %c0_562] : memref<16x64x64xf32, #tpu.memory_space<vmem>>, vector<1x64x64xf32>
    %429 = vector.shape_cast %428 : vector<1x64x64xf32> to vector<64x64xf32>
    %cst_563 = arith.constant dense<0.000000e+00> : vector<1x64xf32>
    %430 = tpu.matmul %427, %429, %cst_563 {dimension_numbers = #tpu.dot_dimension_numbers<[1], [0], [0], [1], [0, 0, 1, 1], [], []>} : vector<1x64xf32>, vector<64x64xf32>, vector<1x64xf32> -> vector<1x64xf32>
    %431 = arith.addf %425, %430 : vector<1x64xf32>
    %c3_564 = arith.constant 3 : index
    %c1_565 = arith.constant 1 : index
    %c0_566 = arith.constant 0 : index
    %432 = vector.load %arg21[%c3_564, %c1_565, %c0_566] : memref<4x4x64xf32, #tpu.memory_space<vmem>>, vector<1x1x64xf32>
    %433 = vector.shape_cast %432 : vector<1x1x64xf32> to vector<1x64xf32>
    %c13 = arith.constant 13 : index
    %c0_567 = arith.constant 0 : index
    %c0_568 = arith.constant 0 : index
    %434 = vector.load %arg8[%c13, %c0_567, %c0_568] : memref<16x64x64xf32, #tpu.memory_space<vmem>>, vector<1x64x64xf32>
    %435 = vector.shape_cast %434 : vector<1x64x64xf32> to vector<64x64xf32>
    %cst_569 = arith.constant dense<0.000000e+00> : vector<1x64xf32>
    %436 = tpu.matmul %433, %435, %cst_569 {dimension_numbers = #tpu.dot_dimension_numbers<[1], [0], [0], [1], [0, 0, 1, 1], [], []>} : vector<1x64xf32>, vector<64x64xf32>, vector<1x64xf32> -> vector<1x64xf32>
    %437 = arith.addf %431, %436 : vector<1x64xf32>
    %c3_570 = arith.constant 3 : index
    %c2_571 = arith.constant 2 : index
    %c0_572 = arith.constant 0 : index
    %438 = vector.load %arg21[%c3_570, %c2_571, %c0_572] : memref<4x4x64xf32, #tpu.memory_space<vmem>>, vector<1x1x64xf32>
    %439 = vector.shape_cast %438 : vector<1x1x64xf32> to vector<1x64xf32>
    %c14 = arith.constant 14 : index
    %c0_573 = arith.constant 0 : index
    %c0_574 = arith.constant 0 : index
    %440 = vector.load %arg8[%c14, %c0_573, %c0_574] : memref<16x64x64xf32, #tpu.memory_space<vmem>>, vector<1x64x64xf32>
    %441 = vector.shape_cast %440 : vector<1x64x64xf32> to vector<64x64xf32>
    %cst_575 = arith.constant dense<0.000000e+00> : vector<1x64xf32>
    %442 = tpu.matmul %439, %441, %cst_575 {dimension_numbers = #tpu.dot_dimension_numbers<[1], [0], [0], [1], [0, 0, 1, 1], [], []>} : vector<1x64xf32>, vector<64x64xf32>, vector<1x64xf32> -> vector<1x64xf32>
    %443 = arith.addf %437, %442 : vector<1x64xf32>
    %c3_576 = arith.constant 3 : index
    %c3_577 = arith.constant 3 : index
    %c0_578 = arith.constant 0 : index
    %444 = vector.load %arg21[%c3_576, %c3_577, %c0_578] : memref<4x4x64xf32, #tpu.memory_space<vmem>>, vector<1x1x64xf32>
    %445 = vector.shape_cast %444 : vector<1x1x64xf32> to vector<1x64xf32>
    %c15 = arith.constant 15 : index
    %c0_579 = arith.constant 0 : index
    %c0_580 = arith.constant 0 : index
    %446 = vector.load %arg8[%c15, %c0_579, %c0_580] : memref<16x64x64xf32, #tpu.memory_space<vmem>>, vector<1x64x64xf32>
    %447 = vector.shape_cast %446 : vector<1x64x64xf32> to vector<64x64xf32>
    %cst_581 = arith.constant dense<0.000000e+00> : vector<1x64xf32>
    %448 = tpu.matmul %445, %447, %cst_581 {dimension_numbers = #tpu.dot_dimension_numbers<[1], [0], [0], [1], [0, 0, 1, 1], [], []>} : vector<1x64xf32>, vector<64x64xf32>, vector<1x64xf32> -> vector<1x64xf32>
    %449 = arith.addf %443, %448 : vector<1x64xf32>
    %c0_582 = arith.constant 0 : index
    %c0_583 = arith.constant 0 : index
    %450 = vector.load %arg9[%c0_582, %c0_583] : memref<1x64xf32, #tpu.memory_space<vmem>>, vector<1x64xf32>
    %451 = arith.addf %449, %450 : vector<1x64xf32>
    %c0_584 = arith.constant 0 : index
    %c0_585 = arith.constant 0 : index
    %452 = vector.load %arg10[%c0_584, %c0_585] : memref<64x128xf32, #tpu.memory_space<vmem>>, vector<64x128xf32>
    %cst_586 = arith.constant dense<0.000000e+00> : vector<1x128xf32>
    %453 = tpu.matmul %451, %452, %cst_586 {dimension_numbers = #tpu.dot_dimension_numbers<[1], [0], [0], [1], [0, 0, 1, 1], [], []>} : vector<1x64xf32>, vector<64x128xf32>, vector<1x128xf32> -> vector<1x128xf32>
    %c0_587 = arith.constant 0 : index
    %c0_588 = arith.constant 0 : index
    %454 = vector.load %arg11[%c0_587, %c0_588] : memref<1x128xf32, #tpu.memory_space<vmem>>, vector<1x128xf32>
    %455 = arith.addf %453, %454 : vector<1x128xf32>
    %c0_589 = arith.constant 0 : index
    %c0_590 = arith.constant 0 : index
    %c0_591 = arith.constant 0 : index
    %456 = vector.load %arg12[%c0_589, %c0_590, %c0_591] : memref<1x1x128xf32, #tpu.memory_space<vmem>>, vector<1x1x128xf32>
    %457 = vector.shape_cast %456 : vector<1x1x128xf32> to vector<1x128xf32>
    %458 = vector.shape_cast %455 : vector<1x128xf32> to vector<1x1x128xf32>
    tpu.vector_store %arg12[%c0_589, %c0_590, %c0_591], %458 {strides = array<i32>} : memref<1x1x128xf32, #tpu.memory_space<vmem>>, vector<1x1x128xf32>,
    return
  }
  func.func @transform_0(%arg0: i32) -> (i32, i32, i32, i32) {
    %c0_i32 = arith.constant 0 : i32
    %c0_i32_0 = arith.constant 0 : i32
    %c0_i32_1 = arith.constant 0 : i32
    %c0_i32_2 = arith.constant 0 : i32
    return %arg0, %c0_i32, %c0_i32_0, %c0_i32_1 : i32, i32, i32, i32
  }
  func.func @transform_1(%arg0: i32) -> (i32, i32) {
    %c0_i32 = arith.constant 0 : i32
    %c0_i32_0 = arith.constant 0 : i32
    %c0_i32_1 = arith.constant 0 : i32
    return %c0_i32, %c0_i32_0 : i32, i32
  }
  func.func @transform_2(%arg0: i32) -> (i32, i32) {
    %c0_i32 = arith.constant 0 : i32
    %c0_i32_0 = arith.constant 0 : i32
    %c0_i32_1 = arith.constant 0 : i32
    return %c0_i32, %c0_i32_0 : i32, i32
  }
  func.func @transform_3(%arg0: i32) -> (i32, i32, i32, i32) {
    %c0_i32 = arith.constant 0 : i32
    %c0_i32_0 = arith.constant 0 : i32
    %c0_i32_1 = arith.constant 0 : i32
    %c0_i32_2 = arith.constant 0 : i32
    %c0_i32_3 = arith.constant 0 : i32
    return %c0_i32, %c0_i32_0, %c0_i32_1, %c0_i32_2 : i32, i32, i32, i32
  }
  func.func @transform_4(%arg0: i32) -> (i32, i32) {
    %c0_i32 = arith.constant 0 : i32
    %c0_i32_0 = arith.constant 0 : i32
    %c0_i32_1 = arith.constant 0 : i32
    return %c0_i32, %c0_i32_0 : i32, i32
  }
  func.func @transform_5(%arg0: i32) -> (i32, i32, i32, i32) {
    %c0_i32 = arith.constant 0 : i32
    %c0_i32_0 = arith.constant 0 : i32
    %c0_i32_1 = arith.constant 0 : i32
    %c0_i32_2 = arith.constant 0 : i32
    %c0_i32_3 = arith.constant 0 : i32
    return %c0_i32, %c0_i32_0, %c0_i32_1, %c0_i32_2 : i32, i32, i32, i32
  }
  func.func @transform_6(%arg0: i32) -> (i32, i32) {
    %c0_i32 = arith.constant 0 : i32
    %c0_i32_0 = arith.constant 0 : i32
    %c0_i32_1 = arith.constant 0 : i32
    return %c0_i32, %c0_i32_0 : i32, i32
  }
  func.func @transform_7(%arg0: i32) -> (i32, i32, i32) {
    %c0_i32 = arith.constant 0 : i32
    %c0_i32_0 = arith.constant 0 : i32
    %c0_i32_1 = arith.constant 0 : i32
    %c0_i32_2 = arith.constant 0 : i32
    return %c0_i32, %c0_i32_0, %c0_i32_1 : i32, i32, i32
  }
  func.func @transform_8(%arg0: i32) -> (i32, i32) {
    %c0_i32 = arith.constant 0 : i32
    %c0_i32_0 = arith.constant 0 : i32
    %c0_i32_1 = arith.constant 0 : i32
    return %c0_i32, %c0_i32_0 : i32, i32
  }
  func.func @transform_9(%arg0: i32) -> (i32, i32) {
    %c0_i32 = arith.constant 0 : i32
    %c0_i32_0 = arith.constant 0 : i32
    %c0_i32_1 = arith.constant 0 : i32
    return %c0_i32, %c0_i32_0 : i32, i32
  }
  func.func @transform_10(%arg0: i32) -> (i32, i32) {
    %c0_i32 = arith.constant 0 : i32
    %c0_i32_0 = arith.constant 0 : i32
    %c0_i32_1 = arith.constant 0 : i32
    return %c0_i32, %c0_i32_0 : i32, i32
  }
  func.func @transform_11(%arg0: i32) -> (i32, i32, i32) {
    %c0_i32 = arith.constant 0 : i32
    %c0_i32_0 = arith.constant 0 : i32
    %c0_i32_1 = arith.constant 0 : i32
    return %arg0, %c0_i32, %c0_i32_0 : i32, i32, i32
  }
}

</mosaic_0001>

<bundles_post_ra>
// kernel: _lambda_.1
= control target key start
LH: loop header
LB: loop body
LE: loop exit
PB: predicated region body
PF: predicated region fallthrough
CT: control target
= control target key end

     0   :  { %16 = vsyncpa [#allocation12], 0  ;;  %s29327_s0 = inlined_call_operand.vmem [shape: f32[2,32,32,75], index: 0, kind: input, shape index: {}]   ;;  %s29328_s1 = inlined_call_operand.vmem [shape: f32[75,32], index: 1, kind: input, shape index: {}]   ;;  %s29329_s2 = inlined_call_operand.vmem [shape: f32[1,32], index: 2, kind: input, shape index: {}, may-alias: {2,4}]   ;;  %s29330_s3 = inlined_call_operand.vmem [shape: f32[5,5,32,32], index: 3, kind: input, shape index: {}]   ;;  %s29331_s4 = inlined_call_operand.vmem [shape: f32[1,32], index: 4, kind: input, shape index: {}, may-alias: {2,4}]   ;;  %s29332_s5 = inlined_call_operand.vmem [shape: f32[5,5,32,64], index: 5, kind: input, shape index: {}]   ;;  %s29333_s6 = inlined_call_operand.vmem [shape: f32[1,64], index: 6, kind: input, shape index: {}, may-alias: {6,8}]   ;;  %s29334_s7 = inlined_call_operand.vmem [shape: f32[16,64,64], index: 7, kind: input, shape index: {}]   ;;  %s29335_s8 = inlined_call_operand.vmem [shape: f32[1,64], index: 8, kind: input, shape index: {}, may-alias: {6,8}]   ;;  %s29336_s9 = inlined_call_operand.vmem [shape: f32[64,128], index: 9, kind: input, shape index: {}]   ;;  %s29337_s10 = inlined_call_operand.vmem [shape: f32[1,128], index: 10, kind: input, shape index: {}]   ;;  %s29338_s11 = inlined_call_operand.hbm [shape: f32[2,1,128], index: 11, kind: output, shape index: {}]  }
   0x1   :  { %18 = vsyncpa [#allocation12 + $0x1], 0  ;;  %s24851_s17 = smov 0   ;;  %s24853_s18 = smov 0  }
   0x2   :  { %s24855_s19 = smov 0   ;;  %s24857_s20 = smov 0  }
   0x3 LB: > { %s24872_s21 = sadd.s32 4294967295, %s24784_s20   ;;  %s17688_s22 = sadd.s32 4294967294, %s24784_s20   ;;  %s24784_s20 = sphi %s24857_s20, %s29668_s20   ;;  %s24780_s19 = sphi %s24855_s19, %s29667_s19   ;;  %s24776_s18 = sphi %s24853_s18, %s29666_s18   ;;  %s24772_s17 = sphi %s24851_s17, %s29665_s17  }
   0x4   : > { %s24876_s23 = sadd.s32 1, %s24784_s20   ;;  %s267_s24 = sadd.s32 1, %s24780_s19 }
   0x5   : > { %s264_s25 = ssub.s32 %s24784_s20, %s24876_s23  ;;  %p277_p0 = scmp.ne.s32.totalorder %s24780_s19, %s24776_s18 }
   0x6   : > { %p265_p1 = scmp.eq.s32.totalorder %s264_s25, 0  ;;  %p278_p2 = scmp.eq.s32.totalorder %s24872_s21, 1 }
   0x7   : > { %p283_p3 = scmp.ne.s32.totalorder %s24776_s18, %s24772_s17  ;;  %p284_p4 = scmp.eq.s32.totalorder %s17688_s22, 1 }
   0x8   : > { %s24887_s26 = scalar_select %p265_p1, %s24780_s19, %s267_s24  }
   0x9   : > { %p24889_p5 = por %p278_p2, %p277_p0  ;;  %p24893_p6 = por %p284_p4, %p283_p3 }
   0xa   : > { %29426 = sst [smem:[#allocation14_spill]] %s24887_s26  ;;  %p17691_p7 = scmp.ge.s32.totalorder %s24784_s20, 1 }
   0xb   : > { %p340_p8 = scmp.lt.s32.totalorder %s24784_s20, 3 }
   0xd   : > { %p341_p9 = pnand %p17691_p7, %p340_p8 }
   0xf   : > { %344 = sbr.rel (%p341_p9) target bundleno = 3270 (0xcc6), region = 64 }
  0x16   : > { %v512_v0 = vld [vmem:[%s29328_s1] sm:$0xff]  ;;  %v513_v1 = vld [vmem:[%s29328_s1 + $0x8] sm:$0xff]  ;;  %v514_v2 = vld [vmem:[%s29328_s1 + $0x10] sm:$0xff]  ;;  %p379_p10 = scmp.lt.s32.totalorder %s24872_s21, 1  ;;  %vm522_vm0 = vcmask 613376   ;;  %vm907_vm1 = vcmask 1042432  }
  0x17   : > { %v23085_v3 = vpack.c.bf16 %v513_v1, %v512_v0  ;;  %v515_v4 = vld [vmem:[%s29328_s1 + $0x18] sm:$0xff]  ;;  %v516_v6 = vld [vmem:[%s29328_s1 + $0x20] sm:$0xff]  ;;  %v517_v7 = vld [vmem:[%s29328_s1 + $0x28] sm:$0xff]  ;;  %vm24786_vm2 = vmmov 1   ;;  %vm1751_vm4 = vcmask 261120   ;;  %vm1882_vm5 = vcmask 257024  }
  0x18   : > { %v23089_v5 = vpack.c.bf16 %v515_v4, %v514_v2  ;;  %s380_s12 = scalar_select %p379_p10, %s24872_s21, 1  ;;  %v23093_v8 = vpack.c.bf16 %v517_v7, %v516_v6  ;;  %v518_v9 = vld [vmem:[%s29328_s1 + $0x30] sm:$0xff]  ;;  %v519_v10 = vld [vmem:[%s29328_s1 + $0x38] sm:$0xff]  ;;  %v520_v13 = vld [vmem:[%s29328_s1 + $0x40] sm:$0xff]  ;;  %vm24789_vm6 = vmmov 0   ;;  %vm16117_vm7 = vcmask 523264  }
  0x19   : > { %23086 = vmatprep.subr.bf16.mxu0 %v23085_v3  ;;  %v23097_v12 = vpack.c.bf16 %v519_v10, %v518_v9  ;;  %v521_v14 = vld [vmem:[%s29328_s1 + $0x48] sm:$0x7]  ;;  %vm23102_vm3 = vmpackc.low %vm907_vm1, %vm24786_vm2  ;;  %vm16165_vm8 = vcmask 519168   ;;  %s377_s22 = sand.u32 1, %s24776_s18   ;;  %s19155_s29 = sshll.u32 %s24872_s21, 4 }
  0x1a   : > { %23088 = vmatpush3.bf16.msra.mxu0 %v23085_v3  ;;  %s19158_s13 = sshll.u32 %s380_s12, 10  ;;  %v23101_v15 = vpack.c.bf16 %v521_v14, %v520_v13  ;;  %v17824_v14 = vld [vmem:[%s29330_s3 + $0x20] sm:$0xff]  ;;  %s378_s30 = scalar_lea.vmem [#allocation11], %s377_s22 }
  0x1b   : > { %23090 = vmatprep.subr.bf16.mxu0 %v23089_v5  ;;  %s24922_s16 = scalar_lea.vmem %s29327_s0, %s19158_s13  ;;  %s29285_s13 = scalar_lea.hbm %s29338_s11, %s19155_s29 }
  0x1c   : > { %v384_v11 = vld [vmem:[%s24922_s16] sm:$0xff]  ;;  %v385_v16 = vld [vmem:[%s24922_s16 + $0x8] sm:$0xff]  ;;  %v386_v17 = vld [vmem:[%s24922_s16 + $0x10] sm:$0xff]  ;;  %s17621_s14 = scalar_lea.sflag [#allocation12], %s377_s22  ;;  %s24790_s21 = smov [#allocation11]  }
  0x1d   : > { %20670 = vmatprep.mubr.msk.f32.mxu0 %vm522_vm0, %v384_v11  ;;  %v387_v18 = vld [vmem:[%s24922_s16 + $0x18] sm:$0xff]  ;;  %v388_v19 = vld [vmem:[%s24922_s16 + $0x20] sm:$0xff]  ;;  %v389_v20 = vld [vmem:[%s24922_s16 + $0x28] sm:$0xff]  ;;  %s24726_s24 = sshll.u32 %s24790_s21, 4  ;;  %s24727_s24 = int_to_ptr.vmem [resolvable:$false] %s24726_s24 }
  0x1e   : > { %23092 = vmatpush3.bf16.msra.mxu0 %v23089_v5  ;;  %v390_v21 = vld [vmem:[%s24922_s16 + $0x30] sm:$0xff]  ;;  %v391_v22 = vld [vmem:[%s24922_s16 + $0x38] sm:$0xff]  ;;  %v392_v23 = vld [vmem:[%s24922_s16 + $0x40] sm:$0xff]  ;;  %s24728_s25 = scalar_lea.vmem %s24727_s24, 32 }
  0x1f   : > { %23094 = vmatprep.subr.bf16.mxu0 %v23093_v8  ;;  %v393_v24 = vld [vmem:[%s24922_s16 + $0x48] sm:$0xff]  ;;  %v394_v25 = vld [vmem:[%s24922_s16 + $0x50] sm:$0xff]  ;;  %v395_v26 = vld [vmem:[%s24922_s16 + $0x58] sm:$0xff] }
  0x20   : > { %v396_v27 = vld [vmem:[%s24922_s16 + $0x60] sm:$0xff]  ;;  %v397_v28 = vld [vmem:[%s24922_s16 + $0x68] sm:$0xff]  ;;  %v398_v29 = vld [vmem:[%s24922_s16 + $0x70] sm:$0xff] }
  0x21   : > { %v399_v30 = vld [vmem:[%s24922_s16 + $0x78] sm:$0xff]  ;;  %v400_v31 = vld [vmem:[%s24922_s16 + $0x80] sm:$0xff]  ;;  %v401_v32 = vld [vmem:[%s24922_s16 + $0x88] sm:$0xff] }
  0x22   : > { %23096 = vmatpush3.bf16.msra.mxu0 %v23093_v8  ;;  %v402_v33 = vld [vmem:[%s24922_s16 + $0x90] sm:$0xff]  ;;  %v403_v34 = vld [vmem:[%s24922_s16 + $0x98] sm:$0xff]  ;;  %v404_v35 = vld [vmem:[%s24922_s16 + $0xa0] sm:$0xff] }
  0x23   : > { %23098 = vmatprep.subr.bf16.mxu0 %v23097_v12  ;;  %v405_v36 = vld [vmem:[%s24922_s16 + $0xa8] sm:$0xff]  ;;  %v406_v37 = vld [vmem:[%s24922_s16 + $0xb0] sm:$0xff]  ;;  %v407_v38 = vld [vmem:[%s24922_s16 + $0xb8] sm:$0xff] }
  0x24   : > { %v408_v39 = vld [vmem:[%s24922_s16 + $0xc0] sm:$0xff]  ;;  %v409_v40 = vld [vmem:[%s24922_s16 + $0xc8] sm:$0xff]  ;;  %v410_v41 = vld [vmem:[%s24922_s16 + $0xd0] sm:$0xff] }
  0x25   : > { %v411_v42 = vld [vmem:[%s24922_s16 + $0xd8] sm:$0xff]  ;;  %v412_v43 = vld [vmem:[%s24922_s16 + $0xe0] sm:$0xff]  ;;  %v413_v44 = vld [vmem:[%s24922_s16 + $0xe8] sm:$0xff] }
  0x26   : > { %23100 = vmatpush3.bf16.msra.mxu0 %v23097_v12  ;;  %v414_v45 = vld [vmem:[%s24922_s16 + $0xf0] sm:$0xff]  ;;  %v415_v46 = vld [vmem:[%s24922_s16 + $0xf8] sm:$0xff]  ;;  %v416_v47 = vld [vmem:[%s24922_s16 + $0x100] sm:$0xff]  ;;  %v29339_v12 = vmov 0.0  }
  0x27   : > { %23103 = vmatprep.subr.msk.bf16.mxu0 %vm23102_vm3, %v23101_v15  ;;  %v417_v48 = vld [vmem:[%s24922_s16 + $0x108] sm:$0xff]  ;;  %v418_v49 = vld [vmem:[%s24922_s16 + $0x110] sm:$0xff]  ;;  %v419_v50 = vld [vmem:[%s24922_s16 + $0x118] sm:$0xff]  ;;  %1880 = vst.msk [vmem:[#allocation4] sm:$0xff] %vm1751_vm4, %v29339_v12 }
  0x28   : > { %v420_v51 = vld [vmem:[%s24922_s16 + $0x120] sm:$0xff]  ;;  %v421_v52 = vld [vmem:[%s24922_s16 + $0x128] sm:$0xff]  ;;  %v422_v53 = vld [vmem:[%s24922_s16 + $0x130] sm:$0xff]  ;;  %1881 = vst.msk [vmem:[#allocation4 + $0x8] sm:$0xff] %vm1751_vm4, %v29339_v12 }
  0x29   : > { %v423_v54 = vld [vmem:[%s24922_s16 + $0x138] sm:$0xff]  ;;  %v424_v55 = vld [vmem:[%s24922_s16 + $0x140] sm:$0xff]  ;;  %v425_v56 = vld [vmem:[%s24922_s16 + $0x148] sm:$0xff]  ;;  %1884 = vst.msk [vmem:[#allocation4 + $0x18] sm:$0xff] %vm1751_vm4, %v29339_v12 }
  0x2a   : > { %23106 = vmatpush3.bf16.msk.msra.mxu0 %vm23102_vm3, %v23101_v15  ;;  %v426_v57 = vld [vmem:[%s24922_s16 + $0x150] sm:$0xff]  ;;  %v427_v58 = vld [vmem:[%s24922_s16 + $0x158] sm:$0xff]  ;;  %v428_v59 = vld [vmem:[%s24922_s16 + $0x160] sm:$0xff]  ;;  %1885 = vst.msk [vmem:[#allocation4 + $0x20] sm:$0xff] %vm1751_vm4, %v29339_v12 }
  0x2b   : > { %v429_v60 = vld [vmem:[%s24922_s16 + $0x168] sm:$0xff]  ;;  %v430_v61 = vld [vmem:[%s24922_s16 + $0x170] sm:$0xff]  ;;  %v431_v62 = vld [vmem:[%s24922_s16 + $0x178] sm:$0xff]  ;;  %1887 = vst.msk [vmem:[#allocation4 + $0x30] sm:$0xff] %vm1751_vm4, %v29339_v12 }
  0x2c   : > { %v432_v63 = vld [vmem:[%s24922_s16 + $0x180] sm:$0xff]  ;;  %v433_v0 = vld [vmem:[%s24922_s16 + $0x188] sm:$0xff]  ;;  %v434_v1 = vld [vmem:[%s24922_s16 + $0x190] sm:$0xff]  ;;  %1888 = vst.msk [vmem:[#allocation4 + $0x38] sm:$0xff] %vm1751_vm4, %v29339_v12 }
  0x2d   : > { %20671 = vmatmul.mubr.msk.f32.vlgmr.msra.gmra.mrb[0].mxu0 %vm522_vm0, %v385_v16  ;;  %v435_v2 = vld [vmem:[%s24922_s16 + $0x198] sm:$0xff]  ;;  %v436_v3 = vld [vmem:[%s24922_s16 + $0x1a0] sm:$0xff]  ;;  %v437_v4 = vld [vmem:[%s24922_s16 + $0x1a8] sm:$0xff]  ;;  %1890 = vst.msk [vmem:[#allocation4 + $0x48] sm:$0xff] %vm1751_vm4, %v29339_v12 }
  0x2e   : > { %20673 = vmatprep.mubr.msk.f32.mxu0 %vm522_vm0, %v386_v17  ;;  %v438_v5 = vld [vmem:[%s24922_s16 + $0x1b0] sm:$0xff]  ;;  %v439_v6 = vld [vmem:[%s24922_s16 + $0x1b8] sm:$0xff]  ;;  %v440_v7 = vld [vmem:[%s24922_s16 + $0x1c0] sm:$0xff]  ;;  %1891 = vst.msk [vmem:[#allocation4 + $0x50] sm:$0xff] %vm1751_vm4, %v29339_v12 }
  0x2f   : > { %v441_v8 = vld [vmem:[%s24922_s16 + $0x1c8] sm:$0xff]  ;;  %v442_v9 = vld [vmem:[%s24922_s16 + $0x1d0] sm:$0xff]  ;;  %v443_v10 = vld [vmem:[%s24922_s16 + $0x1d8] sm:$0xff]  ;;  %1893 = vst.msk [vmem:[#allocation4 + $0x60] sm:$0xff] %vm1751_vm4, %v29339_v12 }
  0x30   : > { %v444_v11 = vld [vmem:[%s24922_s16 + $0x1e0] sm:$0xff]  ;;  %1894 = vst.msk [vmem:[#allocation4 + $0x68] sm:$0xff] %vm1751_vm4, %v29339_v12  ;;  %1896 = vst.msk [vmem:[#allocation4 + $0x78] sm:$0xff] %vm1751_vm4, %v29339_v12  ;;  %v445_v13 = vld [vmem:[%s24922_s16 + $0x1e8] sm:$0xff] }
  0x31   : > { %20674 = vmatmul.mubr.msk.f32.gmra.mrb[2].mxu0 %vm522_vm0, %v387_v18  ;;  %1897 = vst.msk [vmem:[#allocation4 + $0x80] sm:$0xff] %vm1751_vm4, %v29339_v12  ;;  %1899 = vst.msk [vmem:[#allocation4 + $0x90] sm:$0xff] %vm1751_vm4, %v29339_v12  ;;  %v17825_v15 = vld [vmem:[%s29330_s3 + $0x28] sm:$0xff]  ;;  %v446_v16 = vld [vmem:[%s24922_s16 + $0x1f0] sm:$0xff] }
  0x32   : > { %20676 = vmatprep.mubr.msk.f32.mxu0 %vm522_vm0, %v388_v19  ;;  %1900 = vst.msk [vmem:[#allocation4 + $0x98] sm:$0xff] %vm1751_vm4, %v29339_v12  ;;  %1902 = vst.msk [vmem:[#allocation4 + $0xa8] sm:$0xff] %vm1751_vm4, %v29339_v12  ;;  %v23107_v17 = vpack.c.bf16 %v17825_v15, %v17824_v14  ;;  %v447_v18 = vld [vmem:[%s24922_s16 + $0x1f8] sm:$0xff]  ;;  %v17826_v19 = vld [vmem:[%s29330_s3 + $0x30] sm:$0xff] }
  0x33   : > { %1903 = vst.msk [vmem:[#allocation4 + $0xb0] sm:$0xff] %vm1751_vm4, %v29339_v12  ;;  %1905 = vst.msk [vmem:[#allocation4 + $0xc0] sm:$0xff] %vm1751_vm4, %v29339_v12  ;;  %v493_v15 = vld [vmem:[%s24922_s16 + $0x368] sm:$0xff] }
  0x34   : > { %1906 = vst.msk [vmem:[#allocation4 + $0xc8] sm:$0xff] %vm1751_vm4, %v29339_v12  ;;  %1908 = vst.msk [vmem:[#allocation4 + $0xd8] sm:$0xff] %vm1751_vm4, %v29339_v12  ;;  %23108 = vmatprep.subr.bf16.mxu0 %v23107_v17 }
  0x35   : > { %20677 = vmatmul.mubr.msk.f32.gmra.mrb[4].mxu0 %vm522_vm0, %v389_v20  ;;  %1909 = vst.msk [vmem:[#allocation4 + $0xe0] sm:$0xff] %vm1751_vm4, %v29339_v12  ;;  %1911 = vst.msk [vmem:[#allocation4 + $0xf0] sm:$0xff] %vm1751_vm4, %v29339_v12  ;;  %v17827_v20 = vld [vmem:[%s29330_s3 + $0x38] sm:$0xff] }
  0x36   : > { %20679 = vmatprep.mubr.msk.f32.mxu0 %vm522_vm0, %v390_v21  ;;  %1912 = vst.msk [vmem:[#allocation4 + $0xf8] sm:$0xff] %vm1751_vm4, %v29339_v12  ;;  %1914 = vst.msk [vmem:[#allocation4 + $0x108] sm:$0xff] %vm1751_vm4, %v29339_v12  ;;  %23110 = vmatpush3.bf16.msra.mxu0 %v23107_v17  ;;  %v448_v21 = vld [vmem:[%s24922_s16 + $0x200] sm:$0xff] }
  0x37   : > { %1915 = vst.msk [vmem:[#allocation4 + $0x110] sm:$0xff] %vm1751_vm4, %v29339_v12  ;;  %1917 = vst.msk [vmem:[#allocation4 + $0x120] sm:$0xff] %vm1751_vm4, %v29339_v12 }
  0x38   : > { %1918 = vst.msk [vmem:[#allocation4 + $0x128] sm:$0xff] %vm1751_vm4, %v29339_v12  ;;  %1920 = vst.msk [vmem:[#allocation4 + $0x138] sm:$0xff] %vm1751_vm4, %v29339_v12 }
  0x39   : > { %20680 = vmatmul.mubr.msk.f32.gmra.mrb[6].mxu0 %vm522_vm0, %v391_v22  ;;  %1921 = vst.msk [vmem:[#allocation4 + $0x140] sm:$0xff] %vm1751_vm4, %v29339_v12  ;;  %1923 = vst.msk [vmem:[#allocation4 + $0x150] sm:$0xff] %vm1751_vm4, %v29339_v12  ;;  %v23111_v22 = vpack.c.bf16 %v17827_v20, %v17826_v19 }
  0x3a   : > { %20682 = vmatprep.mubr.msk.f32.mxu0 %vm522_vm0, %v392_v23  ;;  %1924 = vst.msk [vmem:[#allocation4 + $0x158] sm:$0xff] %vm1751_vm4, %v29339_v12  ;;  %1926 = vst.msk [vmem:[#allocation4 + $0x168] sm:$0xff] %vm1751_vm4, %v29339_v12  ;;  %v449_v23 = vld [vmem:[%s24922_s16 + $0x208] sm:$0xff] }
  0x3b   : > { %1927 = vst.msk [vmem:[#allocation4 + $0x170] sm:$0xff] %vm1751_vm4, %v29339_v12  ;;  %1929 = vst.msk [vmem:[#allocation4 + $0x180] sm:$0xff] %vm1751_vm4, %v29339_v12  ;;  %23112 = vmatprep.subr.bf16.mxu0 %v23111_v22 }
  0x3c   : > { %1930 = vst.msk [vmem:[#allocation4 + $0x188] sm:$0xff] %vm1751_vm4, %v29339_v12  ;;  %1932 = vst.msk [vmem:[#allocation4 + $0x198] sm:$0xff] %vm1751_vm4, %v29339_v12  ;;  %23114 = vmatpush3.bf16.msra.mxu0 %v23111_v22  ;;  %v496_v22 = vld [vmem:[%s24922_s16 + $0x380] sm:$0xff] }
  0x3d   : > { %20683 = vmatmul.mubr.msk.f32.gmra.mrb[8].mxu0 %vm522_vm0, %v393_v24  ;;  %1933 = vst.msk [vmem:[#allocation4 + $0x1a0] sm:$0xff] %vm1751_vm4, %v29339_v12  ;;  %1935 = vst.msk [vmem:[#allocation4 + $0x1b0] sm:$0xff] %vm1751_vm4, %v29339_v12  ;;  %v450_v24 = vld [vmem:[%s24922_s16 + $0x210] sm:$0xff] }
  0x3e   : > { %20685 = vmatprep.mubr.msk.f32.mxu0 %vm522_vm0, %v394_v25  ;;  %1936 = vst.msk [vmem:[#allocation4 + $0x1b8] sm:$0xff] %vm1751_vm4, %v29339_v12  ;;  %1938 = vst.msk [vmem:[#allocation4 + $0x1c8] sm:$0xff] %vm1751_vm4, %v29339_v12  ;;  %v451_v25 = vld [vmem:[%s24922_s16 + $0x218] sm:$0xff] }
  0x3f   : > { %1939 = vst.msk [vmem:[#allocation4 + $0x1d0] sm:$0xff] %vm1751_vm4, %v29339_v12  ;;  %12213 = vst.msk [vmem:[#allocation7] sm:$0xff] %vm1751_vm4, %v29339_v12 }
  0x40   : > { %12215 = vst.msk [vmem:[#allocation7 + $0x10] sm:$0xff] %vm1751_vm4, %v29339_v12  ;;  %12217 = vst.msk [vmem:[#allocation7 + $0x20] sm:$0xff] %vm1751_vm4, %v29339_v12 }
  0x41   : > { %20686 = vmatmul.mubr.msk.f32.gmra.mrb[10].mxu0 %vm522_vm0, %v395_v26  ;;  %12219 = vst.msk [vmem:[#allocation7 + $0x30] sm:$0xff] %vm1751_vm4, %v29339_v12  ;;  %12221 = vst.msk [vmem:[#allocation7 + $0x40] sm:$0xff] %vm1751_vm4, %v29339_v12  ;;  %v452_v26 = vld [vmem:[%s24922_s16 + $0x220] sm:$0xff] }
  0x42   : > { %20688 = vmatprep.mubr.msk.f32.mxu0 %vm522_vm0, %v396_v27  ;;  %12223 = vst.msk [vmem:[#allocation7 + $0x50] sm:$0xff] %vm1751_vm4, %v29339_v12  ;;  %12225 = vst.msk [vmem:[#allocation7 + $0x60] sm:$0xff] %vm1751_vm4, %v29339_v12  ;;  %v453_v27 = vld [vmem:[%s24922_s16 + $0x228] sm:$0xff] }
  0x43   : > { %12227 = vst.msk [vmem:[#allocation7 + $0x70] sm:$0xff] %vm1751_vm4, %v29339_v12  ;;  %12229 = vst.msk [vmem:[#allocation7 + $0x80] sm:$0xff] %vm1751_vm4, %v29339_v12 }
  0x44   : > { %12231 = vst.msk [vmem:[#allocation7 + $0x90] sm:$0xff] %vm1751_vm4, %v29339_v12  ;;  %12233 = vst.msk [vmem:[#allocation7 + $0xa0] sm:$0xff] %vm1751_vm4, %v29339_v12 }
  0x45   : > { %20689 = vmatmul.mubr.msk.f32.gmra.mrb[12].mxu0 %vm522_vm0, %v397_v28  ;;  %12235 = vst.msk [vmem:[#allocation7 + $0xb0] sm:$0xff] %vm1751_vm4, %v29339_v12  ;;  %v454_v28 = vld [vmem:[%s24922_s16 + $0x230] sm:$0xff] }
  0x46   : > { %20691 = vmatprep.mubr.msk.f32.mxu0 %vm522_vm0, %v398_v29  ;;  %1883 = vst.msk [vmem:[#allocation4 + $0x10] sm:$0xf] %vm1882_vm5, %v29339_v12  ;;  %1886 = vst.msk [vmem:[#allocation4 + $0x28] sm:$0xf] %vm1882_vm5, %v29339_v12  ;;  %v455_v29 = vld [vmem:[%s24922_s16 + $0x238] sm:$0xff] }
  0x47   : > { %1889 = vst.msk [vmem:[#allocation4 + $0x40] sm:$0xf] %vm1882_vm5, %v29339_v12  ;;  %1892 = vst.msk [vmem:[#allocation4 + $0x58] sm:$0xf] %vm1882_vm5, %v29339_v12 }
  0x48   : > { %1895 = vst.msk [vmem:[#allocation4 + $0x70] sm:$0xf] %vm1882_vm5, %v29339_v12  ;;  %1898 = vst.msk [vmem:[#allocation4 + $0x88] sm:$0xf] %vm1882_vm5, %v29339_v12 }
  0x49   : > { %20692 = vmatmul.mubr.msk.f32.gmra.mrb[14].mxu0 %vm522_vm0, %v399_v30  ;;  %1901 = vst.msk [vmem:[#allocation4 + $0xa0] sm:$0xf] %vm1882_vm5, %v29339_v12  ;;  %1904 = vst.msk [vmem:[#allocation4 + $0xb8] sm:$0xf] %vm1882_vm5, %v29339_v12  ;;  %v456_v30 = vld [vmem:[%s24922_s16 + $0x240] sm:$0xff] }
  0x4a   : > { %20694 = vmatprep.mubr.msk.f32.mxu0 %vm522_vm0, %v400_v31  ;;  %1907 = vst.msk [vmem:[#allocation4 + $0xd0] sm:$0xf] %vm1882_vm5, %v29339_v12  ;;  %1910 = vst.msk [vmem:[#allocation4 + $0xe8] sm:$0xf] %vm1882_vm5, %v29339_v12  ;;  %v457_v31 = vld [vmem:[%s24922_s16 + $0x248] sm:$0xff] }
  0x4b   : > { %1913 = vst.msk [vmem:[#allocation4 + $0x100] sm:$0xf] %vm1882_vm5, %v29339_v12  ;;  %1916 = vst.msk [vmem:[#allocation4 + $0x118] sm:$0xf] %vm1882_vm5, %v29339_v12 }
  0x4c   : > { %1919 = vst.msk [vmem:[#allocation4 + $0x130] sm:$0xf] %vm1882_vm5, %v29339_v12  ;;  %1922 = vst.msk [vmem:[#allocation4 + $0x148] sm:$0xf] %vm1882_vm5, %v29339_v12 }
  0x4d   : > { %20695 = vmatmul.mubr.msk.f32.gmra.mrb[16].mxu0 %vm522_vm0, %v401_v32  ;;  %1925 = vst.msk [vmem:[#allocation4 + $0x160] sm:$0xf] %vm1882_vm5, %v29339_v12  ;;  %1928 = vst.msk [vmem:[#allocation4 + $0x178] sm:$0xf] %vm1882_vm5, %v29339_v12  ;;  %v458_v32 = vld [vmem:[%s24922_s16 + $0x250] sm:$0xff] }
  0x4e   : > { %20697 = vmatprep.mubr.msk.f32.mxu0 %vm522_vm0, %v402_v33  ;;  %1931 = vst.msk [vmem:[#allocation4 + $0x190] sm:$0xf] %vm1882_vm5, %v29339_v12  ;;  %1934 = vst.msk [vmem:[#allocation4 + $0x1a8] sm:$0xf] %vm1882_vm5, %v29339_v12  ;;  %v459_v33 = vld [vmem:[%s24922_s16 + $0x258] sm:$0xff] }
  0x4f   : > { %1937 = vst.msk [vmem:[#allocation4 + $0x1c0] sm:$0xf] %vm1882_vm5, %v29339_v12  ;;  %1940 = vst.msk [vmem:[#allocation4 + $0x1d8] sm:$0xf] %vm1882_vm5, %v29339_v12 }
  0x50   : > { %12214 = vst.msk [vmem:[#allocation7 + $0x8] sm:$0xf] %vm1882_vm5, %v29339_v12  ;;  %12216 = vst.msk [vmem:[#allocation7 + $0x18] sm:$0xf] %vm1882_vm5, %v29339_v12 }
  0x51   : > { %20698 = vmatmul.mubr.msk.f32.gmra.mrb[18].mxu0 %vm522_vm0, %v403_v34  ;;  %12218 = vst.msk [vmem:[#allocation7 + $0x28] sm:$0xf] %vm1882_vm5, %v29339_v12  ;;  %12220 = vst.msk [vmem:[#allocation7 + $0x38] sm:$0xf] %vm1882_vm5, %v29339_v12  ;;  %v460_v34 = vld [vmem:[%s24922_s16 + $0x260] sm:$0xff] }
  0x52   : > { %20700 = vmatprep.mubr.msk.f32.mxu0 %vm522_vm0, %v404_v35  ;;  %12222 = vst.msk [vmem:[#allocation7 + $0x48] sm:$0xf] %vm1882_vm5, %v29339_v12  ;;  %12224 = vst.msk [vmem:[#allocation7 + $0x58] sm:$0xf] %vm1882_vm5, %v29339_v12  ;;  %v461_v35 = vld [vmem:[%s24922_s16 + $0x268] sm:$0xff] }
  0x53   : > { %12226 = vst.msk [vmem:[#allocation7 + $0x68] sm:$0xf] %vm1882_vm5, %v29339_v12  ;;  %12228 = vst.msk [vmem:[#allocation7 + $0x78] sm:$0xf] %vm1882_vm5, %v29339_v12 }
  0x54   : > { %12230 = vst.msk [vmem:[#allocation7 + $0x88] sm:$0xf] %vm1882_vm5, %v29339_v12  ;;  %12232 = vst.msk [vmem:[#allocation7 + $0x98] sm:$0xf] %vm1882_vm5, %v29339_v12 }
  0x55   : > { %20701 = vmatmul.mubr.msk.f32.gmra.mrb[20].mxu0 %vm522_vm0, %v405_v36  ;;  %12234 = vst.msk [vmem:[#allocation7 + $0xa8] sm:$0xf] %vm1882_vm5, %v29339_v12  ;;  %12236 = vst.msk [vmem:[#allocation7 + $0xb8] sm:$0xf] %vm1882_vm5, %v29339_v12  ;;  %v462_v36 = vld [vmem:[%s24922_s16 + $0x270] sm:$0xff] }
  0x56   : > { %20703 = vmatprep.mubr.msk.f32.mxu0 %vm522_vm0, %v406_v37  ;;  %v463_v37 = vld [vmem:[%s24922_s16 + $0x278] sm:$0xff] }
  0x59   : > { %20704 = vmatmul.mubr.msk.f32.gmra.mrb[22].mxu0 %vm522_vm0, %v407_v38  ;;  %v464_v38 = vld [vmem:[%s24922_s16 + $0x280] sm:$0xff] }
  0x5a   : > { %20706 = vmatprep.mubr.msk.f32.mxu0 %vm522_vm0, %v408_v39  ;;  %v465_v39 = vld [vmem:[%s24922_s16 + $0x288] sm:$0xff] }
  0x5d   : > { %20707 = vmatmul.mubr.msk.f32.gmra.mrb[24].mxu0 %vm522_vm0, %v409_v40  ;;  %v466_v40 = vld [vmem:[%s24922_s16 + $0x290] sm:$0xff] }
  0x5e   : > { %20709 = vmatprep.mubr.msk.f32.mxu0 %vm522_vm0, %v410_v41  ;;  %v467_v41 = vld [vmem:[%s24922_s16 + $0x298] sm:$0xff] }
  0x61   : > { %20710 = vmatmul.mubr.msk.f32.gmra.mrb[26].mxu0 %vm522_vm0, %v411_v42  ;;  %v468_v42 = vld [vmem:[%s24922_s16 + $0x2a0] sm:$0xff] }
  0x62   : > { %20712 = vmatprep.mubr.msk.f32.mxu0 %vm522_vm0, %v412_v43  ;;  %v18000_v43 = vld [vmem:[%s29330_s3 + $0xa0] sm:$0xff] }
  0x65   : > { %20713 = vmatmul.mubr.msk.f32.gmra.mrb[28].mxu0 %vm522_vm0, %v413_v44  ;;  %v18001_v44 = vld [vmem:[%s29330_s3 + $0xa8] sm:$0xff] }
  0x66   : > { %20715 = vmatprep.mubr.msk.f32.mxu0 %vm522_vm0, %v414_v45  ;;  %v469_v45 = vld [vmem:[%s24922_s16 + $0x2a8] sm:$0xff] }
  0x69   : > { %20716 = vmatmul.mubr.msk.f32.gmra.mrb[30].mxu0 %vm522_vm0, %v415_v46  ;;  %v25293_v46 = vpack.c.bf16 %v18001_v44, %v18000_v43 }
  0x6a   : > { %20718 = vmatprep.mubr.msk.f32.mxu0 %vm522_vm0, %v416_v47  ;;  %v470_v47 = vld [vmem:[%s24922_s16 + $0x2b0] sm:$0xff] }
  0x6b   : > { %23711 = vmatprep.subr.bf16.mxu1 %v25293_v46 }
  0x6c   : > { %23713 = vmatpush3.bf16.msra.mxu1 %v25293_v46 }
  0x6d   : > { %20719 = vmatmul.mubr.msk.f32.gmra.mrb[32].mxu0 %vm522_vm0, %v417_v48  ;;  %v18002_v48 = vld [vmem:[%s29330_s3 + $0xb0] sm:$0xff] }
  0x6e   : > { %20721 = vmatprep.mubr.msk.f32.mxu0 %vm522_vm0, %v418_v49  ;;  %v18003_v49 = vld [vmem:[%s29330_s3 + $0xb8] sm:$0xff] }
  0x71   : > { %20722 = vmatmul.mubr.msk.f32.gmra.mrb[34].mxu0 %vm522_vm0, %v419_v50  ;;  %v471_v50 = vld [vmem:[%s24922_s16 + $0x2b8] sm:$0xff] }
  0x72   : > { %20724 = vmatprep.mubr.msk.f32.mxu0 %vm522_vm0, %v420_v51  ;;  %v25307_v51 = vpack.c.bf16 %v18003_v49, %v18002_v48  ;;  %v502_v49 = vld [vmem:[%s24922_s16 + $0x3b0] sm:$0xff] }
  0x74   : > { %23712 = vmatprep.subr.bf16.mxu1 %v25307_v51 }
  0x75   : > { %20725 = vmatmul.mubr.msk.f32.gmra.mrb[36].mxu0 %vm522_vm0, %v421_v52  ;;  %v472_v52 = vld [vmem:[%s24922_s16 + $0x2c0] sm:$0xff]  ;;  %23714 = vmatpush3.bf16.msra.mxu1 %v25307_v51 }
  0x76   : > { %20727 = vmatprep.mubr.msk.f32.mxu0 %vm522_vm0, %v422_v53  ;;  %v473_v53 = vld [vmem:[%s24922_s16 + $0x2c8] sm:$0xff] }
  0x79   : > { %20728 = vmatmul.mubr.msk.f32.gmra.mrb[38].mxu0 %vm522_vm0, %v423_v54  ;;  %v474_v54 = vld [vmem:[%s24922_s16 + $0x2d0] sm:$0xff] }
  0x7a   : > { %20730 = vmatprep.mubr.msk.f32.mxu0 %vm522_vm0, %v424_v55  ;;  %v475_v55 = vld [vmem:[%s24922_s16 + $0x2d8] sm:$0xff] }
  0x7d   : > { %20731 = vmatmul.mubr.msk.f32.gmra.mrb[40].mxu0 %vm522_vm0, %v425_v56  ;;  %v476_v56 = vld [vmem:[%s24922_s16 + $0x2e0] sm:$0xff] }
  0x7e   : > { %20733 = vmatprep.mubr.msk.f32.mxu0 %vm522_vm0, %v426_v57  ;;  %v477_v57 = vld [vmem:[%s24922_s16 + $0x2e8] sm:$0xff] }
  0x81   : > { %20734 = vmatmul.mubr.msk.f32.gmra.mrb[42].mxu0 %vm522_vm0, %v427_v58  ;;  %v478_v58 = vld [vmem:[%s24922_s16 + $0x2f0] sm:$0xff] }
  0x82   : > { %20736 = vmatprep.mubr.msk.f32.mxu0 %vm522_vm0, %v428_v59  ;;  %v479_v59 = vld [vmem:[%s24922_s16 + $0x2f8] sm:$0xff] }
  0x85   : > { %20737 = vmatmul.mubr.msk.f32.gmra.mrb[44].mxu0 %vm522_vm0, %v429_v60  ;;  %v480_v60 = vld [vmem:[%s24922_s16 + $0x300] sm:$0xff] }
  0x86   : > { %20739 = vmatprep.mubr.msk.f32.mxu0 %vm522_vm0, %v430_v61  ;;  %v481_v61 = vld [vmem:[%s24922_s16 + $0x308] sm:$0xff] }
  0x89   : > { %20740 = vmatmul.mubr.msk.f32.gmra.mrb[46].mxu0 %vm522_vm0, %v431_v62  ;;  %v482_v62 = vld [vmem:[%s24922_s16 + $0x310] sm:$0xff] }
  0x8a   : > { %20742 = vmatprep.mubr.msk.f32.mxu0 %vm522_vm0, %v432_v63  ;;  %v483_v63 = vld [vmem:[%s24922_s16 + $0x318] sm:$0xff] }
  0x8d   : > { %20743 = vmatmul.mubr.msk.f32.gmra.mrb[48].mxu0 %vm522_vm0, %v433_v0  ;;  %v484_v0 = vld [vmem:[%s24922_s16 + $0x320] sm:$0xff] }
  0x8e   : > { %20745 = vmatprep.mubr.msk.f32.mxu0 %vm522_vm0, %v434_v1  ;;  %v485_v1 = vld [vmem:[%s24922_s16 + $0x328] sm:$0xff] }
  0x91   : > { %20746 = vmatmul.mubr.msk.f32.gmra.mrb[50].mxu0 %vm522_vm0, %v435_v2  ;;  %v486_v2 = vld [vmem:[%s24922_s16 + $0x330] sm:$0xff] }
  0x92   : > { %20748 = vmatprep.mubr.msk.f32.mxu0 %vm522_vm0, %v436_v3  ;;  %v487_v3 = vld [vmem:[%s24922_s16 + $0x338] sm:$0xff] }
  0x95   : > { %20749 = vmatmul.mubr.msk.f32.gmra.mrb[52].mxu0 %vm522_vm0, %v437_v4  ;;  %v488_v4 = vld [vmem:[%s24922_s16 + $0x340] sm:$0xff] }
  0x96   : > { %20751 = vmatprep.mubr.msk.f32.mxu0 %vm522_vm0, %v438_v5  ;;  %v489_v5 = vld [vmem:[%s24922_s16 + $0x348] sm:$0xff] }
  0x99   : > { %20752 = vmatmul.mubr.msk.f32.gmra.mrb[54].mxu0 %vm522_vm0, %v439_v6  ;;  %v490_v6 = vld [vmem:[%s24922_s16 + $0x350] sm:$0xff] }
  0x9a   : > { %20754 = vmatprep.mubr.msk.f32.mxu0 %vm522_vm0, %v440_v7  ;;  %v25352_v7 = vld [vmem:[%s29329_s2] ss:$0 sm:$0xff] }
  0x9d   : > { %20755 = vmatmul.mubr.msk.f32.gmra.mrb[56].mxu0 %vm522_vm0, %v441_v8  ;;  %v491_v8 = vld [vmem:[%s24922_s16 + $0x358] sm:$0xff] }
  0x9e   : > { %20757 = vmatprep.mubr.msk.f32.mxu0 %vm522_vm0, %v442_v9  ;;  %v492_v9 = vld [vmem:[%s24922_s16 + $0x360] sm:$0xff] }
  0xa1   : > { %20758 = vmatmul.mubr.msk.f32.gmra.mrb[58].mxu0 %vm522_vm0, %v443_v10 }
  0xa2   : > { %20760 = vmatprep.mubr.msk.f32.mxu0 %vm522_vm0, %v444_v11 }
  0xa5   : > { %20761 = vmatmul.mubr.msk.f32.gmra.mrb[60].mxu0 %vm522_vm0, %v445_v13 }
  0xa6   : > { %20763 = vmatprep.mubr.msk.f32.mxu0 %vm522_vm0, %v446_v16  ;;  %v494_v16 = vld [vmem:[%s24922_s16 + $0x370] sm:$0xff] }
  0xa9   : > { %20764 = vmatmul.mubr.msk.f32.gmra.mrb[62].mxu0 %vm522_vm0, %v447_v18 }
  0xaa   : > { %20766 = vmatprep.mubr.msk.f32.mxu0 %vm522_vm0, %v448_v21  ;;  %v495_v21 = vld [vmem:[%s24922_s16 + $0x378] sm:$0xff] }
  0xad   : > { %20767 = vmatmul.mubr.msk.f32.gmra.mrb[64].mxu0 %vm522_vm0, %v449_v23 }
  0xae   : > { %20769 = vmatprep.mubr.msk.f32.mxu0 %vm522_vm0, %v450_v24 }
  0xb1   : > { %20770 = vmatmul.mubr.msk.f32.gmra.mrb[66].mxu0 %vm522_vm0, %v451_v25 }
  0xb2   : > { %20772 = vmatprep.mubr.msk.f32.mxu0 %vm522_vm0, %v452_v26 }
  0xb5   : > { %20773 = vmatmul.mubr.msk.f32.gmra.mrb[68].mxu0 %vm522_vm0, %v453_v27  ;;  %v497_v27 = vld [vmem:[%s24922_s16 + $0x388] sm:$0xff] }
  0xb6   : > { %20775 = vmatprep.mubr.msk.f32.mxu0 %vm522_vm0, %v454_v28 }
  0xb9   : > { %20776 = vmatmul.mubr.msk.f32.gmra.mrb[70].mxu0 %vm522_vm0, %v455_v29 }
  0xba   : > { %20778 = vmatprep.mubr.msk.f32.mxu0 %vm522_vm0, %v456_v30  ;;  %v498_v30 = vld [vmem:[%s24922_s16 + $0x390] sm:$0xff] }
  0xbd   : > { %20779 = vmatmul.mubr.msk.f32.gmra.mrb[72].mxu0 %vm522_vm0, %v457_v31 }
  0xbe   : > { %20781 = vmatprep.mubr.msk.f32.mxu0 %vm522_vm0, %v458_v32 }
  0xc1   : > { %20782 = vmatmul.mubr.msk.f32.gmra.mrb[74].mxu0 %vm522_vm0, %v459_v33 }
  0xc2   : > { %20784 = vmatprep.mubr.msk.f32.mxu0 %vm522_vm0, %v460_v34 }
  0xc5   : > { %20785 = vmatmul.mubr.msk.f32.gmra.mrb[76].mxu0 %vm522_vm0, %v461_v35 }
  0xc6   : > { %20787 = vmatprep.mubr.msk.f32.mxu0 %vm522_vm0, %v462_v36  ;;  %v499_v36 = vld [vmem:[%s24922_s16 + $0x398] sm:$0xff] }
  0xc9   : > { %20788 = vmatmul.mubr.msk.f32.gmra.mrb[78].mxu0 %vm522_vm0, %v463_v37 }
  0xca   : > { %20790 = vmatprep.mubr.msk.f32.mxu0 %vm522_vm0, %v464_v38 }
  0xcd   : > { %20791 = vmatmul.mubr.msk.f32.gmra.mrb[80].mxu0 %vm522_vm0, %v465_v39  ;;  %v500_v39 = vld [vmem:[%s24922_s16 + $0x3a0] sm:$0xff] }
  0xce   : > { %20793 = vmatprep.mubr.msk.f32.mxu0 %vm522_vm0, %v466_v40 }
  0xd1   : > { %20794 = vmatmul.mubr.msk.f32.gmra.mrb[82].mxu0 %vm522_vm0, %v467_v41 }
  0xd2   : > { %20796 = vmatprep.mubr.msk.f32.mxu0 %vm522_vm0, %v468_v42 }
  0xd5   : > { %20797 = vmatmul.mubr.msk.f32.gmra.mrb[84].mxu0 %vm522_vm0, %v469_v45  ;;  %v501_v45 = vld [vmem:[%s24922_s16 + $0x3a8] sm:$0xff] }
  0xd6   : > { %20799 = vmatprep.mubr.msk.f32.mxu0 %vm522_vm0, %v470_v47 }
  0xd9   : > { %20800 = vmatmul.mubr.msk.f32.gmra.mrb[86].mxu0 %vm522_vm0, %v471_v50 }
  0xda   : > { %20802 = vmatprep.mubr.msk.f32.mxu0 %vm522_vm0, %v472_v52 }
  0xdd   : > { %20803 = vmatmul.mubr.msk.f32.gmra.mrb[88].mxu0 %vm522_vm0, %v473_v53 }
  0xde   : > { %20805 = vmatprep.mubr.msk.f32.mxu0 %vm522_vm0, %v474_v54 }
  0xe1   : > { %20806 = vmatmul.mubr.msk.f32.gmra.mrb[90].mxu0 %vm522_vm0, %v475_v55 }
  0xe2   : > { %20808 = vmatprep.mubr.msk.f32.mxu0 %vm522_vm0, %v476_v56  ;;  %v503_v56 = vld [vmem:[%s24922_s16 + $0x3b8] sm:$0xff] }
  0xe5   : > { %20809 = vmatmul.mubr.msk.f32.gmra.mrb[92].mxu0 %vm522_vm0, %v477_v57 }
  0xe6   : > { %20811 = vmatprep.mubr.msk.f32.mxu0 %vm522_vm0, %v478_v58 }
  0xe9   : > { %20812 = vmatmul.mubr.msk.f32.gmra.mrb[94].mxu0 %vm522_vm0, %v479_v59  ;;  %v504_v59 = vld [vmem:[%s24922_s16 + $0x3c0] sm:$0xff] }
  0xea   : > { %20814 = vmatprep.mubr.msk.f32.mxu0 %vm522_vm0, %v480_v60 }
  0xed   : > { %20815 = vmatmul.mubr.msk.f32.gmra.mrb[96].mxu0 %vm522_vm0, %v481_v61 }
  0xee   : > { %20817 = vmatprep.mubr.msk.f32.mxu0 %vm522_vm0, %v482_v62 }
  0xf1   : > { %20818 = vmatmul.mubr.msk.f32.gmra.mrb[98].mxu0 %vm522_vm0, %v483_v63 }
  0xf2   : > { %20820 = vmatprep.mubr.msk.f32.mxu0 %vm522_vm0, %v484_v0 }
  0xf5   : > { %20821 = vmatmul.mubr.msk.f32.gmra.mrb[100].mxu0 %vm522_vm0, %v485_v1  ;;  %v505_v1 = vld [vmem:[%s24922_s16 + $0x3c8] sm:$0xff] }
  0xf6   : > { %20823 = vmatprep.mubr.msk.f32.mxu0 %vm522_vm0, %v486_v2 }
  0xf9   : > { %20824 = vmatmul.mubr.msk.f32.gmra.mrb[102].mxu0 %vm522_vm0, %v487_v3 }
  0xfa   : > { %20826 = vmatprep.mubr.msk.f32.mxu0 %vm522_vm0, %v488_v4  ;;  %v506_v4 = vld [vmem:[%s24922_s16 + $0x3d0] sm:$0xff] }
  0xfd   : > { %20827 = vmatmul.mubr.msk.f32.gmra.mrb[104].mxu0 %vm522_vm0, %v489_v5 }
  0xfe   : > { %20829 = vmatprep.mubr.msk.f32.mxu0 %vm522_vm0, %v490_v6 }
 0x100   : > { %v20672_v10 = vpop.f32.mrb[0].mxu0 }
 0x101   : > { %v1624_v11 = vadd.f32 %v20672_v10, %v25352_v7  ;;  %v977_v13 = vpop.f32.mrb[1].mxu0  ;;  %20830 = vmatmul.mubr.msk.f32.gmra.mrb[106].mxu0 %vm522_vm0, %v491_v8 }
 0x102   : > { %v1623_v14 = vadd.f32 %v25352_v7, %v977_v13  ;;  %20832 = vmatprep.mubr.msk.f32.mxu0 %vm522_vm0, %v492_v9 }
 0x103   : > { %1753 = vst.msk [vmem:[#allocation2 + $0x8] sm:$0xff] %vm1751_vm4, %v1624_v11 }
 0x104   : > { %1752 = vst.msk [vmem:[#allocation2] sm:$0xff] %vm1751_vm4, %v1623_v14  ;;  %v20675_v17 = vpop.f32.mrb[2].mxu0  ;;  %v507_v14 = vld [vmem:[%s24922_s16 + $0x3d8] sm:$0xff] }
 0x105   : > { %v1626_v18 = vadd.f32 %v20675_v17, %v25352_v7  ;;  %v987_v19 = vpop.f32.mrb[3].mxu0  ;;  %20833 = vmatmul.mubr.msk.f32.gmra.mrb[108].mxu0 %vm522_vm0, %v493_v15 }
 0x106   : > { %v1625_v20 = vadd.f32 %v25352_v7, %v987_v19  ;;  %20835 = vmatprep.mubr.msk.f32.mxu0 %vm522_vm0, %v494_v16 }
 0x107   : > { %1755 = vst.msk [vmem:[#allocation2 + $0x18] sm:$0xff] %vm1751_vm4, %v1626_v18  ;;  %v508_v18 = vld [vmem:[%s24922_s16 + $0x3e0] sm:$0xff] }
 0x108   : > { %1754 = vst.msk [vmem:[#allocation2 + $0x10] sm:$0xff] %vm1751_vm4, %v1625_v20  ;;  %v20678_v23 = vpop.f32.mrb[4].mxu0 }
 0x109   : > { %v1628_v24 = vadd.f32 %v20678_v23, %v25352_v7  ;;  %v997_v25 = vpop.f32.mrb[5].mxu0  ;;  %20836 = vmatmul.mubr.msk.f32.gmra.mrb[110].mxu0 %vm522_vm0, %v495_v21 }
 0x10a   : > { %v1627_v26 = vadd.f32 %v25352_v7, %v997_v25  ;;  %20838 = vmatprep.mubr.msk.f32.mxu0 %vm522_vm0, %v496_v22 }
 0x10b   : > { %v1941_v28 = vld [vmem:[#allocation2] ss:$2 sm:$0xff]  ;;  %v2069_v29 = vld [vmem:[#allocation2 + $0x1] ss:$2 sm:$0xff]  ;;  %1757 = vst.msk [vmem:[#allocation2 + $0x28] sm:$0xff] %vm1751_vm4, %v1628_v24 }
 0x10c   : > { %v2196_v31 = vmax.f32 %v1941_v28, %v2069_v29  ;;  %1756 = vst.msk [vmem:[#allocation2 + $0x20] sm:$0xff] %vm1751_vm4, %v1627_v26  ;;  %v20681_v32 = vpop.f32.mrb[6].mxu0  ;;  %v509_v26 = vld [vmem:[%s24922_s16 + $0x3e8] sm:$0xff] }
 0x10d   : > { %v1630_v33 = vadd.f32 %v20681_v32, %v25352_v7  ;;  %v1007_v34 = vpop.f32.mrb[7].mxu0  ;;  %20839 = vmatmul.mubr.msk.f32.gmra.mrb[112].mxu0 %vm522_vm0, %v497_v27 }
 0x10e   : > { %2260 = vst.msk [vmem:[#allocation3] sm:$0xff] %vm1751_vm4, %v2196_v31  ;;  %v1629_v35 = vadd.f32 %v25352_v7, %v1007_v34  ;;  %20841 = vmatprep.mubr.msk.f32.mxu0 %vm522_vm0, %v498_v30  ;;  %v510_v30 = vld [vmem:[%s24922_s16 + $0x3f0] sm:$0xff] }
 0x10f   : > { %v1943_v37 = vld [vmem:[#allocation2 + $0x10] ss:$2 sm:$0xff]  ;;  %v2071_v38 = vld [vmem:[#allocation2 + $0x11] ss:$2 sm:$0xff]  ;;  %1759 = vst.msk [vmem:[#allocation2 + $0x38] sm:$0xff] %vm1751_vm4, %v1630_v33 }
 0x110   : > { %v2197_v40 = vmax.f32 %v1943_v37, %v2071_v38  ;;  %1758 = vst.msk [vmem:[#allocation2 + $0x30] sm:$0xff] %vm1751_vm4, %v1629_v35  ;;  %v20684_v41 = vpop.f32.mrb[8].mxu0 }
 0x111   : > { %v1632_v42 = vadd.f32 %v20684_v41, %v25352_v7  ;;  %v1017_v43 = vpop.f32.mrb[9].mxu0  ;;  %20842 = vmatmul.mubr.msk.f32.gmra.mrb[114].mxu0 %vm522_vm0, %v499_v36  ;;  %v511_v36 = vld [vmem:[%s24922_s16 + $0x3f8] sm:$0xff]  ;;  %s17633_s16 = sshll.u32 %s378_s30, 4  ;;  %s29287_s16 = int_to_ptr.vmem [resolvable:$true] %s17633_s16 }
 0x112   : > { %2261 = vst.msk [vmem:[#allocation3 + $0x8] sm:$0xff] %vm1751_vm4, %v2197_v40  ;;  %v1631_v44 = vadd.f32 %v25352_v7, %v1017_v43  ;;  %20844 = vmatprep.mubr.msk.f32.mxu0 %vm522_vm0, %v500_v39  ;;  %v2490_v39 = vld [vmem:[#allocation4 + $0x1] sm:$0xff]  ;;  %s24722_s15 = scalar_lea.vmem %s29287_s16, 16  ;;  %p24729_p0 = scmp.lt.s32.totalorder %s29287_s16, %s24727_s24 }
 0x113   : > { %v1945_v47 = vld [vmem:[#allocation2 + $0x20] ss:$2 sm:$0xff]  ;;  %v2073_v48 = vld [vmem:[#allocation2 + $0x21] ss:$2 sm:$0xff]  ;;  %1761 = vst.msk [vmem:[#allocation2 + $0x48] sm:$0xff] %vm1751_vm4, %v1632_v42  ;;  %p24723_p11 = scmp.ne.s32.totalorder %s29287_s16, %s24722_s15  ;;  %p24730_p1 = scmp.lt.s32.totalorder %s24728_s25, %s24722_s15 }
 0x114   : > { %v2198_v50 = vmax.f32 %v1945_v47, %v2073_v48  ;;  %1760 = vst.msk [vmem:[#allocation2 + $0x40] sm:$0xff] %vm1751_vm4, %v1631_v44  ;;  %v20687_v52 = vpop.f32.mrb[10].mxu0 }
 0x115   : > { %v1634_v53 = vadd.f32 %v20687_v52, %v25352_v7  ;;  %v1027_v54 = vpop.f32.mrb[11].mxu0  ;;  %20845 = vmatmul.mubr.msk.f32.gmra.mrb[116].mxu0 %vm522_vm0, %v501_v45  ;;  %v2324_v10 = vld [vmem:[#allocation3] sm:$0xff]  ;;  %v2491_v45 = vld [vmem:[#allocation4 + $0x9] sm:$0xff]  ;;  %p24724_p12 = pnand %p24723_p11, %p24889_p5  ;;  %p24731_p2 = por %p24730_p1, %p24729_p0 }
 0x116   : > { %2262 = vst.msk [vmem:[#allocation3 + $0x10] sm:$0xff] %vm1751_vm4, %v2198_v50  ;;  %v1633_v55 = vadd.f32 %v25352_v7, %v1027_v54  ;;  %20847 = vmatprep.mubr.msk.f32.mxu0 %vm522_vm0, %v502_v49  ;;  %v2492_v49 = vld [vmem:[#allocation4 + $0x19] sm:$0xff] }
 0x117   : > { %v1947_v57 = vld [vmem:[#allocation2 + $0x30] ss:$2 sm:$0xff]  ;;  %v2075_v58 = vld [vmem:[#allocation2 + $0x31] ss:$2 sm:$0xff]  ;;  %1763 = vst.msk [vmem:[#allocation2 + $0x58] sm:$0xff] %vm1751_vm4, %v1634_v53  ;;  %p24725_p13 = pneg %p24724_p12 }
 0x118   : > { %v2199_v60 = vmax.f32 %v1947_v57, %v2075_v58  ;;  %1762 = vst.msk [vmem:[#allocation2 + $0x50] sm:$0xff] %vm1751_vm4, %v1633_v55  ;;  %v20690_v61 = vpop.f32.mrb[12].mxu0  ;;  %v2493_v58 = vld [vmem:[#allocation4 + $0x21] sm:$0xff] }
 0x119   : > { %v1636_v62 = vadd.f32 %v20690_v61, %v25352_v7  ;;  %v1037_v63 = vpop.f32.mrb[13].mxu0  ;;  %20848 = vmatmul.mubr.msk.f32.gmra.mrb[118].mxu0 %vm522_vm0, %v503_v56  ;;  %v2325_v23 = vld [vmem:[#allocation3 + $0x8] sm:$0xff]  ;;  %p24732_p3 = pnand %p24731_p2, %p24725_p13 }
 0x11a   : > { %2263 = vst.msk [vmem:[#allocation3 + $0x18] sm:$0xff] %vm1751_vm4, %v2199_v60  ;;  %v1635_v0 = vadd.f32 %v25352_v7, %v1037_v63  ;;  %20850 = vmatprep.mubr.msk.f32.mxu0 %vm522_vm0, %v504_v59 }
 0x11b   : > { %v1949_v2 = vld [vmem:[#allocation2 + $0x40] ss:$2 sm:$0xff]  ;;  %v2077_v3 = vld [vmem:[#allocation2 + $0x41] ss:$2 sm:$0xff]  ;;  %1765 = vst.msk [vmem:[#allocation2 + $0x68] sm:$0xff] %vm1751_vm4, %v1636_v62 }
 0x11c   : > { %v2200_v5 = vmax.f32 %v1949_v2, %v2077_v3  ;;  %1764 = vst.msk [vmem:[#allocation2 + $0x60] sm:$0xff] %vm1751_vm4, %v1635_v0  ;;  %v20693_v6 = vpop.f32.mrb[14].mxu0 }
 0x11d   : > { %v1638_v8 = vadd.f32 %v20693_v6, %v25352_v7  ;;  %v1047_v9 = vpop.f32.mrb[15].mxu0  ;;  %20851 = vmatmul.mubr.msk.f32.gmra.mrb[120].mxu0 %vm522_vm0, %v505_v1  ;;  %v2357_v11 = vld [vmem:[#allocation3 + $0x10] sm:$0xff] }
 0x11e   : > { %2264 = vst.msk [vmem:[#allocation3 + $0x20] sm:$0xff] %vm1751_vm4, %v2200_v5  ;;  %v1637_v13 = vadd.f32 %v25352_v7, %v1047_v9  ;;  %20853 = vmatprep.mubr.msk.f32.mxu0 %vm522_vm0, %v506_v4  ;;  %v2389_v15 = vmax.f32 %v2324_v10, %v2357_v11 }
 0x11f   : > { %v1951_v16 = vld [vmem:[#allocation2 + $0x50] ss:$2 sm:$0xff]  ;;  %v2079_v17 = vld [vmem:[#allocation2 + $0x51] ss:$2 sm:$0xff]  ;;  %1767 = vst.msk [vmem:[#allocation2 + $0x78] sm:$0xff] %vm1751_vm4, %v1638_v8 }
 0x120   : > { %v2201_v19 = vmax.f32 %v1951_v16, %v2079_v17  ;;  %1766 = vst.msk [vmem:[#allocation2 + $0x70] sm:$0xff] %vm1751_vm4, %v1637_v13  ;;  %v20696_v20 = vpop.f32.mrb[16].mxu0  ;;  %2422 = vst.msk [vmem:[#allocation4 + $0x32] sm:$0xff] %vm1751_vm4, %v2389_v15 }
 0x121   : > { %v1640_v21 = vadd.f32 %v20696_v20, %v25352_v7  ;;  %v1057_v22 = vpop.f32.mrb[17].mxu0  ;;  %20854 = vmatmul.mubr.msk.f32.gmra.mrb[122].mxu0 %vm522_vm0, %v507_v14  ;;  %v2358_v24 = vld [vmem:[#allocation3 + $0x18] sm:$0xff] }
 0x122   : > { %2265 = vst.msk [vmem:[#allocation3 + $0x28] sm:$0xff] %vm1751_vm4, %v2201_v19  ;;  %v1639_v25 = vadd.f32 %v25352_v7, %v1057_v22  ;;  %20856 = vmatprep.mubr.msk.f32.mxu0 %vm522_vm0, %v508_v18  ;;  %v2390_v27 = vmax.f32 %v2325_v23, %v2358_v24 }
 0x123   : > { %v1953_v28 = vld [vmem:[#allocation2 + $0x60] ss:$2 sm:$0xff]  ;;  %v2081_v29 = vld [vmem:[#allocation2 + $0x61] ss:$2 sm:$0xff]  ;;  %1769 = vst.msk [vmem:[#allocation2 + $0x88] sm:$0xff] %vm1751_vm4, %v1640_v21 }
 0x124   : > { %v2202_v31 = vmax.f32 %v1953_v28, %v2081_v29  ;;  %1768 = vst.msk [vmem:[#allocation2 + $0x80] sm:$0xff] %vm1751_vm4, %v1639_v25  ;;  %v20699_v32 = vpop.f32.mrb[18].mxu0  ;;  %2423 = vst.msk [vmem:[#allocation4 + $0x3a] sm:$0xff] %vm1751_vm4, %v2390_v27 }
 0x125   : > { %v1642_v33 = vadd.f32 %v20699_v32, %v25352_v7  ;;  %v1067_v34 = vpop.f32.mrb[19].mxu0  ;;  %20857 = vmatmul.mubr.msk.f32.gmra.mrb[124].mxu0 %vm522_vm0, %v509_v26  ;;  %v2326_v55 = vld [vmem:[#allocation3 + $0x20] sm:$0xff] }
 0x126   : > { %2266 = vst.msk [vmem:[#allocation3 + $0x30] sm:$0xff] %vm1751_vm4, %v2202_v31  ;;  %v1641_v35 = vadd.f32 %v25352_v7, %v1067_v34  ;;  %20859 = vmatprep.mubr.msk.f32.mxu0 %vm522_vm0, %v510_v30 }
 0x127   : > { %v1955_v37 = vld [vmem:[#allocation2 + $0x70] ss:$2 sm:$0xff]  ;;  %v2083_v38 = vld [vmem:[#allocation2 + $0x71] ss:$2 sm:$0xff]  ;;  %1771 = vst.msk [vmem:[#allocation2 + $0x98] sm:$0xff] %vm1751_vm4, %v1642_v33 }
 0x128   : > { %v2203_v40 = vmax.f32 %v1955_v37, %v2083_v38  ;;  %1770 = vst.msk [vmem:[#allocation2 + $0x90] sm:$0xff] %vm1751_vm4, %v1641_v35  ;;  %v20702_v41 = vpop.f32.mrb[20].mxu0  ;;  %v2494_v2 = vld [vmem:[#allocation4 + $0x31] sm:$0xff] }
 0x129   : > { %v1644_v42 = vadd.f32 %v20702_v41, %v25352_v7  ;;  %v1077_v43 = vpop.f32.mrb[21].mxu0  ;;  %20860 = vmatmul.mubr.msk.f32.gmra.mrb[126].mxu0 %vm522_vm0, %v511_v36  ;;  %v2327_v3 = vld [vmem:[#allocation3 + $0x28] sm:$0xff] }
 0x12a   : > { %2267 = vst.msk [vmem:[#allocation3 + $0x38] sm:$0xff] %vm1751_vm4, %v2203_v40  ;;  %v1643_v44 = vadd.f32 %v25352_v7, %v1077_v43  ;;  %20870 = vmatprep.mubr.msk.f32.mxu0 %vm1751_vm4, %v2490_v39 }
 0x12b   : > { %v1957_v47 = vld [vmem:[#allocation2 + $0x80] ss:$2 sm:$0xff]  ;;  %v2085_v48 = vld [vmem:[#allocation2 + $0x81] ss:$2 sm:$0xff]  ;;  %1773 = vst.msk [vmem:[#allocation2 + $0xa8] sm:$0xff] %vm1751_vm4, %v1644_v42 }
 0x12c   : > { %v2204_v50 = vmax.f32 %v1957_v47, %v2085_v48  ;;  %1772 = vst.msk [vmem:[#allocation2 + $0xa0] sm:$0xff] %vm1751_vm4, %v1643_v44  ;;  %v20705_v52 = vpop.f32.mrb[22].mxu0  ;;  %v2495_v13 = vld [vmem:[#allocation4 + $0x39] sm:$0xff] }
 0x12d   : > { %v1646_v53 = vadd.f32 %v20705_v52, %v25352_v7  ;;  %v1087_v54 = vpop.f32.mrb[23].mxu0  ;;  %20871 = vmatmul.mubr.msk.f32.vlgmr.msra.gmra.mrb[128].mxu0 %vm1751_vm4, %v2491_v45  ;;  %v2359_v56 = vld [vmem:[#allocation3 + $0x30] sm:$0xff] }
 0x12e   : > { %2268 = vst.msk [vmem:[#allocation3 + $0x40] sm:$0xff] %vm1751_vm4, %v2204_v50  ;;  %v1645_v57 = vadd.f32 %v25352_v7, %v1087_v54  ;;  %20873 = vmatprep.mubr.msk.f32.mxu0 %vm1751_vm4, %v2492_v49  ;;  %v2391_v59 = vmax.f32 %v2326_v55, %v2359_v56 }
 0x12f   : > { %v1959_v60 = vld [vmem:[#allocation2 + $0x90] ss:$2 sm:$0xff]  ;;  %v2087_v61 = vld [vmem:[#allocation2 + $0x91] ss:$2 sm:$0xff]  ;;  %1775 = vst.msk [vmem:[#allocation2 + $0xb8] sm:$0xff] %vm1751_vm4, %v1646_v53 }
 0x130   : > { %v2205_v62 = vmax.f32 %v1959_v60, %v2087_v61  ;;  %1774 = vst.msk [vmem:[#allocation2 + $0xb0] sm:$0xff] %vm1751_vm4, %v1645_v57  ;;  %v20708_v63 = vpop.f32.mrb[24].mxu0  ;;  %2424 = vst.msk [vmem:[#allocation4 + $0x4a] sm:$0xff] %vm1751_vm4, %v2391_v59 }
 0x131   : > { %v1648_v0 = vadd.f32 %v20708_v63, %v25352_v7  ;;  %v1097_v1 = vpop.f32.mrb[25].mxu0  ;;  %20874 = vmatmul.mubr.msk.f32.gmra.mrb[130].mxu0 %vm1751_vm4, %v2493_v58  ;;  %v2360_v4 = vld [vmem:[#allocation3 + $0x38] sm:$0xff] }
 0x132   : > { %2269 = vst.msk [vmem:[#allocation3 + $0x48] sm:$0xff] %vm1751_vm4, %v2205_v62  ;;  %v1647_v5 = vadd.f32 %v25352_v7, %v1097_v1  ;;  %20876 = vmatprep.mubr.msk.f32.mxu0 %vm1751_vm4, %v2494_v2  ;;  %v2392_v6 = vmax.f32 %v2327_v3, %v2360_v4 }
 0x133   : > { %v1961_v8 = vld [vmem:[#allocation2 + $0xa0] ss:$2 sm:$0xff]  ;;  %v2089_v9 = vld [vmem:[#allocation2 + $0xa1] ss:$2 sm:$0xff]  ;;  %1777 = vst.msk [vmem:[#allocation2 + $0xc8] sm:$0xff] %vm1751_vm4, %v1648_v0 }
 0x134   : > { %v2206_v10 = vmax.f32 %v1961_v8, %v2089_v9  ;;  %1776 = vst.msk [vmem:[#allocation2 + $0xc0] sm:$0xff] %vm1751_vm4, %v1647_v5  ;;  %v20711_v11 = vpop.f32.mrb[26].mxu0  ;;  %2425 = vst.msk [vmem:[#allocation4 + $0x52] sm:$0xff] %vm1751_vm4, %v2392_v6 }
 0x135   : > { %v1650_v14 = vadd.f32 %v20711_v11, %v25352_v7  ;;  %v1107_v15 = vpop.f32.mrb[27].mxu0  ;;  %20877 = vmatmul.mubr.msk.f32.gmra.mrb[132].mxu0 %vm1751_vm4, %v2495_v13  ;;  %v2328_v32 = vld [vmem:[#allocation3 + $0x40] sm:$0xff] }
 0x136   : > { %2270 = vst.msk [vmem:[#allocation3 + $0x50] sm:$0xff] %vm1751_vm4, %v2206_v10  ;;  %v1649_v16 = vadd.f32 %v25352_v7, %v1107_v15 }
 0x137   : > { %v1963_v17 = vld [vmem:[#allocation2 + $0xb0] ss:$2 sm:$0xff]  ;;  %v2091_v18 = vld [vmem:[#allocation2 + $0xb1] ss:$2 sm:$0xff]  ;;  %1779 = vst.msk [vmem:[#allocation2 + $0xd8] sm:$0xff] %vm1751_vm4, %v1650_v14 }
 0x138   : > { %v2496_v19 = vld [vmem:[#allocation4 + $0x49] sm:$0xff]  ;;  %v2207_v20 = vmax.f32 %v1963_v17, %v2091_v18  ;;  %1778 = vst.msk [vmem:[#allocation2 + $0xd0] sm:$0xff] %vm1751_vm4, %v1649_v16  ;;  %v20714_v21 = vpop.f32.mrb[28].mxu0 }
 0x139   : > { %20879 = vmatprep.mubr.msk.f32.mxu0 %vm1751_vm4, %v2496_v19  ;;  %v1652_v22 = vadd.f32 %v20714_v21, %v25352_v7  ;;  %v1117_v23 = vpop.f32.mrb[29].mxu0  ;;  %v2329_v42 = vld [vmem:[#allocation3 + $0x48] sm:$0xff] }
 0x13a   : > { %2271 = vst.msk [vmem:[#allocation3 + $0x58] sm:$0xff] %vm1751_vm4, %v2207_v20  ;;  %v1651_v24 = vadd.f32 %v25352_v7, %v1117_v23 }
 0x13b   : > { %v1965_v25 = vld [vmem:[#allocation2 + $0xc0] ss:$2 sm:$0xff]  ;;  %v2093_v26 = vld [vmem:[#allocation2 + $0xc1] ss:$2 sm:$0xff]  ;;  %1781 = vst.msk [vmem:[#allocation2 + $0xe8] sm:$0xff] %vm1751_vm4, %v1652_v22  ;;  %v2497_v27 = vld [vmem:[#allocation4 + $0x51] sm:$0xff] }
 0x13c   : > { %v2208_v28 = vmax.f32 %v1965_v25, %v2093_v26  ;;  %1780 = vst.msk [vmem:[#allocation2 + $0xe0] sm:$0xff] %vm1751_vm4, %v1651_v24  ;;  %v20717_v29 = vpop.f32.mrb[30].mxu0  ;;  %20880 = vmatmul.mubr.msk.f32.gmra.mrb[134].mxu0 %vm1751_vm4, %v2497_v27 }
 0x13d   : > { %v1654_v30 = vadd.f32 %v20717_v29, %v25352_v7  ;;  %v1127_v31 = vpop.f32.mrb[31].mxu0  ;;  %v2361_v33 = vld [vmem:[#allocation3 + $0x50] sm:$0xff] }
 0x13e   : > { %2272 = vst.msk [vmem:[#allocation3 + $0x60] sm:$0xff] %vm1751_vm4, %v2208_v28  ;;  %v1653_v34 = vadd.f32 %v25352_v7, %v1127_v31  ;;  %v2393_v35 = vmax.f32 %v2328_v32, %v2361_v33 }
 0x13f   : > { %v1967_v36 = vld [vmem:[#allocation2 + $0xd0] ss:$2 sm:$0xff]  ;;  %v2095_v37 = vld [vmem:[#allocation2 + $0xd1] ss:$2 sm:$0xff]  ;;  %1783 = vst.msk [vmem:[#allocation2 + $0xf8] sm:$0xff] %vm1751_vm4, %v1654_v30 }
 0x140   : > { %v2209_v38 = vmax.f32 %v1967_v36, %v2095_v37  ;;  %1782 = vst.msk [vmem:[#allocation2 + $0xf0] sm:$0xff] %vm1751_vm4, %v1653_v34  ;;  %v20720_v39 = vpop.f32.mrb[32].mxu0  ;;  %2426 = vst.msk [vmem:[#allocation4 + $0x62] sm:$0xff] %vm1751_vm4, %v2393_v35 }
 0x141   : > { %v1656_v40 = vadd.f32 %v20720_v39, %v25352_v7  ;;  %v1137_v41 = vpop.f32.mrb[33].mxu0  ;;  %v2362_v43 = vld [vmem:[#allocation3 + $0x58] sm:$0xff] }
 0x142   : > { %2273 = vst.msk [vmem:[#allocation3 + $0x68] sm:$0xff] %vm1751_vm4, %v2209_v38  ;;  %v1655_v44 = vadd.f32 %v25352_v7, %v1137_v41  ;;  %v2394_v45 = vmax.f32 %v2329_v42, %v2362_v43 }
 0x143   : > { %v1969_v47 = vld [vmem:[#allocation2 + $0xe0] ss:$2 sm:$0xff]  ;;  %v2097_v48 = vld [vmem:[#allocation2 + $0xe1] ss:$2 sm:$0xff]  ;;  %1785 = vst.msk [vmem:[#allocation2 + $0x108] sm:$0xff] %vm1751_vm4, %v1656_v40 }
 0x144   : > { %v2210_v49 = vmax.f32 %v1969_v47, %v2097_v48  ;;  %1784 = vst.msk [vmem:[#allocation2 + $0x100] sm:$0xff] %vm1751_vm4, %v1655_v44  ;;  %v20723_v50 = vpop.f32.mrb[34].mxu0  ;;  %2427 = vst.msk [vmem:[#allocation4 + $0x6a] sm:$0xff] %vm1751_vm4, %v2394_v45 }
 0x145   : > { %v1658_v52 = vadd.f32 %v20723_v50, %v25352_v7  ;;  %v1147_v53 = vpop.f32.mrb[35].mxu0  ;;  %v2330_v6 = vld [vmem:[#allocation3 + $0x60] sm:$0xff] }
 0x146   : > { %2274 = vst.msk [vmem:[#allocation3 + $0x70] sm:$0xff] %vm1751_vm4, %v2210_v49  ;;  %v1657_v54 = vadd.f32 %v25352_v7, %v1147_v53 }
 0x147   : > { %v1971_v55 = vld [vmem:[#allocation2 + $0xf0] ss:$2 sm:$0xff]  ;;  %v2099_v56 = vld [vmem:[#allocation2 + $0xf1] ss:$2 sm:$0xff]  ;;  %1787 = vst.msk [vmem:[#allocation2 + $0x118] sm:$0xff] %vm1751_vm4, %v1658_v52  ;;  %v2498_v57 = vld [vmem:[#allocation4 + $0x61] sm:$0xff] }
 0x148   : > { %v2211_v58 = vmax.f32 %v1971_v55, %v2099_v56  ;;  %1786 = vst.msk [vmem:[#allocation2 + $0x110] sm:$0xff] %vm1751_vm4, %v1657_v54  ;;  %v20726_v59 = vpop.f32.mrb[36].mxu0  ;;  %20882 = vmatprep.mubr.msk.f32.mxu0 %vm1751_vm4, %v2498_v57 }
 0x149   : > { %v1660_v60 = vadd.f32 %v20726_v59, %v25352_v7  ;;  %v1157_v61 = vpop.f32.mrb[37].mxu0  ;;  %v2331_v18 = vld [vmem:[#allocation3 + $0x68] sm:$0xff] }
 0x14a   : > { %2275 = vst.msk [vmem:[#allocation3 + $0x78] sm:$0xff] %vm1751_vm4, %v2211_v58  ;;  %v1659_v62 = vadd.f32 %v25352_v7, %v1157_v61 }
 0x14b   : > { %v1973_v63 = vld [vmem:[#allocation2 + $0x100] ss:$2 sm:$0xff]  ;;  %v2101_v0 = vld [vmem:[#allocation2 + $0x101] ss:$2 sm:$0xff]  ;;  %1789 = vst.msk [vmem:[#allocation2 + $0x128] sm:$0xff] %vm1751_vm4, %v1660_v60 }
 0x14c   : > { %v2499_v1 = vld [vmem:[#allocation4 + $0x69] sm:$0xff]  ;;  %v2212_v2 = vmax.f32 %v1973_v63, %v2101_v0  ;;  %1788 = vst.msk [vmem:[#allocation2 + $0x120] sm:$0xff] %vm1751_vm4, %v1659_v62  ;;  %v20729_v3 = vpop.f32.mrb[38].mxu0 }
 0x14d   : > { %20883 = vmatmul.mubr.msk.f32.gmra.mrb[136].mxu0 %vm1751_vm4, %v2499_v1  ;;  %v1662_v4 = vadd.f32 %v20729_v3, %v25352_v7  ;;  %v1167_v5 = vpop.f32.mrb[39].mxu0  ;;  %v2363_v8 = vld [vmem:[#allocation3 + $0x70] sm:$0xff] }
 0x14e   : > { %2276 = vst.msk [vmem:[#allocation3 + $0x80] sm:$0xff] %vm1751_vm4, %v2212_v2  ;;  %v1661_v9 = vadd.f32 %v25352_v7, %v1167_v5  ;;  %v2395_v10 = vmax.f32 %v2330_v6, %v2363_v8 }
 0x14f   : > { %v1975_v11 = vld [vmem:[#allocation2 + $0x110] ss:$2 sm:$0xff]  ;;  %v2103_v13 = vld [vmem:[#allocation2 + $0x111] ss:$2 sm:$0xff]  ;;  %1791 = vst.msk [vmem:[#allocation2 + $0x138] sm:$0xff] %vm1751_vm4, %v1662_v4 }
 0x150   : > { %v2213_v14 = vmax.f32 %v1975_v11, %v2103_v13  ;;  %1790 = vst.msk [vmem:[#allocation2 + $0x130] sm:$0xff] %vm1751_vm4, %v1661_v9  ;;  %v20732_v15 = vpop.f32.mrb[40].mxu0  ;;  %2428 = vst.msk [vmem:[#allocation4 + $0x7a] sm:$0xff] %vm1751_vm4, %v2395_v10 }
 0x151   : > { %v1664_v16 = vadd.f32 %v20732_v15, %v25352_v7  ;;  %v1177_v17 = vpop.f32.mrb[41].mxu0  ;;  %v2364_v19 = vld [vmem:[#allocation3 + $0x78] sm:$0xff] }
 0x152   : > { %2277 = vst.msk [vmem:[#allocation3 + $0x88] sm:$0xff] %vm1751_vm4, %v2213_v14  ;;  %v1663_v20 = vadd.f32 %v25352_v7, %v1177_v17  ;;  %v2396_v21 = vmax.f32 %v2331_v18, %v2364_v19  ;;  %v18037_v17 = vld [vmem:[%s29330_s3 + $0xc8] sm:$0xff] }
 0x153   : > { %v1977_v22 = vld [vmem:[#allocation2 + $0x120] ss:$2 sm:$0xff]  ;;  %v2105_v23 = vld [vmem:[#allocation2 + $0x121] ss:$2 sm:$0xff]  ;;  %1793 = vst.msk [vmem:[#allocation2 + $0x148] sm:$0xff] %vm1751_vm4, %v1664_v16 }
 0x154   : > { %v2214_v24 = vmax.f32 %v1977_v22, %v2105_v23  ;;  %1792 = vst.msk [vmem:[#allocation2 + $0x140] sm:$0xff] %vm1751_vm4, %v1663_v20  ;;  %v20735_v25 = vpop.f32.mrb[42].mxu0  ;;  %2429 = vst.msk [vmem:[#allocation4 + $0x82] sm:$0xff] %vm1751_vm4, %v2396_v21  ;;  %v18036_v16 = vld [vmem:[%s29330_s3 + $0xc0] sm:$0xff] }
 0x155   : > { %v1666_v26 = vadd.f32 %v20735_v25, %v25352_v7  ;;  %v1187_v27 = vpop.f32.mrb[43].mxu0  ;;  %v2332_v47 = vld [vmem:[#allocation3 + $0x80] sm:$0xff]  ;;  %v23155_v21 = vpack.c.bf16 %v18037_v17, %v18036_v16 }
 0x156   : > { %2278 = vst.msk [vmem:[#allocation3 + $0x90] sm:$0xff] %vm1751_vm4, %v2214_v24  ;;  %v1665_v28 = vadd.f32 %v25352_v7, %v1187_v27 }
 0x157   : > { %v1979_v29 = vld [vmem:[#allocation2 + $0x130] ss:$2 sm:$0xff]  ;;  %v2107_v30 = vld [vmem:[#allocation2 + $0x131] ss:$2 sm:$0xff]  ;;  %1795 = vst.msk [vmem:[#allocation2 + $0x158] sm:$0xff] %vm1751_vm4, %v1666_v26  ;;  %23156 = vmatprep.subr.bf16.mxu1 %v23155_v21 }
 0x158   : > { %v2500_v31 = vld [vmem:[#allocation4 + $0x79] sm:$0xff]  ;;  %v2215_v32 = vmax.f32 %v1979_v29, %v2107_v30  ;;  %1794 = vst.msk [vmem:[#allocation2 + $0x150] sm:$0xff] %vm1751_vm4, %v1665_v28  ;;  %v20738_v33 = vpop.f32.mrb[44].mxu0 }
 0x159   : > { %20885 = vmatprep.mubr.msk.f32.mxu0 %vm1751_vm4, %v2500_v31  ;;  %v4348_v34 = vld [vmem:[#allocation4 + $0x78] sm:$0xff]  ;;  %v1668_v35 = vadd.f32 %v20738_v33, %v25352_v7  ;;  %v1197_v36 = vpop.f32.mrb[45].mxu0  ;;  %v2333_v58 = vld [vmem:[#allocation3 + $0x88] sm:$0xff] }
 0x15a   : > { %21162 = vmatprep.mubr.msk.f32.mxu1 %vm1751_vm4, %v4348_v34  ;;  %2279 = vst.msk [vmem:[#allocation3 + $0x98] sm:$0xff] %vm1751_vm4, %v2215_v32  ;;  %v1667_v37 = vadd.f32 %v25352_v7, %v1197_v36 }
 0x15b   : > { %v1981_v38 = vld [vmem:[#allocation2 + $0x140] ss:$2 sm:$0xff]  ;;  %v2109_v39 = vld [vmem:[#allocation2 + $0x141] ss:$2 sm:$0xff]  ;;  %1797 = vst.msk [vmem:[#allocation2 + $0x168] sm:$0xff] %vm1751_vm4, %v1668_v35 }
 0x15c   : > { %v2501_v40 = vld [vmem:[#allocation4 + $0x81] sm:$0xff]  ;;  %v2216_v41 = vmax.f32 %v1981_v38, %v2109_v39  ;;  %1796 = vst.msk [vmem:[#allocation2 + $0x160] sm:$0xff] %vm1751_vm4, %v1667_v37  ;;  %v20741_v42 = vpop.f32.mrb[46].mxu0 }
 0x15d   : > { %20886 = vmatmul.mubr.msk.f32.gmra.mrb[138].mxu0 %vm1751_vm4, %v2501_v40  ;;  %v4349_v43 = vld [vmem:[#allocation4 + $0x80] sm:$0xff]  ;;  %v1670_v44 = vadd.f32 %v20741_v42, %v25352_v7  ;;  %v1207_v45 = vpop.f32.mrb[47].mxu0  ;;  %v2365_v48 = vld [vmem:[#allocation3 + $0x90] sm:$0xff] }
 0x15e   : > { %21163 = vmatmul.mubr.msk.f32.vlgmr.msra.gmra.mrb[0].mxu1 %vm1751_vm4, %v4349_v43  ;;  %2280 = vst.msk [vmem:[#allocation3 + $0xa0] sm:$0xff] %vm1751_vm4, %v2216_v41  ;;  %v1669_v49 = vadd.f32 %v25352_v7, %v1207_v45  ;;  %v2397_v50 = vmax.f32 %v2332_v47, %v2365_v48 }
 0x15f   : > { %v1983_v52 = vld [vmem:[#allocation2 + $0x150] ss:$2 sm:$0xff]  ;;  %v2111_v53 = vld [vmem:[#allocation2 + $0x151] ss:$2 sm:$0xff]  ;;  %1799 = vst.msk [vmem:[#allocation2 + $0x178] sm:$0xff] %vm1751_vm4, %v1670_v44  ;;  %23158 = vmatpush3.bf16.msra.mxu1 %v23155_v21 }
 0x160   : > { %v2217_v54 = vmax.f32 %v1983_v52, %v2111_v53  ;;  %1798 = vst.msk [vmem:[#allocation2 + $0x170] sm:$0xff] %vm1751_vm4, %v1669_v49  ;;  %v20744_v55 = vpop.f32.mrb[48].mxu0  ;;  %2430 = vst.msk [vmem:[#allocation4 + $0x92] sm:$0xff] %vm1751_vm4, %v2397_v50  ;;  %v2486_v49 = vld [vmem:[%s29330_s3] sm:$0xff]  ;;  %v2487_v50 = vld [vmem:[%s29330_s3 + $0x8] sm:$0xff] }
 0x161   : > { %v1672_v56 = vadd.f32 %v20744_v55, %v25352_v7  ;;  %v1217_v57 = vpop.f32.mrb[49].mxu0  ;;  %v2366_v59 = vld [vmem:[#allocation3 + $0x98] sm:$0xff]  ;;  %v23115_v55 = vpack.c.bf16 %v2487_v50, %v2486_v49 }
 0x162   : > { %2281 = vst.msk [vmem:[#allocation3 + $0xa8] sm:$0xff] %vm1751_vm4, %v2217_v54  ;;  %v1671_v60 = vadd.f32 %v25352_v7, %v1217_v57  ;;  %v2398_v61 = vmax.f32 %v2333_v58, %v2366_v59 }
 0x163   : > { %v1985_v62 = vld [vmem:[#allocation2 + $0x160] ss:$2 sm:$0xff]  ;;  %v2113_v63 = vld [vmem:[#allocation2 + $0x161] ss:$2 sm:$0xff]  ;;  %1801 = vst.msk [vmem:[#allocation2 + $0x188] sm:$0xff] %vm1751_vm4, %v1672_v56  ;;  %23116 = vmatprep.subr.bf16.mxu0 %v23115_v55 }
 0x164   : > { %v2218_v0 = vmax.f32 %v1985_v62, %v2113_v63  ;;  %1800 = vst.msk [vmem:[#allocation2 + $0x180] sm:$0xff] %vm1751_vm4, %v1671_v60  ;;  %v20747_v1 = vpop.f32.mrb[50].mxu0  ;;  %2431 = vst.msk [vmem:[#allocation4 + $0x9a] sm:$0xff] %vm1751_vm4, %v2398_v61  ;;  %v18038_v62 = vld [vmem:[%s29330_s3 + $0xd0] sm:$0xff]  ;;  %v18039_v63 = vld [vmem:[%s29330_s3 + $0xd8] sm:$0xff]  ;;  %23118 = vmatpush3.bf16.msra.mxu0 %v23115_v55 }
 0x165   : > { %v1674_v2 = vadd.f32 %v20747_v1, %v25352_v7  ;;  %v1227_v3 = vpop.f32.mrb[51].mxu0  ;;  %v2334_v27 = vld [vmem:[#allocation3 + $0xa0] sm:$0xff] }
 0x166   : > { %2282 = vst.msk [vmem:[#allocation3 + $0xb0] sm:$0xff] %vm1751_vm4, %v2218_v0  ;;  %v1673_v4 = vadd.f32 %v25352_v7, %v1227_v3  ;;  %v2488_v0 = vld [vmem:[%s29330_s3 + $0x10] sm:$0xff] }
 0x167   : > { %v1987_v5 = vld [vmem:[#allocation2 + $0x170] ss:$2 sm:$0xff]  ;;  %v2115_v6 = vld [vmem:[#allocation2 + $0x171] ss:$2 sm:$0xff]  ;;  %1803 = vst.msk [vmem:[#allocation2 + $0x198] sm:$0xff] %vm1751_vm4, %v1674_v2 }
 0x168   : > { %v2502_v8 = vld [vmem:[#allocation4 + $0x91] sm:$0xff]  ;;  %v2219_v9 = vmax.f32 %v1987_v5, %v2115_v6  ;;  %1802 = vst.msk [vmem:[#allocation2 + $0x190] sm:$0xff] %vm1751_vm4, %v1673_v4  ;;  %v20750_v10 = vpop.f32.mrb[52].mxu0  ;;  %v23159_v4 = vpack.c.bf16 %v18039_v63, %v18038_v62 }
 0x169   : > { %20888 = vmatprep.mubr.msk.f32.mxu0 %vm1751_vm4, %v2502_v8  ;;  %v4350_v11 = vld [vmem:[#allocation4 + $0x90] sm:$0xff]  ;;  %v1676_v13 = vadd.f32 %v20750_v10, %v25352_v7  ;;  %v1237_v14 = vpop.f32.mrb[53].mxu0  ;;  %v2335_v37 = vld [vmem:[#allocation3 + $0xa8] sm:$0xff] }
 0x16a   : > { %21165 = vmatprep.mubr.msk.f32.mxu1 %vm1751_vm4, %v4350_v11  ;;  %2283 = vst.msk [vmem:[#allocation3 + $0xb8] sm:$0xff] %vm1751_vm4, %v2219_v9  ;;  %v1675_v15 = vadd.f32 %v25352_v7, %v1237_v14  ;;  %v2489_v9 = vld [vmem:[%s29330_s3 + $0x18] sm:$0xff]  ;;  %23160 = vmatprep.subr.bf16.mxu1 %v23159_v4 }
 0x16b   : > { %v1989_v18 = vld [vmem:[#allocation2 + $0x180] ss:$2 sm:$0xff]  ;;  %v2117_v19 = vld [vmem:[#allocation2 + $0x181] ss:$2 sm:$0xff]  ;;  %1805 = vst.msk [vmem:[#allocation2 + $0x1a8] sm:$0xff] %vm1751_vm4, %v1676_v13  ;;  %v4351_v24 = vld [vmem:[#allocation4 + $0x98] sm:$0xff]  ;;  %23162 = vmatpush3.bf16.msra.mxu1 %v23159_v4 }
 0x16c   : > { %v2503_v20 = vld [vmem:[#allocation4 + $0x99] sm:$0xff]  ;;  %v2220_v22 = vmax.f32 %v1989_v18, %v2117_v19  ;;  %1804 = vst.msk [vmem:[#allocation2 + $0x1a0] sm:$0xff] %vm1751_vm4, %v1675_v15  ;;  %v20753_v23 = vpop.f32.mrb[54].mxu0  ;;  %21166 = vmatmul.mubr.msk.f32.gmra.mrb[2].mxu1 %vm1751_vm4, %v4351_v24  ;;  %v23119_v15 = vpack.c.bf16 %v2489_v9, %v2488_v0 }
 0x16d   : > { %20889 = vmatmul.mubr.msk.f32.gmra.mrb[140].mxu0 %vm1751_vm4, %v2503_v20  ;;  %v1678_v25 = vadd.f32 %v20753_v23, %v25352_v7  ;;  %v1247_v26 = vpop.f32.mrb[55].mxu0  ;;  %v2367_v28 = vld [vmem:[#allocation3 + $0xb0] sm:$0xff] }
 0x16e   : > { %2284 = vst.msk [vmem:[#allocation3 + $0xc0] sm:$0xff] %vm1751_vm4, %v2220_v22  ;;  %v1677_v29 = vadd.f32 %v25352_v7, %v1247_v26  ;;  %v2399_v30 = vmax.f32 %v2334_v27, %v2367_v28  ;;  %23120 = vmatprep.subr.bf16.mxu0 %v23119_v15 }
 0x16f   : > { %v1991_v31 = vld [vmem:[#allocation2 + $0x190] ss:$2 sm:$0xff]  ;;  %v2119_v32 = vld [vmem:[#allocation2 + $0x191] ss:$2 sm:$0xff]  ;;  %1807 = vst.msk [vmem:[#allocation2 + $0x1b8] sm:$0xff] %vm1751_vm4, %v1678_v25  ;;  %23122 = vmatpush3.bf16.msra.mxu0 %v23119_v15 }
 0x170   : > { %v2221_v33 = vmax.f32 %v1991_v31, %v2119_v32  ;;  %1806 = vst.msk [vmem:[#allocation2 + $0x1b0] sm:$0xff] %vm1751_vm4, %v1677_v29  ;;  %v20756_v34 = vpop.f32.mrb[56].mxu0  ;;  %2432 = vst.msk [vmem:[#allocation4 + $0xaa] sm:$0xff] %vm1751_vm4, %v2399_v30 }
 0x171   : > { %v1680_v35 = vadd.f32 %v20756_v34, %v25352_v7  ;;  %v1257_v36 = vpop.f32.mrb[57].mxu0  ;;  %v2368_v38 = vld [vmem:[#allocation3 + $0xb8] sm:$0xff] }
 0x172   : > { %2285 = vst.msk [vmem:[#allocation3 + $0xc8] sm:$0xff] %vm1751_vm4, %v2221_v33  ;;  %v1679_v39 = vadd.f32 %v25352_v7, %v1257_v36  ;;  %v2400_v40 = vmax.f32 %v2335_v37, %v2368_v38 }
 0x173   : > { %v1993_v41 = vld [vmem:[#allocation2 + $0x1a0] ss:$2 sm:$0xff]  ;;  %v2121_v42 = vld [vmem:[#allocation2 + $0x1a1] ss:$2 sm:$0xff]  ;;  %1809 = vst.msk [vmem:[#allocation2 + $0x1c8] sm:$0xff] %vm1751_vm4, %v1680_v35 }
 0x174   : > { %v2222_v43 = vmax.f32 %v1993_v41, %v2121_v42  ;;  %1808 = vst.msk [vmem:[#allocation2 + $0x1c0] sm:$0xff] %vm1751_vm4, %v1679_v39  ;;  %v20759_v44 = vpop.f32.mrb[58].mxu0  ;;  %2433 = vst.msk [vmem:[#allocation4 + $0xb2] sm:$0xff] %vm1751_vm4, %v2400_v40 }
 0x175   : > { %v1682_v45 = vadd.f32 %v20759_v44, %v25352_v7  ;;  %v1267_v47 = vpop.f32.mrb[59].mxu0  ;;  %v2336_v13 = vld [vmem:[#allocation3 + $0xc0] sm:$0xff] }
 0x176   : > { %2286 = vst.msk [vmem:[#allocation3 + $0xd0] sm:$0xff] %vm1751_vm4, %v2222_v43  ;;  %v1681_v48 = vadd.f32 %v25352_v7, %v1267_v47 }
 0x177   : > { %v1995_v52 = vld [vmem:[#allocation2 + $0x1b0] ss:$2 sm:$0xff]  ;;  %v2123_v53 = vld [vmem:[#allocation2 + $0x1b1] ss:$2 sm:$0xff]  ;;  %1811 = vst.msk [vmem:[#allocation2 + $0x1d8] sm:$0xff] %vm1751_vm4, %v1682_v45  ;;  %v4352_v58 = vld [vmem:[#allocation4 + $0xa8] sm:$0xff] }
 0x178   : > { %v2504_v54 = vld [vmem:[#allocation4 + $0xa9] sm:$0xff]  ;;  %v2223_v56 = vmax.f32 %v1995_v52, %v2123_v53  ;;  %1810 = vst.msk [vmem:[#allocation2 + $0x1d0] sm:$0xff] %vm1751_vm4, %v1681_v48  ;;  %v20762_v57 = vpop.f32.mrb[60].mxu0  ;;  %21168 = vmatprep.mubr.msk.f32.mxu1 %vm1751_vm4, %v4352_v58  ;;  %v25646_v52 = vld [vmem:[%s29329_s2] ss:$0 sm:$0xff] }
 0x179   : > { %20891 = vmatprep.mubr.msk.f32.mxu0 %vm1751_vm4, %v2504_v54  ;;  %v1684_v59 = vadd.f32 %v20762_v57, %v25352_v7  ;;  %v1277_v60 = vpop.f32.mrb[61].mxu0  ;;  %v2337_v24 = vld [vmem:[#allocation3 + $0xc8] sm:$0xff] }
 0x17a   : > { %2287 = vst.msk [vmem:[#allocation3 + $0xd8] sm:$0xff] %vm1751_vm4, %v2223_v56  ;;  %v1683_v61 = vadd.f32 %v25352_v7, %v1277_v60  ;;  %v18072_v56 = vld [vmem:[%s29330_s3 + $0xe0] sm:$0xff] }
 0x17b   : > { %v1997_v1 = vld [vmem:[#allocation2 + $0x1c0] ss:$2 sm:$0xff]  ;;  %v2125_v2 = vld [vmem:[#allocation2 + $0x1c1] ss:$2 sm:$0xff]  ;;  %1813 = vst.msk [vmem:[#allocation2 + $0x1e8] sm:$0xff] %vm1751_vm4, %v1684_v59  ;;  %v2505_v3 = vld [vmem:[#allocation4 + $0xb1] sm:$0xff] }
 0x17c   : > { %v2224_v5 = vmax.f32 %v1997_v1, %v2125_v2  ;;  %1812 = vst.msk [vmem:[#allocation2 + $0x1e0] sm:$0xff] %vm1751_vm4, %v1683_v61  ;;  %v20765_v6 = vpop.f32.mrb[62].mxu0  ;;  %20892 = vmatmul.mubr.msk.f32.gmra.mrb[142].mxu0 %vm1751_vm4, %v2505_v3  ;;  %v4353_v8 = vld [vmem:[#allocation4 + $0xb0] sm:$0xff]  ;;  %v18073_v59 = vld [vmem:[%s29330_s3 + $0xe8] sm:$0xff] }
 0x17d   : > { %v1686_v10 = vadd.f32 %v20765_v6, %v25352_v7  ;;  %21169 = vmatmul.mubr.msk.f32.gmra.mrb[4].mxu1 %vm1751_vm4, %v4353_v8  ;;  %v1287_v11 = vpop.f32.mrb[63].mxu0  ;;  %v2369_v14 = vld [vmem:[#allocation3 + $0xd0] sm:$0xff]  ;;  %v25660_v62 = vpack.c.bf16 %v18073_v59, %v18072_v56 }
 0x17e   : > { %2288 = vst.msk [vmem:[#allocation3 + $0xe0] sm:$0xff] %vm1751_vm4, %v2224_v5  ;;  %v1685_v16 = vadd.f32 %v25352_v7, %v1287_v11  ;;  %v2401_v17 = vmax.f32 %v2336_v13, %v2369_v14 }
 0x17f   : > { %v1999_v18 = vld [vmem:[#allocation2 + $0x1d0] ss:$2 sm:$0xff]  ;;  %v2127_v19 = vld [vmem:[#allocation2 + $0x1d1] ss:$2 sm:$0xff]  ;;  %1815 = vst.msk [vmem:[#allocation2 + $0x1f8] sm:$0xff] %vm1751_vm4, %v1686_v10  ;;  %23164 = vmatprep.subr.bf16.mxu1 %v25660_v62 }
 0x180   : > { %v2225_v20 = vmax.f32 %v1999_v18, %v2127_v19  ;;  %1814 = vst.msk [vmem:[#allocation2 + $0x1f0] sm:$0xff] %vm1751_vm4, %v1685_v16  ;;  %v20768_v21 = vpop.f32.mrb[64].mxu0  ;;  %2434 = vst.msk [vmem:[#allocation4 + $0xc2] sm:$0xff] %vm1751_vm4, %v2401_v17 }
 0x181   : > { %v1688_v22 = vadd.f32 %v20768_v21, %v25352_v7  ;;  %v1297_v23 = vpop.f32.mrb[65].mxu0  ;;  %v2370_v25 = vld [vmem:[#allocation3 + $0xd8] sm:$0xff] }
 0x182   : > { %2289 = vst.msk [vmem:[#allocation3 + $0xe8] sm:$0xff] %vm1751_vm4, %v2225_v20  ;;  %v1687_v26 = vadd.f32 %v25352_v7, %v1297_v23  ;;  %v2402_v27 = vmax.f32 %v2337_v24, %v2370_v25 }
 0x183   : > { %v2001_v28 = vld [vmem:[#allocation2 + $0x1e0] ss:$2 sm:$0xff]  ;;  %v2129_v29 = vld [vmem:[#allocation2 + $0x1e1] ss:$2 sm:$0xff]  ;;  %1817 = vst.msk [vmem:[#allocation2 + $0x208] sm:$0xff] %vm1751_vm4, %v1688_v22 }
 0x184   : > { %v2226_v30 = vmax.f32 %v2001_v28, %v2129_v29  ;;  %1816 = vst.msk [vmem:[#allocation2 + $0x200] sm:$0xff] %vm1751_vm4, %v1687_v26  ;;  %v20771_v31 = vpop.f32.mrb[66].mxu0  ;;  %2435 = vst.msk [vmem:[#allocation4 + $0xca] sm:$0xff] %vm1751_vm4, %v2402_v27 }
 0x185   : > { %v1690_v32 = vadd.f32 %v20771_v31, %v25352_v7  ;;  %v1307_v33 = vpop.f32.mrb[67].mxu0  ;;  %v2338_v54 = vld [vmem:[#allocation3 + $0xe0] sm:$0xff] }
 0x186   : > { %2290 = vst.msk [vmem:[#allocation3 + $0xf0] sm:$0xff] %vm1751_vm4, %v2226_v30  ;;  %v1689_v34 = vadd.f32 %v25352_v7, %v1307_v33 }
 0x187   : > { %v2003_v35 = vld [vmem:[#allocation2 + $0x1f0] ss:$2 sm:$0xff]  ;;  %v2131_v36 = vld [vmem:[#allocation2 + $0x1f1] ss:$2 sm:$0xff]  ;;  %1819 = vst.msk [vmem:[#allocation2 + $0x218] sm:$0xff] %vm1751_vm4, %v1690_v32  ;;  %v25623_v37 = vld [vmem:[#allocation4 + $0xc1] sm:$0xff] }
 0x188   : > { %v2227_v38 = vmax.f32 %v2003_v35, %v2131_v36  ;;  %1818 = vst.msk [vmem:[#allocation2 + $0x210] sm:$0xff] %vm1751_vm4, %v1689_v34  ;;  %v20774_v39 = vpop.f32.mrb[68].mxu0  ;;  %20894 = vmatprep.mubr.msk.f32.mxu0 %vm1751_vm4, %v25623_v37  ;;  %v25628_v40 = vld [vmem:[#allocation4 + $0xc0] sm:$0xff] }
 0x189   : > { %v1692_v41 = vadd.f32 %v20774_v39, %v25352_v7  ;;  %21171 = vmatprep.mubr.msk.f32.mxu1 %vm1751_vm4, %v25628_v40  ;;  %v1317_v42 = vpop.f32.mrb[69].mxu0  ;;  %v2339_v3 = vld [vmem:[#allocation3 + $0xe8] sm:$0xff] }
 0x18a   : > { %2291 = vst.msk [vmem:[#allocation3 + $0xf8] sm:$0xff] %vm1751_vm4, %v2227_v38  ;;  %v1691_v43 = vadd.f32 %v25352_v7, %v1317_v42 }
 0x18b   : > { %v2005_v44 = vld [vmem:[#allocation2 + $0x200] ss:$2 sm:$0xff]  ;;  %v2133_v45 = vld [vmem:[#allocation2 + $0x201] ss:$2 sm:$0xff]  ;;  %1821 = vst.msk [vmem:[#allocation2 + $0x228] sm:$0xff] %vm1751_vm4, %v1692_v41 }
 0x18c   : > { %v25636_v47 = vld [vmem:[#allocation4 + $0xc9] sm:$0xff]  ;;  %v2228_v48 = vmax.f32 %v2005_v44, %v2133_v45  ;;  %1820 = vst.msk [vmem:[#allocation2 + $0x220] sm:$0xff] %vm1751_vm4, %v1691_v43  ;;  %v20777_v49 = vpop.f32.mrb[70].mxu0 }
 0x18d   : > { %20895 = vmatmul.mubr.msk.f32.gmra.mrb[144].mxu0 %vm1751_vm4, %v25636_v47  ;;  %v25641_v50 = vld [vmem:[#allocation4 + $0xc8] sm:$0xff]  ;;  %v1694_v7 = vadd.f32 %v25646_v52, %v20777_v49  ;;  %v1327_v53 = vpop.f32.mrb[71].mxu0  ;;  %v2371_v55 = vld [vmem:[#allocation3 + $0xf0] sm:$0xff] }
 0x18e   : > { %21172 = vmatmul.mubr.msk.f32.gmra.mrb[6].mxu1 %vm1751_vm4, %v25641_v50  ;;  %2292 = vst.msk [vmem:[#allocation3 + $0x100] sm:$0xff] %vm1751_vm4, %v2228_v48  ;;  %v1693_v57 = vadd.f32 %v25646_v52, %v1327_v53  ;;  %v2403_v58 = vmax.f32 %v2338_v54, %v2371_v55 }
 0x18f   : > { %v2007_v60 = vld [vmem:[#allocation2 + $0x210] ss:$2 sm:$0xff]  ;;  %v2135_v61 = vld [vmem:[#allocation2 + $0x211] ss:$2 sm:$0xff]  ;;  %1823 = vst.msk [vmem:[#allocation2 + $0x238] sm:$0xff] %vm1751_vm4, %v1694_v7 }
 0x190   : > { %v2229_v63 = vmax.f32 %v2007_v60, %v2135_v61  ;;  %1822 = vst.msk [vmem:[#allocation2 + $0x230] sm:$0xff] %vm1751_vm4, %v1693_v57  ;;  %v20780_v0 = vpop.f32.mrb[72].mxu0  ;;  %2436 = vst.msk [vmem:[#allocation4 + $0xda] sm:$0xff] %vm1751_vm4, %v2403_v58 }
 0x191   : > { %v1696_v1 = vadd.f32 %v25646_v52, %v20780_v0  ;;  %v1337_v2 = vpop.f32.mrb[73].mxu0  ;;  %v2372_v4 = vld [vmem:[#allocation3 + $0xf8] sm:$0xff] }
 0x192   : > { %2293 = vst.msk [vmem:[#allocation3 + $0x108] sm:$0xff] %vm1751_vm4, %v2229_v63  ;;  %v1695_v5 = vadd.f32 %v25646_v52, %v1337_v2  ;;  %v2404_v6 = vmax.f32 %v2339_v3, %v2372_v4 }
 0x193   : > { %v2009_v8 = vld [vmem:[#allocation2 + $0x220] ss:$2 sm:$0xff]  ;;  %v2137_v9 = vld [vmem:[#allocation2 + $0x221] ss:$2 sm:$0xff]  ;;  %1825 = vst.msk [vmem:[#allocation2 + $0x248] sm:$0xff] %vm1751_vm4, %v1696_v1 }
 0x194   : > { %v2230_v10 = vmax.f32 %v2009_v8, %v2137_v9  ;;  %1824 = vst.msk [vmem:[#allocation2 + $0x240] sm:$0xff] %vm1751_vm4, %v1695_v5  ;;  %v20783_v11 = vpop.f32.mrb[74].mxu0  ;;  %2437 = vst.msk [vmem:[#allocation4 + $0xe2] sm:$0xff] %vm1751_vm4, %v2404_v6 }
 0x195   : > { %v1698_v13 = vadd.f32 %v25646_v52, %v20783_v11  ;;  %v1347_v14 = vpop.f32.mrb[75].mxu0  ;;  %v2340_v33 = vld [vmem:[#allocation3 + $0x100] sm:$0xff] }
 0x196   : > { %2294 = vst.msk [vmem:[#allocation3 + $0x110] sm:$0xff] %vm1751_vm4, %v2230_v10  ;;  %v1697_v15 = vadd.f32 %v25646_v52, %v1347_v14 }
 0x197   : > { %v2011_v16 = vld [vmem:[#allocation2 + $0x230] ss:$2 sm:$0xff]  ;;  %v2139_v17 = vld [vmem:[#allocation2 + $0x231] ss:$2 sm:$0xff]  ;;  %1827 = vst.msk [vmem:[#allocation2 + $0x258] sm:$0xff] %vm1751_vm4, %v1698_v13 }
 0x198   : > { %v25675_v18 = vld [vmem:[#allocation4 + $0xd9] sm:$0xff]  ;;  %v2231_v19 = vmax.f32 %v2011_v16, %v2139_v17  ;;  %1826 = vst.msk [vmem:[#allocation2 + $0x250] sm:$0xff] %vm1751_vm4, %v1697_v15  ;;  %v20786_v20 = vpop.f32.mrb[76].mxu0 }
 0x199   : > { %20897 = vmatprep.mubr.msk.f32.mxu0 %vm1751_vm4, %v25675_v18  ;;  %v25680_v21 = vld [vmem:[#allocation4 + $0xd8] sm:$0xff]  ;;  %v1700_v22 = vadd.f32 %v25646_v52, %v20786_v20  ;;  %v1357_v23 = vpop.f32.mrb[77].mxu0  ;;  %v2341_v45 = vld [vmem:[#allocation3 + $0x108] sm:$0xff] }
 0x19a   : > { %21174 = vmatprep.mubr.msk.f32.mxu1 %vm1751_vm4, %v25680_v21  ;;  %2295 = vst.msk [vmem:[#allocation3 + $0x118] sm:$0xff] %vm1751_vm4, %v2231_v19  ;;  %v1699_v24 = vadd.f32 %v25646_v52, %v1357_v23 }
 0x19b   : > { %v2013_v25 = vld [vmem:[#allocation2 + $0x240] ss:$2 sm:$0xff]  ;;  %v2141_v26 = vld [vmem:[#allocation2 + $0x241] ss:$2 sm:$0xff]  ;;  %1829 = vst.msk [vmem:[#allocation2 + $0x268] sm:$0xff] %vm1751_vm4, %v1700_v22 }
 0x19c   : > { %v25688_v27 = vld [vmem:[#allocation4 + $0xe1] sm:$0xff]  ;;  %v2232_v28 = vmax.f32 %v2013_v25, %v2141_v26  ;;  %1828 = vst.msk [vmem:[#allocation2 + $0x260] sm:$0xff] %vm1751_vm4, %v1699_v24  ;;  %v20789_v29 = vpop.f32.mrb[78].mxu0 }
 0x19d   : > { %20898 = vmatmul.mubr.msk.f32.gmra.mrb[146].mxu0 %vm1751_vm4, %v25688_v27  ;;  %v25693_v30 = vld [vmem:[#allocation4 + $0xe0] sm:$0xff]  ;;  %v1702_v31 = vadd.f32 %v25646_v52, %v20789_v29  ;;  %v1367_v32 = vpop.f32.mrb[79].mxu0  ;;  %v2373_v34 = vld [vmem:[#allocation3 + $0x110] sm:$0xff] }
 0x19e   : > { %21175 = vmatmul.mubr.msk.f32.gmra.mrb[8].mxu1 %vm1751_vm4, %v25693_v30  ;;  %2296 = vst.msk [vmem:[#allocation3 + $0x120] sm:$0xff] %vm1751_vm4, %v2232_v28  ;;  %v1701_v35 = vadd.f32 %v25646_v52, %v1367_v32  ;;  %v2405_v36 = vmax.f32 %v2340_v33, %v2373_v34  ;;  %v26632_v12 = vld [vmem:[#allocation4 + $0xe1] sm:$0xff] }
 0x19f   : > { %v2015_v38 = vld [vmem:[#allocation2 + $0x250] ss:$2 sm:$0xff]  ;;  %v2143_v39 = vld [vmem:[#allocation2 + $0x251] ss:$2 sm:$0xff]  ;;  %1831 = vst.msk [vmem:[#allocation2 + $0x278] sm:$0xff] %vm1751_vm4, %v1702_v31  ;;  %29439 = vst [vmem:[#allocation25_spill] sm:$0xff] %v26632_v12 }
 0x1a0   : > { %v2233_v41 = vmax.f32 %v2015_v38, %v2143_v39  ;;  %1830 = vst.msk [vmem:[#allocation2 + $0x270] sm:$0xff] %vm1751_vm4, %v1701_v35  ;;  %v20792_v42 = vpop.f32.mrb[80].mxu0  ;;  %2438 = vst.msk [vmem:[#allocation4 + $0xf2] sm:$0xff] %vm1751_vm4, %v2405_v36 }
 0x1a1   : > { %v1704_v43 = vadd.f32 %v25646_v52, %v20792_v42  ;;  %v1377_v44 = vpop.f32.mrb[81].mxu0  ;;  %v2374_v48 = vld [vmem:[#allocation3 + $0x118] sm:$0xff] }
 0x1a2   : > { %2297 = vst.msk [vmem:[#allocation3 + $0x128] sm:$0xff] %vm1751_vm4, %v2233_v41  ;;  %v1703_v49 = vadd.f32 %v25646_v52, %v1377_v44  ;;  %v2406_v7 = vmax.f32 %v2341_v45, %v2374_v48 }
 0x1a3   : > { %v2017_v53 = vld [vmem:[#allocation2 + $0x260] ss:$2 sm:$0xff]  ;;  %v2145_v54 = vld [vmem:[#allocation2 + $0x261] ss:$2 sm:$0xff]  ;;  %1833 = vst.msk [vmem:[#allocation2 + $0x288] sm:$0xff] %vm1751_vm4, %v1704_v43 }
 0x1a4   : > { %v2234_v55 = vmax.f32 %v2017_v53, %v2145_v54  ;;  %1832 = vst.msk [vmem:[#allocation2 + $0x280] sm:$0xff] %vm1751_vm4, %v1703_v49  ;;  %v20795_v56 = vpop.f32.mrb[82].mxu0  ;;  %2439 = vst.msk [vmem:[#allocation4 + $0xfa] sm:$0xff] %vm1751_vm4, %v2406_v7  ;;  %v17892_v53 = vld [vmem:[%s29330_s3 + $0x40] sm:$0xff]  ;;  %v17893_v54 = vld [vmem:[%s29330_s3 + $0x48] sm:$0xff] }
 0x1a5   : > { %v1706_v57 = vadd.f32 %v25646_v52, %v20795_v56  ;;  %v1387_v58 = vpop.f32.mrb[83].mxu0  ;;  %v2342_v16 = vld [vmem:[#allocation3 + $0x120] sm:$0xff] }
 0x1a6   : > { %2298 = vst.msk [vmem:[#allocation3 + $0x130] sm:$0xff] %vm1751_vm4, %v2234_v55  ;;  %v1705_v59 = vadd.f32 %v25646_v52, %v1387_v58 }
 0x1a7   : > { %v2019_v60 = vld [vmem:[#allocation2 + $0x270] ss:$2 sm:$0xff]  ;;  %v2147_v61 = vld [vmem:[#allocation2 + $0x271] ss:$2 sm:$0xff]  ;;  %1835 = vst.msk [vmem:[#allocation2 + $0x298] sm:$0xff] %vm1751_vm4, %v1706_v57  ;;  %v25767_v57 = vpack.c.bf16 %v17893_v54, %v17892_v53 }
 0x1a8   : > { %v25713_v63 = vld [vmem:[#allocation4 + $0xf1] sm:$0xff]  ;;  %v2235_v0 = vmax.f32 %v2019_v60, %v2147_v61  ;;  %1834 = vst.msk [vmem:[#allocation2 + $0x290] sm:$0xff] %vm1751_vm4, %v1705_v59  ;;  %v20798_v1 = vpop.f32.mrb[84].mxu0 }
 0x1a9   : > { %20900 = vmatprep.mubr.msk.f32.mxu0 %vm1751_vm4, %v25713_v63  ;;  %v25718_v2 = vld [vmem:[#allocation4 + $0xf0] sm:$0xff]  ;;  %v1708_v3 = vadd.f32 %v25646_v52, %v20798_v1  ;;  %v1397_v4 = vpop.f32.mrb[85].mxu0  ;;  %v2343_v29 = vld [vmem:[#allocation3 + $0x128] sm:$0xff]  ;;  %23124 = vmatprep.subr.bf16.mxu0 %v25767_v57 }
 0x1aa   : > { %21177 = vmatprep.mubr.msk.f32.mxu1 %vm1751_vm4, %v25718_v2  ;;  %2299 = vst.msk [vmem:[#allocation3 + $0x138] sm:$0xff] %vm1751_vm4, %v2235_v0  ;;  %v1707_v5 = vadd.f32 %v25646_v52, %v1397_v4 }
 0x1ab   : > { %v2021_v6 = vld [vmem:[#allocation2 + $0x280] ss:$2 sm:$0xff]  ;;  %v2149_v8 = vld [vmem:[#allocation2 + $0x281] ss:$2 sm:$0xff]  ;;  %1837 = vst.msk [vmem:[#allocation2 + $0x2a8] sm:$0xff] %vm1751_vm4, %v1708_v3  ;;  %v25731_v13 = vld [vmem:[#allocation4 + $0xf8] sm:$0xff] }
 0x1ac   : > { %v25726_v9 = vld [vmem:[#allocation4 + $0xf9] sm:$0xff]  ;;  %v2236_v10 = vmax.f32 %v2021_v6, %v2149_v8  ;;  %1836 = vst.msk [vmem:[#allocation2 + $0x2a0] sm:$0xff] %vm1751_vm4, %v1707_v5  ;;  %v20801_v11 = vpop.f32.mrb[86].mxu0  ;;  %21178 = vmatmul.mubr.msk.f32.gmra.mrb[10].mxu1 %vm1751_vm4, %v25731_v13 }
 0x1ad   : > { %20901 = vmatmul.mubr.msk.f32.gmra.mrb[148].mxu0 %vm1751_vm4, %v25726_v9  ;;  %v1710_v14 = vadd.f32 %v25646_v52, %v20801_v11  ;;  %v1407_v15 = vpop.f32.mrb[87].mxu0  ;;  %v2375_v17 = vld [vmem:[#allocation3 + $0x130] sm:$0xff] }
 0x1ae   : > { %2300 = vst.msk [vmem:[#allocation3 + $0x140] sm:$0xff] %vm1751_vm4, %v2236_v10  ;;  %v1709_v19 = vadd.f32 %v25646_v52, %v1407_v15  ;;  %v2407_v20 = vmax.f32 %v2342_v16, %v2375_v17 }
 0x1af   : > { %v2023_v22 = vld [vmem:[#allocation2 + $0x290] ss:$2 sm:$0xff]  ;;  %v2151_v23 = vld [vmem:[#allocation2 + $0x291] ss:$2 sm:$0xff]  ;;  %1839 = vst.msk [vmem:[#allocation2 + $0x2b8] sm:$0xff] %vm1751_vm4, %v1710_v14 }
 0x1b0   : > { %v2237_v24 = vmax.f32 %v2023_v22, %v2151_v23  ;;  %1838 = vst.msk [vmem:[#allocation2 + $0x2b0] sm:$0xff] %vm1751_vm4, %v1709_v19  ;;  %v20804_v25 = vpop.f32.mrb[88].mxu0  ;;  %2440 = vst.msk [vmem:[#allocation4 + $0x10a] sm:$0xff] %vm1751_vm4, %v2407_v20 }
 0x1b1   : > { %v1712_v26 = vadd.f32 %v25646_v52, %v20804_v25  ;;  %v1417_v28 = vpop.f32.mrb[89].mxu0  ;;  %v2376_v31 = vld [vmem:[#allocation3 + $0x138] sm:$0xff] }
 0x1b2   : > { %2301 = vst.msk [vmem:[#allocation3 + $0x148] sm:$0xff] %vm1751_vm4, %v2237_v24  ;;  %v1711_v32 = vadd.f32 %v25646_v52, %v1417_v28  ;;  %v2408_v33 = vmax.f32 %v2343_v29, %v2376_v31 }
 0x1b3   : > { %v2025_v34 = vld [vmem:[#allocation2 + $0x2a0] ss:$2 sm:$0xff]  ;;  %v2153_v35 = vld [vmem:[#allocation2 + $0x2a1] ss:$2 sm:$0xff]  ;;  %1841 = vst.msk [vmem:[#allocation2 + $0x2c8] sm:$0xff] %vm1751_vm4, %v1712_v26 }
 0x1b4   : > { %v2238_v36 = vmax.f32 %v2025_v34, %v2153_v35  ;;  %1840 = vst.msk [vmem:[#allocation2 + $0x2c0] sm:$0xff] %vm1751_vm4, %v1711_v32  ;;  %v20807_v38 = vpop.f32.mrb[90].mxu0  ;;  %2441 = vst.msk [vmem:[#allocation4 + $0x112] sm:$0xff] %vm1751_vm4, %v2408_v33 }
 0x1b5   : > { %v1714_v39 = vadd.f32 %v25646_v52, %v20807_v38  ;;  %v1427_v41 = vpop.f32.mrb[91].mxu0  ;;  %v2344_v6 = vld [vmem:[#allocation3 + $0x140] sm:$0xff] }
 0x1b6   : > { %2302 = vst.msk [vmem:[#allocation3 + $0x150] sm:$0xff] %vm1751_vm4, %v2238_v36  ;;  %v1713_v42 = vadd.f32 %v25646_v52, %v1427_v41 }
 0x1b7   : > { %v2027_v43 = vld [vmem:[#allocation2 + $0x2b0] ss:$2 sm:$0xff]  ;;  %v2155_v44 = vld [vmem:[#allocation2 + $0x2b1] ss:$2 sm:$0xff]  ;;  %1843 = vst.msk [vmem:[#allocation2 + $0x2d8] sm:$0xff] %vm1751_vm4, %v1714_v39  ;;  %v25756_v7 = vld [vmem:[#allocation4 + $0x108] sm:$0xff] }
 0x1b8   : > { %v25751_v45 = vld [vmem:[#allocation4 + $0x109] sm:$0xff]  ;;  %v2239_v48 = vmax.f32 %v2027_v43, %v2155_v44  ;;  %1842 = vst.msk [vmem:[#allocation2 + $0x2d0] sm:$0xff] %vm1751_vm4, %v1713_v42  ;;  %v20810_v49 = vpop.f32.mrb[92].mxu0  ;;  %21180 = vmatprep.mubr.msk.f32.mxu1 %vm1751_vm4, %v25756_v7 }
 0x1b9   : > { %20903 = vmatprep.mubr.msk.f32.mxu0 %vm1751_vm4, %v25751_v45  ;;  %v1716_v55 = vadd.f32 %v25646_v52, %v20810_v49  ;;  %v1437_v56 = vpop.f32.mrb[93].mxu0  ;;  %v2345_v22 = vld [vmem:[#allocation3 + $0x148] sm:$0xff] }
 0x1ba   : > { %2303 = vst.msk [vmem:[#allocation3 + $0x158] sm:$0xff] %vm1751_vm4, %v2239_v48  ;;  %v1715_v58 = vadd.f32 %v25646_v52, %v1437_v56 }
 0x1bb   : > { %v2029_v59 = vld [vmem:[#allocation2 + $0x2c0] ss:$2 sm:$0xff]  ;;  %v2157_v60 = vld [vmem:[#allocation2 + $0x2c1] ss:$2 sm:$0xff]  ;;  %1845 = vst.msk [vmem:[#allocation2 + $0x2e8] sm:$0xff] %vm1751_vm4, %v1716_v55  ;;  %v25772_v61 = vld [vmem:[#allocation4 + $0x111] sm:$0xff] }
 0x1bc   : > { %v2240_v0 = vmax.f32 %v2029_v59, %v2157_v60  ;;  %1844 = vst.msk [vmem:[#allocation2 + $0x2e0] sm:$0xff] %vm1751_vm4, %v1715_v58  ;;  %v20813_v1 = vpop.f32.mrb[94].mxu0  ;;  %20904 = vmatmul.mubr.msk.f32.gmra.mrb[150].mxu0 %vm1751_vm4, %v25772_v61  ;;  %v25778_v3 = vld [vmem:[#allocation4 + $0x110] sm:$0xff] }
 0x1bd   : > { %v1718_v4 = vadd.f32 %v25646_v52, %v20813_v1  ;;  %21181 = vmatmul.mubr.msk.f32.gmra.mrb[12].mxu1 %vm1751_vm4, %v25778_v3  ;;  %v1447_v5 = vpop.f32.mrb[95].mxu0  ;;  %v2377_v8 = vld [vmem:[#allocation3 + $0x150] sm:$0xff] }
 0x1be   : > { %2304 = vst.msk [vmem:[#allocation3 + $0x160] sm:$0xff] %vm1751_vm4, %v2240_v0  ;;  %v1717_v10 = vadd.f32 %v25646_v52, %v1447_v5  ;;  %v2409_v11 = vmax.f32 %v2344_v6, %v2377_v8 }
 0x1bf   : > { %v2031_v14 = vld [vmem:[#allocation2 + $0x2d0] ss:$2 sm:$0xff]  ;;  %v2159_v15 = vld [vmem:[#allocation2 + $0x2d1] ss:$2 sm:$0xff]  ;;  %1847 = vst.msk [vmem:[#allocation2 + $0x2f8] sm:$0xff] %vm1751_vm4, %v1718_v4 }
 0x1c0   : > { %v2241_v16 = vmax.f32 %v2031_v14, %v2159_v15  ;;  %1846 = vst.msk [vmem:[#allocation2 + $0x2f0] sm:$0xff] %vm1751_vm4, %v1717_v10  ;;  %v20816_v17 = vpop.f32.mrb[96].mxu0  ;;  %2442 = vst.msk [vmem:[#allocation4 + $0x122] sm:$0xff] %vm1751_vm4, %v2409_v11 }
 0x1c1   : > { %v1720_v19 = vadd.f32 %v25646_v52, %v20816_v17  ;;  %v1457_v20 = vpop.f32.mrb[97].mxu0  ;;  %v2378_v23 = vld [vmem:[#allocation3 + $0x158] sm:$0xff] }
 0x1c2   : > { %2305 = vst.msk [vmem:[#allocation3 + $0x168] sm:$0xff] %vm1751_vm4, %v2241_v16  ;;  %v1719_v24 = vadd.f32 %v25646_v52, %v1457_v20  ;;  %v2410_v25 = vmax.f32 %v2345_v22, %v2378_v23 }
 0x1c3   : > { %v2033_v26 = vld [vmem:[#allocation2 + $0x2e0] ss:$2 sm:$0xff]  ;;  %v2161_v28 = vld [vmem:[#allocation2 + $0x2e1] ss:$2 sm:$0xff]  ;;  %1849 = vst.msk [vmem:[#allocation2 + $0x308] sm:$0xff] %vm1751_vm4, %v1720_v19 }
 0x1c4   : > { %v2242_v29 = vmax.f32 %v2033_v26, %v2161_v28  ;;  %1848 = vst.msk [vmem:[#allocation2 + $0x300] sm:$0xff] %vm1751_vm4, %v1719_v24  ;;  %v20819_v31 = vpop.f32.mrb[98].mxu0  ;;  %2443 = vst.msk [vmem:[#allocation4 + $0x12a] sm:$0xff] %vm1751_vm4, %v2410_v25 }
 0x1c5   : > { %v1722_v32 = vadd.f32 %v25646_v52, %v20819_v31  ;;  %v1467_v33 = vpop.f32.mrb[99].mxu0  ;;  %v2346_v0 = vld [vmem:[#allocation3 + $0x160] sm:$0xff] }
 0x1c6   : > { %2306 = vst.msk [vmem:[#allocation3 + $0x170] sm:$0xff] %vm1751_vm4, %v2242_v29  ;;  %v1721_v34 = vadd.f32 %v25646_v52, %v1467_v33 }
 0x1c7   : > { %v2035_v35 = vld [vmem:[#allocation2 + $0x2f0] ss:$2 sm:$0xff]  ;;  %v2163_v36 = vld [vmem:[#allocation2 + $0x2f1] ss:$2 sm:$0xff]  ;;  %1851 = vst.msk [vmem:[#allocation2 + $0x318] sm:$0xff] %vm1751_vm4, %v1722_v32  ;;  %v25798_v38 = vld [vmem:[#allocation4 + $0x121] sm:$0xff] }
 0x1c8   : > { %v2243_v39 = vmax.f32 %v2035_v35, %v2163_v36  ;;  %1850 = vst.msk [vmem:[#allocation2 + $0x310] sm:$0xff] %vm1751_vm4, %v1721_v34  ;;  %v20822_v41 = vpop.f32.mrb[100].mxu0  ;;  %20906 = vmatprep.mubr.msk.f32.mxu0 %vm1751_vm4, %v25798_v38  ;;  %v25803_v42 = vld [vmem:[#allocation4 + $0x120] sm:$0xff] }
 0x1c9   : > { %v1724_v43 = vadd.f32 %v25646_v52, %v20822_v41  ;;  %21183 = vmatprep.mubr.msk.f32.mxu1 %vm1751_vm4, %v25803_v42  ;;  %v1477_v44 = vpop.f32.mrb[101].mxu0  ;;  %v2347_v16 = vld [vmem:[#allocation3 + $0x168] sm:$0xff] }
 0x1ca   : > { %2307 = vst.msk [vmem:[#allocation3 + $0x178] sm:$0xff] %vm1751_vm4, %v2243_v39  ;;  %v1723_v48 = vadd.f32 %v25646_v52, %v1477_v44 }
 0x1cb   : > { %v2037_v49 = vld [vmem:[#allocation2 + $0x300] ss:$2 sm:$0xff]  ;;  %v2165_v53 = vld [vmem:[#allocation2 + $0x301] ss:$2 sm:$0xff]  ;;  %1853 = vst.msk [vmem:[#allocation2 + $0x328] sm:$0xff] %vm1751_vm4, %v1724_v43 }
 0x1cc   : > { %v25811_v54 = vld [vmem:[#allocation4 + $0x129] sm:$0xff]  ;;  %v2244_v55 = vmax.f32 %v2037_v49, %v2165_v53  ;;  %1852 = vst.msk [vmem:[#allocation2 + $0x320] sm:$0xff] %vm1751_vm4, %v1723_v48  ;;  %v20825_v56 = vpop.f32.mrb[102].mxu0 }
 0x1cd   : > { %20907 = vmatmul.mubr.msk.f32.gmra.mrb[152].mxu0 %vm1751_vm4, %v25811_v54  ;;  %v25816_v58 = vld [vmem:[#allocation4 + $0x128] sm:$0xff]  ;;  %v1726_v59 = vadd.f32 %v25646_v52, %v20825_v56  ;;  %v1487_v60 = vpop.f32.mrb[103].mxu0  ;;  %v2379_v1 = vld [vmem:[#allocation3 + $0x170] sm:$0xff] }
 0x1ce   : > { %21184 = vmatmul.mubr.msk.f32.gmra.mrb[14].mxu1 %vm1751_vm4, %v25816_v58  ;;  %2308 = vst.msk [vmem:[#allocation3 + $0x180] sm:$0xff] %vm1751_vm4, %v2244_v55  ;;  %v1725_v4 = vadd.f32 %v25646_v52, %v1487_v60  ;;  %v2411_v5 = vmax.f32 %v2346_v0, %v2379_v1 }
 0x1cf   : > { %v2039_v6 = vld [vmem:[#allocation2 + $0x310] ss:$2 sm:$0xff]  ;;  %v2167_v8 = vld [vmem:[#allocation2 + $0x311] ss:$2 sm:$0xff]  ;;  %1855 = vst.msk [vmem:[#allocation2 + $0x338] sm:$0xff] %vm1751_vm4, %v1726_v59 }
 0x1d0   : > { %v2245_v10 = vmax.f32 %v2039_v6, %v2167_v8  ;;  %1854 = vst.msk [vmem:[#allocation2 + $0x330] sm:$0xff] %vm1751_vm4, %v1725_v4  ;;  %v20828_v11 = vpop.f32.mrb[104].mxu0  ;;  %2444 = vst.msk [vmem:[#allocation4 + $0x13a] sm:$0xff] %vm1751_vm4, %v2411_v5 }
 0x1d1   : > { %v1728_v14 = vadd.f32 %v25646_v52, %v20828_v11  ;;  %v1497_v15 = vpop.f32.mrb[105].mxu0  ;;  %v2380_v17 = vld [vmem:[#allocation3 + $0x178] sm:$0xff] }
 0x1d2   : > { %2309 = vst.msk [vmem:[#allocation3 + $0x188] sm:$0xff] %vm1751_vm4, %v2245_v10  ;;  %v1727_v19 = vadd.f32 %v25646_v52, %v1497_v15  ;;  %v2412_v20 = vmax.f32 %v2347_v16, %v2380_v17 }
 0x1d3   : > { %v2041_v22 = vld [vmem:[#allocation2 + $0x320] ss:$2 sm:$0xff]  ;;  %v2169_v23 = vld [vmem:[#allocation2 + $0x321] ss:$2 sm:$0xff]  ;;  %1857 = vst.msk [vmem:[#allocation2 + $0x348] sm:$0xff] %vm1751_vm4, %v1728_v14 }
 0x1d4   : > { %v2246_v24 = vmax.f32 %v2041_v22, %v2169_v23  ;;  %1856 = vst.msk [vmem:[#allocation2 + $0x340] sm:$0xff] %vm1751_vm4, %v1727_v19  ;;  %v20831_v25 = vpop.f32.mrb[106].mxu0  ;;  %2445 = vst.msk [vmem:[#allocation4 + $0x142] sm:$0xff] %vm1751_vm4, %v2412_v20 }
 0x1d5   : > { %v1730_v26 = vadd.f32 %v25646_v52, %v20831_v25  ;;  %v1507_v28 = vpop.f32.mrb[107].mxu0  ;;  %v2348_v0 = vld [vmem:[#allocation3 + $0x180] sm:$0xff] }
 0x1d6   : > { %2310 = vst.msk [vmem:[#allocation3 + $0x190] sm:$0xff] %vm1751_vm4, %v2246_v24  ;;  %v1729_v29 = vadd.f32 %v25646_v52, %v1507_v28 }
 0x1d7   : > { %v2043_v31 = vld [vmem:[#allocation2 + $0x330] ss:$2 sm:$0xff]  ;;  %v2171_v32 = vld [vmem:[#allocation2 + $0x331] ss:$2 sm:$0xff]  ;;  %1859 = vst.msk [vmem:[#allocation2 + $0x358] sm:$0xff] %vm1751_vm4, %v1730_v26 }
 0x1d8   : > { %v25836_v33 = vld [vmem:[#allocation4 + $0x139] sm:$0xff]  ;;  %v2247_v34 = vmax.f32 %v2043_v31, %v2171_v32  ;;  %1858 = vst.msk [vmem:[#allocation2 + $0x350] sm:$0xff] %vm1751_vm4, %v1729_v29  ;;  %v20834_v35 = vpop.f32.mrb[108].mxu0 }
 0x1d9   : > { %20909 = vmatprep.mubr.msk.f32.mxu0 %vm1751_vm4, %v25836_v33  ;;  %v25841_v36 = vld [vmem:[#allocation4 + $0x138] sm:$0xff]  ;;  %v1732_v39 = vadd.f32 %v25646_v52, %v20834_v35  ;;  %v1517_v41 = vpop.f32.mrb[109].mxu0  ;;  %v2349_v16 = vld [vmem:[#allocation3 + $0x188] sm:$0xff] }
 0x1da   : > { %21186 = vmatprep.mubr.msk.f32.mxu1 %vm1751_vm4, %v25841_v36  ;;  %2311 = vst.msk [vmem:[#allocation3 + $0x198] sm:$0xff] %vm1751_vm4, %v2247_v34  ;;  %v1731_v43 = vadd.f32 %v25646_v52, %v1517_v41 }
 0x1db   : > { %v2045_v44 = vld [vmem:[#allocation2 + $0x340] ss:$2 sm:$0xff]  ;;  %v2173_v48 = vld [vmem:[#allocation2 + $0x341] ss:$2 sm:$0xff]  ;;  %1861 = vst.msk [vmem:[#allocation2 + $0x368] sm:$0xff] %vm1751_vm4, %v1732_v39 }
 0x1dc   : > { %v25849_v49 = vld [vmem:[#allocation4 + $0x141] sm:$0xff]  ;;  %v2248_v53 = vmax.f32 %v2045_v44, %v2173_v48  ;;  %1860 = vst.msk [vmem:[#allocation2 + $0x360] sm:$0xff] %vm1751_vm4, %v1731_v43  ;;  %v20837_v55 = vpop.f32.mrb[110].mxu0 }
 0x1dd   : > { %20910 = vmatmul.mubr.msk.f32.gmra.mrb[154].mxu0 %vm1751_vm4, %v25849_v49  ;;  %v25854_v56 = vld [vmem:[#allocation4 + $0x140] sm:$0xff]  ;;  %v1734_v59 = vadd.f32 %v25646_v52, %v20837_v55  ;;  %v1527_v60 = vpop.f32.mrb[111].mxu0  ;;  %v2381_v1 = vld [vmem:[#allocation3 + $0x190] sm:$0xff] }
 0x1de   : > { %21187 = vmatmul.mubr.msk.f32.gmra.mrb[16].mxu1 %vm1751_vm4, %v25854_v56  ;;  %2312 = vst.msk [vmem:[#allocation3 + $0x1a0] sm:$0xff] %vm1751_vm4, %v2248_v53  ;;  %v1733_v4 = vadd.f32 %v25646_v52, %v1527_v60  ;;  %v2413_v5 = vmax.f32 %v2348_v0, %v2381_v1 }
 0x1df   : > { %v2047_v6 = vld [vmem:[#allocation2 + $0x350] ss:$2 sm:$0xff]  ;;  %v2175_v8 = vld [vmem:[#allocation2 + $0x351] ss:$2 sm:$0xff]  ;;  %1863 = vst.msk [vmem:[#allocation2 + $0x378] sm:$0xff] %vm1751_vm4, %v1734_v59 }
 0x1e0   : > { %v2249_v10 = vmax.f32 %v2047_v6, %v2175_v8  ;;  %1862 = vst.msk [vmem:[#allocation2 + $0x370] sm:$0xff] %vm1751_vm4, %v1733_v4  ;;  %v20840_v11 = vpop.f32.mrb[112].mxu0  ;;  %2446 = vst.msk [vmem:[#allocation4 + $0x152] sm:$0xff] %vm1751_vm4, %v2413_v5 }
 0x1e1   : > { %v1736_v14 = vadd.f32 %v25646_v52, %v20840_v11  ;;  %v1537_v15 = vpop.f32.mrb[113].mxu0  ;;  %v2382_v17 = vld [vmem:[#allocation3 + $0x198] sm:$0xff] }
 0x1e2   : > { %2313 = vst.msk [vmem:[#allocation3 + $0x1a8] sm:$0xff] %vm1751_vm4, %v2249_v10  ;;  %v1735_v19 = vadd.f32 %v25646_v52, %v1537_v15  ;;  %v2414_v20 = vmax.f32 %v2349_v16, %v2382_v17 }
 0x1e3   : > { %v2049_v22 = vld [vmem:[#allocation2 + $0x360] ss:$2 sm:$0xff]  ;;  %v2177_v23 = vld [vmem:[#allocation2 + $0x361] ss:$2 sm:$0xff]  ;;  %1865 = vst.msk [vmem:[#allocation2 + $0x388] sm:$0xff] %vm1751_vm4, %v1736_v14 }
 0x1e4   : > { %v2250_v24 = vmax.f32 %v2049_v22, %v2177_v23  ;;  %1864 = vst.msk [vmem:[#allocation2 + $0x380] sm:$0xff] %vm1751_vm4, %v1735_v19  ;;  %v20843_v25 = vpop.f32.mrb[114].mxu0  ;;  %2447 = vst.msk [vmem:[#allocation4 + $0x15a] sm:$0xff] %vm1751_vm4, %v2414_v20 }
 0x1e5   : > { %v1738_v26 = vadd.f32 %v25646_v52, %v20843_v25  ;;  %v1547_v28 = vpop.f32.mrb[115].mxu0  ;;  %v2350_v6 = vld [vmem:[#allocation3 + $0x1a0] sm:$0xff] }
 0x1e6   : > { %2314 = vst.msk [vmem:[#allocation3 + $0x1b0] sm:$0xff] %vm1751_vm4, %v2250_v24  ;;  %v1737_v29 = vadd.f32 %v25646_v52, %v1547_v28 }
 0x1e7   : > { %v2051_v31 = vld [vmem:[#allocation2 + $0x370] ss:$2 sm:$0xff]  ;;  %v2179_v32 = vld [vmem:[#allocation2 + $0x371] ss:$2 sm:$0xff]  ;;  %1867 = vst.msk [vmem:[#allocation2 + $0x398] sm:$0xff] %vm1751_vm4, %v1738_v26 }
 0x1e8   : > { %v25874_v34 = vld [vmem:[#allocation4 + $0x151] sm:$0xff]  ;;  %v2251_v35 = vmax.f32 %v2051_v31, %v2179_v32  ;;  %1866 = vst.msk [vmem:[#allocation2 + $0x390] sm:$0xff] %vm1751_vm4, %v1737_v29  ;;  %v20846_v39 = vpop.f32.mrb[116].mxu0  ;;  %v2454_v31 = vld [vmem:[#allocation4] sm:$0xff] }
 0x1e9   : > { %20912 = vmatprep.mubr.msk.f32.mxu0 %vm1751_vm4, %v25874_v34  ;;  %v25879_v41 = vld [vmem:[#allocation4 + $0x150] sm:$0xff]  ;;  %v1740_v43 = vadd.f32 %v25646_v52, %v20846_v39  ;;  %v1557_v44 = vpop.f32.mrb[117].mxu0  ;;  %v2351_v17 = vld [vmem:[#allocation3 + $0x1a8] sm:$0xff] }
 0x1ea   : > { %21189 = vmatprep.mubr.msk.f32.mxu1 %vm1751_vm4, %v25879_v41  ;;  %2315 = vst.msk [vmem:[#allocation3 + $0x1b8] sm:$0xff] %vm1751_vm4, %v2251_v35  ;;  %v1739_v48 = vadd.f32 %v25646_v52, %v1557_v44  ;;  %v17894_v32 = vld [vmem:[%s29330_s3 + $0x50] sm:$0xff]  ;;  %v2455_v44 = vld [vmem:[#allocation4 + $0x8] sm:$0xff] }
 0x1eb   : > { %v2053_v53 = vld [vmem:[#allocation2 + $0x380] ss:$2 sm:$0xff]  ;;  %v2181_v55 = vld [vmem:[#allocation2 + $0x381] ss:$2 sm:$0xff]  ;;  %1869 = vst.msk [vmem:[#allocation2 + $0x3a8] sm:$0xff] %vm1751_vm4, %v1740_v43  ;;  %v25892_v1 = vld [vmem:[#allocation4 + $0x158] sm:$0xff] }
 0x1ec   : > { %v25887_v59 = vld [vmem:[#allocation4 + $0x159] sm:$0xff]  ;;  %v2252_v60 = vmax.f32 %v2053_v53, %v2181_v55  ;;  %1868 = vst.msk [vmem:[#allocation2 + $0x3a0] sm:$0xff] %vm1751_vm4, %v1739_v48  ;;  %v20849_v0 = vpop.f32.mrb[118].mxu0  ;;  %21190 = vmatmul.mubr.msk.f32.gmra.mrb[18].mxu1 %vm1751_vm4, %v25892_v1 }
 0x1ed   : > { %20913 = vmatmul.mubr.msk.f32.gmra.mrb[156].mxu0 %vm1751_vm4, %v25887_v59  ;;  %v1742_v4 = vadd.f32 %v25646_v52, %v20849_v0  ;;  %v1567_v5 = vpop.f32.mrb[119].mxu0  ;;  %v2383_v8 = vld [vmem:[#allocation3 + $0x1b0] sm:$0xff]  ;;  %v17895_v43 = vld [vmem:[%s29330_s3 + $0x58] sm:$0xff] }
 0x1ee   : > { %2316 = vst.msk [vmem:[#allocation3 + $0x1c0] sm:$0xff] %vm1751_vm4, %v2252_v60  ;;  %v1741_v10 = vadd.f32 %v25646_v52, %v1567_v5  ;;  %v2415_v11 = vmax.f32 %v2350_v6, %v2383_v8  ;;  %v2456_v55 = vld [vmem:[#allocation4 + $0x18] sm:$0xff]  ;;  %v23127_v0 = vpack.c.bf16 %v17895_v43, %v17894_v32  ;;  %v17929_v5 = vld [vmem:[%s29330_s3 + $0x68] sm:$0xff]  ;;  %v2457_v6 = vld [vmem:[#allocation4 + $0x20] sm:$0xff] }
 0x1ef   : > { %v2055_v14 = vld [vmem:[#allocation2 + $0x390] ss:$2 sm:$0xff]  ;;  %v2183_v15 = vld [vmem:[#allocation2 + $0x391] ss:$2 sm:$0xff]  ;;  %1871 = vst.msk [vmem:[#allocation2 + $0x3b8] sm:$0xff] %vm1751_vm4, %v1742_v4  ;;  %v17928_v4 = vld [vmem:[%s29330_s3 + $0x60] sm:$0xff] }
 0x1f0   : > { %v2253_v16 = vmax.f32 %v2055_v14, %v2183_v15  ;;  %1870 = vst.msk [vmem:[#allocation2 + $0x3b0] sm:$0xff] %vm1751_vm4, %v1741_v10  ;;  %2448 = vst.msk [vmem:[#allocation4 + $0x16a] sm:$0xff] %vm1751_vm4, %v2415_v11  ;;  %v25939_v14 = vpack.c.bf16 %v17929_v5, %v17928_v4  ;;  %v2458_v15 = vld [vmem:[#allocation4 + $0x30] sm:$0xff]  ;;  %v2464_v32 = vld [vmem:[#allocation4 + $0x78] sm:$0xff] }
 0x1f1   : > { %v2384_v19 = vld [vmem:[#allocation3 + $0x1b8] sm:$0xff]  ;;  %v18108_v43 = vld [vmem:[%s29330_s3 + $0x100] sm:$0xff]  ;;  %v4734_v4 = vld [vmem:[#allocation4 + $0x49] sm:$0xff] }
 0x1f2   : > { %2317 = vst.msk [vmem:[#allocation3 + $0x1c8] sm:$0xff] %vm1751_vm4, %v2253_v16  ;;  %v2416_v20 = vmax.f32 %v2351_v17, %v2384_v19  ;;  %v2459_v16 = vld [vmem:[#allocation4 + $0x38] sm:$0xff]  ;;  %v2461_v19 = vld [vmem:[#allocation4 + $0x50] sm:$0xff] }
 0x1f3   : > { %v2057_v22 = vld [vmem:[#allocation2 + $0x3a0] ss:$2 sm:$0xff]  ;;  %v2185_v23 = vld [vmem:[#allocation2 + $0x3a1] ss:$2 sm:$0xff]  ;;  %v4735_v5 = vld [vmem:[#allocation4 + $0x51] sm:$0xff] }
 0x1f4   : > { %v2254_v24 = vmax.f32 %v2057_v22, %v2185_v23  ;;  %2449 = vst.msk [vmem:[#allocation4 + $0x172] sm:$0xff] %vm1751_vm4, %v2416_v20  ;;  %v4730_v20 = vld [vmem:[#allocation4 + $0x19] sm:$0xff]  ;;  %v18074_v23 = vld [vmem:[%s29330_s3 + $0xf0] sm:$0xff] }
 0x1f5   : > { %v2352_v48 = vld [vmem:[#allocation3 + $0x1c0] sm:$0xff] }
 0x1f6   : > { %2318 = vst.msk [vmem:[#allocation3 + $0x1d0] sm:$0xff] %vm1751_vm4, %v2254_v24  ;;  %v18075_v24 = vld [vmem:[%s29330_s3 + $0xf8] sm:$0xff] }
 0x1f7   : > { %v2059_v52 = vld [vmem:[#allocation2 + $0x3b0] ss:$2 sm:$0xff]  ;;  %v2187_v25 = vld [vmem:[#allocation2 + $0x3b1] ss:$2 sm:$0xff]  ;;  %v25909_v29 = vld [vmem:[#allocation4 + $0x168] sm:$0xff] }
 0x1f8   : > { %v25905_v26 = vld [vmem:[#allocation4 + $0x169] sm:$0xff]  ;;  %v2255_v28 = vmax.f32 %v2059_v52, %v2187_v25  ;;  %21192 = vmatprep.mubr.msk.f32.mxu1 %vm1751_vm4, %v25909_v29  ;;  %v2462_v52 = vld [vmem:[#allocation4 + $0x60] sm:$0xff] }
 0x1f9   : > { %20915 = vmatprep.mubr.msk.f32.mxu0 %vm1751_vm4, %v25905_v26  ;;  %v2353_v8 = vld [vmem:[#allocation3 + $0x1c8] sm:$0xff] }
 0x1fa   : > { %2319 = vst.msk [vmem:[#allocation3 + $0x1d8] sm:$0xff] %vm1751_vm4, %v2255_v28  ;;  %v4731_v25 = vld [vmem:[#allocation4 + $0x21] sm:$0xff]  ;;  %v23167_v28 = vpack.c.bf16 %v18075_v24, %v18074_v23  ;;  %v3189_v23 = vld [vmem:[#allocation4 + $0xf2] sm:$0xff] }
 0x1fb   : > { %v25917_v35 = vld [vmem:[#allocation4 + $0x171] sm:$0xff]  ;;  %v3190_v24 = vld [vmem:[#allocation4 + $0xfa] sm:$0xff] }
 0x1fc   : > { %v25919_v39 = vld [vmem:[#allocation4 + $0x170] sm:$0xff]  ;;  %20916 = vmatmul.mubr.msk.f32.gmra.mrb[158].mxu0 %vm1751_vm4, %v25917_v35 }
 0x1fd   : > { %21193 = vmatmul.mubr.msk.f32.gmra.mrb[20].mxu1 %vm1751_vm4, %v25919_v39  ;;  %20926 = vmatprep.mubr.msk.f32.mxu0 %vm1751_vm4, %v2454_v31  ;;  %v2385_v53 = vld [vmem:[#allocation3 + $0x1d0] sm:$0xff]  ;;  %v2463_v31 = vld [vmem:[#allocation4 + $0x68] sm:$0xff] }
 0x1fe   : > { %v2417_v60 = vmax.f32 %v2352_v48, %v2385_v53  ;;  %v4732_v48 = vld [vmem:[#allocation4 + $0x31] sm:$0xff]  ;;  %v2465_v53 = vld [vmem:[#allocation4 + $0x80] sm:$0xff] }
 0x200   : > { %20927 = vmatmul.mubr.msk.f32.vlgmr.msra.gmra.mrb[128].mxu0 %vm1751_vm4, %v2455_v44  ;;  %2450 = vst.msk [vmem:[#allocation4 + $0x182] sm:$0xff] %vm1751_vm4, %v2417_v60  ;;  %v18109_v44 = vld [vmem:[%s29330_s3 + $0x108] sm:$0xff] }
 0x201   : > { %20929 = vmatprep.mubr.msk.f32.mxu0 %vm1751_vm4, %v2456_v55  ;;  %v2386_v10 = vld [vmem:[#allocation3 + $0x1d8] sm:$0xff]  ;;  %23126 = vmatpush3.bf16.msra.mxu0 %v25767_v57  ;;  %v2460_v57 = vld [vmem:[#allocation4 + $0x48] sm:$0xff]  ;;  %v25969_v60 = vpack.c.bf16 %v18109_v44, %v18108_v43 }
 0x202   : > { %v2418_v11 = vmax.f32 %v2353_v8, %v2386_v10  ;;  %23128 = vmatprep.subr.bf16.mxu0 %v23127_v0  ;;  %v4733_v55 = vld [vmem:[#allocation4 + $0x39] sm:$0xff]  ;;  %v24719_v8 = vld [vmem:[#allocation4 + $0xa8] sm:$0xff] }
 0x203   : > { %v4737_v10 = vld [vmem:[#allocation4 + $0x69] sm:$0xff]  ;;  %v3197_v44 = vld [vmem:[#allocation4 + $0x152] sm:$0xff] }
 0x204   : > { %20930 = vmatmul.mubr.msk.f32.gmra.mrb[130].mxu0 %vm1751_vm4, %v2457_v6  ;;  %2451 = vst.msk [vmem:[#allocation4 + $0x18a] sm:$0xff] %vm1751_vm4, %v2418_v11  ;;  %v4736_v6 = vld [vmem:[#allocation4 + $0x61] sm:$0xff]  ;;  %v24720_v11 = vld [vmem:[#allocation4 + $0xb0] sm:$0xff] }
 0x205   : > { %20932 = vmatprep.mubr.msk.f32.mxu0 %vm1751_vm4, %v2458_v15  ;;  %23130 = vmatpush3.bf16.msra.mxu0 %v23127_v0  ;;  %v2466_v0 = vld [vmem:[#allocation4 + $0x90] sm:$0xff]  ;;  %v4738_v15 = vld [vmem:[#allocation4 + $0x79] sm:$0xff]  ;;  %v3196_v43 = vld [vmem:[#allocation4 + $0x142] sm:$0xff] }
 0x206   : > { %23132 = vmatprep.subr.bf16.mxu0 %v25939_v14 }
 0x207   : > { %v4370_v17 = vld [vmem:[#allocation4 + $0x180] sm:$0xff] }
 0x208   : > { %20933 = vmatmul.mubr.msk.f32.gmra.mrb[132].mxu0 %vm1751_vm4, %v2459_v16  ;;  %21195 = vmatprep.mubr.msk.f32.mxu1 %vm1751_vm4, %v4370_v17  ;;  %v4739_v16 = vld [vmem:[#allocation4 + $0x81] sm:$0xff]  ;;  %v4740_v17 = vld [vmem:[#allocation4 + $0x91] sm:$0xff] }
 0x209   : > { %20935 = vmatprep.mubr.msk.f32.mxu0 %vm1751_vm4, %v2460_v57  ;;  %v4741_v57 = vld [vmem:[#allocation4 + $0x99] sm:$0xff] }
 0x20b   : > { %v4371_v22 = vld [vmem:[#allocation4 + $0x188] sm:$0xff] }
 0x20c   : > { %20936 = vmatmul.mubr.msk.f32.gmra.mrb[134].mxu0 %vm1751_vm4, %v2461_v19  ;;  %21196 = vmatmul.mubr.msk.f32.gmra.mrb[22].mxu1 %vm1751_vm4, %v4371_v22  ;;  %v3186_v19 = vld [vmem:[#allocation4 + $0xca] sm:$0xff]  ;;  %v3188_v22 = vld [vmem:[#allocation4 + $0xe2] sm:$0xff] }
 0x20d   : > { %20938 = vmatprep.mubr.msk.f32.mxu0 %vm1751_vm4, %v2462_v52  ;;  %21206 = vmatprep.mubr.msk.f32.mxu1 %vm1751_vm4, %v4730_v20  ;;  %v3187_v20 = vld [vmem:[#allocation4 + $0xda] sm:$0xff]  ;;  %v3191_v52 = vld [vmem:[#allocation4 + $0x10a] sm:$0xff] }
 0x210   : > { %20939 = vmatmul.mubr.msk.f32.gmra.mrb[136].mxu0 %vm1751_vm4, %v2463_v31  ;;  %21207 = vmatmul.mubr.msk.f32.vlgmr.msra.gmra.mrb[24].mxu1 %vm1751_vm4, %v4731_v25  ;;  %v3192_v25 = vld [vmem:[#allocation4 + $0x112] sm:$0xff]  ;;  %v3194_v31 = vld [vmem:[#allocation4 + $0x12a] sm:$0xff] }
 0x211   : > { %23166 = vmatpush3.bf16.msra.mxu1 %v25660_v62  ;;  %20941 = vmatprep.mubr.msk.f32.mxu0 %vm1751_vm4, %v2464_v32  ;;  %v2467_v62 = vld [vmem:[#allocation4 + $0x98] sm:$0xff] }
 0x212   : > { %21209 = vmatprep.mubr.msk.f32.mxu1 %vm1751_vm4, %v4732_v48  ;;  %23168 = vmatprep.subr.bf16.mxu1 %v23167_v28  ;;  %v3195_v32 = vld [vmem:[#allocation4 + $0x13a] sm:$0xff] }
 0x213   : > { %v3198_v48 = vld [vmem:[#allocation4 + $0x15a] sm:$0xff] }
 0x214   : > { %20942 = vmatmul.mubr.msk.f32.gmra.mrb[138].mxu0 %vm1751_vm4, %v2465_v53  ;;  %21210 = vmatmul.mubr.msk.f32.gmra.mrb[26].mxu1 %vm1751_vm4, %v4733_v55  ;;  %v3199_v53 = vld [vmem:[#allocation4 + $0x16a] sm:$0xff] }
 0x215   : > { %20944 = vmatprep.mubr.msk.f32.mxu0 %vm1751_vm4, %v2466_v0  ;;  %21212 = vmatprep.mubr.msk.f32.mxu1 %vm1751_vm4, %v4734_v4  ;;  %v3559_v55 = vld [vmem:[#allocation4 + $0x3] sm:$0xff]  ;;  %v17966_v0 = vld [vmem:[%s29330_s3 + $0x90] sm:$0xff]  ;;  %v17967_v4 = vld [vmem:[%s29330_s3 + $0x98] sm:$0xff] }
 0x216   : > { %23170 = vmatpush3.bf16.msra.mxu1 %v23167_v28  ;;  %v3193_v28 = vld [vmem:[#allocation4 + $0x122] sm:$0xff] }
 0x217   : > { %23172 = vmatprep.subr.bf16.mxu1 %v25969_v60 }
 0x218   : > { %20945 = vmatmul.mubr.msk.f32.gmra.mrb[140].mxu0 %vm1751_vm4, %v2467_v62  ;;  %21213 = vmatmul.mubr.msk.f32.gmra.mrb[28].mxu1 %vm1751_vm4, %v4735_v5  ;;  %v3560_v62 = vld [vmem:[#allocation4 + $0xb] sm:$0xff]  ;;  %v3561_v5 = vld [vmem:[#allocation4 + $0x1b] sm:$0xff] }
 0x219   : > { %20947 = vmatprep.mubr.msk.f32.mxu0 %vm1751_vm4, %v24719_v8  ;;  %21215 = vmatprep.mubr.msk.f32.mxu1 %vm1751_vm4, %v4736_v6  ;;  %v23143_v6 = vpack.c.bf16 %v17967_v4, %v17966_v0  ;;  %v3562_v8 = vld [vmem:[#allocation4 + $0x23] sm:$0xff]  ;;  %v3582_v4 = vld [vmem:[#allocation4 + $0x113] sm:$0xff] }
 0x21c   : > { %20948 = vmatmul.mubr.msk.f32.gmra.mrb[142].mxu0 %vm1751_vm4, %v24720_v11  ;;  %21216 = vmatmul.mubr.msk.f32.gmra.mrb[30].mxu1 %vm1751_vm4, %v4737_v10  ;;  %v3563_v10 = vld [vmem:[#allocation4 + $0x33] sm:$0xff]  ;;  %v3564_v11 = vld [vmem:[#allocation4 + $0x3b] sm:$0xff] }
 0x21d   : > { %20950 = vmatprep.mubr.msk.f32.mxu0 %vm1751_vm4, %v25628_v40  ;;  %21218 = vmatprep.mubr.msk.f32.mxu1 %vm1751_vm4, %v4738_v15  ;;  %v4742_v40 = vld [vmem:[#allocation4 + $0xa9] sm:$0xff] }
 0x21e   : > { %v3565_v15 = vld [vmem:[#allocation4 + $0x4b] sm:$0xff] }
 0x220   : > { %20951 = vmatmul.mubr.msk.f32.gmra.mrb[144].mxu0 %vm1751_vm4, %v25641_v50  ;;  %21219 = vmatmul.mubr.msk.f32.gmra.mrb[0].mxu1 %vm1751_vm4, %v4739_v16  ;;  %v4743_v50 = vld [vmem:[#allocation4 + $0xb1] sm:$0xff]  ;;  %v5150_v16 = vld [vmem:[#allocation4 + $0x182] sm:$0xff] }
 0x221   : > { %20953 = vmatprep.mubr.msk.f32.mxu0 %vm1751_vm4, %v25680_v21  ;;  %21221 = vmatprep.mubr.msk.f32.mxu1 %vm1751_vm4, %v4740_v17  ;;  %v3170_v21 = vld [vmem:[#allocation4 + $0xa] sm:$0xff]  ;;  %v3566_v17 = vld [vmem:[#allocation4 + $0x53] sm:$0xff] }
 0x224   : > { %20954 = vmatmul.mubr.msk.f32.gmra.mrb[146].mxu0 %vm1751_vm4, %v25693_v30  ;;  %21222 = vmatmul.mubr.msk.f32.gmra.mrb[2].mxu1 %vm1751_vm4, %v4741_v57  ;;  %v5151_v57 = vld [vmem:[#allocation4 + $0x18a] sm:$0xff] }
 0x225   : > { %20956 = vmatprep.mubr.msk.f32.mxu0 %vm1751_vm4, %v25718_v2  ;;  %21224 = vmatprep.mubr.msk.f32.mxu1 %vm1751_vm4, %v4742_v40  ;;  %v17965_v2 = vld [vmem:[%s29330_s3 + $0x88] sm:$0xff]  ;;  %v18146_v40 = vld [vmem:[%s29330_s3 + $0x130] sm:$0xff] }
 0x228   : > { %20957 = vmatmul.mubr.msk.f32.gmra.mrb[148].mxu0 %vm1751_vm4, %v25731_v13  ;;  %21225 = vmatmul.mubr.msk.f32.gmra.mrb[4].mxu1 %vm1751_vm4, %v4743_v50  ;;  %v18147_v50 = vld [vmem:[%s29330_s3 + $0x138] sm:$0xff] }
 0x229   : > { %20959 = vmatprep.mubr.msk.f32.mxu0 %vm1751_vm4, %v25756_v7  ;;  %21227 = vmatprep.mubr.msk.f32.mxu1 %vm1751_vm4, %v25623_v37  ;;  %v3169_v37 = vld [vmem:[#allocation4 + $0x2] sm:$0xff]  ;;  %v3174_v7 = vld [vmem:[#allocation4 + $0x3a] sm:$0xff] }
 0x22c   : > { %20960 = vmatmul.mubr.msk.f32.gmra.mrb[150].mxu0 %vm1751_vm4, %v25778_v3  ;;  %21228 = vmatmul.mubr.msk.f32.gmra.mrb[6].mxu1 %vm1751_vm4, %v25636_v47  ;;  %v17930_v47 = vld [vmem:[%s29330_s3 + $0x70] sm:$0xff]  ;;  %v4760_v3 = vld [vmem:[#allocation4 + $0x181] sm:$0xff] }
 0x22d   : > { %20962 = vmatprep.mubr.msk.f32.mxu0 %vm1751_vm4, %v25803_v42  ;;  %21230 = vmatprep.mubr.msk.f32.mxu1 %vm1751_vm4, %v25675_v18  ;;  %v17931_v18 = vld [vmem:[%s29330_s3 + $0x78] sm:$0xff]  ;;  %v4761_v42 = vld [vmem:[#allocation4 + $0x189] sm:$0xff] }
 0x22e   : > { %v23135_v30 = vpack.c.bf16 %v17931_v18, %v17930_v47  ;;  %v23183_v47 = vpack.c.bf16 %v18147_v50, %v18146_v40  ;;  %v3568_v18 = vld [vmem:[#allocation4 + $0x6b] sm:$0xff] }
 0x22f   : > { %v3949_v40 = vld [vmem:[#allocation4 + $0x4] sm:$0xff] }
 0x230   : > { %20963 = vmatmul.mubr.msk.f32.gmra.mrb[152].mxu0 %vm1751_vm4, %v25816_v58  ;;  %21231 = vmatmul.mubr.msk.f32.gmra.mrb[8].mxu1 %vm1751_vm4, %v25688_v27  ;;  %v3171_v27 = vld [vmem:[#allocation4 + $0x1a] sm:$0xff] }
 0x231   : > { %20965 = vmatprep.mubr.msk.f32.mxu0 %vm1751_vm4, %v25841_v36  ;;  %21233 = vmatprep.mubr.msk.f32.mxu1 %vm1751_vm4, %v25713_v63  ;;  %v17964_v63 = vld [vmem:[%s29330_s3 + $0x80] sm:$0xff]  ;;  %v18111_v58 = vld [vmem:[%s29330_s3 + $0x118] sm:$0xff] }
 0x232   : > { %v26062_v13 = vpack.c.bf16 %v17965_v2, %v17964_v63  ;;  %v3570_v63 = vld [vmem:[#allocation4 + $0x83] sm:$0xff] }
 0x234   : > { %20966 = vmatmul.mubr.msk.f32.gmra.mrb[154].mxu0 %vm1751_vm4, %v25854_v56  ;;  %21234 = vmatmul.mubr.msk.f32.gmra.mrb[10].mxu1 %vm1751_vm4, %v25726_v9  ;;  %v3172_v9 = vld [vmem:[#allocation4 + $0x22] sm:$0xff]  ;;  %v3179_v56 = vld [vmem:[#allocation4 + $0x7a] sm:$0xff] }
 0x235   : > { %20968 = vmatprep.mubr.msk.f32.mxu0 %vm1751_vm4, %v25879_v41  ;;  %21236 = vmatprep.mubr.msk.f32.mxu1 %vm1751_vm4, %v25751_v45  ;;  %v3173_v45 = vld [vmem:[#allocation4 + $0x32] sm:$0xff]  ;;  %v18145_v41 = vld [vmem:[%s29330_s3 + $0x128] sm:$0xff] }
 0x238   : > { %20969 = vmatmul.mubr.msk.f32.gmra.mrb[156].mxu0 %vm1751_vm4, %v25892_v1  ;;  %21237 = vmatmul.mubr.msk.f32.gmra.mrb[12].mxu1 %vm1751_vm4, %v25772_v61  ;;  %v3175_v61 = vld [vmem:[#allocation4 + $0x4a] sm:$0xff] }
 0x239   : > { %20971 = vmatprep.mubr.msk.f32.mxu0 %vm1751_vm4, %v25909_v29  ;;  %21239 = vmatprep.mubr.msk.f32.mxu1 %vm1751_vm4, %v25798_v38  ;;  %v3176_v38 = vld [vmem:[#allocation4 + $0x52] sm:$0xff]  ;;  %v3182_v29 = vld [vmem:[#allocation4 + $0x9a] sm:$0xff] }
 0x23c   : > { %20972 = vmatmul.mubr.msk.f32.gmra.mrb[158].mxu0 %vm1751_vm4, %v25919_v39  ;;  %21240 = vmatmul.mubr.msk.f32.gmra.mrb[14].mxu1 %vm1751_vm4, %v25811_v54  ;;  %v18110_v54 = vld [vmem:[%s29330_s3 + $0x110] sm:$0xff] }
 0x23d   : > { %21242 = vmatprep.mubr.msk.f32.mxu1 %vm1751_vm4, %v25836_v33  ;;  %20982 = vmatprep.mubr.msk.f32.mxu0 %vm1751_vm4, %v3169_v37  ;;  %v3177_v33 = vld [vmem:[#allocation4 + $0x62] sm:$0xff]  ;;  %v23175_v36 = vpack.c.bf16 %v18111_v58, %v18110_v54  ;;  %v3184_v39 = vld [vmem:[#allocation4 + $0xb2] sm:$0xff] }
 0x23e   : > { %v3567_v37 = vld [vmem:[#allocation4 + $0x63] sm:$0xff]  ;;  %v3574_v58 = vld [vmem:[#allocation4 + $0xb3] sm:$0xff] }
 0x240   : > { %20983 = vmatmul.mubr.msk.f32.vlgmr.msra.gmra.mrb[128].mxu0 %vm1751_vm4, %v3170_v21  ;;  %21243 = vmatmul.mubr.msk.f32.gmra.mrb[16].mxu1 %vm1751_vm4, %v25849_v49  ;;  %v3178_v49 = vld [vmem:[#allocation4 + $0x6a] sm:$0xff]  ;;  %v3569_v21 = vld [vmem:[#allocation4 + $0x7b] sm:$0xff] }
 0x241   : > { %21245 = vmatprep.mubr.msk.f32.mxu1 %vm1751_vm4, %v25874_v34  ;;  %20985 = vmatprep.mubr.msk.f32.mxu0 %vm1751_vm4, %v3171_v27  ;;  %v18144_v34 = vld [vmem:[%s29330_s3 + $0x120] sm:$0xff] }
 0x242   : > { %23134 = vmatpush3.bf16.msra.mxu0 %v25939_v14  ;;  %v26097_v1 = vpack.c.bf16 %v18145_v41, %v18144_v34  ;;  %v3185_v14 = vld [vmem:[#allocation4 + $0xc2] sm:$0xff] }
 0x243   : > { %23136 = vmatprep.subr.bf16.mxu0 %v23135_v30 }
 0x244   : > { %20986 = vmatmul.mubr.msk.f32.gmra.mrb[130].mxu0 %vm1751_vm4, %v3172_v9  ;;  %21246 = vmatmul.mubr.msk.f32.gmra.mrb[18].mxu1 %vm1751_vm4, %v25887_v59  ;;  %v3180_v59 = vld [vmem:[#allocation4 + $0x82] sm:$0xff] }
 0x245   : > { %20988 = vmatprep.mubr.msk.f32.mxu0 %vm1751_vm4, %v3173_v45  ;;  %21248 = vmatprep.mubr.msk.f32.mxu1 %vm1751_vm4, %v25905_v26  ;;  %v3181_v26 = vld [vmem:[#allocation4 + $0x92] sm:$0xff] }
 0x246   : > { %23138 = vmatpush3.bf16.msra.mxu0 %v23135_v30  ;;  %v18181_v30 = vld [vmem:[%s29330_s3 + $0x148] sm:$0xff] }
 0x247   : > { %23140 = vmatprep.subr.bf16.mxu0 %v26062_v13 }
 0x248   : > { %20989 = vmatmul.mubr.msk.f32.gmra.mrb[132].mxu0 %vm1751_vm4, %v3174_v7  ;;  %21249 = vmatmul.mubr.msk.f32.gmra.mrb[20].mxu1 %vm1751_vm4, %v25917_v35  ;;  %v3183_v35 = vld [vmem:[#allocation4 + $0xaa] sm:$0xff] }
 0x249   : > { %20991 = vmatprep.mubr.msk.f32.mxu0 %vm1751_vm4, %v3175_v61  ;;  %21251 = vmatprep.mubr.msk.f32.mxu1 %vm1751_vm4, %v4760_v3 }
 0x24c   : > { %20992 = vmatmul.mubr.msk.f32.gmra.mrb[134].mxu0 %vm1751_vm4, %v3176_v38  ;;  %21252 = vmatmul.mubr.msk.f32.gmra.mrb[22].mxu1 %vm1751_vm4, %v4761_v42 }
 0x24d   : > { %20994 = vmatprep.mubr.msk.f32.mxu0 %vm1751_vm4, %v3177_v33  ;;  %21262 = vmatprep.mubr.msk.f32.mxu1 %vm1751_vm4, %v3171_v27  ;;  %v18180_v27 = vld [vmem:[%s29330_s3 + $0x140] sm:$0xff] }
 0x24e   : > { %v26185_v2 = vpack.c.bf16 %v18181_v30, %v18180_v27  ;;  %v3951_v27 = vld [vmem:[#allocation4 + $0x1c] sm:$0xff]  ;;  %v3952_v30 = vld [vmem:[#allocation4 + $0x24] sm:$0xff] }
 0x250   : > { %20995 = vmatmul.mubr.msk.f32.gmra.mrb[136].mxu0 %vm1751_vm4, %v3178_v49  ;;  %21263 = vmatmul.mubr.msk.f32.vlgmr.msra.gmra.mrb[24].mxu1 %vm1751_vm4, %v3172_v9  ;;  %v3571_v9 = vld [vmem:[#allocation4 + $0x93] sm:$0xff] }
 0x251   : > { %23174 = vmatpush3.bf16.msra.mxu1 %v25969_v60  ;;  %20997 = vmatprep.mubr.msk.f32.mxu0 %vm1751_vm4, %v3179_v56  ;;  %v3200_v60 = vld [vmem:[#allocation4 + $0x172] sm:$0xff] }
 0x252   : > { %21265 = vmatprep.mubr.msk.f32.mxu1 %vm1751_vm4, %v3173_v45  ;;  %23176 = vmatprep.subr.bf16.mxu1 %v23175_v36  ;;  %v3573_v45 = vld [vmem:[#allocation4 + $0xab] sm:$0xff] }
 0x254   : > { %20998 = vmatmul.mubr.msk.f32.gmra.mrb[138].mxu0 %vm1751_vm4, %v3180_v59  ;;  %21266 = vmatmul.mubr.msk.f32.gmra.mrb[26].mxu1 %vm1751_vm4, %v3174_v7  ;;  %v20852_v7 = vpop.f32.mrb[120].mxu0 }
 0x255   : > { %21000 = vmatprep.mubr.msk.f32.mxu0 %vm1751_vm4, %v3181_v26  ;;  %21268 = vmatprep.mubr.msk.f32.mxu1 %vm1751_vm4, %v3175_v61  ;;  %v24721_v61 = vld [vmem:[%s29329_s2] ss:$0 sm:$0xff] }
 0x256   : > { %23178 = vmatpush3.bf16.msra.mxu1 %v23175_v36  ;;  %v1744_v3 = vadd.f32 %v24721_v61, %v20852_v7  ;;  %v5541_v7 = vld [vmem:[#allocation4 + $0x18b] sm:$0xff] }
 0x257   : > { %23180 = vmatprep.subr.bf16.mxu1 %v26097_v1 }
 0x258   : > { %21001 = vmatmul.mubr.msk.f32.gmra.mrb[140].mxu0 %vm1751_vm4, %v3182_v29  ;;  %21269 = vmatmul.mubr.msk.f32.gmra.mrb[28].mxu1 %vm1751_vm4, %v3176_v38  ;;  %v1577_v38 = vpop.f32.mrb[121].mxu0  ;;  %1873 = vst.msk [vmem:[#allocation2 + $0x3c8] sm:$0xff] %vm1751_vm4, %v1744_v3  ;;  %v3957_v3 = vld [vmem:[#allocation4 + $0x64] sm:$0xff] }
 0x259   : > { %21003 = vmatprep.mubr.msk.f32.mxu0 %vm1751_vm4, %v3183_v35  ;;  %21271 = vmatprep.mubr.msk.f32.mxu1 %vm1751_vm4, %v3177_v33  ;;  %v1743_v42 = vadd.f32 %v24721_v61, %v1577_v38  ;;  %v20855_v54 = vpop.f32.mrb[122].mxu0 }
 0x25a   : > { %v1746_v33 = vadd.f32 %v24721_v61, %v20855_v54  ;;  %v1587_v36 = vpop.f32.mrb[123].mxu0  ;;  %v3959_v54 = vld [vmem:[#allocation4 + $0x7c] sm:$0xff] }
 0x25b   : > { %1872 = vst.msk [vmem:[#allocation2 + $0x3c0] sm:$0xff] %vm1751_vm4, %v1743_v42  ;;  %v20858_v34 = vpop.f32.mrb[124].mxu0  ;;  %v3958_v42 = vld [vmem:[#allocation4 + $0x6c] sm:$0xff] }
 0x25c   : > { %21004 = vmatmul.mubr.msk.f32.gmra.mrb[142].mxu0 %vm1751_vm4, %v3184_v39  ;;  %21272 = vmatmul.mubr.msk.f32.gmra.mrb[30].mxu1 %vm1751_vm4, %v3178_v49  ;;  %v3575_v49 = vld [vmem:[#allocation4 + $0xc3] sm:$0xff]  ;;  %1875 = vst.msk [vmem:[#allocation2 + $0x3d8] sm:$0xff] %vm1751_vm4, %v1746_v33  ;;  %v1748_v41 = vadd.f32 %v24721_v61, %v20858_v34 }
 0x25d   : > { %21006 = vmatprep.mubr.msk.f32.mxu0 %vm1751_vm4, %v3185_v14  ;;  %21274 = vmatprep.mubr.msk.f32.mxu1 %vm1751_vm4, %v3179_v56  ;;  %v1745_v56 = vadd.f32 %v24721_v61, %v1587_v36  ;;  %v18217_v33 = vld [vmem:[%s29330_s3 + $0x168] sm:$0xff]  ;;  %v3962_v34 = vld [vmem:[#allocation4 + $0x9c] sm:$0xff] }
 0x25e   : > { %1877 = vst.msk [vmem:[#allocation2 + $0x3e8] sm:$0xff] %vm1751_vm4, %v1748_v41  ;;  %v3960_v36 = vld [vmem:[#allocation4 + $0x84] sm:$0xff]  ;;  %v26296_v41 = vld [vmem:[#allocation4 + $0xb4] sm:$0xff] }
 0x25f   : > { %1874 = vst.msk [vmem:[#allocation2 + $0x3d0] sm:$0xff] %vm1751_vm4, %v1745_v56  ;;  %v3961_v56 = vld [vmem:[#allocation4 + $0x94] sm:$0xff] }
 0x260   : > { %21007 = vmatmul.mubr.msk.f32.gmra.mrb[144].mxu0 %vm1751_vm4, %v3186_v19  ;;  %21275 = vmatmul.mubr.msk.f32.gmra.mrb[0].mxu1 %vm1751_vm4, %v3180_v59  ;;  %v1597_v59 = vpop.f32.mrb[125].mxu0 }
 0x261   : > { %21009 = vmatprep.mubr.msk.f32.mxu0 %vm1751_vm4, %v3187_v20  ;;  %21277 = vmatprep.mubr.msk.f32.mxu1 %vm1751_vm4, %v3181_v26  ;;  %v20861_v26 = vpop.f32.mrb[126].mxu0 }
 0x264   : > { %21010 = vmatmul.mubr.msk.f32.gmra.mrb[146].mxu0 %vm1751_vm4, %v3188_v22  ;;  %21278 = vmatmul.mubr.msk.f32.gmra.mrb[2].mxu1 %vm1751_vm4, %v3182_v29  ;;  %v3576_v29 = vld [vmem:[#allocation4 + $0xcb] sm:$0xff] }
 0x265   : > { %21012 = vmatprep.mubr.msk.f32.mxu0 %vm1751_vm4, %v3189_v23  ;;  %21280 = vmatprep.mubr.msk.f32.mxu1 %vm1751_vm4, %v3183_v35  ;;  %v1750_v35 = vadd.f32 %v24721_v61, %v20861_v26  ;;  %v26311_v26 = vld [vmem:[#allocation4 + $0xdc] sm:$0xff] }
 0x267   : > { %1879 = vst.msk [vmem:[#allocation2 + $0x3f8] sm:$0xff] %vm1751_vm4, %v1750_v35  ;;  %v26321_v35 = vld [vmem:[#allocation4 + $0xf4] sm:$0xff] }
 0x268   : > { %21013 = vmatmul.mubr.msk.f32.gmra.mrb[148].mxu0 %vm1751_vm4, %v3190_v24  ;;  %21281 = vmatmul.mubr.msk.f32.gmra.mrb[4].mxu1 %vm1751_vm4, %v3184_v39  ;;  %v1607_v39 = vpop.f32.mrb[127].mxu0 }
 0x269   : > { %21015 = vmatprep.mubr.msk.f32.mxu0 %vm1751_vm4, %v3191_v52  ;;  %21283 = vmatprep.mubr.msk.f32.mxu1 %vm1751_vm4, %v3185_v14  ;;  %v3577_v14 = vld [vmem:[#allocation4 + $0xdb] sm:$0xff] }
 0x26c   : > { %21016 = vmatmul.mubr.msk.f32.gmra.mrb[150].mxu0 %vm1751_vm4, %v3192_v25  ;;  %21284 = vmatmul.mubr.msk.f32.gmra.mrb[6].mxu1 %vm1751_vm4, %v3186_v19  ;;  %v1749_v19 = vadd.f32 %v24721_v61, %v1607_v39  ;;  %v26326_v39 = vld [vmem:[#allocation4 + $0xfc] sm:$0xff] }
 0x26d   : > { %21018 = vmatprep.mubr.msk.f32.mxu0 %vm1751_vm4, %v3193_v28  ;;  %21286 = vmatprep.mubr.msk.f32.mxu1 %vm1751_vm4, %v3187_v20  ;;  %v3578_v20 = vld [vmem:[#allocation4 + $0xe3] sm:$0xff] }
 0x26e   : > { %1878 = vst.msk [vmem:[#allocation2 + $0x3f0] sm:$0xff] %vm1751_vm4, %v1749_v19  ;;  %v26338_v19 = vld [vmem:[#allocation4 + $0x114] sm:$0xff] }
 0x270   : > { %21019 = vmatmul.mubr.msk.f32.gmra.mrb[152].mxu0 %vm1751_vm4, %v3194_v31  ;;  %21287 = vmatmul.mubr.msk.f32.gmra.mrb[8].mxu1 %vm1751_vm4, %v3188_v22  ;;  %v2061_v22 = vld [vmem:[#allocation2 + $0x3c0] ss:$2 sm:$0xff] }
 0x271   : > { %21021 = vmatprep.mubr.msk.f32.mxu0 %vm1751_vm4, %v3195_v32  ;;  %21289 = vmatprep.mubr.msk.f32.mxu1 %vm1751_vm4, %v3189_v23  ;;  %v2189_v23 = vld [vmem:[#allocation2 + $0x3c1] ss:$2 sm:$0xff] }
 0x274   : > { %21022 = vmatmul.mubr.msk.f32.gmra.mrb[154].mxu0 %vm1751_vm4, %v3196_v43  ;;  %21290 = vmatmul.mubr.msk.f32.gmra.mrb[10].mxu1 %vm1751_vm4, %v3190_v24  ;;  %v3579_v24 = vld [vmem:[#allocation4 + $0xf3] sm:$0xff] }
 0x275   : > { %21024 = vmatprep.mubr.msk.f32.mxu0 %vm1751_vm4, %v3197_v44  ;;  %21292 = vmatprep.mubr.msk.f32.mxu1 %vm1751_vm4, %v3191_v52  ;;  %v2256_v52 = vmax.f32 %v2061_v22, %v2189_v23  ;;  %v26350_v22 = vld [vmem:[#allocation4 + $0x12c] sm:$0xff]  ;;  %v26356_v23 = vld [vmem:[#allocation4 + $0x13c] sm:$0xff] }
 0x277   : > { %2320 = vst.msk [vmem:[#allocation3 + $0x1e0] sm:$0xff] %vm1751_vm4, %v2256_v52  ;;  %v26368_v52 = vld [vmem:[#allocation4 + $0x154] sm:$0xff] }
 0x278   : > { %21025 = vmatmul.mubr.msk.f32.gmra.mrb[156].mxu0 %vm1751_vm4, %v3198_v48  ;;  %21293 = vmatmul.mubr.msk.f32.gmra.mrb[12].mxu1 %vm1751_vm4, %v3192_v25  ;;  %v2063_v25 = vld [vmem:[#allocation2 + $0x3d0] ss:$2 sm:$0xff] }
 0x279   : > { %21027 = vmatprep.mubr.msk.f32.mxu0 %vm1751_vm4, %v3199_v53  ;;  %21295 = vmatprep.mubr.msk.f32.mxu1 %vm1751_vm4, %v3193_v28  ;;  %v2191_v28 = vld [vmem:[#allocation2 + $0x3d1] ss:$2 sm:$0xff] }
 0x27c   : > { %21028 = vmatmul.mubr.msk.f32.gmra.mrb[158].mxu0 %vm1751_vm4, %v3200_v60  ;;  %21296 = vmatmul.mubr.msk.f32.gmra.mrb[14].mxu1 %vm1751_vm4, %v3194_v31  ;;  %v2257_v31 = vmax.f32 %v2063_v25, %v2191_v28  ;;  %v26374_v25 = vld [vmem:[#allocation4 + $0x15c] sm:$0xff]  ;;  %v26380_v28 = vld [vmem:[#allocation4 + $0x16c] sm:$0xff] }
 0x27d   : > { %21298 = vmatprep.mubr.msk.f32.mxu1 %vm1751_vm4, %v3195_v32  ;;  %21038 = vmatprep.mubr.msk.f32.mxu0 %vm1751_vm4, %v3559_v55  ;;  %v3580_v32 = vld [vmem:[#allocation4 + $0xfb] sm:$0xff] }
 0x27e   : > { %2321 = vst.msk [vmem:[#allocation3 + $0x1e8] sm:$0xff] %vm1751_vm4, %v2257_v31  ;;  %v2067_v55 = vld [vmem:[#allocation2 + $0x3f0] ss:$2 sm:$0xff] }
 0x27f   : > { %v4340_v31 = vld [vmem:[#allocation4 + $0x18] sm:$0xff] }
 0x280   : > { %21039 = vmatmul.mubr.msk.f32.vlgmr.msra.gmra.mrb[128].mxu0 %vm1751_vm4, %v3560_v62  ;;  %21299 = vmatmul.mubr.msk.f32.gmra.mrb[16].mxu1 %vm1751_vm4, %v3196_v43  ;;  %v3583_v62 = vld [vmem:[#allocation4 + $0x123] sm:$0xff] }
 0x281   : > { %21301 = vmatprep.mubr.msk.f32.mxu1 %vm1751_vm4, %v3197_v44  ;;  %21041 = vmatprep.mubr.msk.f32.mxu0 %vm1751_vm4, %v3561_v5 }
 0x282   : > { %23142 = vmatpush3.bf16.msra.mxu0 %v26062_v13  ;;  %v3572_v13 = vld [vmem:[#allocation4 + $0x9b] sm:$0xff] }
 0x283   : > { %23144 = vmatprep.subr.bf16.mxu0 %v23143_v6 }
 0x284   : > { %21042 = vmatmul.mubr.msk.f32.gmra.mrb[130].mxu0 %vm1751_vm4, %v3562_v8  ;;  %21302 = vmatmul.mubr.msk.f32.gmra.mrb[18].mxu1 %vm1751_vm4, %v3198_v48  ;;  %v3581_v48 = vld [vmem:[#allocation4 + $0x10b] sm:$0xff] }
 0x285   : > { %21044 = vmatprep.mubr.msk.f32.mxu0 %vm1751_vm4, %v3563_v10  ;;  %21304 = vmatprep.mubr.msk.f32.mxu1 %vm1751_vm4, %v3199_v53 }
 0x286   : > { %23146 = vmatpush3.bf16.msra.mxu0 %v23143_v6  ;;  %v3585_v6 = vld [vmem:[#allocation4 + $0x13b] sm:$0xff] }
 0x287   : > { %23148 = vmatprep.subr.bf16.mxu0 %v25293_v46 }
 0x288   : > { %21045 = vmatmul.mubr.msk.f32.gmra.mrb[132].mxu0 %vm1751_vm4, %v3564_v11  ;;  %21305 = vmatmul.mubr.msk.f32.gmra.mrb[20].mxu1 %vm1751_vm4, %v3200_v60  ;;  %v2195_v60 = vld [vmem:[#allocation2 + $0x3f1] ss:$2 sm:$0xff] }
 0x289   : > { %21047 = vmatprep.mubr.msk.f32.mxu0 %vm1751_vm4, %v3565_v15  ;;  %21307 = vmatprep.mubr.msk.f32.mxu1 %vm1751_vm4, %v5150_v16  ;;  %v2259_v0 = vmax.f32 %v2067_v55, %v2195_v60  ;;  %v2354_v16 = vld [vmem:[#allocation3 + $0x1e0] sm:$0xff]  ;;  %v26410_v55 = vld [vmem:[#allocation4 + $0x50] sm:$0xff] }
 0x28a   : > { %v26416_v60 = vld [vmem:[#allocation4 + $0x60] sm:$0xff] }
 0x28b   : > { %2323 = vst.msk [vmem:[#allocation3 + $0x1f8] sm:$0xff] %vm1751_vm4, %v2259_v0  ;;  %v26418_v0 = vld [vmem:[#allocation4 + $0x184] sm:$0xff] }
 0x28c   : > { %21048 = vmatmul.mubr.msk.f32.gmra.mrb[134].mxu0 %vm1751_vm4, %v3566_v17  ;;  %21308 = vmatmul.mubr.msk.f32.gmra.mrb[22].mxu1 %vm1751_vm4, %v5151_v57  ;;  %v2355_v57 = vld [vmem:[#allocation3 + $0x1e8] sm:$0xff] }
 0x28d   : > { %21050 = vmatprep.mubr.msk.f32.mxu0 %vm1751_vm4, %v3567_v37  ;;  %21318 = vmatprep.mubr.msk.f32.mxu1 %vm1751_vm4, %v3561_v5  ;;  %v3584_v5 = vld [vmem:[#allocation4 + $0x12b] sm:$0xff] }
 0x290   : > { %21051 = vmatmul.mubr.msk.f32.gmra.mrb[136].mxu0 %vm1751_vm4, %v3568_v18  ;;  %21319 = vmatmul.mubr.msk.f32.vlgmr.msra.gmra.mrb[24].mxu1 %vm1751_vm4, %v3562_v8  ;;  %v3586_v8 = vld [vmem:[#allocation4 + $0x143] sm:$0xff] }
 0x291   : > { %23182 = vmatpush3.bf16.msra.mxu1 %v26097_v1  ;;  %21053 = vmatprep.mubr.msk.f32.mxu0 %vm1751_vm4, %v3569_v21  ;;  %v1747_v1 = vadd.f32 %v24721_v61, %v1597_v59  ;;  %v18182_v61 = vld [vmem:[%s29330_s3 + $0x150] sm:$0xff]  ;;  %v26301_v59 = vld [vmem:[#allocation4 + $0xc4] sm:$0xff] }
 0x292   : > { %21321 = vmatprep.mubr.msk.f32.mxu1 %vm1751_vm4, %v3563_v10  ;;  %23184 = vmatprep.subr.bf16.mxu1 %v23183_v47  ;;  %v3587_v10 = vld [vmem:[#allocation4 + $0x153] sm:$0xff] }
 0x293   : > { %1876 = vst.msk [vmem:[#allocation2 + $0x3e0] sm:$0xff] %vm1751_vm4, %v1747_v1  ;;  %v26306_v1 = vld [vmem:[#allocation4 + $0xcc] sm:$0xff] }
 0x294   : > { %21054 = vmatmul.mubr.msk.f32.gmra.mrb[138].mxu0 %vm1751_vm4, %v3570_v63  ;;  %21322 = vmatmul.mubr.msk.f32.gmra.mrb[26].mxu1 %vm1751_vm4, %v3564_v11  ;;  %v3588_v11 = vld [vmem:[#allocation4 + $0x15b] sm:$0xff] }
 0x295   : > { %21056 = vmatprep.mubr.msk.f32.mxu0 %vm1751_vm4, %v3571_v9  ;;  %21324 = vmatprep.mubr.msk.f32.mxu1 %vm1751_vm4, %v3565_v15  ;;  %v3589_v15 = vld [vmem:[#allocation4 + $0x16b] sm:$0xff] }
 0x296   : > { %23186 = vmatpush3.bf16.msra.mxu1 %v23183_v47  ;;  %v3590_v47 = vld [vmem:[#allocation4 + $0x173] sm:$0xff] }
 0x297   : > { %23188 = vmatprep.subr.bf16.mxu1 %v26185_v2 }
 0x298   : > { %21057 = vmatmul.mubr.msk.f32.gmra.mrb[140].mxu0 %vm1751_vm4, %v3572_v13  ;;  %21325 = vmatmul.mubr.msk.f32.gmra.mrb[28].mxu1 %vm1751_vm4, %v3566_v17 }
 0x299   : > { %21059 = vmatprep.mubr.msk.f32.mxu0 %vm1751_vm4, %v3573_v45  ;;  %21327 = vmatprep.mubr.msk.f32.mxu1 %vm1751_vm4, %v3567_v37  ;;  %v2388_v37 = vld [vmem:[#allocation3 + $0x1f8] sm:$0xff] }
 0x29a   : > { %v2065_v43 = vld [vmem:[#allocation2 + $0x3e0] ss:$2 sm:$0xff]  ;;  %v2193_v44 = vld [vmem:[#allocation2 + $0x3e1] ss:$2 sm:$0xff] }
 0x29b   : > { %v2258_v53 = vmax.f32 %v2065_v43, %v2193_v44  ;;  %v4341_v43 = vld [vmem:[#allocation4 + $0x20] sm:$0xff]  ;;  %v4342_v44 = vld [vmem:[#allocation4 + $0x30] sm:$0xff] }
 0x29c   : > { %21060 = vmatmul.mubr.msk.f32.gmra.mrb[142].mxu0 %vm1751_vm4, %v3574_v58  ;;  %21328 = vmatmul.mubr.msk.f32.gmra.mrb[30].mxu1 %vm1751_vm4, %v3568_v18  ;;  %v2420_v18 = vmax.f32 %v2355_v57, %v2388_v37  ;;  %v26466_v57 = vld [vmem:[#allocation4 + $0x90] sm:$0xff] }
 0x29d   : > { %21062 = vmatprep.mubr.msk.f32.mxu0 %vm1751_vm4, %v3575_v49  ;;  %21330 = vmatprep.mubr.msk.f32.mxu1 %vm1751_vm4, %v3569_v21  ;;  %2322 = vst.msk [vmem:[#allocation3 + $0x1f0] sm:$0xff] %vm1751_vm4, %v2258_v53  ;;  %v3950_v21 = vld [vmem:[#allocation4 + $0xc] sm:$0xff] }
 0x29e   : > { %2453 = vst.msk [vmem:[#allocation4 + $0x1a2] sm:$0xff] %vm1751_vm4, %v2420_v18  ;;  %v26404_v53 = vld [vmem:[#allocation4 + $0x48] sm:$0xff]  ;;  %v26478_v37 = vld [vmem:[#allocation4 + $0xb0] sm:$0xff] }
 0x29f   : > { %v26486_v18 = vld [vmem:[#allocation4 + $0xc8] sm:$0xff] }
 0x2a0   : > { %21063 = vmatmul.mubr.msk.f32.gmra.mrb[144].mxu0 %vm1751_vm4, %v3576_v29  ;;  %21331 = vmatmul.mubr.msk.f32.gmra.mrb[0].mxu1 %vm1751_vm4, %v3570_v63  ;;  %v3953_v63 = vld [vmem:[#allocation4 + $0x34] sm:$0xff] }
 0x2a1   : > { %21065 = vmatprep.mubr.msk.f32.mxu0 %vm1751_vm4, %v3577_v14  ;;  %21333 = vmatprep.mubr.msk.f32.mxu1 %vm1751_vm4, %v3571_v9  ;;  %v3954_v9 = vld [vmem:[#allocation4 + $0x3c] sm:$0xff] }
 0x2a4   : > { %21066 = vmatmul.mubr.msk.f32.gmra.mrb[146].mxu0 %vm1751_vm4, %v3578_v20  ;;  %21334 = vmatmul.mubr.msk.f32.gmra.mrb[2].mxu1 %vm1751_vm4, %v3572_v13  ;;  %v2387_v17 = vld [vmem:[#allocation3 + $0x1f0] sm:$0xff] }
 0x2a5   : > { %21068 = vmatprep.mubr.msk.f32.mxu0 %vm1751_vm4, %v3579_v24  ;;  %21336 = vmatprep.mubr.msk.f32.mxu1 %vm1751_vm4, %v3573_v45  ;;  %v2419_v50 = vmax.f32 %v2354_v16, %v2387_v17  ;;  %v3955_v13 = vld [vmem:[#allocation4 + $0x4c] sm:$0xff]  ;;  %v3956_v45 = vld [vmem:[#allocation4 + $0x54] sm:$0xff]  ;;  %v26462_v17 = vld [vmem:[#allocation4 + $0x80] sm:$0xff] }
 0x2a6   : > { %v26458_v16 = vld [vmem:[#allocation4 + $0x78] sm:$0xff] }
 0x2a7   : > { %2452 = vst.msk [vmem:[#allocation4 + $0x19a] sm:$0xff] %vm1751_vm4, %v2419_v50  ;;  %v26474_v50 = vld [vmem:[#allocation4 + $0xa8] sm:$0xff] }
 0x2a8   : > { %21069 = vmatmul.mubr.msk.f32.gmra.mrb[148].mxu0 %vm1751_vm4, %v3580_v32  ;;  %21337 = vmatmul.mubr.msk.f32.gmra.mrb[4].mxu1 %vm1751_vm4, %v3574_v58  ;;  %v18216_v58 = vld [vmem:[%s29330_s3 + $0x160] sm:$0xff] }
 0x2a9   : > { %21071 = vmatprep.mubr.msk.f32.mxu0 %vm1751_vm4, %v3581_v48  ;;  %21339 = vmatprep.mubr.msk.f32.mxu1 %vm1751_vm4, %v3575_v49  ;;  %v26285_v49 = vpack.c.bf16 %v18217_v33, %v18216_v58  ;;  %v26550_v58 = vld [vmem:[#allocation4 + $0x188] sm:$0xff] }
 0x2ac   : > { %21072 = vmatmul.mubr.msk.f32.gmra.mrb[150].mxu0 %vm1751_vm4, %v3582_v4  ;;  %21340 = vmatmul.mubr.msk.f32.gmra.mrb[6].mxu1 %vm1751_vm4, %v3576_v29  ;;  %v26316_v29 = vld [vmem:[#allocation4 + $0xe4] sm:$0xff] }
 0x2ad   : > { %21074 = vmatprep.mubr.msk.f32.mxu0 %vm1751_vm4, %v3583_v62  ;;  %21342 = vmatprep.mubr.msk.f32.mxu1 %vm1751_vm4, %v3577_v14  ;;  %v26332_v14 = vld [vmem:[#allocation4 + $0x10c] sm:$0xff] }
 0x2ae   : > { %v26554_v33 = vld [vmem:[#allocation4 + $0x198] sm:$0xff] }
 0x2b0   : > { %21075 = vmatmul.mubr.msk.f32.gmra.mrb[152].mxu0 %vm1751_vm4, %v3584_v5  ;;  %21343 = vmatmul.mubr.msk.f32.gmra.mrb[8].mxu1 %vm1751_vm4, %v3578_v20  ;;  %v26344_v20 = vld [vmem:[#allocation4 + $0x124] sm:$0xff] }
 0x2b1   : > { %21077 = vmatprep.mubr.msk.f32.mxu0 %vm1751_vm4, %v3585_v6  ;;  %21345 = vmatprep.mubr.msk.f32.mxu1 %vm1751_vm4, %v3579_v24  ;;  %v26362_v24 = vld [vmem:[#allocation4 + $0x144] sm:$0xff] }
 0x2b4   : > { %21078 = vmatmul.mubr.msk.f32.gmra.mrb[154].mxu0 %vm1751_vm4, %v3586_v8  ;;  %21346 = vmatmul.mubr.msk.f32.gmra.mrb[10].mxu1 %vm1751_vm4, %v3580_v32  ;;  %v26386_v32 = vld [vmem:[#allocation4 + $0x174] sm:$0xff] }
 0x2b5   : > { %21080 = vmatprep.mubr.msk.f32.mxu0 %vm1751_vm4, %v3587_v10  ;;  %21348 = vmatprep.mubr.msk.f32.mxu1 %vm1751_vm4, %v3581_v48  ;;  %v4343_v48 = vld [vmem:[#allocation4 + $0x38] sm:$0xff] }
 0x2b8   : > { %21081 = vmatmul.mubr.msk.f32.gmra.mrb[156].mxu0 %vm1751_vm4, %v3588_v11  ;;  %21349 = vmatmul.mubr.msk.f32.gmra.mrb[12].mxu1 %vm1751_vm4, %v3582_v4  ;;  %v26424_v4 = vld [vmem:[#allocation4 + $0x68] sm:$0xff] }
 0x2b9   : > { %21083 = vmatprep.mubr.msk.f32.mxu0 %vm1751_vm4, %v3589_v15  ;;  %21351 = vmatprep.mubr.msk.f32.mxu1 %vm1751_vm4, %v3583_v62  ;;  %v26426_v62 = vld [vmem:[#allocation4 + $0x18c] sm:$0xff] }
 0x2bc   : > { %21084 = vmatmul.mubr.msk.f32.gmra.mrb[158].mxu0 %vm1751_vm4, %v3590_v47  ;;  %21352 = vmatmul.mubr.msk.f32.gmra.mrb[14].mxu1 %vm1751_vm4, %v3584_v5  ;;  %v18218_v5 = vld [vmem:[%s29330_s3 + $0x170] sm:$0xff] }
 0x2bd   : > { %21354 = vmatprep.mubr.msk.f32.mxu1 %vm1751_vm4, %v3585_v6  ;;  %21094 = vmatprep.mubr.msk.f32.mxu0 %vm1751_vm4, %v3949_v40  ;;  %v18219_v6 = vld [vmem:[%s29330_s3 + $0x178] sm:$0xff] }
 0x2be   : > { %v26470_v40 = vld [vmem:[#allocation4 + $0x98] sm:$0xff] }
 0x2c0   : > { %21095 = vmatmul.mubr.msk.f32.vlgmr.msra.gmra.mrb[128].mxu0 %vm1751_vm4, %v3950_v21  ;;  %21355 = vmatmul.mubr.msk.f32.gmra.mrb[16].mxu1 %vm1751_vm4, %v3586_v8  ;;  %v23199_v8 = vpack.c.bf16 %v18219_v6, %v18218_v5  ;;  %v26490_v21 = vld [vmem:[#allocation4 + $0xd8] sm:$0xff] }
 0x2c1   : > { %21357 = vmatprep.mubr.msk.f32.mxu1 %vm1751_vm4, %v3587_v10  ;;  %21097 = vmatprep.mubr.msk.f32.mxu0 %vm1751_vm4, %v3951_v27  ;;  %v18252_v10 = vld [vmem:[%s29330_s3 + $0x180] sm:$0xff]  ;;  %v26583_v6 = vld [vmem:[#allocation4 + $0x51] sm:$0xff] }
 0x2c2   : > { %23150 = vmatpush3.bf16.msra.mxu0 %v25293_v46  ;;  %v5540_v46 = vld [vmem:[#allocation4 + $0x183] sm:$0xff] }
 0x2c3   : > { %23152 = vmatprep.subr.bf16.mxu0 %v25307_v51 }
 0x2c4   : > { %21098 = vmatmul.mubr.msk.f32.gmra.mrb[130].mxu0 %vm1751_vm4, %v3952_v30  ;;  %21358 = vmatmul.mubr.msk.f32.gmra.mrb[18].mxu1 %vm1751_vm4, %v3588_v11  ;;  %v18253_v11 = vld [vmem:[%s29330_s3 + $0x188] sm:$0xff] }
 0x2c5   : > { %21100 = vmatprep.mubr.msk.f32.mxu0 %vm1751_vm4, %v3953_v63  ;;  %21360 = vmatprep.mubr.msk.f32.mxu1 %vm1751_vm4, %v3589_v15  ;;  %v26449_v15 = vpack.c.bf16 %v18253_v11, %v18252_v10  ;;  %v26592_v10 = vld [vmem:[#allocation4 + $0x69] sm:$0xff]  ;;  %v26596_v11 = vld [vmem:[#allocation4 + $0x79] sm:$0xff] }
 0x2c6   : > { %23154 = vmatpush3.bf16.msra.mxu0 %v25307_v51  ;;  %v18183_v51 = vld [vmem:[%s29330_s3 + $0x158] sm:$0xff]  ;;  %29429 = vst [vmem:[#allocation15_spill] sm:$0xff] %v26592_v10  ;;  %29430 = vst [vmem:[#allocation16_spill] sm:$0xff] %v26596_v11 }
 0x2c7   : > { %v23191_v38 = vpack.c.bf16 %v18183_v51, %v18182_v61  ;;  %v26526_v61 = vld [vmem:[#allocation4 + $0x140] sm:$0xff]  ;;  %v26530_v51 = vld [vmem:[#allocation4 + $0x150] sm:$0xff] }
 0x2c8   : > { %21101 = vmatmul.mubr.msk.f32.gmra.mrb[132].mxu0 %vm1751_vm4, %v3954_v9  ;;  %21361 = vmatmul.mubr.msk.f32.gmra.mrb[20].mxu1 %vm1751_vm4, %v3590_v47  ;;  %v26482_v47 = vld [vmem:[#allocation4 + $0xc0] sm:$0xff] }
 0x2c9   : > { %21103 = vmatprep.mubr.msk.f32.mxu0 %vm1751_vm4, %v3955_v13  ;;  %21363 = vmatprep.mubr.msk.f32.mxu1 %vm1751_vm4, %v5540_v46  ;;  %v26514_v46 = vld [vmem:[#allocation4 + $0x120] sm:$0xff] }
 0x2cc   : > { %21104 = vmatmul.mubr.msk.f32.gmra.mrb[134].mxu0 %vm1751_vm4, %v3956_v45  ;;  %21364 = vmatmul.mubr.msk.f32.gmra.mrb[22].mxu1 %vm1751_vm4, %v5541_v7  ;;  %v26522_v7 = vld [vmem:[#allocation4 + $0x138] sm:$0xff] }
 0x2cd   : > { %21106 = vmatprep.mubr.msk.f32.mxu0 %vm1751_vm4, %v3957_v3  ;;  %21374 = vmatprep.mubr.msk.f32.mxu1 %vm1751_vm4, %v3951_v27  ;;  %v26494_v27 = vld [vmem:[#allocation4 + $0xe0] sm:$0xff] }
 0x2d0   : > { %21107 = vmatmul.mubr.msk.f32.gmra.mrb[136].mxu0 %vm1751_vm4, %v3958_v42  ;;  %21375 = vmatmul.mubr.msk.f32.vlgmr.msra.gmra.mrb[24].mxu1 %vm1751_vm4, %v3952_v30  ;;  %v26498_v30 = vld [vmem:[#allocation4 + $0xf0] sm:$0xff] }
 0x2d1   : > { %23190 = vmatpush3.bf16.msra.mxu1 %v26185_v2  ;;  %21109 = vmatprep.mubr.msk.f32.mxu0 %vm1751_vm4, %v3959_v54  ;;  %v3963_v2 = vld [vmem:[#allocation4 + $0xac] sm:$0xff] }
 0x2d2   : > { %21377 = vmatprep.mubr.msk.f32.mxu1 %vm1751_vm4, %v3953_v63  ;;  %23192 = vmatprep.subr.bf16.mxu1 %v23191_v38  ;;  %v26502_v63 = vld [vmem:[#allocation4 + $0xf8] sm:$0xff] }
 0x2d4   : > { %21110 = vmatmul.mubr.msk.f32.gmra.mrb[138].mxu0 %vm1751_vm4, %v3960_v36  ;;  %21378 = vmatmul.mubr.msk.f32.gmra.mrb[26].mxu1 %vm1751_vm4, %v3954_v9  ;;  %v26506_v9 = vld [vmem:[#allocation4 + $0x108] sm:$0xff] }
 0x2d5   : > { %21112 = vmatprep.mubr.msk.f32.mxu0 %vm1751_vm4, %v3961_v56  ;;  %21380 = vmatprep.mubr.msk.f32.mxu1 %vm1751_vm4, %v3955_v13  ;;  %v26510_v13 = vld [vmem:[#allocation4 + $0x110] sm:$0xff] }
 0x2d6   : > { %23194 = vmatpush3.bf16.msra.mxu1 %v23191_v38  ;;  %v26538_v38 = vld [vmem:[#allocation4 + $0x168] sm:$0xff] }
 0x2d7   : > { %23196 = vmatprep.subr.bf16.mxu1 %v26285_v49 }
 0x2d8   : > { %21113 = vmatmul.mubr.msk.f32.gmra.mrb[140].mxu0 %vm1751_vm4, %v3962_v34  ;;  %21381 = vmatmul.mubr.msk.f32.gmra.mrb[28].mxu1 %vm1751_vm4, %v3956_v45  ;;  %v26518_v45 = vld [vmem:[#allocation4 + $0x128] sm:$0xff] }
 0x2d9   : > { %21115 = vmatprep.mubr.msk.f32.mxu0 %vm1751_vm4, %v3963_v2  ;;  %21383 = vmatprep.mubr.msk.f32.mxu1 %vm1751_vm4, %v3957_v3  ;;  %v26534_v3 = vld [vmem:[#allocation4 + $0x158] sm:$0xff] }
 0x2dc   : > { %21116 = vmatmul.mubr.msk.f32.gmra.mrb[142].mxu0 %vm1751_vm4, %v26296_v41  ;;  %21384 = vmatmul.mubr.msk.f32.gmra.mrb[30].mxu1 %vm1751_vm4, %v3958_v42  ;;  %v26542_v42 = vld [vmem:[#allocation4 + $0x170] sm:$0xff] }
 0x2dd   : > { %21118 = vmatprep.mubr.msk.f32.mxu0 %vm1751_vm4, %v26301_v59  ;;  %21386 = vmatprep.mubr.msk.f32.mxu1 %vm1751_vm4, %v3959_v54  ;;  %v26546_v54 = vld [vmem:[#allocation4 + $0x180] sm:$0xff] }
 0x2e0   : > { %21119 = vmatmul.mubr.msk.f32.gmra.mrb[144].mxu0 %vm1751_vm4, %v26306_v1  ;;  %21387 = vmatmul.mubr.msk.f32.gmra.mrb[0].mxu1 %vm1751_vm4, %v3960_v36  ;;  %v26558_v36 = vld [vmem:[#allocation4 + $0x1a0] sm:$0xff] }
 0x2e1   : > { %21121 = vmatprep.mubr.msk.f32.mxu0 %vm1751_vm4, %v26311_v26  ;;  %21389 = vmatprep.mubr.msk.f32.mxu1 %vm1751_vm4, %v3961_v56  ;;  %v18255_v56 = vld [vmem:[%s29330_s3 + $0x198] sm:$0xff] }
 0x2e4   : > { %21122 = vmatmul.mubr.msk.f32.gmra.mrb[146].mxu0 %vm1751_vm4, %v26316_v29  ;;  %21390 = vmatmul.mubr.msk.f32.gmra.mrb[2].mxu1 %vm1751_vm4, %v3962_v34  ;;  %v6680_v34 = vld [vmem:[#allocation4 + $0x31] sm:$0xff] }
 0x2e5   : > { %21124 = vmatprep.mubr.msk.f32.mxu0 %vm1751_vm4, %v26321_v35  ;;  %21392 = vmatprep.mubr.msk.f32.mxu1 %vm1751_vm4, %v3963_v2 }
 0x2e8   : > { %21125 = vmatmul.mubr.msk.f32.gmra.mrb[148].mxu0 %vm1751_vm4, %v26326_v39  ;;  %21393 = vmatmul.mubr.msk.f32.gmra.mrb[4].mxu1 %vm1751_vm4, %v26296_v41 }
 0x2e9   : > { %21127 = vmatprep.mubr.msk.f32.mxu0 %vm1751_vm4, %v26332_v14  ;;  %21395 = vmatprep.mubr.msk.f32.mxu1 %vm1751_vm4, %v26301_v59 }
 0x2ec   : > { %21128 = vmatmul.mubr.msk.f32.gmra.mrb[150].mxu0 %vm1751_vm4, %v26338_v19  ;;  %21396 = vmatmul.mubr.msk.f32.gmra.mrb[6].mxu1 %vm1751_vm4, %v26306_v1 }
 0x2ed   : > { %21130 = vmatprep.mubr.msk.f32.mxu0 %vm1751_vm4, %v26344_v20  ;;  %21398 = vmatprep.mubr.msk.f32.mxu1 %vm1751_vm4, %v26311_v26 }
 0x2f0   : > { %21131 = vmatmul.mubr.msk.f32.gmra.mrb[152].mxu0 %vm1751_vm4, %v26350_v22  ;;  %21399 = vmatmul.mubr.msk.f32.gmra.mrb[8].mxu1 %vm1751_vm4, %v26316_v29 }
 0x2f1   : > { %21133 = vmatprep.mubr.msk.f32.mxu0 %vm1751_vm4, %v26356_v23  ;;  %21401 = vmatprep.mubr.msk.f32.mxu1 %vm1751_vm4, %v26321_v35 }
 0x2f4   : > { %21134 = vmatmul.mubr.msk.f32.gmra.mrb[154].mxu0 %vm1751_vm4, %v26362_v24  ;;  %21402 = vmatmul.mubr.msk.f32.gmra.mrb[10].mxu1 %vm1751_vm4, %v26326_v39 }
 0x2f5   : > { %21136 = vmatprep.mubr.msk.f32.mxu0 %vm1751_vm4, %v26368_v52  ;;  %21404 = vmatprep.mubr.msk.f32.mxu1 %vm1751_vm4, %v26332_v14 }
 0x2f8   : > { %21137 = vmatmul.mubr.msk.f32.gmra.mrb[156].mxu0 %vm1751_vm4, %v26374_v25  ;;  %21405 = vmatmul.mubr.msk.f32.gmra.mrb[12].mxu1 %vm1751_vm4, %v26338_v19 }
 0x2f9   : > { %21139 = vmatprep.mubr.msk.f32.mxu0 %vm1751_vm4, %v26380_v28  ;;  %21407 = vmatprep.mubr.msk.f32.mxu1 %vm1751_vm4, %v26344_v20 }
 0x2fc   : > { %21140 = vmatmul.mubr.msk.f32.gmra.mrb[158].mxu0 %vm1751_vm4, %v26386_v32  ;;  %21408 = vmatmul.mubr.msk.f32.gmra.mrb[14].mxu1 %vm1751_vm4, %v26350_v22 }
 0x2fd   : > { %21410 = vmatprep.mubr.msk.f32.mxu1 %vm1751_vm4, %v26356_v23  ;;  %21150 = vmatprep.mubr.msk.f32.mxu0 %vm1751_vm4, %v4340_v31  ;;  %v6681_v31 = vld [vmem:[#allocation4 + $0x39] sm:$0xff] }
 0x300   : > { %21151 = vmatmul.mubr.msk.f32.vlgmr.msra.gmra.mrb[128].mxu0 %vm1751_vm4, %v4341_v43  ;;  %21411 = vmatmul.mubr.msk.f32.gmra.mrb[16].mxu1 %vm1751_vm4, %v26362_v24  ;;  %v18288_v43 = vld [vmem:[%s29330_s3 + $0x1a0] sm:$0xff] }
 0x301   : > { %21153 = vmatprep.mubr.msk.f32.mxu0 %vm1751_vm4, %v4342_v44  ;;  %21413 = vmatprep.mubr.msk.f32.mxu1 %vm1751_vm4, %v26368_v52 }
 0x304   : > { %21154 = vmatmul.mubr.msk.f32.gmra.mrb[130].mxu0 %vm1751_vm4, %v4343_v48  ;;  %21414 = vmatmul.mubr.msk.f32.gmra.mrb[18].mxu1 %vm1751_vm4, %v26374_v25 }
 0x305   : > { %21156 = vmatprep.mubr.msk.f32.mxu0 %vm1751_vm4, %v26404_v53  ;;  %21416 = vmatprep.mubr.msk.f32.mxu1 %vm1751_vm4, %v26380_v28 }
 0x308   : > { %21157 = vmatmul.mubr.msk.f32.gmra.mrb[132].mxu0 %vm1751_vm4, %v26410_v55  ;;  %21417 = vmatmul.mubr.msk.f32.gmra.mrb[20].mxu1 %vm1751_vm4, %v26386_v32 }
 0x309   : > { %21159 = vmatprep.mubr.msk.f32.mxu0 %vm1751_vm4, %v26416_v60  ;;  %21419 = vmatprep.mubr.msk.f32.mxu1 %vm1751_vm4, %v26418_v0 }
 0x30c   : > { %21160 = vmatmul.mubr.msk.f32.gmra.mrb[134].mxu0 %vm1751_vm4, %v26424_v4  ;;  %21420 = vmatmul.mubr.msk.f32.gmra.mrb[22].mxu1 %vm1751_vm4, %v26426_v62 }
 0x30d   : > { %21430 = vmatprep.mubr.msk.f32.mxu1 %vm1751_vm4, %v4342_v44  ;;  %v18289_v44 = vld [vmem:[%s29330_s3 + $0x1a8] sm:$0xff] }
 0x30e   : > { %v26581_v5 = vpack.c.bf16 %v18289_v44, %v18288_v43  ;;  %v26624_v43 = vld [vmem:[#allocation4 + $0xc9] sm:$0xff]  ;;  %v26628_v44 = vld [vmem:[#allocation4 + $0xd9] sm:$0xff] }
 0x30f   : > { %29437 = vst [vmem:[#allocation23_spill] sm:$0xff] %v26624_v43  ;;  %29438 = vst [vmem:[#allocation24_spill] sm:$0xff] %v26628_v44 }
 0x310   : > { %21431 = vmatmul.mubr.msk.f32.vlgmr.msra.gmra.mrb[24].mxu1 %vm1751_vm4, %v4343_v48  ;;  %v26576_v48 = vld [vmem:[#allocation4 + $0x49] sm:$0xff] }
 0x311   : > { %23198 = vmatpush3.bf16.msra.mxu1 %v26285_v49  ;;  %21433 = vmatprep.mubr.msk.f32.mxu1 %vm1751_vm4, %v26404_v53  ;;  %v18254_v49 = vld [vmem:[%s29330_s3 + $0x190] sm:$0xff] }
 0x312   : > { %23200 = vmatprep.subr.bf16.mxu1 %v23199_v8  ;;  %v23207_v2 = vpack.c.bf16 %v18255_v56, %v18254_v49  ;;  %v26604_v49 = vld [vmem:[#allocation4 + $0x91] sm:$0xff]  ;;  %v26608_v56 = vld [vmem:[#allocation4 + $0x99] sm:$0xff] }
 0x313   : > { %29432 = vst [vmem:[#allocation18_spill] sm:$0xff] %v26604_v49  ;;  %29433 = vst [vmem:[#allocation19_spill] sm:$0xff] %v26608_v56 }
 0x314   : > { %21434 = vmatmul.mubr.msk.f32.gmra.mrb[26].mxu1 %vm1751_vm4, %v26410_v55 }
 0x315   : > { %21436 = vmatprep.mubr.msk.f32.mxu1 %vm1751_vm4, %v26416_v60  ;;  %23202 = vmatpush3.bf16.msra.mxu1 %v23199_v8  ;;  %v26587_v8 = vld [vmem:[#allocation4 + $0x61] sm:$0xff] }
 0x316   : > { %23204 = vmatprep.subr.bf16.mxu1 %v26449_v15 }
 0x318   : > { %21437 = vmatmul.mubr.msk.f32.gmra.mrb[28].mxu1 %vm1751_vm4, %v26424_v4 }
 0x319   : > { %21439 = vmatprep.mubr.msk.f32.mxu1 %vm1751_vm4, %v26458_v16 }
 0x31c   : > { %21440 = vmatmul.mubr.msk.f32.gmra.mrb[30].mxu1 %vm1751_vm4, %v26462_v17 }
 0x31d   : > { %21442 = vmatprep.mubr.msk.f32.mxu1 %vm1751_vm4, %v26466_v57 }
 0x320   : > { %21443 = vmatmul.mubr.msk.f32.gmra.mrb[0].mxu1 %vm1751_vm4, %v26470_v40 }
 0x321   : > { %21445 = vmatprep.mubr.msk.f32.mxu1 %vm1751_vm4, %v26474_v50 }
 0x324   : > { %21446 = vmatmul.mubr.msk.f32.gmra.mrb[2].mxu1 %vm1751_vm4, %v26478_v37 }
 0x325   : > { %21448 = vmatprep.mubr.msk.f32.mxu1 %vm1751_vm4, %v26482_v47 }
 0x328   : > { %21449 = vmatmul.mubr.msk.f32.gmra.mrb[4].mxu1 %vm1751_vm4, %v26486_v18 }
 0x329   : > { %21451 = vmatprep.mubr.msk.f32.mxu1 %vm1751_vm4, %v26490_v21 }
 0x32c   : > { %21452 = vmatmul.mubr.msk.f32.gmra.mrb[6].mxu1 %vm1751_vm4, %v26494_v27 }
 0x32d   : > { %21454 = vmatprep.mubr.msk.f32.mxu1 %vm1751_vm4, %v26498_v30 }
 0x330   : > { %21455 = vmatmul.mubr.msk.f32.gmra.mrb[8].mxu1 %vm1751_vm4, %v26502_v63 }
 0x331   : > { %21457 = vmatprep.mubr.msk.f32.mxu1 %vm1751_vm4, %v26506_v9 }
 0x334   : > { %21458 = vmatmul.mubr.msk.f32.gmra.mrb[10].mxu1 %vm1751_vm4, %v26510_v13 }
 0x335   : > { %21460 = vmatprep.mubr.msk.f32.mxu1 %vm1751_vm4, %v26514_v46 }
 0x338   : > { %21461 = vmatmul.mubr.msk.f32.gmra.mrb[12].mxu1 %vm1751_vm4, %v26518_v45 }
 0x339   : > { %21463 = vmatprep.mubr.msk.f32.mxu1 %vm1751_vm4, %v26522_v7 }
 0x33c   : > { %21464 = vmatmul.mubr.msk.f32.gmra.mrb[14].mxu1 %vm1751_vm4, %v26526_v61 }
 0x33d   : > { %21466 = vmatprep.mubr.msk.f32.mxu1 %vm1751_vm4, %v26530_v51 }
 0x340   : > { %21467 = vmatmul.mubr.msk.f32.gmra.mrb[16].mxu1 %vm1751_vm4, %v26534_v3 }
 0x341   : > { %21469 = vmatprep.mubr.msk.f32.mxu1 %vm1751_vm4, %v26538_v38 }
 0x344   : > { %21470 = vmatmul.mubr.msk.f32.gmra.mrb[18].mxu1 %vm1751_vm4, %v26542_v42 }
 0x345   : > { %21472 = vmatprep.mubr.msk.f32.mxu1 %vm1751_vm4, %v26546_v54 }
 0x348   : > { %21473 = vmatmul.mubr.msk.f32.gmra.mrb[20].mxu1 %vm1751_vm4, %v26550_v58 }
 0x349   : > { %21475 = vmatprep.mubr.msk.f32.mxu1 %vm1751_vm4, %v26554_v33 }
 0x34c   : > { %21476 = vmatmul.mubr.msk.f32.gmra.mrb[22].mxu1 %vm1751_vm4, %v26558_v36 }
 0x34d   : > { %21486 = vmatprep.mubr.msk.f32.mxu1 %vm1751_vm4, %v6680_v34  ;;  %v26612_v34 = vld [vmem:[#allocation4 + $0xa9] sm:$0xff] }
 0x34e   : > { %29434 = vst [vmem:[#allocation20_spill] sm:$0xff] %v26612_v34 }
 0x350   : > { %21487 = vmatmul.mubr.msk.f32.vlgmr.msra.gmra.mrb[24].mxu1 %vm1751_vm4, %v6681_v31  ;;  %v26620_v31 = vld [vmem:[#allocation4 + $0xc1] sm:$0xff] }
 0x351   : > { %23206 = vmatpush3.bf16.msra.mxu1 %v26449_v15  ;;  %21489 = vmatprep.mubr.msk.f32.mxu1 %vm1751_vm4, %v26576_v48  ;;  %v26600_v15 = vld [vmem:[#allocation4 + $0x81] sm:$0xff]  ;;  %29436 = vst [vmem:[#allocation22_spill] sm:$0xff] %v26620_v31 }
 0x352   : > { %23208 = vmatprep.subr.bf16.mxu1 %v23207_v2  ;;  %29431 = vst [vmem:[#allocation17_spill] sm:$0xff] %v26600_v15 }
 0x354   : > { %21490 = vmatmul.mubr.msk.f32.gmra.mrb[26].mxu1 %vm1751_vm4, %v26583_v6 }
 0x355   : > { %21492 = vmatprep.mubr.msk.f32.mxu1 %vm1751_vm4, %v26587_v8  ;;  %23210 = vmatpush3.bf16.msra.mxu1 %v23207_v2  ;;  %v26616_v2 = vld [vmem:[#allocation4 + $0xb1] sm:$0xff] }
 0x356   : > { %23212 = vmatprep.subr.bf16.mxu1 %v26581_v5  ;;  %29435 = vst [vmem:[#allocation21_spill] sm:$0xff] %v26616_v2 }
 0x358   : > { %21493 = vmatmul.mubr.msk.f32.gmra.mrb[28].mxu1 %vm1751_vm4, %v26592_v10 }
 0x359   : > { %21495 = vmatprep.mubr.msk.f32.mxu1 %vm1751_vm4, %v26596_v11  ;;  %v18361_v11 = vld [vmem:[%s29330_s3 + $0x1e8] sm:$0xff] }
 0x35c   : > { %21496 = vmatmul.mubr.msk.f32.gmra.mrb[30].mxu1 %vm1751_vm4, %v26600_v15  ;;  %v26714_v15 = vld [vmem:[#allocation4 + $0x4a] sm:$0xff] }
 0x35d   : > { %21498 = vmatprep.mubr.msk.f32.mxu1 %vm1751_vm4, %v26604_v49  ;;  %v18325_v49 = vld [vmem:[%s29330_s3 + $0x1c8] sm:$0xff]  ;;  %29456 = vst [vmem:[#allocation42_spill] sm:$0xff] %v26714_v15 }
 0x360   : > { %21499 = vmatmul.mubr.msk.f32.gmra.mrb[0].mxu1 %vm1751_vm4, %v26608_v56  ;;  %v7071_v56 = vld [vmem:[#allocation4 + $0x3a] sm:$0xff] }
 0x361   : > { %21501 = vmatprep.mubr.msk.f32.mxu1 %vm1751_vm4, %v26612_v34  ;;  %v7070_v34 = vld [vmem:[#allocation4 + $0x32] sm:$0xff] }
 0x364   : > { %21502 = vmatmul.mubr.msk.f32.gmra.mrb[2].mxu1 %vm1751_vm4, %v26616_v2  ;;  %v26636_v2 = vld [vmem:[#allocation4 + $0xf1] sm:$0xff] }
 0x365   : > { %21504 = vmatprep.mubr.msk.f32.mxu1 %vm1751_vm4, %v26620_v31  ;;  %29440 = vst [vmem:[#allocation26_spill] sm:$0xff] %v26636_v2  ;;  %v26640_v31 = vld [vmem:[#allocation4 + $0xf9] sm:$0xff] }
 0x366   : > { %29441 = vst [vmem:[#allocation27_spill] sm:$0xff] %v26640_v31 }
 0x368   : > { %21505 = vmatmul.mubr.msk.f32.gmra.mrb[4].mxu1 %vm1751_vm4, %v26624_v43  ;;  %v26644_v43 = vld [vmem:[#allocation4 + $0x109] sm:$0xff] }
 0x369   : > { %21507 = vmatprep.mubr.msk.f32.mxu1 %vm1751_vm4, %v26628_v44  ;;  %29442 = vst [vmem:[#allocation28_spill] sm:$0xff] %v26644_v43  ;;  %v26648_v44 = vld [vmem:[#allocation4 + $0x111] sm:$0xff] }
 0x36a   : > { %29443 = vst [vmem:[#allocation29_spill] sm:$0xff] %v26648_v44 }
 0x36c   : > { %21508 = vmatmul.mubr.msk.f32.gmra.mrb[6].mxu1 %vm1751_vm4, %v26632_v12  ;;  %v26652_v12 = vld [vmem:[#allocation4 + $0x121] sm:$0xff] }
 0x36d   : > { %21510 = vmatprep.mubr.msk.f32.mxu1 %vm1751_vm4, %v26636_v2  ;;  %29444 = vst [vmem:[#allocation30_spill] sm:$0xff] %v26652_v12  ;;  %v26656_v2 = vld [vmem:[#allocation4 + $0x129] sm:$0xff] }
 0x36e   : > { %29445 = vst [vmem:[#allocation31_spill] sm:$0xff] %v26656_v2 }
 0x370   : > { %21511 = vmatmul.mubr.msk.f32.gmra.mrb[8].mxu1 %vm1751_vm4, %v26640_v31  ;;  %v26660_v31 = vld [vmem:[#allocation4 + $0x139] sm:$0xff] }
 0x371   : > { %21513 = vmatprep.mubr.msk.f32.mxu1 %vm1751_vm4, %v26644_v43  ;;  %29446 = vst [vmem:[#allocation32_spill] sm:$0xff] %v26660_v31  ;;  %v26664_v43 = vld [vmem:[#allocation4 + $0x141] sm:$0xff] }
 0x372   : > { %29447 = vst [vmem:[#allocation33_spill] sm:$0xff] %v26664_v43 }
 0x374   : > { %21514 = vmatmul.mubr.msk.f32.gmra.mrb[10].mxu1 %vm1751_vm4, %v26648_v44  ;;  %v26668_v44 = vld [vmem:[#allocation4 + $0x151] sm:$0xff] }
 0x375   : > { %21516 = vmatprep.mubr.msk.f32.mxu1 %vm1751_vm4, %v26652_v12  ;;  %29448 = vst [vmem:[#allocation34_spill] sm:$0xff] %v26668_v44  ;;  %v26672_v12 = vld [vmem:[#allocation4 + $0x159] sm:$0xff] }
 0x376   : > { %29449 = vst [vmem:[#allocation35_spill] sm:$0xff] %v26672_v12 }
 0x378   : > { %21517 = vmatmul.mubr.msk.f32.gmra.mrb[12].mxu1 %vm1751_vm4, %v26656_v2  ;;  %v26676_v2 = vld [vmem:[#allocation4 + $0x169] sm:$0xff] }
 0x379   : > { %21519 = vmatprep.mubr.msk.f32.mxu1 %vm1751_vm4, %v26660_v31  ;;  %29450 = vst [vmem:[#allocation36_spill] sm:$0xff] %v26676_v2  ;;  %v26680_v31 = vld [vmem:[#allocation4 + $0x171] sm:$0xff] }
 0x37a   : > { %29451 = vst [vmem:[#allocation37_spill] sm:$0xff] %v26680_v31 }
 0x37c   : > { %21520 = vmatmul.mubr.msk.f32.gmra.mrb[14].mxu1 %vm1751_vm4, %v26664_v43  ;;  %v26684_v43 = vld [vmem:[#allocation4 + $0x181] sm:$0xff] }
 0x37d   : > { %21522 = vmatprep.mubr.msk.f32.mxu1 %vm1751_vm4, %v26668_v44  ;;  %29452 = vst [vmem:[#allocation38_spill] sm:$0xff] %v26684_v43  ;;  %v26688_v44 = vld [vmem:[#allocation4 + $0x189] sm:$0xff] }
 0x37e   : > { %29453 = vst [vmem:[#allocation39_spill] sm:$0xff] %v26688_v44 }
 0x380   : > { %21523 = vmatmul.mubr.msk.f32.gmra.mrb[16].mxu1 %vm1751_vm4, %v26672_v12  ;;  %v26692_v12 = vld [vmem:[#allocation4 + $0x199] sm:$0xff] }
 0x381   : > { %21525 = vmatprep.mubr.msk.f32.mxu1 %vm1751_vm4, %v26676_v2  ;;  %29454 = vst [vmem:[#allocation40_spill] sm:$0xff] %v26692_v12  ;;  %v26696_v2 = vld [vmem:[#allocation4 + $0x1a1] sm:$0xff] }
 0x382   : > { %29455 = vst [vmem:[#allocation41_spill] sm:$0xff] %v26696_v2 }
 0x384   : > { %21526 = vmatmul.mubr.msk.f32.gmra.mrb[18].mxu1 %vm1751_vm4, %v26680_v31  ;;  %v18290_v31 = vld [vmem:[%s29330_s3 + $0x1b0] sm:$0xff] }
 0x385   : > { %21528 = vmatprep.mubr.msk.f32.mxu1 %vm1751_vm4, %v26684_v43  ;;  %v18291_v43 = vld [vmem:[%s29330_s3 + $0x1b8] sm:$0xff] }
 0x388   : > { %21529 = vmatmul.mubr.msk.f32.gmra.mrb[20].mxu1 %vm1751_vm4, %v26688_v44  ;;  %v23215_v44 = vpack.c.bf16 %v18291_v43, %v18290_v31  ;;  %v26721_v31 = vld [vmem:[#allocation4 + $0x52] sm:$0xff]  ;;  %v26725_v43 = vld [vmem:[#allocation4 + $0x62] sm:$0xff] }
 0x389   : > { %21531 = vmatprep.mubr.msk.f32.mxu1 %vm1751_vm4, %v26692_v12  ;;  %v18324_v12 = vld [vmem:[%s29330_s3 + $0x1c0] sm:$0xff]  ;;  %29457 = vst [vmem:[#allocation43_spill] sm:$0xff] %v26721_v31  ;;  %29458 = vst [vmem:[#allocation44_spill] sm:$0xff] %v26725_v43 }
 0x38c   : > { %21532 = vmatmul.mubr.msk.f32.gmra.mrb[22].mxu1 %vm1751_vm4, %v26696_v2  ;;  %v18360_v2 = vld [vmem:[%s29330_s3 + $0x1e0] sm:$0xff] }
 0x38d   : > { %21542 = vmatprep.mubr.msk.f32.mxu1 %vm1751_vm4, %v7070_v34  ;;  %v26719_v34 = vpack.c.bf16 %v18325_v49, %v18324_v12  ;;  %v26734_v12 = vld [vmem:[#allocation4 + $0x7a] sm:$0xff]  ;;  %v26738_v49 = vld [vmem:[#allocation4 + $0x82] sm:$0xff] }
 0x38e   : > { %29460 = vst [vmem:[#allocation46_spill] sm:$0xff] %v26734_v12  ;;  %29461 = vst [vmem:[#allocation47_spill] sm:$0xff] %v26738_v49 }
 0x390   : > { %21543 = vmatmul.mubr.msk.f32.vlgmr.msra.gmra.mrb[24].mxu1 %vm1751_vm4, %v7071_v56  ;;  %v26742_v56 = vld [vmem:[#allocation4 + $0x92] sm:$0xff] }
 0x391   : > { %23214 = vmatpush3.bf16.msra.mxu1 %v26581_v5  ;;  %21545 = vmatprep.mubr.msk.f32.mxu1 %vm1751_vm4, %v26714_v15  ;;  %v26730_v5 = vld [vmem:[#allocation4 + $0x6a] sm:$0xff]  ;;  %29462 = vst [vmem:[#allocation48_spill] sm:$0xff] %v26742_v56 }
 0x392   : > { %23216 = vmatprep.subr.bf16.mxu1 %v23215_v44  ;;  %29459 = vst [vmem:[#allocation45_spill] sm:$0xff] %v26730_v5 }
 0x394   : > { %21546 = vmatmul.mubr.msk.f32.gmra.mrb[26].mxu1 %vm1751_vm4, %v26721_v31  ;;  %v26768_v31 = vld [vmem:[#allocation4 + $0xca] sm:$0xff] }
 0x395   : > { %21548 = vmatprep.mubr.msk.f32.mxu1 %vm1751_vm4, %v26725_v43  ;;  %23218 = vmatpush3.bf16.msra.mxu1 %v23215_v44  ;;  %v26746_v44 = vld [vmem:[#allocation4 + $0x9a] sm:$0xff]  ;;  %v26756_v43 = vld [vmem:[#allocation4 + $0xb2] sm:$0xff]  ;;  %29470 = vst [vmem:[#allocation56_spill] sm:$0xff] %v26768_v31 }
 0x396   : > { %23220 = vmatprep.subr.bf16.mxu1 %v26719_v34  ;;  %29463 = vst [vmem:[#allocation49_spill] sm:$0xff] %v26746_v44  ;;  %29466 = vst [vmem:[#allocation52_spill] sm:$0xff] %v26756_v43 }
 0x398   : > { %21549 = vmatmul.mubr.msk.f32.gmra.mrb[28].mxu1 %vm1751_vm4, %v26730_v5  ;;  %v26750_v5 = vld [vmem:[#allocation4 + $0xaa] sm:$0xff] }
 0x399   : > { %21551 = vmatprep.mubr.msk.f32.mxu1 %vm1751_vm4, %v26734_v12  ;;  %29464 = vst [vmem:[#allocation50_spill] sm:$0xff] %v26750_v5 }
 0x39c   : > { %21552 = vmatmul.mubr.msk.f32.gmra.mrb[30].mxu1 %vm1751_vm4, %v26738_v49 }
 0x39d   : > { %21554 = vmatprep.mubr.msk.f32.mxu1 %vm1751_vm4, %v26742_v56  ;;  %v26762_v56 = vld [vmem:[#allocation4 + $0xc2] sm:$0xff] }
 0x39e   : > { %29468 = vst [vmem:[#allocation54_spill] sm:$0xff] %v26762_v56 }
 0x3a0   : > { %21555 = vmatmul.mubr.msk.f32.gmra.mrb[0].mxu1 %vm1751_vm4, %v26746_v44 }
 0x3a1   : > { %21557 = vmatprep.mubr.msk.f32.mxu1 %vm1751_vm4, %v26750_v5 }
 0x3a3   : > { %v26754_v12 = vpop.f32.mrb[136].mxu0 }
 0x3a4   : > { %29465 = vst [vmem:[#allocation51_spill] sm:$0xff] %v26754_v12  ;;  %v26758_v49 = vpop.f32.mrb[137].mxu0  ;;  %21558 = vmatmul.mubr.msk.f32.gmra.mrb[2].mxu1 %vm1751_vm4, %v26756_v43  ;;  %v26774_v12 = vld [vmem:[#allocation4 + $0xda] sm:$0xff]  ;;  %v26780_v43 = vld [vmem:[#allocation4 + $0xe2] sm:$0xff] }
 0x3a5   : > { %29467 = vst [vmem:[#allocation53_spill] sm:$0xff] %v26758_v49  ;;  %21560 = vmatprep.mubr.msk.f32.mxu1 %vm1751_vm4, %v26762_v56  ;;  %29472 = vst [vmem:[#allocation58_spill] sm:$0xff] %v26774_v12 }
 0x3a6   : > { %29474 = vst [vmem:[#allocation60_spill] sm:$0xff] %v26780_v43 }
 0x3a7   : > { %v26766_v44 = vpop.f32.mrb[138].mxu0 }
 0x3a8   : > { %29469 = vst [vmem:[#allocation55_spill] sm:$0xff] %v26766_v44  ;;  %v26770_v15 = vpop.f32.mrb[139].mxu0  ;;  %21561 = vmatmul.mubr.msk.f32.gmra.mrb[4].mxu1 %vm1751_vm4, %v26768_v31  ;;  %v26786_v44 = vld [vmem:[#allocation4 + $0xf2] sm:$0xff]  ;;  %v26792_v31 = vld [vmem:[#allocation4 + $0xfa] sm:$0xff] }
 0x3a9   : > { %29471 = vst [vmem:[#allocation57_spill] sm:$0xff] %v26770_v15  ;;  %21563 = vmatprep.mubr.msk.f32.mxu1 %vm1751_vm4, %v26774_v12  ;;  %29476 = vst [vmem:[#allocation62_spill] sm:$0xff] %v26786_v44 }
 0x3aa   : > { %29478 = vst [vmem:[#allocation64_spill] sm:$0xff] %v26792_v31 }
 0x3ab   : > { %v26778_v49 = vpop.f32.mrb[140].mxu0 }
 0x3ac   : > { %29473 = vst [vmem:[#allocation59_spill] sm:$0xff] %v26778_v49  ;;  %v26782_v5 = vpop.f32.mrb[141].mxu0  ;;  %21564 = vmatmul.mubr.msk.f32.gmra.mrb[6].mxu1 %vm1751_vm4, %v26780_v43  ;;  %v26798_v49 = vld [vmem:[#allocation4 + $0x10a] sm:$0xff]  ;;  %v26804_v43 = vld [vmem:[#allocation4 + $0x112] sm:$0xff] }
 0x3ad   : > { %29475 = vst [vmem:[#allocation61_spill] sm:$0xff] %v26782_v5  ;;  %21566 = vmatprep.mubr.msk.f32.mxu1 %vm1751_vm4, %v26786_v44  ;;  %29480 = vst [vmem:[#allocation66_spill] sm:$0xff] %v26798_v49 }
 0x3ae   : > { %29482 = vst [vmem:[#allocation68_spill] sm:$0xff] %v26804_v43 }
 0x3af   : > { %v26790_v15 = vpop.f32.mrb[142].mxu0 }
 0x3b0   : > { %29477 = vst [vmem:[#allocation63_spill] sm:$0xff] %v26790_v15  ;;  %v26794_v56 = vpop.f32.mrb[143].mxu0  ;;  %21567 = vmatmul.mubr.msk.f32.gmra.mrb[8].mxu1 %vm1751_vm4, %v26792_v31  ;;  %v26810_v15 = vld [vmem:[#allocation4 + $0x122] sm:$0xff]  ;;  %v26816_v31 = vld [vmem:[#allocation4 + $0x12a] sm:$0xff] }
 0x3b1   : > { %29479 = vst [vmem:[#allocation65_spill] sm:$0xff] %v26794_v56  ;;  %21569 = vmatprep.mubr.msk.f32.mxu1 %vm1751_vm4, %v26798_v49  ;;  %29484 = vst [vmem:[#allocation70_spill] sm:$0xff] %v26810_v15 }
 0x3b2   : > { %29486 = vst [vmem:[#allocation72_spill] sm:$0xff] %v26816_v31 }
 0x3b3   : > { %v26802_v5 = vpop.f32.mrb[144].mxu0 }
 0x3b4   : > { %29481 = vst [vmem:[#allocation67_spill] sm:$0xff] %v26802_v5  ;;  %v26806_v12 = vpop.f32.mrb[145].mxu0  ;;  %21570 = vmatmul.mubr.msk.f32.gmra.mrb[10].mxu1 %vm1751_vm4, %v26804_v43  ;;  %v26822_v5 = vld [vmem:[#allocation4 + $0x13a] sm:$0xff]  ;;  %v26828_v43 = vld [vmem:[#allocation4 + $0x142] sm:$0xff] }
 0x3b5   : > { %29483 = vst [vmem:[#allocation69_spill] sm:$0xff] %v26806_v12  ;;  %21572 = vmatprep.mubr.msk.f32.mxu1 %vm1751_vm4, %v26810_v15  ;;  %29488 = vst [vmem:[#allocation74_spill] sm:$0xff] %v26822_v5 }
 0x3b6   : > { %29490 = vst [vmem:[#allocation76_spill] sm:$0xff] %v26828_v43 }
 0x3b7   : > { %v26814_v56 = vpop.f32.mrb[146].mxu0 }
 0x3b8   : > { %29485 = vst [vmem:[#allocation71_spill] sm:$0xff] %v26814_v56  ;;  %v26818_v44 = vpop.f32.mrb[147].mxu0  ;;  %21573 = vmatmul.mubr.msk.f32.gmra.mrb[12].mxu1 %vm1751_vm4, %v26816_v31  ;;  %v26834_v56 = vld [vmem:[#allocation4 + $0x152] sm:$0xff]  ;;  %v26840_v31 = vld [vmem:[#allocation4 + $0x15a] sm:$0xff] }
 0x3b9   : > { %29487 = vst [vmem:[#allocation73_spill] sm:$0xff] %v26818_v44  ;;  %21575 = vmatprep.mubr.msk.f32.mxu1 %vm1751_vm4, %v26822_v5  ;;  %29492 = vst [vmem:[#allocation78_spill] sm:$0xff] %v26834_v56 }
 0x3ba   : > { %29494 = vst [vmem:[#allocation80_spill] sm:$0xff] %v26840_v31 }
 0x3bb   : > { %v26826_v12 = vpop.f32.mrb[148].mxu0 }
 0x3bc   : > { %29489 = vst [vmem:[#allocation75_spill] sm:$0xff] %v26826_v12  ;;  %v26830_v49 = vpop.f32.mrb[149].mxu0  ;;  %21576 = vmatmul.mubr.msk.f32.gmra.mrb[14].mxu1 %vm1751_vm4, %v26828_v43  ;;  %v26846_v12 = vld [vmem:[#allocation4 + $0x16a] sm:$0xff]  ;;  %v26852_v43 = vld [vmem:[#allocation4 + $0x172] sm:$0xff] }
 0x3bd   : > { %29491 = vst [vmem:[#allocation77_spill] sm:$0xff] %v26830_v49  ;;  %21578 = vmatprep.mubr.msk.f32.mxu1 %vm1751_vm4, %v26834_v56  ;;  %29496 = vst [vmem:[#allocation82_spill] sm:$0xff] %v26846_v12 }
 0x3be   : > { %29498 = vst [vmem:[#allocation84_spill] sm:$0xff] %v26852_v43 }
 0x3bf   : > { %v26838_v44 = vpop.f32.mrb[150].mxu0 }
 0x3c0   : > { %29493 = vst [vmem:[#allocation79_spill] sm:$0xff] %v26838_v44  ;;  %v26842_v15 = vpop.f32.mrb[151].mxu0  ;;  %21579 = vmatmul.mubr.msk.f32.gmra.mrb[16].mxu1 %vm1751_vm4, %v26840_v31  ;;  %v26858_v44 = vld [vmem:[#allocation4 + $0x182] sm:$0xff]  ;;  %v26864_v31 = vld [vmem:[#allocation4 + $0x18a] sm:$0xff] }
 0x3c1   : > { %29495 = vst [vmem:[#allocation81_spill] sm:$0xff] %v26842_v15  ;;  %21581 = vmatprep.mubr.msk.f32.mxu1 %vm1751_vm4, %v26846_v12  ;;  %29500 = vst [vmem:[#allocation86_spill] sm:$0xff] %v26858_v44  ;;  %v7461_v12 = vld [vmem:[#allocation4 + $0x3b] sm:$0xff] }
 0x3c2   : > { %29502 = vst [vmem:[#allocation88_spill] sm:$0xff] %v26864_v31 }
 0x3c3   : > { %v26850_v49 = vpop.f32.mrb[152].mxu0 }
 0x3c4   : > { %29497 = vst [vmem:[#allocation83_spill] sm:$0xff] %v26850_v49  ;;  %v26854_v5 = vpop.f32.mrb[153].mxu0  ;;  %21582 = vmatmul.mubr.msk.f32.gmra.mrb[18].mxu1 %vm1751_vm4, %v26852_v43  ;;  %v26870_v49 = vld [vmem:[#allocation4 + $0x19a] sm:$0xff]  ;;  %v26876_v43 = vld [vmem:[#allocation4 + $0x1a2] sm:$0xff] }
 0x3c5   : > { %29499 = vst [vmem:[#allocation85_spill] sm:$0xff] %v26854_v5  ;;  %21584 = vmatprep.mubr.msk.f32.mxu1 %vm1751_vm4, %v26858_v44  ;;  %29504 = vst [vmem:[#allocation90_spill] sm:$0xff] %v26870_v49 }
 0x3c7   : > { %v26862_v15 = vpop.f32.mrb[154].mxu0 }
 0x3c8   : > { %29501 = vst [vmem:[#allocation87_spill] sm:$0xff] %v26862_v15  ;;  %v26866_v56 = vpop.f32.mrb[155].mxu0  ;;  %21585 = vmatmul.mubr.msk.f32.gmra.mrb[20].mxu1 %vm1751_vm4, %v26864_v31  ;;  %v18326_v15 = vld [vmem:[%s29330_s3 + $0x1d0] sm:$0xff] }
 0x3c9   : > { %29503 = vst [vmem:[#allocation89_spill] sm:$0xff] %v26866_v56  ;;  %21587 = vmatprep.mubr.msk.f32.mxu1 %vm1751_vm4, %v26870_v49  ;;  %v18327_v56 = vld [vmem:[%s29330_s3 + $0x1d8] sm:$0xff] }
 0x3ca   : > { %v7460_v31 = vld [vmem:[#allocation4 + $0x33] sm:$0xff]  ;;  %v23223_v49 = vpack.c.bf16 %v18327_v56, %v18326_v15  ;;  %v26905_v15 = vpack.c.bf16 %v18361_v11, %v18360_v2  ;;  %v26922_v11 = vld [vmem:[#allocation4 + $0x6b] sm:$0xff] }
 0x3cb   : > { %v26874_v5 = vpop.f32.mrb[156].mxu0  ;;  %29514 = vst [vmem:[#allocation100_spill] sm:$0xff] %v26922_v11 }
 0x3cc   : > { %29505 = vst [vmem:[#allocation91_spill] sm:$0xff] %v26874_v5  ;;  %v26884_v44 = vpop.f32.mrb[157].mxu0  ;;  %21588 = vmatmul.mubr.msk.f32.gmra.mrb[22].mxu1 %vm1751_vm4, %v26876_v43 }
 0x3cd   : > { %29506 = vst [vmem:[#allocation92_spill] sm:$0xff] %v26884_v44  ;;  %21598 = vmatprep.mubr.msk.f32.mxu1 %vm1751_vm4, %v7460_v31  ;;  %v26900_v44 = vld [vmem:[#allocation4 + $0x4b] sm:$0xff]  ;;  %v26907_v31 = vld [vmem:[#allocation4 + $0x53] sm:$0xff] }
 0x3ce   : > { %29509 = vst [vmem:[#allocation95_spill] sm:$0xff] %v26907_v31 }
 0x3cf   : > { %v26889_v5 = vpop.f32.mrb[158].mxu0 }
 0x3d0   : > { %29507 = vst [vmem:[#allocation93_spill] sm:$0xff] %v26889_v5  ;;  %v26897_v10 = vpop.f32.mrb[159].mxu0  ;;  %21599 = vmatmul.mubr.msk.f32.vlgmr.msra.gmra.mrb[24].mxu1 %vm1751_vm4, %v7461_v12  ;;  %v26928_v5 = vld [vmem:[#allocation4 + $0x7b] sm:$0xff] }
 0x3d1   : > { %29508 = vst [vmem:[#allocation94_spill] sm:$0xff] %v26897_v10  ;;  %23222 = vmatpush3.bf16.msra.mxu1 %v26719_v34  ;;  %21601 = vmatprep.mubr.msk.f32.mxu1 %vm1751_vm4, %v26900_v44  ;;  %v26913_v10 = vld [vmem:[#allocation4 + $0x63] sm:$0xff]  ;;  %29516 = vst [vmem:[#allocation102_spill] sm:$0xff] %v26928_v5 }
 0x3d2   : > { %23224 = vmatprep.subr.bf16.mxu1 %v23223_v49  ;;  %29511 = vst [vmem:[#allocation97_spill] sm:$0xff] %v26913_v10 }
 0x3d3   : > { %v26909_v56 = vpop.f32.mrb[128].mxu0 }
 0x3d4   : > { %29510 = vst [vmem:[#allocation96_spill] sm:$0xff] %v26909_v56  ;;  %21602 = vmatmul.mubr.msk.f32.gmra.mrb[26].mxu1 %vm1751_vm4, %v26907_v31  ;;  %v26915_v12 = vpop.f32.mrb[129].mxu0  ;;  %v26934_v56 = vld [vmem:[#allocation4 + $0x83] sm:$0xff]  ;;  %v27054_v31 = vld [vmem:[#allocation4 + $0x4c] sm:$0xff] }
 0x3d5   : > { %29512 = vst [vmem:[#allocation98_spill] sm:$0xff] %v26915_v12  ;;  %21604 = vmatprep.mubr.msk.f32.mxu1 %vm1751_vm4, %v26913_v10  ;;  %23226 = vmatpush3.bf16.msra.mxu1 %v23223_v49  ;;  %29518 = vst [vmem:[#allocation104_spill] sm:$0xff] %v26934_v56 }
 0x3d6   : > { %23228 = vmatprep.subr.bf16.mxu1 %v26905_v15 }
 0x3d7   : > { %v26920_v34 = vpop.f32.mrb[130].mxu0 }
 0x3d8   : > { %29513 = vst [vmem:[#allocation99_spill] sm:$0xff] %v26920_v34  ;;  %v26924_v2 = vpop.f32.mrb[131].mxu0  ;;  %21605 = vmatmul.mubr.msk.f32.gmra.mrb[28].mxu1 %vm1751_vm4, %v26922_v11  ;;  %v26940_v34 = vld [vmem:[#allocation4 + $0x93] sm:$0xff]  ;;  %v26946_v11 = vld [vmem:[#allocation4 + $0x9b] sm:$0xff] }
 0x3d9   : > { %29515 = vst [vmem:[#allocation101_spill] sm:$0xff] %v26924_v2  ;;  %21607 = vmatprep.mubr.msk.f32.mxu1 %vm1751_vm4, %v26928_v5  ;;  %29520 = vst [vmem:[#allocation106_spill] sm:$0xff] %v26940_v34  ;;  %v18397_v5 = vld [vmem:[%s29330_s3 + $0x208] sm:$0xff] }
 0x3da   : > { %29522 = vst [vmem:[#allocation108_spill] sm:$0xff] %v26946_v11 }
 0x3db   : > { %v26932_v12 = vpop.f32.mrb[132].mxu0 }
 0x3dc   : > { %29517 = vst [vmem:[#allocation103_spill] sm:$0xff] %v26932_v12  ;;  %v26936_v49 = vpop.f32.mrb[133].mxu0  ;;  %21608 = vmatmul.mubr.msk.f32.gmra.mrb[30].mxu1 %vm1751_vm4, %v26934_v56  ;;  %v26952_v12 = vld [vmem:[#allocation4 + $0xab] sm:$0xff]  ;;  %v7851_v56 = vld [vmem:[#allocation4 + $0x3c] sm:$0xff] }
 0x3dd   : > { %29519 = vst [vmem:[#allocation105_spill] sm:$0xff] %v26936_v49  ;;  %21610 = vmatprep.mubr.msk.f32.mxu1 %vm1751_vm4, %v26940_v34  ;;  %29524 = vst [vmem:[#allocation110_spill] sm:$0xff] %v26952_v12  ;;  %v26956_v49 = vld [vmem:[#allocation4 + $0xb3] sm:$0xff]  ;;  %v26960_v34 = vld [vmem:[#allocation4 + $0xc3] sm:$0xff] }
 0x3de   : > { %29525 = vst [vmem:[#allocation111_spill] sm:$0xff] %v26956_v49  ;;  %29526 = vst [vmem:[#allocation112_spill] sm:$0xff] %v26960_v34 }
 0x3df   : > { %v26944_v2 = vpop.f32.mrb[134].mxu0 }
 0x3e0   : > { %29521 = vst [vmem:[#allocation107_spill] sm:$0xff] %v26944_v2  ;;  %v26948_v10 = vpop.f32.mrb[135].mxu0  ;;  %21611 = vmatmul.mubr.msk.f32.gmra.mrb[0].mxu1 %vm1751_vm4, %v26946_v11  ;;  %v26964_v2 = vld [vmem:[#allocation4 + $0xcb] sm:$0xff]  ;;  %v7850_v11 = vld [vmem:[#allocation4 + $0x34] sm:$0xff] }
 0x3e1   : > { %29523 = vst [vmem:[#allocation109_spill] sm:$0xff] %v26948_v10  ;;  %21613 = vmatprep.mubr.msk.f32.mxu1 %vm1751_vm4, %v26952_v12  ;;  %29527 = vst [vmem:[#allocation113_spill] sm:$0xff] %v26964_v2  ;;  %v26968_v10 = vld [vmem:[#allocation4 + $0xdb] sm:$0xff]  ;;  %v26972_v12 = vld [vmem:[#allocation4 + $0xe3] sm:$0xff] }
 0x3e2   : > { %29528 = vst [vmem:[#allocation114_spill] sm:$0xff] %v26968_v10  ;;  %29529 = vst [vmem:[#allocation115_spill] sm:$0xff] %v26972_v12 }
 0x3e4   : > { %21614 = vmatmul.mubr.msk.f32.gmra.mrb[2].mxu1 %vm1751_vm4, %v26956_v49  ;;  %v26976_v49 = vld [vmem:[#allocation4 + $0xf3] sm:$0xff] }
 0x3e5   : > { %21616 = vmatprep.mubr.msk.f32.mxu1 %vm1751_vm4, %v26960_v34  ;;  %29530 = vst [vmem:[#allocation116_spill] sm:$0xff] %v26976_v49  ;;  %v26980_v34 = vld [vmem:[#allocation4 + $0xfb] sm:$0xff] }
 0x3e6   : > { %29531 = vst [vmem:[#allocation117_spill] sm:$0xff] %v26980_v34 }
 0x3e8   : > { %21617 = vmatmul.mubr.msk.f32.gmra.mrb[4].mxu1 %vm1751_vm4, %v26964_v2  ;;  %v26984_v2 = vld [vmem:[#allocation4 + $0x10b] sm:$0xff] }
 0x3e9   : > { %21619 = vmatprep.mubr.msk.f32.mxu1 %vm1751_vm4, %v26968_v10  ;;  %29532 = vst [vmem:[#allocation118_spill] sm:$0xff] %v26984_v2  ;;  %v26988_v10 = vld [vmem:[#allocation4 + $0x113] sm:$0xff] }
 0x3ea   : > { %29533 = vst [vmem:[#allocation119_spill] sm:$0xff] %v26988_v10 }
 0x3ec   : > { %21620 = vmatmul.mubr.msk.f32.gmra.mrb[6].mxu1 %vm1751_vm4, %v26972_v12  ;;  %v26992_v12 = vld [vmem:[#allocation4 + $0x123] sm:$0xff] }
 0x3ed   : > { %21622 = vmatprep.mubr.msk.f32.mxu1 %vm1751_vm4, %v26976_v49  ;;  %29534 = vst [vmem:[#allocation120_spill] sm:$0xff] %v26992_v12  ;;  %v26996_v49 = vld [vmem:[#allocation4 + $0x12b] sm:$0xff] }
 0x3ee   : > { %29535 = vst [vmem:[#allocation121_spill] sm:$0xff] %v26996_v49 }
 0x3f0   : > { %21623 = vmatmul.mubr.msk.f32.gmra.mrb[8].mxu1 %vm1751_vm4, %v26980_v34  ;;  %v27000_v34 = vld [vmem:[#allocation4 + $0x13b] sm:$0xff] }
 0x3f1   : > { %21625 = vmatprep.mubr.msk.f32.mxu1 %vm1751_vm4, %v26984_v2  ;;  %29536 = vst [vmem:[#allocation122_spill] sm:$0xff] %v27000_v34  ;;  %v27004_v2 = vld [vmem:[#allocation4 + $0x143] sm:$0xff] }
 0x3f2   : > { %29537 = vst [vmem:[#allocation123_spill] sm:$0xff] %v27004_v2 }
 0x3f4   : > { %21626 = vmatmul.mubr.msk.f32.gmra.mrb[10].mxu1 %vm1751_vm4, %v26988_v10  ;;  %v27008_v10 = vld [vmem:[#allocation4 + $0x153] sm:$0xff] }
 0x3f5   : > { %21628 = vmatprep.mubr.msk.f32.mxu1 %vm1751_vm4, %v26992_v12  ;;  %29538 = vst [vmem:[#allocation124_spill] sm:$0xff] %v27008_v10  ;;  %v27012_v12 = vld [vmem:[#allocation4 + $0x15b] sm:$0xff] }
 0x3f6   : > { %29539 = vst [vmem:[#allocation125_spill] sm:$0xff] %v27012_v12 }
 0x3f8   : > { %21629 = vmatmul.mubr.msk.f32.gmra.mrb[12].mxu1 %vm1751_vm4, %v26996_v49  ;;  %v27016_v49 = vld [vmem:[#allocation4 + $0x16b] sm:$0xff] }
 0x3f9   : > { %21631 = vmatprep.mubr.msk.f32.mxu1 %vm1751_vm4, %v27000_v34  ;;  %29540 = vst [vmem:[#allocation126_spill] sm:$0xff] %v27016_v49  ;;  %v27020_v34 = vld [vmem:[#allocation4 + $0x173] sm:$0xff] }
 0x3fa   : > { %29541 = vst [vmem:[#allocation127_spill] sm:$0xff] %v27020_v34 }
 0x3fc   : > { %21632 = vmatmul.mubr.msk.f32.gmra.mrb[14].mxu1 %vm1751_vm4, %v27004_v2  ;;  %v27024_v2 = vld [vmem:[#allocation4 + $0x183] sm:$0xff] }
 0x3fd   : > { %21634 = vmatprep.mubr.msk.f32.mxu1 %vm1751_vm4, %v27008_v10  ;;  %29542 = vst [vmem:[#allocation128_spill] sm:$0xff] %v27024_v2  ;;  %v27028_v10 = vld [vmem:[#allocation4 + $0x18b] sm:$0xff] }
 0x3fe   : > { %29543 = vst [vmem:[#allocation129_spill] sm:$0xff] %v27028_v10 }
 0x400   : > { %21635 = vmatmul.mubr.msk.f32.gmra.mrb[16].mxu1 %vm1751_vm4, %v27012_v12  ;;  %v27032_v12 = vld [vmem:[#allocation4 + $0x19b] sm:$0xff] }
 0x401   : > { %21637 = vmatprep.mubr.msk.f32.mxu1 %vm1751_vm4, %v27016_v49  ;;  %29544 = vst [vmem:[#allocation130_spill] sm:$0xff] %v27032_v12  ;;  %v27036_v49 = vld [vmem:[#allocation4 + $0x1a3] sm:$0xff] }
 0x404   : > { %21638 = vmatmul.mubr.msk.f32.gmra.mrb[18].mxu1 %vm1751_vm4, %v27020_v34  ;;  %v18362_v34 = vld [vmem:[%s29330_s3 + $0x1f0] sm:$0xff] }
 0x405   : > { %21640 = vmatprep.mubr.msk.f32.mxu1 %vm1751_vm4, %v27024_v2  ;;  %v18363_v2 = vld [vmem:[%s29330_s3 + $0x1f8] sm:$0xff] }
 0x408   : > { %21641 = vmatmul.mubr.msk.f32.gmra.mrb[20].mxu1 %vm1751_vm4, %v27028_v10  ;;  %v23231_v10 = vpack.c.bf16 %v18363_v2, %v18362_v34  ;;  %v27063_v2 = vld [vmem:[#allocation4 + $0x64] sm:$0xff] }
 0x409   : > { %21643 = vmatprep.mubr.msk.f32.mxu1 %vm1751_vm4, %v27032_v12  ;;  %v18396_v12 = vld [vmem:[%s29330_s3 + $0x200] sm:$0xff] }
 0x40a   : > { %v23235_v34 = vpack.c.bf16 %v18397_v5, %v18396_v12  ;;  %v27075_v5 = vld [vmem:[#allocation4 + $0x84] sm:$0xff]  ;;  %v27079_v12 = vld [vmem:[#allocation4 + $0x94] sm:$0xff] }
 0x40c   : > { %21644 = vmatmul.mubr.msk.f32.gmra.mrb[22].mxu1 %vm1751_vm4, %v27036_v49 }
 0x40d   : > { %21654 = vmatprep.mubr.msk.f32.mxu1 %vm1751_vm4, %v7850_v11  ;;  %v27059_v11 = vld [vmem:[#allocation4 + $0x54] sm:$0xff] }
 0x410   : > { %21655 = vmatmul.mubr.msk.f32.vlgmr.msra.gmra.mrb[24].mxu1 %vm1751_vm4, %v7851_v56  ;;  %v27067_v56 = vld [vmem:[#allocation4 + $0x6c] sm:$0xff] }
 0x411   : > { %23230 = vmatpush3.bf16.msra.mxu1 %v26905_v15  ;;  %21657 = vmatprep.mubr.msk.f32.mxu1 %vm1751_vm4, %v27054_v31  ;;  %29545 = vst [vmem:[#allocation131_spill] sm:$0xff] %v27067_v56  ;;  %v27071_v15 = vld [vmem:[#allocation4 + $0x7c] sm:$0xff] }
 0x412   : > { %23232 = vmatprep.subr.bf16.mxu1 %v23231_v10 }
 0x414   : > { %21658 = vmatmul.mubr.msk.f32.gmra.mrb[26].mxu1 %vm1751_vm4, %v27059_v11 }
 0x415   : > { %21660 = vmatprep.mubr.msk.f32.mxu1 %vm1751_vm4, %v27063_v2  ;;  %23234 = vmatpush3.bf16.msra.mxu1 %v23231_v10  ;;  %v27083_v10 = vld [vmem:[#allocation4 + $0x9c] sm:$0xff] }
 0x416   : > { %23236 = vmatprep.subr.bf16.mxu1 %v23235_v34 }
 0x418   : > { %21661 = vmatmul.mubr.msk.f32.gmra.mrb[28].mxu1 %vm1751_vm4, %v27067_v56  ;;  %v27087_v56 = vld [vmem:[#allocation4 + $0xac] sm:$0xff] }
 0x419   : > { %21663 = vmatprep.mubr.msk.f32.mxu1 %vm1751_vm4, %v27071_v15 }
 0x41c   : > { %21664 = vmatmul.mubr.msk.f32.gmra.mrb[30].mxu1 %vm1751_vm4, %v27075_v5 }
 0x41d   : > { %21666 = vmatprep.mubr.msk.f32.mxu1 %vm1751_vm4, %v27079_v12 }
 0x420   : > { %21667 = vmatmul.mubr.msk.f32.gmra.mrb[0].mxu1 %vm1751_vm4, %v27083_v10 }
 0x421   : > { %21669 = vmatprep.mubr.msk.f32.mxu1 %vm1751_vm4, %v27087_v56 }
 0x424   : > { %21670 = vmatmul.mubr.msk.f32.gmra.mrb[2].mxu1 %vm1751_vm4, %v26296_v41  ;;  %v27129_v41 = vld [vmem:[#allocation4 + $0x19c] sm:$0xff] }
 0x425   : > { %21672 = vmatprep.mubr.msk.f32.mxu1 %vm1751_vm4, %v26301_v59  ;;  %v27133_v59 = vld [vmem:[#allocation4 + $0x1a4] sm:$0xff] }
 0x428   : > { %21673 = vmatmul.mubr.msk.f32.gmra.mrb[4].mxu1 %vm1751_vm4, %v26306_v1  ;;  %v18398_v1 = vld [vmem:[%s29330_s3 + $0x210] sm:$0xff] }
 0x429   : > { %21675 = vmatprep.mubr.msk.f32.mxu1 %vm1751_vm4, %v26311_v26  ;;  %v18399_v26 = vld [vmem:[%s29330_s3 + $0x218] sm:$0xff] }
 0x42c   : > { %21676 = vmatmul.mubr.msk.f32.gmra.mrb[6].mxu1 %vm1751_vm4, %v26316_v29  ;;  %v23239_v29 = vpack.c.bf16 %v18399_v26, %v18398_v1  ;;  %v29576_v26 = vld [vmem:[#allocation45_spill] sm:$0xff] }
 0x42d   : > { %21678 = vmatprep.mubr.msk.f32.mxu1 %vm1751_vm4, %v26321_v35  ;;  %v18432_v35 = vld [vmem:[%s29330_s3 + $0x220] sm:$0xff] }
 0x430   : > { %21679 = vmatmul.mubr.msk.f32.gmra.mrb[8].mxu1 %vm1751_vm4, %v26326_v39  ;;  %v18433_v39 = vld [vmem:[%s29330_s3 + $0x228] sm:$0xff] }
 0x431   : > { %21681 = vmatprep.mubr.msk.f32.mxu1 %vm1751_vm4, %v26332_v14  ;;  %v23243_v14 = vpack.c.bf16 %v18433_v39, %v18432_v35  ;;  %v29578_v35 = vld [vmem:[#allocation47_spill] sm:$0xff]  ;;  %v29579_v39 = vld [vmem:[#allocation48_spill] sm:$0xff] }
 0x434   : > { %21682 = vmatmul.mubr.msk.f32.gmra.mrb[10].mxu1 %vm1751_vm4, %v26338_v19  ;;  %v27207_v19 = vld [vmem:[#allocation4 + $0x1b0] sm:$0xff] }
 0x435   : > { %21684 = vmatprep.mubr.msk.f32.mxu1 %vm1751_vm4, %v26344_v20  ;;  %v27213_v20 = vld [vmem:[#allocation4 + $0x1b8] sm:$0xff] }
 0x438   : > { %21685 = vmatmul.mubr.msk.f32.gmra.mrb[12].mxu1 %vm1751_vm4, %v26350_v22  ;;  %v18434_v22 = vld [vmem:[%s29330_s3 + $0x230] sm:$0xff] }
 0x439   : > { %21687 = vmatprep.mubr.msk.f32.mxu1 %vm1751_vm4, %v26356_v23  ;;  %v18435_v23 = vld [vmem:[%s29330_s3 + $0x238] sm:$0xff] }
 0x43c   : > { %21688 = vmatmul.mubr.msk.f32.gmra.mrb[14].mxu1 %vm1751_vm4, %v26362_v24  ;;  %v23247_v24 = vpack.c.bf16 %v18435_v23, %v18434_v22  ;;  %v29581_v22 = vld [vmem:[#allocation50_spill] sm:$0xff]  ;;  %v29582_v23 = vld [vmem:[#allocation52_spill] sm:$0xff] }
 0x43d   : > { %21690 = vmatprep.mubr.msk.f32.mxu1 %vm1751_vm4, %v26368_v52  ;;  %v18468_v52 = vld [vmem:[%s29330_s3 + $0x240] sm:$0xff] }
 0x440   : > { %21691 = vmatmul.mubr.msk.f32.gmra.mrb[16].mxu1 %vm1751_vm4, %v26374_v25  ;;  %v18469_v25 = vld [vmem:[%s29330_s3 + $0x248] sm:$0xff] }
 0x441   : > { %21693 = vmatprep.mubr.msk.f32.mxu1 %vm1751_vm4, %v26380_v28  ;;  %v23251_v28 = vpack.c.bf16 %v18469_v25, %v18468_v52  ;;  %v29584_v52 = vld [vmem:[#allocation56_spill] sm:$0xff]  ;;  %v29585_v25 = vld [vmem:[#allocation58_spill] sm:$0xff] }
 0x444   : > { %21694 = vmatmul.mubr.msk.f32.gmra.mrb[18].mxu1 %vm1751_vm4, %v26386_v32  ;;  %v29546_v32 = vld [vmem:[#allocation15_spill] sm:$0xff] }
 0x445   : > { %21696 = vmatprep.mubr.msk.f32.mxu1 %vm1751_vm4, %v26418_v0  ;;  %v29550_v0 = vld [vmem:[#allocation19_spill] sm:$0xff] }
 0x448   : > { %21697 = vmatmul.mubr.msk.f32.gmra.mrb[20].mxu1 %vm1751_vm4, %v26426_v62  ;;  %v29552_v62 = vld [vmem:[#allocation21_spill] sm:$0xff] }
 0x449   : > { %21699 = vmatprep.mubr.msk.f32.mxu1 %vm1751_vm4, %v27129_v41 }
 0x44c   : > { %21700 = vmatmul.mubr.msk.f32.gmra.mrb[22].mxu1 %vm1751_vm4, %v27133_v59 }
 0x44d   : > { %21710 = vmatprep.mubr.msk.f32.mxu1 %vm1751_vm4, %v26404_v53  ;;  %v29547_v53 = vld [vmem:[#allocation16_spill] sm:$0xff] }
 0x450   : > { %21711 = vmatmul.mubr.msk.f32.vlgmr.msra.gmra.mrb[24].mxu1 %vm1751_vm4, %v26410_v55  ;;  %v29548_v55 = vld [vmem:[#allocation17_spill] sm:$0xff] }
 0x451   : > { %23238 = vmatpush3.bf16.msra.mxu1 %v23235_v34  ;;  %21713 = vmatprep.mubr.msk.f32.mxu1 %vm1751_vm4, %v26416_v60  ;;  %v29549_v60 = vld [vmem:[#allocation18_spill] sm:$0xff]  ;;  %v29575_v34 = vld [vmem:[#allocation44_spill] sm:$0xff] }
 0x452   : > { %23240 = vmatprep.subr.bf16.mxu1 %v23239_v29 }
 0x454   : > { %21714 = vmatmul.mubr.msk.f32.gmra.mrb[26].mxu1 %vm1751_vm4, %v26424_v4  ;;  %v29551_v4 = vld [vmem:[#allocation20_spill] sm:$0xff] }
 0x455   : > { %21716 = vmatprep.mubr.msk.f32.mxu1 %vm1751_vm4, %v26458_v16  ;;  %23242 = vmatpush3.bf16.msra.mxu1 %v23239_v29  ;;  %v29553_v16 = vld [vmem:[#allocation22_spill] sm:$0xff] }
 0x456   : > { %23244 = vmatprep.subr.bf16.mxu1 %v23243_v14  ;;  %v29577_v29 = vld [vmem:[#allocation46_spill] sm:$0xff] }
 0x458   : > { %21717 = vmatmul.mubr.msk.f32.gmra.mrb[28].mxu1 %vm1751_vm4, %v26462_v17  ;;  %v29554_v17 = vld [vmem:[#allocation23_spill] sm:$0xff] }
 0x459   : > { %21719 = vmatprep.mubr.msk.f32.mxu1 %vm1751_vm4, %v26466_v57  ;;  %v29555_v57 = vld [vmem:[#allocation24_spill] sm:$0xff] }
 0x45c   : > { %21720 = vmatmul.mubr.msk.f32.gmra.mrb[30].mxu1 %vm1751_vm4, %v26470_v40  ;;  %v29556_v40 = vld [vmem:[#allocation25_spill] sm:$0xff] }
 0x45d   : > { %21722 = vmatprep.mubr.msk.f32.mxu1 %vm1751_vm4, %v26474_v50  ;;  %v29557_v50 = vld [vmem:[#allocation26_spill] sm:$0xff] }
 0x460   : > { %21723 = vmatmul.mubr.msk.f32.gmra.mrb[0].mxu1 %vm1751_vm4, %v26478_v37  ;;  %v29558_v37 = vld [vmem:[#allocation27_spill] sm:$0xff] }
 0x461   : > { %21725 = vmatprep.mubr.msk.f32.mxu1 %vm1751_vm4, %v26482_v47  ;;  %v29559_v47 = vld [vmem:[#allocation28_spill] sm:$0xff] }
 0x464   : > { %21726 = vmatmul.mubr.msk.f32.gmra.mrb[2].mxu1 %vm1751_vm4, %v26486_v18  ;;  %v29560_v18 = vld [vmem:[#allocation29_spill] sm:$0xff] }
 0x465   : > { %21728 = vmatprep.mubr.msk.f32.mxu1 %vm1751_vm4, %v26490_v21  ;;  %v29561_v21 = vld [vmem:[#allocation30_spill] sm:$0xff] }
 0x468   : > { %21729 = vmatmul.mubr.msk.f32.gmra.mrb[4].mxu1 %vm1751_vm4, %v26494_v27  ;;  %v29562_v27 = vld [vmem:[#allocation31_spill] sm:$0xff] }
 0x469   : > { %21731 = vmatprep.mubr.msk.f32.mxu1 %vm1751_vm4, %v26498_v30  ;;  %v29563_v30 = vld [vmem:[#allocation32_spill] sm:$0xff] }
 0x46c   : > { %21732 = vmatmul.mubr.msk.f32.gmra.mrb[6].mxu1 %vm1751_vm4, %v26502_v63  ;;  %v29564_v63 = vld [vmem:[#allocation33_spill] sm:$0xff] }
 0x46d   : > { %21734 = vmatprep.mubr.msk.f32.mxu1 %vm1751_vm4, %v26506_v9  ;;  %v29565_v9 = vld [vmem:[#allocation34_spill] sm:$0xff] }
 0x470   : > { %21735 = vmatmul.mubr.msk.f32.gmra.mrb[8].mxu1 %vm1751_vm4, %v26510_v13  ;;  %v29566_v13 = vld [vmem:[#allocation35_spill] sm:$0xff] }
 0x471   : > { %21737 = vmatprep.mubr.msk.f32.mxu1 %vm1751_vm4, %v26514_v46  ;;  %v29567_v46 = vld [vmem:[#allocation36_spill] sm:$0xff] }
 0x474   : > { %21738 = vmatmul.mubr.msk.f32.gmra.mrb[10].mxu1 %vm1751_vm4, %v26518_v45  ;;  %v29568_v45 = vld [vmem:[#allocation37_spill] sm:$0xff] }
 0x475   : > { %21740 = vmatprep.mubr.msk.f32.mxu1 %vm1751_vm4, %v26522_v7  ;;  %v29569_v7 = vld [vmem:[#allocation38_spill] sm:$0xff] }
 0x478   : > { %21741 = vmatmul.mubr.msk.f32.gmra.mrb[12].mxu1 %vm1751_vm4, %v26526_v61  ;;  %v29570_v61 = vld [vmem:[#allocation39_spill] sm:$0xff] }
 0x479   : > { %21743 = vmatprep.mubr.msk.f32.mxu1 %vm1751_vm4, %v26530_v51  ;;  %v29571_v51 = vld [vmem:[#allocation40_spill] sm:$0xff] }
 0x47c   : > { %21744 = vmatmul.mubr.msk.f32.gmra.mrb[14].mxu1 %vm1751_vm4, %v26534_v3  ;;  %v27287_v3 = vld [vmem:[#allocation4 + $0x1b1] sm:$0xff] }
 0x47d   : > { %21746 = vmatprep.mubr.msk.f32.mxu1 %vm1751_vm4, %v26538_v38  ;;  %v29572_v38 = vld [vmem:[#allocation41_spill] sm:$0xff] }
 0x480   : > { %21747 = vmatmul.mubr.msk.f32.gmra.mrb[16].mxu1 %vm1751_vm4, %v26542_v42  ;;  %v27293_v42 = vld [vmem:[#allocation4 + $0x1b9] sm:$0xff] }
 0x481   : > { %21749 = vmatprep.mubr.msk.f32.mxu1 %vm1751_vm4, %v26546_v54  ;;  %v18470_v54 = vld [vmem:[%s29330_s3 + $0x250] sm:$0xff] }
 0x484   : > { %21750 = vmatmul.mubr.msk.f32.gmra.mrb[18].mxu1 %vm1751_vm4, %v26550_v58  ;;  %v18471_v58 = vld [vmem:[%s29330_s3 + $0x258] sm:$0xff] }
 0x485   : > { %21752 = vmatprep.mubr.msk.f32.mxu1 %vm1751_vm4, %v26554_v33  ;;  %v29573_v33 = vld [vmem:[#allocation42_spill] sm:$0xff] }
 0x488   : > { %21753 = vmatmul.mubr.msk.f32.gmra.mrb[20].mxu1 %vm1751_vm4, %v26558_v36  ;;  %v23255_v36 = vpack.c.bf16 %v18471_v58, %v18470_v54  ;;  %v29608_v54 = vld [vmem:[#allocation108_spill] sm:$0xff]  ;;  %v29609_v58 = vld [vmem:[#allocation110_spill] sm:$0xff] }
 0x489   : > { %21755 = vmatprep.mubr.msk.f32.mxu1 %vm1751_vm4, %v27207_v19 }
 0x48c   : > { %21756 = vmatmul.mubr.msk.f32.gmra.mrb[22].mxu1 %vm1751_vm4, %v27213_v20 }
 0x48d   : > { %21766 = vmatprep.mubr.msk.f32.mxu1 %vm1751_vm4, %v26576_v48  ;;  %v18504_v48 = vld [vmem:[%s29330_s3 + $0x260] sm:$0xff] }
 0x490   : > { %21767 = vmatmul.mubr.msk.f32.vlgmr.msra.gmra.mrb[24].mxu1 %vm1751_vm4, %v26583_v6  ;;  %v18505_v6 = vld [vmem:[%s29330_s3 + $0x268] sm:$0xff] }
 0x491   : > { %23246 = vmatpush3.bf16.msra.mxu1 %v23243_v14  ;;  %21769 = vmatprep.mubr.msk.f32.mxu1 %vm1751_vm4, %v26587_v8  ;;  %v29574_v8 = vld [vmem:[#allocation43_spill] sm:$0xff]  ;;  %v23259_v1 = vpack.c.bf16 %v18505_v6, %v18504_v48  ;;  %v29580_v14 = vld [vmem:[#allocation49_spill] sm:$0xff]  ;;  %v29613_v6 = vld [vmem:[#allocation114_spill] sm:$0xff] }
 0x492   : > { %23248 = vmatprep.subr.bf16.mxu1 %v23247_v24  ;;  %v29612_v48 = vld [vmem:[#allocation113_spill] sm:$0xff] }
 0x494   : > { %21770 = vmatmul.mubr.msk.f32.gmra.mrb[26].mxu1 %vm1751_vm4, %v29546_v32  ;;  %v29587_v32 = vld [vmem:[#allocation62_spill] sm:$0xff] }
 0x495   : > { %21772 = vmatprep.mubr.msk.f32.mxu1 %vm1751_vm4, %v29547_v53  ;;  %23250 = vmatpush3.bf16.msra.mxu1 %v23247_v24  ;;  %v29583_v24 = vld [vmem:[#allocation54_spill] sm:$0xff]  ;;  %v29588_v53 = vld [vmem:[#allocation64_spill] sm:$0xff] }
 0x496   : > { %23252 = vmatprep.subr.bf16.mxu1 %v23251_v28 }
 0x498   : > { %21773 = vmatmul.mubr.msk.f32.gmra.mrb[28].mxu1 %vm1751_vm4, %v29548_v55  ;;  %v29589_v55 = vld [vmem:[#allocation66_spill] sm:$0xff] }
 0x499   : > { %21775 = vmatprep.mubr.msk.f32.mxu1 %vm1751_vm4, %v29549_v60  ;;  %v29590_v60 = vld [vmem:[#allocation68_spill] sm:$0xff] }
 0x49c   : > { %21776 = vmatmul.mubr.msk.f32.gmra.mrb[30].mxu1 %vm1751_vm4, %v29550_v0  ;;  %v29591_v0 = vld [vmem:[#allocation70_spill] sm:$0xff] }
 0x49d   : > { %21778 = vmatprep.mubr.msk.f32.mxu1 %vm1751_vm4, %v29551_v4  ;;  %v29592_v4 = vld [vmem:[#allocation72_spill] sm:$0xff] }
 0x4a0   : > { %21779 = vmatmul.mubr.msk.f32.gmra.mrb[0].mxu1 %vm1751_vm4, %v29552_v62  ;;  %v29593_v62 = vld [vmem:[#allocation74_spill] sm:$0xff] }
 0x4a1   : > { %21781 = vmatprep.mubr.msk.f32.mxu1 %vm1751_vm4, %v29553_v16  ;;  %v29594_v16 = vld [vmem:[#allocation76_spill] sm:$0xff] }
 0x4a4   : > { %21782 = vmatmul.mubr.msk.f32.gmra.mrb[2].mxu1 %vm1751_vm4, %v29554_v17  ;;  %v29595_v17 = vld [vmem:[#allocation78_spill] sm:$0xff] }
 0x4a5   : > { %21784 = vmatprep.mubr.msk.f32.mxu1 %vm1751_vm4, %v29555_v57  ;;  %v29596_v57 = vld [vmem:[#allocation80_spill] sm:$0xff] }
 0x4a8   : > { %21785 = vmatmul.mubr.msk.f32.gmra.mrb[4].mxu1 %vm1751_vm4, %v29556_v40  ;;  %v29597_v40 = vld [vmem:[#allocation82_spill] sm:$0xff] }
 0x4a9   : > { %21787 = vmatprep.mubr.msk.f32.mxu1 %vm1751_vm4, %v29557_v50  ;;  %v29598_v50 = vld [vmem:[#allocation84_spill] sm:$0xff] }
 0x4ac   : > { %21788 = vmatmul.mubr.msk.f32.gmra.mrb[6].mxu1 %vm1751_vm4, %v29558_v37  ;;  %v29599_v37 = vld [vmem:[#allocation86_spill] sm:$0xff] }
 0x4ad   : > { %21790 = vmatprep.mubr.msk.f32.mxu1 %vm1751_vm4, %v29559_v47  ;;  %v29600_v47 = vld [vmem:[#allocation88_spill] sm:$0xff] }
 0x4b0   : > { %21791 = vmatmul.mubr.msk.f32.gmra.mrb[8].mxu1 %vm1751_vm4, %v29560_v18  ;;  %v29601_v18 = vld [vmem:[#allocation90_spill] sm:$0xff] }
 0x4b1   : > { %21793 = vmatprep.mubr.msk.f32.mxu1 %vm1751_vm4, %v29561_v21  ;;  %v27367_v21 = vld [vmem:[#allocation4 + $0x1b2] sm:$0xff] }
 0x4b4   : > { %21794 = vmatmul.mubr.msk.f32.gmra.mrb[10].mxu1 %vm1751_vm4, %v29562_v27  ;;  %v27373_v27 = vld [vmem:[#allocation4 + $0x1ba] sm:$0xff] }
 0x4b5   : > { %21796 = vmatprep.mubr.msk.f32.mxu1 %vm1751_vm4, %v29563_v30  ;;  %v18506_v30 = vld [vmem:[%s29330_s3 + $0x270] sm:$0xff] }
 0x4b8   : > { %21797 = vmatmul.mubr.msk.f32.gmra.mrb[12].mxu1 %vm1751_vm4, %v29564_v63  ;;  %v18507_v63 = vld [vmem:[%s29330_s3 + $0x278] sm:$0xff] }
 0x4b9   : > { %21799 = vmatprep.mubr.msk.f32.mxu1 %vm1751_vm4, %v29565_v9  ;;  %v18540_v9 = vld [vmem:[%s29330_s3 + $0x280] sm:$0xff] }
 0x4bc   : > { %21800 = vmatmul.mubr.msk.f32.gmra.mrb[14].mxu1 %vm1751_vm4, %v29566_v13  ;;  %v18541_v13 = vld [vmem:[%s29330_s3 + $0x288] sm:$0xff] }
 0x4bd   : > { %21802 = vmatprep.mubr.msk.f32.mxu1 %vm1751_vm4, %v29567_v46  ;;  %v29602_v46 = vld [vmem:[#allocation95_spill] sm:$0xff] }
 0x4c0   : > { %21803 = vmatmul.mubr.msk.f32.gmra.mrb[16].mxu1 %vm1751_vm4, %v29568_v45  ;;  %v29603_v45 = vld [vmem:[#allocation97_spill] sm:$0xff] }
 0x4c1   : > { %21805 = vmatprep.mubr.msk.f32.mxu1 %vm1751_vm4, %v29569_v7  ;;  %v23267_v7 = vpack.c.bf16 %v18541_v13, %v18540_v9  ;;  %v27551_v9 = vld [vmem:[#allocation4 + $0x174] sm:$0xff]  ;;  %v27555_v13 = vld [vmem:[#allocation4 + $0x184] sm:$0xff] }
 0x4c4   : > { %21806 = vmatmul.mubr.msk.f32.gmra.mrb[18].mxu1 %vm1751_vm4, %v29570_v61  ;;  %v29604_v61 = vld [vmem:[#allocation100_spill] sm:$0xff] }
 0x4c5   : > { %21808 = vmatprep.mubr.msk.f32.mxu1 %vm1751_vm4, %v29571_v51  ;;  %v29606_v51 = vld [vmem:[#allocation104_spill] sm:$0xff] }
 0x4c8   : > { %21809 = vmatmul.mubr.msk.f32.gmra.mrb[20].mxu1 %vm1751_vm4, %v29572_v38  ;;  %v29607_v38 = vld [vmem:[#allocation106_spill] sm:$0xff] }
 0x4c9   : > { %21811 = vmatprep.mubr.msk.f32.mxu1 %vm1751_vm4, %v27287_v3 }
 0x4cc   : > { %21812 = vmatmul.mubr.msk.f32.gmra.mrb[22].mxu1 %vm1751_vm4, %v27293_v42 }
 0x4cd   : > { %21822 = vmatprep.mubr.msk.f32.mxu1 %vm1751_vm4, %v29573_v33  ;;  %v29610_v33 = vld [vmem:[#allocation111_spill] sm:$0xff] }
 0x4d0   : > { %21823 = vmatmul.mubr.msk.f32.vlgmr.msra.gmra.mrb[24].mxu1 %vm1751_vm4, %v29574_v8  ;;  %v29614_v8 = vld [vmem:[#allocation115_spill] sm:$0xff] }
 0x4d1   : > { %23254 = vmatpush3.bf16.msra.mxu1 %v23251_v28  ;;  %21825 = vmatprep.mubr.msk.f32.mxu1 %vm1751_vm4, %v29575_v34  ;;  %v29586_v28 = vld [vmem:[#allocation60_spill] sm:$0xff] }
 0x4d2   : > { %23256 = vmatprep.subr.bf16.mxu1 %v23255_v36  ;;  %v29615_v34 = vld [vmem:[#allocation116_spill] sm:$0xff] }
 0x4d4   : > { %21826 = vmatmul.mubr.msk.f32.gmra.mrb[26].mxu1 %vm1751_vm4, %v29576_v26  ;;  %v29617_v26 = vld [vmem:[#allocation118_spill] sm:$0xff] }
 0x4d5   : > { %21828 = vmatprep.mubr.msk.f32.mxu1 %vm1751_vm4, %v29577_v29  ;;  %23258 = vmatpush3.bf16.msra.mxu1 %v23255_v36  ;;  %v29611_v36 = vld [vmem:[#allocation112_spill] sm:$0xff]  ;;  %v29618_v29 = vld [vmem:[#allocation119_spill] sm:$0xff] }
 0x4d6   : > { %23260 = vmatprep.subr.bf16.mxu1 %v23259_v1 }
 0x4d8   : > { %21829 = vmatmul.mubr.msk.f32.gmra.mrb[28].mxu1 %vm1751_vm4, %v29578_v35  ;;  %v29619_v35 = vld [vmem:[#allocation120_spill] sm:$0xff] }
 0x4d9   : > { %21831 = vmatprep.mubr.msk.f32.mxu1 %vm1751_vm4, %v29579_v39  ;;  %v29620_v39 = vld [vmem:[#allocation121_spill] sm:$0xff] }
 0x4dc   : > { %21832 = vmatmul.mubr.msk.f32.gmra.mrb[30].mxu1 %vm1751_vm4, %v29580_v14  ;;  %v29621_v14 = vld [vmem:[#allocation122_spill] sm:$0xff] }
 0x4dd   : > { %21834 = vmatprep.mubr.msk.f32.mxu1 %vm1751_vm4, %v29581_v22  ;;  %v29622_v22 = vld [vmem:[#allocation123_spill] sm:$0xff] }
 0x4e0   : > { %21835 = vmatmul.mubr.msk.f32.gmra.mrb[0].mxu1 %vm1751_vm4, %v29582_v23  ;;  %v29623_v23 = vld [vmem:[#allocation124_spill] sm:$0xff] }
 0x4e1   : > { %21837 = vmatprep.mubr.msk.f32.mxu1 %vm1751_vm4, %v29583_v24  ;;  %v29624_v24 = vld [vmem:[#allocation125_spill] sm:$0xff] }
 0x4e4   : > { %21838 = vmatmul.mubr.msk.f32.gmra.mrb[2].mxu1 %vm1751_vm4, %v29584_v52  ;;  %v29625_v52 = vld [vmem:[#allocation126_spill] sm:$0xff] }
 0x4e5   : > { %21840 = vmatprep.mubr.msk.f32.mxu1 %vm1751_vm4, %v29585_v25  ;;  %v29626_v25 = vld [vmem:[#allocation127_spill] sm:$0xff] }
 0x4e8   : > { %21841 = vmatmul.mubr.msk.f32.gmra.mrb[4].mxu1 %vm1751_vm4, %v29586_v28  ;;  %v29627_v28 = vld [vmem:[#allocation128_spill] sm:$0xff] }
 0x4e9   : > { %21843 = vmatprep.mubr.msk.f32.mxu1 %vm1751_vm4, %v29587_v32  ;;  %v29628_v32 = vld [vmem:[#allocation129_spill] sm:$0xff] }
 0x4ec   : > { %21844 = vmatmul.mubr.msk.f32.gmra.mrb[6].mxu1 %vm1751_vm4, %v29588_v53  ;;  %v29629_v53 = vld [vmem:[#allocation130_spill] sm:$0xff] }
 0x4ed   : > { %21846 = vmatprep.mubr.msk.f32.mxu1 %vm1751_vm4, %v29589_v55  ;;  %v27447_v55 = vld [vmem:[#allocation4 + $0x1b3] sm:$0xff] }
 0x4f0   : > { %21847 = vmatmul.mubr.msk.f32.gmra.mrb[8].mxu1 %vm1751_vm4, %v29590_v60  ;;  %v27453_v60 = vld [vmem:[#allocation4 + $0x1bb] sm:$0xff] }
 0x4f1   : > { %21849 = vmatprep.mubr.msk.f32.mxu1 %vm1751_vm4, %v29591_v0  ;;  %v18542_v0 = vld [vmem:[%s29330_s3 + $0x290] sm:$0xff] }
 0x4f4   : > { %21850 = vmatmul.mubr.msk.f32.gmra.mrb[10].mxu1 %vm1751_vm4, %v29592_v4  ;;  %v18543_v4 = vld [vmem:[%s29330_s3 + $0x298] sm:$0xff] }
 0x4f5   : > { %21852 = vmatprep.mubr.msk.f32.mxu1 %vm1751_vm4, %v29593_v62  ;;  %v18576_v62 = vld [vmem:[%s29330_s3 + $0x2a0] sm:$0xff] }
 0x4f8   : > { %21853 = vmatmul.mubr.msk.f32.gmra.mrb[12].mxu1 %vm1751_vm4, %v29594_v16  ;;  %v18577_v16 = vld [vmem:[%s29330_s3 + $0x2a8] sm:$0xff] }
 0x4f9   : > { %21855 = vmatprep.mubr.msk.f32.mxu1 %vm1751_vm4, %v29595_v17  ;;  %v23275_v17 = vpack.c.bf16 %v18577_v16, %v18576_v62  ;;  %v10217_v62 = vld [vmem:[#allocation4 + $0x188] sm:$0xff]  ;;  %v10218_v16 = vld [vmem:[#allocation4 + $0x198] sm:$0xff] }
 0x4fc   : > { %21856 = vmatmul.mubr.msk.f32.gmra.mrb[14].mxu1 %vm1751_vm4, %v29596_v57  ;;  %v29630_v57 = vld [vmem:[#allocation131_spill] sm:$0xff] }
 0x4fd   : > { %21858 = vmatprep.mubr.msk.f32.mxu1 %vm1751_vm4, %v29597_v40  ;;  %v27519_v40 = vld [vmem:[#allocation4 + $0x114] sm:$0xff] }
 0x500   : > { %21859 = vmatmul.mubr.msk.f32.gmra.mrb[16].mxu1 %vm1751_vm4, %v29598_v50  ;;  %v27523_v50 = vld [vmem:[#allocation4 + $0x124] sm:$0xff] }
 0x501   : > { %21861 = vmatprep.mubr.msk.f32.mxu1 %vm1751_vm4, %v29599_v37  ;;  %v27527_v37 = vld [vmem:[#allocation4 + $0x12c] sm:$0xff] }
 0x504   : > { %21862 = vmatmul.mubr.msk.f32.gmra.mrb[18].mxu1 %vm1751_vm4, %v29600_v47  ;;  %v27531_v47 = vld [vmem:[#allocation4 + $0x13c] sm:$0xff] }
 0x505   : > { %21864 = vmatprep.mubr.msk.f32.mxu1 %vm1751_vm4, %v29601_v18  ;;  %v27535_v18 = vld [vmem:[#allocation4 + $0x144] sm:$0xff] }
 0x508   : > { %21865 = vmatmul.mubr.msk.f32.gmra.mrb[20].mxu1 %vm1751_vm4, %v26876_v43  ;;  %v23263_v43 = vpack.c.bf16 %v18507_v63, %v18506_v30  ;;  %v27539_v30 = vld [vmem:[#allocation4 + $0x154] sm:$0xff]  ;;  %v27543_v63 = vld [vmem:[#allocation4 + $0x15c] sm:$0xff] }
 0x509   : > { %21867 = vmatprep.mubr.msk.f32.mxu1 %vm1751_vm4, %v27367_v21 }
 0x50c   : > { %21868 = vmatmul.mubr.msk.f32.gmra.mrb[22].mxu1 %vm1751_vm4, %v27373_v27 }
 0x50d   : > { %21878 = vmatprep.mubr.msk.f32.mxu1 %vm1751_vm4, %v26900_v44  ;;  %v29605_v44 = vld [vmem:[#allocation102_spill] sm:$0xff] }
 0x510   : > { %21879 = vmatmul.mubr.msk.f32.vlgmr.msra.gmra.mrb[24].mxu1 %vm1751_vm4, %v29602_v46  ;;  %v27559_v46 = vld [vmem:[#allocation4 + $0x18c] sm:$0xff] }
 0x511   : > { %23262 = vmatpush3.bf16.msra.mxu1 %v23259_v1  ;;  %21881 = vmatprep.mubr.msk.f32.mxu1 %vm1751_vm4, %v29603_v45  ;;  %v29616_v1 = vld [vmem:[#allocation117_spill] sm:$0xff]  ;;  %v27565_v45 = vld [vmem:[#allocation4 + $0x1b4] sm:$0xff] }
 0x512   : > { %23264 = vmatprep.subr.bf16.mxu1 %v23263_v43 }
 0x514   : > { %21882 = vmatmul.mubr.msk.f32.gmra.mrb[26].mxu1 %vm1751_vm4, %v29604_v61  ;;  %v18578_v61 = vld [vmem:[%s29330_s3 + $0x2b0] sm:$0xff] }
 0x515   : > { %21884 = vmatprep.mubr.msk.f32.mxu1 %vm1751_vm4, %v29605_v44  ;;  %23266 = vmatpush3.bf16.msra.mxu1 %v23263_v43  ;;  %v27547_v43 = vld [vmem:[#allocation4 + $0x16c] sm:$0xff]  ;;  %v18579_v44 = vld [vmem:[%s29330_s3 + $0x2b8] sm:$0xff] }
 0x516   : > { %23268 = vmatprep.subr.bf16.mxu1 %v23267_v7 }
 0x518   : > { %21885 = vmatmul.mubr.msk.f32.gmra.mrb[28].mxu1 %vm1751_vm4, %v29606_v51  ;;  %v10193_v51 = vld [vmem:[#allocation4 + $0x68] sm:$0xff] }
 0x519   : > { %21887 = vmatprep.mubr.msk.f32.mxu1 %vm1751_vm4, %v29607_v38  ;;  %v18612_v38 = vld [vmem:[%s29330_s3 + $0x2c0] sm:$0xff] }
 0x51c   : > { %21888 = vmatmul.mubr.msk.f32.gmra.mrb[30].mxu1 %vm1751_vm4, %v29608_v54  ;;  %v18613_v54 = vld [vmem:[%s29330_s3 + $0x2c8] sm:$0xff] }
 0x51d   : > { %21890 = vmatprep.mubr.msk.f32.mxu1 %vm1751_vm4, %v29609_v58  ;;  %v10194_v58 = vld [vmem:[#allocation4 + $0x78] sm:$0xff] }
 0x520   : > { %21891 = vmatmul.mubr.msk.f32.gmra.mrb[0].mxu1 %vm1751_vm4, %v29610_v33  ;;  %v27590_v33 = vpack.c.bf16 %v18613_v54, %v18612_v38  ;;  %v18649_v38 = vld [vmem:[%s29330_s3 + $0x2e8] sm:$0xff]  ;;  %v10584_v54 = vld [vmem:[#allocation4 + $0x79] sm:$0xff] }
 0x521   : > { %21893 = vmatprep.mubr.msk.f32.mxu1 %vm1751_vm4, %v29611_v36  ;;  %v10195_v36 = vld [vmem:[#allocation4 + $0x80] sm:$0xff] }
 0x524   : > { %21894 = vmatmul.mubr.msk.f32.gmra.mrb[2].mxu1 %vm1751_vm4, %v29612_v48  ;;  %v10196_v48 = vld [vmem:[#allocation4 + $0x90] sm:$0xff] }
 0x525   : > { %21896 = vmatprep.mubr.msk.f32.mxu1 %vm1751_vm4, %v29613_v6  ;;  %v10197_v6 = vld [vmem:[#allocation4 + $0x98] sm:$0xff] }
 0x528   : > { %21897 = vmatmul.mubr.msk.f32.gmra.mrb[4].mxu1 %vm1751_vm4, %v29614_v8  ;;  %v10198_v8 = vld [vmem:[#allocation4 + $0xa8] sm:$0xff] }
 0x529   : > { %21899 = vmatprep.mubr.msk.f32.mxu1 %vm1751_vm4, %v29615_v34  ;;  %v10199_v34 = vld [vmem:[#allocation4 + $0xb0] sm:$0xff] }
 0x52c   : > { %21900 = vmatmul.mubr.msk.f32.gmra.mrb[6].mxu1 %vm1751_vm4, %v29616_v1  ;;  %v10200_v1 = vld [vmem:[#allocation4 + $0xc0] sm:$0xff] }
 0x52d   : > { %21902 = vmatprep.mubr.msk.f32.mxu1 %vm1751_vm4, %v29617_v26  ;;  %v10201_v26 = vld [vmem:[#allocation4 + $0xc8] sm:$0xff] }
 0x530   : > { %21903 = vmatmul.mubr.msk.f32.gmra.mrb[8].mxu1 %vm1751_vm4, %v29618_v29  ;;  %v10202_v29 = vld [vmem:[#allocation4 + $0xd8] sm:$0xff] }
 0x531   : > { %21905 = vmatprep.mubr.msk.f32.mxu1 %vm1751_vm4, %v29619_v35  ;;  %v10203_v35 = vld [vmem:[#allocation4 + $0xe0] sm:$0xff] }
 0x534   : > { %21906 = vmatmul.mubr.msk.f32.gmra.mrb[10].mxu1 %vm1751_vm4, %v29620_v39  ;;  %v10204_v39 = vld [vmem:[#allocation4 + $0xf0] sm:$0xff] }
 0x535   : > { %21908 = vmatprep.mubr.msk.f32.mxu1 %vm1751_vm4, %v29621_v14  ;;  %v10205_v14 = vld [vmem:[#allocation4 + $0xf8] sm:$0xff] }
 0x538   : > { %21909 = vmatmul.mubr.msk.f32.gmra.mrb[12].mxu1 %vm1751_vm4, %v29622_v22  ;;  %v10206_v22 = vld [vmem:[#allocation4 + $0x108] sm:$0xff] }
 0x539   : > { %21911 = vmatprep.mubr.msk.f32.mxu1 %vm1751_vm4, %v29623_v23  ;;  %v10207_v23 = vld [vmem:[#allocation4 + $0x110] sm:$0xff] }
 0x53c   : > { %21912 = vmatmul.mubr.msk.f32.gmra.mrb[14].mxu1 %vm1751_vm4, %v29624_v24  ;;  %v10208_v24 = vld [vmem:[#allocation4 + $0x120] sm:$0xff] }
 0x53d   : > { %21914 = vmatprep.mubr.msk.f32.mxu1 %vm1751_vm4, %v29625_v52  ;;  %v10209_v52 = vld [vmem:[#allocation4 + $0x128] sm:$0xff] }
 0x540   : > { %21915 = vmatmul.mubr.msk.f32.gmra.mrb[16].mxu1 %vm1751_vm4, %v29626_v25  ;;  %v10210_v25 = vld [vmem:[#allocation4 + $0x138] sm:$0xff] }
 0x541   : > { %21917 = vmatprep.mubr.msk.f32.mxu1 %vm1751_vm4, %v29627_v28  ;;  %v10211_v28 = vld [vmem:[#allocation4 + $0x140] sm:$0xff] }
 0x544   : > { %21918 = vmatmul.mubr.msk.f32.gmra.mrb[18].mxu1 %vm1751_vm4, %v29628_v32  ;;  %v10212_v32 = vld [vmem:[#allocation4 + $0x150] sm:$0xff] }
 0x545   : > { %21920 = vmatprep.mubr.msk.f32.mxu1 %vm1751_vm4, %v29629_v53  ;;  %v10213_v53 = vld [vmem:[#allocation4 + $0x158] sm:$0xff] }
 0x548   : > { %21921 = vmatmul.mubr.msk.f32.gmra.mrb[20].mxu1 %vm1751_vm4, %v27036_v49  ;;  %v23271_v49 = vpack.c.bf16 %v18543_v4, %v18542_v0  ;;  %v10214_v0 = vld [vmem:[#allocation4 + $0x168] sm:$0xff]  ;;  %v10215_v4 = vld [vmem:[#allocation4 + $0x170] sm:$0xff] }
 0x549   : > { %21923 = vmatprep.mubr.msk.f32.mxu1 %vm1751_vm4, %v27447_v55 }
 0x54c   : > { %21924 = vmatmul.mubr.msk.f32.gmra.mrb[22].mxu1 %vm1751_vm4, %v27453_v60 }
 0x54d   : > { %21934 = vmatprep.mubr.msk.f32.mxu1 %vm1751_vm4, %v27054_v31  ;;  %v27487_v31 = vld [vmem:[#allocation4 + $0xb4] sm:$0xff] }
 0x550   : > { %21935 = vmatmul.mubr.msk.f32.vlgmr.msra.gmra.mrb[24].mxu1 %vm1751_vm4, %v27059_v11  ;;  %v27491_v11 = vld [vmem:[#allocation4 + $0xc4] sm:$0xff] }
 0x551   : > { %23270 = vmatpush3.bf16.msra.mxu1 %v23267_v7  ;;  %21937 = vmatprep.mubr.msk.f32.mxu1 %vm1751_vm4, %v27063_v2  ;;  %v27495_v2 = vld [vmem:[#allocation4 + $0xcc] sm:$0xff]  ;;  %v27571_v7 = vld [vmem:[#allocation4 + $0x1bc] sm:$0xff] }
 0x552   : > { %23272 = vmatprep.subr.bf16.mxu1 %v23271_v49 }
 0x554   : > { %21938 = vmatmul.mubr.msk.f32.gmra.mrb[26].mxu1 %vm1751_vm4, %v29630_v57  ;;  %v10222_v57 = vld [vmem:[#allocation4 + $0x1c8] sm:$0xff] }
 0x555   : > { %21940 = vmatprep.mubr.msk.f32.mxu1 %vm1751_vm4, %v27071_v15  ;;  %23274 = vmatpush3.bf16.msra.mxu1 %v23271_v49  ;;  %v27499_v15 = vld [vmem:[#allocation4 + $0xdc] sm:$0xff] }
 0x556   : > { %23276 = vmatprep.subr.bf16.mxu1 %v23275_v17  ;;  %v10216_v49 = vld [vmem:[#allocation4 + $0x180] sm:$0xff] }
 0x558   : > { %21941 = vmatmul.mubr.msk.f32.gmra.mrb[28].mxu1 %vm1751_vm4, %v27075_v5  ;;  %v27507_v5 = vld [vmem:[#allocation4 + $0xf4] sm:$0xff] }
 0x559   : > { %21943 = vmatprep.mubr.msk.f32.mxu1 %vm1751_vm4, %v27079_v12  ;;  %v27511_v12 = vld [vmem:[#allocation4 + $0xfc] sm:$0xff] }
 0x55c   : > { %21944 = vmatmul.mubr.msk.f32.gmra.mrb[30].mxu1 %vm1751_vm4, %v27083_v10  ;;  %v27515_v10 = vld [vmem:[#allocation4 + $0x10c] sm:$0xff] }
 0x55d   : > { %21946 = vmatprep.mubr.msk.f32.mxu1 %vm1751_vm4, %v27087_v56  ;;  %v27503_v56 = vld [vmem:[#allocation4 + $0xe4] sm:$0xff] }
 0x560   : > { %21947 = vmatmul.mubr.msk.f32.gmra.mrb[0].mxu1 %vm1751_vm4, %v27487_v31 }
 0x561   : > { %21949 = vmatprep.mubr.msk.f32.mxu1 %vm1751_vm4, %v27491_v11 }
 0x564   : > { %21950 = vmatmul.mubr.msk.f32.gmra.mrb[2].mxu1 %vm1751_vm4, %v27495_v2 }
 0x565   : > { %21952 = vmatprep.mubr.msk.f32.mxu1 %vm1751_vm4, %v27499_v15 }
 0x568   : > { %21953 = vmatmul.mubr.msk.f32.gmra.mrb[4].mxu1 %vm1751_vm4, %v27503_v56 }
 0x569   : > { %21955 = vmatprep.mubr.msk.f32.mxu1 %vm1751_vm4, %v27507_v5 }
 0x56c   : > { %21956 = vmatmul.mubr.msk.f32.gmra.mrb[6].mxu1 %vm1751_vm4, %v27511_v12 }
 0x56d   : > { %21958 = vmatprep.mubr.msk.f32.mxu1 %vm1751_vm4, %v27515_v10 }
 0x570   : > { %21959 = vmatmul.mubr.msk.f32.gmra.mrb[8].mxu1 %vm1751_vm4, %v27519_v40 }
 0x571   : > { %21961 = vmatprep.mubr.msk.f32.mxu1 %vm1751_vm4, %v27523_v50 }
 0x574   : > { %21962 = vmatmul.mubr.msk.f32.gmra.mrb[10].mxu1 %vm1751_vm4, %v27527_v37 }
 0x575   : > { %21964 = vmatprep.mubr.msk.f32.mxu1 %vm1751_vm4, %v27531_v47 }
 0x578   : > { %21965 = vmatmul.mubr.msk.f32.gmra.mrb[12].mxu1 %vm1751_vm4, %v27535_v18 }
 0x579   : > { %21967 = vmatprep.mubr.msk.f32.mxu1 %vm1751_vm4, %v27539_v30 }
 0x57c   : > { %21968 = vmatmul.mubr.msk.f32.gmra.mrb[14].mxu1 %vm1751_vm4, %v27543_v63 }
 0x57d   : > { %21970 = vmatprep.mubr.msk.f32.mxu1 %vm1751_vm4, %v27547_v43 }
 0x580   : > { %21971 = vmatmul.mubr.msk.f32.gmra.mrb[16].mxu1 %vm1751_vm4, %v27551_v9 }
 0x581   : > { %21973 = vmatprep.mubr.msk.f32.mxu1 %vm1751_vm4, %v27555_v13 }
 0x584   : > { %21974 = vmatmul.mubr.msk.f32.gmra.mrb[18].mxu1 %vm1751_vm4, %v27559_v46 }
 0x585   : > { %21976 = vmatprep.mubr.msk.f32.mxu1 %vm1751_vm4, %v27129_v41  ;;  %v10192_v41 = vld [vmem:[#allocation4 + $0x60] sm:$0xff] }
 0x588   : > { %21977 = vmatmul.mubr.msk.f32.gmra.mrb[20].mxu1 %vm1751_vm4, %v27133_v59  ;;  %v23279_v59 = vpack.c.bf16 %v18579_v44, %v18578_v61  ;;  %v10223_v61 = vld [vmem:[#allocation4 + $0x1d0] sm:$0xff] }
 0x589   : > { %21979 = vmatprep.mubr.msk.f32.mxu1 %vm1751_vm4, %v27565_v45  ;;  %v18614_v44 = vld [vmem:[%s29330_s3 + $0x2d0] sm:$0xff] }
 0x58c   : > { %21980 = vmatmul.mubr.msk.f32.gmra.mrb[22].mxu1 %vm1751_vm4, %v27571_v7 }
 0x58d   : > { %21990 = vmatprep.mubr.msk.f32.mxu1 %vm1751_vm4, %v10192_v41  ;;  %v18615_v41 = vld [vmem:[%s29330_s3 + $0x2d8] sm:$0xff] }
 0x590   : > { %21991 = vmatmul.mubr.msk.f32.vlgmr.msra.gmra.mrb[24].mxu1 %vm1751_vm4, %v10193_v51  ;;  %v10583_v51 = vld [vmem:[#allocation4 + $0x69] sm:$0xff] }
 0x591   : > { %23278 = vmatpush3.bf16.msra.mxu1 %v23275_v17  ;;  %21993 = vmatprep.mubr.msk.f32.mxu1 %vm1751_vm4, %v10194_v58  ;;  %v10219_v17 = vld [vmem:[#allocation4 + $0x1a0] sm:$0xff] }
 0x592   : > { %23280 = vmatprep.subr.bf16.mxu1 %v23279_v59 }
 0x594   : > { %21994 = vmatmul.mubr.msk.f32.gmra.mrb[26].mxu1 %vm1751_vm4, %v10195_v36  ;;  %v10585_v36 = vld [vmem:[#allocation4 + $0x81] sm:$0xff] }
 0x595   : > { %21996 = vmatprep.mubr.msk.f32.mxu1 %vm1751_vm4, %v10196_v48  ;;  %23282 = vmatpush3.bf16.msra.mxu1 %v23279_v59  ;;  %v10582_v59 = vld [vmem:[#allocation4 + $0x61] sm:$0xff]  ;;  %v10586_v48 = vld [vmem:[#allocation4 + $0x91] sm:$0xff] }
 0x596   : > { %23284 = vmatprep.subr.bf16.mxu1 %v27590_v33 }
 0x598   : > { %21997 = vmatmul.mubr.msk.f32.gmra.mrb[28].mxu1 %vm1751_vm4, %v10197_v6  ;;  %v10587_v6 = vld [vmem:[#allocation4 + $0x99] sm:$0xff] }
 0x599   : > { %21999 = vmatprep.mubr.msk.f32.mxu1 %vm1751_vm4, %v10198_v8  ;;  %v10588_v8 = vld [vmem:[#allocation4 + $0xa9] sm:$0xff] }
 0x59c   : > { %22000 = vmatmul.mubr.msk.f32.gmra.mrb[30].mxu1 %vm1751_vm4, %v10199_v34  ;;  %v10590_v34 = vld [vmem:[#allocation4 + $0xc1] sm:$0xff] }
 0x59d   : > { %22002 = vmatprep.mubr.msk.f32.mxu1 %vm1751_vm4, %v10200_v1  ;;  %v10591_v1 = vld [vmem:[#allocation4 + $0xc9] sm:$0xff] }
 0x5a0   : > { %22003 = vmatmul.mubr.msk.f32.gmra.mrb[0].mxu1 %vm1751_vm4, %v10201_v26  ;;  %v10592_v26 = vld [vmem:[#allocation4 + $0xd9] sm:$0xff] }
 0x5a1   : > { %22005 = vmatprep.mubr.msk.f32.mxu1 %vm1751_vm4, %v10202_v29  ;;  %v10593_v29 = vld [vmem:[#allocation4 + $0xe1] sm:$0xff] }
 0x5a4   : > { %22006 = vmatmul.mubr.msk.f32.gmra.mrb[2].mxu1 %vm1751_vm4, %v10203_v35  ;;  %v10594_v35 = vld [vmem:[#allocation4 + $0xf1] sm:$0xff] }
 0x5a5   : > { %22008 = vmatprep.mubr.msk.f32.mxu1 %vm1751_vm4, %v10204_v39  ;;  %v10595_v39 = vld [vmem:[#allocation4 + $0xf9] sm:$0xff] }
 0x5a8   : > { %22009 = vmatmul.mubr.msk.f32.gmra.mrb[4].mxu1 %vm1751_vm4, %v10205_v14  ;;  %v10596_v14 = vld [vmem:[#allocation4 + $0x109] sm:$0xff] }
 0x5a9   : > { %22011 = vmatprep.mubr.msk.f32.mxu1 %vm1751_vm4, %v10206_v22  ;;  %v10597_v22 = vld [vmem:[#allocation4 + $0x111] sm:$0xff] }
 0x5ac   : > { %22012 = vmatmul.mubr.msk.f32.gmra.mrb[6].mxu1 %vm1751_vm4, %v10207_v23  ;;  %v10598_v23 = vld [vmem:[#allocation4 + $0x121] sm:$0xff] }
 0x5ad   : > { %22014 = vmatprep.mubr.msk.f32.mxu1 %vm1751_vm4, %v10208_v24  ;;  %v10599_v24 = vld [vmem:[#allocation4 + $0x129] sm:$0xff] }
 0x5b0   : > { %22015 = vmatmul.mubr.msk.f32.gmra.mrb[8].mxu1 %vm1751_vm4, %v10209_v52  ;;  %v10600_v52 = vld [vmem:[#allocation4 + $0x139] sm:$0xff] }
 0x5b1   : > { %22017 = vmatprep.mubr.msk.f32.mxu1 %vm1751_vm4, %v10210_v25  ;;  %v10601_v25 = vld [vmem:[#allocation4 + $0x141] sm:$0xff] }
 0x5b4   : > { %22018 = vmatmul.mubr.msk.f32.gmra.mrb[10].mxu1 %vm1751_vm4, %v10211_v28  ;;  %v10602_v28 = vld [vmem:[#allocation4 + $0x151] sm:$0xff] }
 0x5b5   : > { %22020 = vmatprep.mubr.msk.f32.mxu1 %vm1751_vm4, %v10212_v32  ;;  %v10603_v32 = vld [vmem:[#allocation4 + $0x159] sm:$0xff] }
 0x5b8   : > { %22021 = vmatmul.mubr.msk.f32.gmra.mrb[12].mxu1 %vm1751_vm4, %v10213_v53  ;;  %v10604_v53 = vld [vmem:[#allocation4 + $0x169] sm:$0xff] }
 0x5b9   : > { %22023 = vmatprep.mubr.msk.f32.mxu1 %vm1751_vm4, %v10214_v0  ;;  %v10605_v0 = vld [vmem:[#allocation4 + $0x171] sm:$0xff] }
 0x5bc   : > { %22024 = vmatmul.mubr.msk.f32.gmra.mrb[14].mxu1 %vm1751_vm4, %v10215_v4  ;;  %v10606_v4 = vld [vmem:[#allocation4 + $0x181] sm:$0xff] }
 0x5bd   : > { %22026 = vmatprep.mubr.msk.f32.mxu1 %vm1751_vm4, %v10216_v49  ;;  %v10607_v49 = vld [vmem:[#allocation4 + $0x189] sm:$0xff] }
 0x5c0   : > { %22027 = vmatmul.mubr.msk.f32.gmra.mrb[16].mxu1 %vm1751_vm4, %v10217_v62  ;;  %v10608_v62 = vld [vmem:[#allocation4 + $0x199] sm:$0xff] }
 0x5c1   : > { %22029 = vmatprep.mubr.msk.f32.mxu1 %vm1751_vm4, %v10218_v16  ;;  %v10609_v16 = vld [vmem:[#allocation4 + $0x1a1] sm:$0xff] }
 0x5c4   : > { %22030 = vmatmul.mubr.msk.f32.gmra.mrb[18].mxu1 %vm1751_vm4, %v10219_v17  ;;  %v10612_v17 = vld [vmem:[#allocation4 + $0x1c9] sm:$0xff] }
 0x5c5   : > { %22032 = vmatprep.mubr.msk.f32.mxu1 %vm1751_vm4, %v27207_v19  ;;  %v23287_v19 = vpack.c.bf16 %v18615_v41, %v18614_v44  ;;  %v18651_v44 = vld [vmem:[%s29330_s3 + $0x2f8] sm:$0xff]  ;;  %v10972_v41 = vld [vmem:[#allocation4 + $0x62] sm:$0xff] }
 0x5c8   : > { %22033 = vmatmul.mubr.msk.f32.gmra.mrb[20].mxu1 %vm1751_vm4, %v27213_v20  ;;  %v18648_v20 = vld [vmem:[%s29330_s3 + $0x2e0] sm:$0xff] }
 0x5c9   : > { %22035 = vmatprep.mubr.msk.f32.mxu1 %vm1751_vm4, %v10222_v57  ;;  %v27640_v58 = vpack.c.bf16 %v18649_v38, %v18648_v20  ;;  %v10613_v57 = vld [vmem:[#allocation4 + $0x1d1] sm:$0xff]  ;;  %v10975_v38 = vld [vmem:[#allocation4 + $0x82] sm:$0xff] }
 0x5cc   : > { %22036 = vmatmul.mubr.msk.f32.gmra.mrb[22].mxu1 %vm1751_vm4, %v10223_v61  ;;  %v18650_v61 = vld [vmem:[%s29330_s3 + $0x2f0] sm:$0xff] }
 0x5cd   : > { %22046 = vmatprep.mubr.msk.f32.mxu1 %vm1751_vm4, %v10582_v59  ;;  %v10973_v59 = vld [vmem:[#allocation4 + $0x6a] sm:$0xff] }
 0x5d0   : > { %22047 = vmatmul.mubr.msk.f32.vlgmr.msra.gmra.mrb[24].mxu1 %vm1751_vm4, %v10583_v51  ;;  %v10974_v51 = vld [vmem:[#allocation4 + $0x7a] sm:$0xff] }
 0x5d1   : > { %23286 = vmatpush3.bf16.msra.mxu1 %v27590_v33  ;;  %22049 = vmatprep.mubr.msk.f32.mxu1 %vm1751_vm4, %v10584_v54  ;;  %v10589_v33 = vld [vmem:[#allocation4 + $0xb1] sm:$0xff] }
 0x5d2   : > { %23288 = vmatprep.subr.bf16.mxu1 %v23287_v19  ;;  %v10976_v54 = vld [vmem:[#allocation4 + $0x92] sm:$0xff] }
 0x5d4   : > { %22050 = vmatmul.mubr.msk.f32.gmra.mrb[26].mxu1 %vm1751_vm4, %v10585_v36  ;;  %v10977_v36 = vld [vmem:[#allocation4 + $0x9a] sm:$0xff] }
 0x5d5   : > { %22052 = vmatprep.mubr.msk.f32.mxu1 %vm1751_vm4, %v10586_v48  ;;  %23290 = vmatpush3.bf16.msra.mxu1 %v23287_v19  ;;  %v18685_v19 = vld [vmem:[%s29330_s3 + $0x308] sm:$0xff] }
 0x5d6   : > { %23292 = vmatprep.subr.bf16.mxu1 %v27640_v58  ;;  %v10978_v48 = vld [vmem:[#allocation4 + $0xaa] sm:$0xff] }
 0x5d8   : > { %22053 = vmatmul.mubr.msk.f32.gmra.mrb[28].mxu1 %vm1751_vm4, %v10587_v6  ;;  %v10980_v6 = vld [vmem:[#allocation4 + $0xc2] sm:$0xff] }
 0x5d9   : > { %22055 = vmatprep.mubr.msk.f32.mxu1 %vm1751_vm4, %v10588_v8  ;;  %v10981_v8 = vld [vmem:[#allocation4 + $0xca] sm:$0xff] }
 0x5dc   : > { %22056 = vmatmul.mubr.msk.f32.gmra.mrb[30].mxu1 %vm1751_vm4, %v10589_v33  ;;  %v10982_v33 = vld [vmem:[#allocation4 + $0xda] sm:$0xff] }
 0x5dd   : > { %22058 = vmatprep.mubr.msk.f32.mxu1 %vm1751_vm4, %v10590_v34  ;;  %v10983_v34 = vld [vmem:[#allocation4 + $0xe2] sm:$0xff] }
 0x5e0   : > { %22059 = vmatmul.mubr.msk.f32.gmra.mrb[0].mxu1 %vm1751_vm4, %v10591_v1  ;;  %v10984_v1 = vld [vmem:[#allocation4 + $0xf2] sm:$0xff] }
 0x5e1   : > { %22061 = vmatprep.mubr.msk.f32.mxu1 %vm1751_vm4, %v10592_v26  ;;  %v10985_v26 = vld [vmem:[#allocation4 + $0xfa] sm:$0xff] }
 0x5e4   : > { %22062 = vmatmul.mubr.msk.f32.gmra.mrb[2].mxu1 %vm1751_vm4, %v10593_v29  ;;  %v10986_v29 = vld [vmem:[#allocation4 + $0x10a] sm:$0xff] }
 0x5e5   : > { %22064 = vmatprep.mubr.msk.f32.mxu1 %vm1751_vm4, %v10594_v35  ;;  %v10987_v35 = vld [vmem:[#allocation4 + $0x112] sm:$0xff] }
 0x5e8   : > { %22065 = vmatmul.mubr.msk.f32.gmra.mrb[4].mxu1 %vm1751_vm4, %v10595_v39  ;;  %v10988_v39 = vld [vmem:[#allocation4 + $0x122] sm:$0xff] }
 0x5e9   : > { %22067 = vmatprep.mubr.msk.f32.mxu1 %vm1751_vm4, %v10596_v14  ;;  %v10989_v14 = vld [vmem:[#allocation4 + $0x12a] sm:$0xff] }
 0x5ec   : > { %22068 = vmatmul.mubr.msk.f32.gmra.mrb[6].mxu1 %vm1751_vm4, %v10597_v22  ;;  %v10990_v22 = vld [vmem:[#allocation4 + $0x13a] sm:$0xff] }
 0x5ed   : > { %22070 = vmatprep.mubr.msk.f32.mxu1 %vm1751_vm4, %v10598_v23  ;;  %v10991_v23 = vld [vmem:[#allocation4 + $0x142] sm:$0xff] }
 0x5f0   : > { %22071 = vmatmul.mubr.msk.f32.gmra.mrb[8].mxu1 %vm1751_vm4, %v10599_v24  ;;  %v10992_v24 = vld [vmem:[#allocation4 + $0x152] sm:$0xff] }
 0x5f1   : > { %22073 = vmatprep.mubr.msk.f32.mxu1 %vm1751_vm4, %v10600_v52  ;;  %v10993_v52 = vld [vmem:[#allocation4 + $0x15a] sm:$0xff] }
 0x5f4   : > { %22074 = vmatmul.mubr.msk.f32.gmra.mrb[10].mxu1 %vm1751_vm4, %v10601_v25  ;;  %v10994_v25 = vld [vmem:[#allocation4 + $0x16a] sm:$0xff] }
 0x5f5   : > { %22076 = vmatprep.mubr.msk.f32.mxu1 %vm1751_vm4, %v10602_v28  ;;  %v10995_v28 = vld [vmem:[#allocation4 + $0x172] sm:$0xff] }
 0x5f8   : > { %22077 = vmatmul.mubr.msk.f32.gmra.mrb[12].mxu1 %vm1751_vm4, %v10603_v32  ;;  %v10996_v32 = vld [vmem:[#allocation4 + $0x182] sm:$0xff] }
 0x5f9   : > { %22079 = vmatprep.mubr.msk.f32.mxu1 %vm1751_vm4, %v10604_v53  ;;  %v10997_v53 = vld [vmem:[#allocation4 + $0x18a] sm:$0xff] }
 0x5fc   : > { %22080 = vmatmul.mubr.msk.f32.gmra.mrb[14].mxu1 %vm1751_vm4, %v10605_v0  ;;  %v10998_v0 = vld [vmem:[#allocation4 + $0x19a] sm:$0xff] }
 0x5fd   : > { %22082 = vmatprep.mubr.msk.f32.mxu1 %vm1751_vm4, %v10606_v4  ;;  %v10999_v4 = vld [vmem:[#allocation4 + $0x1a2] sm:$0xff] }
 0x600   : > { %22083 = vmatmul.mubr.msk.f32.gmra.mrb[16].mxu1 %vm1751_vm4, %v10607_v49  ;;  %v11002_v49 = vld [vmem:[#allocation4 + $0x1ca] sm:$0xff] }
 0x601   : > { %22085 = vmatprep.mubr.msk.f32.mxu1 %vm1751_vm4, %v10608_v62  ;;  %v11003_v62 = vld [vmem:[#allocation4 + $0x1d2] sm:$0xff] }
 0x604   : > { %22086 = vmatmul.mubr.msk.f32.gmra.mrb[18].mxu1 %vm1751_vm4, %v10609_v16  ;;  %v18686_v16 = vld [vmem:[%s29330_s3 + $0x310] sm:$0xff] }
 0x605   : > { %22088 = vmatprep.mubr.msk.f32.mxu1 %vm1751_vm4, %v27287_v3  ;;  %v23295_v3 = vpack.c.bf16 %v18651_v44, %v18650_v61  ;;  %v11363_v61 = vld [vmem:[#allocation4 + $0x6b] sm:$0xff]  ;;  %v11365_v44 = vld [vmem:[#allocation4 + $0x83] sm:$0xff] }
 0x608   : > { %22089 = vmatmul.mubr.msk.f32.gmra.mrb[20].mxu1 %vm1751_vm4, %v27293_v42  ;;  %v18684_v42 = vld [vmem:[%s29330_s3 + $0x300] sm:$0xff] }
 0x609   : > { %22091 = vmatprep.mubr.msk.f32.mxu1 %vm1751_vm4, %v10612_v17  ;;  %v27690_v20 = vpack.c.bf16 %v18685_v19, %v18684_v42  ;;  %v18687_v17 = vld [vmem:[%s29330_s3 + $0x318] sm:$0xff]  ;;  %v11370_v19 = vld [vmem:[#allocation4 + $0xc3] sm:$0xff] }
 0x60a   : > { %v11369_v42 = vld [vmem:[#allocation4 + $0xb3] sm:$0xff] }
 0x60c   : > { %22092 = vmatmul.mubr.msk.f32.gmra.mrb[22].mxu1 %vm1751_vm4, %v10613_v57  ;;  %v11362_v57 = vld [vmem:[#allocation4 + $0x63] sm:$0xff] }
 0x60d   : > { %22102 = vmatprep.mubr.msk.f32.mxu1 %vm1751_vm4, %v10972_v41  ;;  %v11366_v41 = vld [vmem:[#allocation4 + $0x93] sm:$0xff] }
 0x610   : > { %22103 = vmatmul.mubr.msk.f32.vlgmr.msra.gmra.mrb[24].mxu1 %vm1751_vm4, %v10973_v59  ;;  %v11368_v59 = vld [vmem:[#allocation4 + $0xab] sm:$0xff] }
 0x611   : > { %23294 = vmatpush3.bf16.msra.mxu1 %v27640_v58  ;;  %22105 = vmatprep.mubr.msk.f32.mxu1 %vm1751_vm4, %v10974_v51  ;;  %v10979_v58 = vld [vmem:[#allocation4 + $0xb2] sm:$0xff] }
 0x612   : > { %23296 = vmatprep.subr.bf16.mxu1 %v23295_v3  ;;  %v11371_v51 = vld [vmem:[#allocation4 + $0xcb] sm:$0xff] }
 0x614   : > { %22106 = vmatmul.mubr.msk.f32.gmra.mrb[26].mxu1 %vm1751_vm4, %v10975_v38  ;;  %v11373_v38 = vld [vmem:[#allocation4 + $0xe3] sm:$0xff] }
 0x615   : > { %22108 = vmatprep.mubr.msk.f32.mxu1 %vm1751_vm4, %v10976_v54  ;;  %23298 = vmatpush3.bf16.msra.mxu1 %v23295_v3  ;;  %v11367_v3 = vld [vmem:[#allocation4 + $0x9b] sm:$0xff]  ;;  %v11374_v54 = vld [vmem:[#allocation4 + $0xf3] sm:$0xff] }
 0x616   : > { %23300 = vmatprep.subr.bf16.mxu1 %v27690_v20 }
 0x618   : > { %22109 = vmatmul.mubr.msk.f32.gmra.mrb[28].mxu1 %vm1751_vm4, %v10977_v36  ;;  %v11375_v36 = vld [vmem:[#allocation4 + $0xfb] sm:$0xff] }
 0x619   : > { %22111 = vmatprep.mubr.msk.f32.mxu1 %vm1751_vm4, %v10978_v48  ;;  %v11376_v48 = vld [vmem:[#allocation4 + $0x10b] sm:$0xff] }
 0x61c   : > { %22112 = vmatmul.mubr.msk.f32.gmra.mrb[30].mxu1 %vm1751_vm4, %v10979_v58  ;;  %v11377_v58 = vld [vmem:[#allocation4 + $0x113] sm:$0xff] }
 0x61d   : > { %22114 = vmatprep.mubr.msk.f32.mxu1 %vm1751_vm4, %v10980_v6  ;;  %v11378_v6 = vld [vmem:[#allocation4 + $0x123] sm:$0xff] }
 0x620   : > { %22115 = vmatmul.mubr.msk.f32.gmra.mrb[0].mxu1 %vm1751_vm4, %v10981_v8  ;;  %v11379_v8 = vld [vmem:[#allocation4 + $0x12b] sm:$0xff] }
 0x621   : > { %22117 = vmatprep.mubr.msk.f32.mxu1 %vm1751_vm4, %v10982_v33  ;;  %v11380_v33 = vld [vmem:[#allocation4 + $0x13b] sm:$0xff] }
 0x624   : > { %22118 = vmatmul.mubr.msk.f32.gmra.mrb[2].mxu1 %vm1751_vm4, %v10983_v34  ;;  %v11381_v34 = vld [vmem:[#allocation4 + $0x143] sm:$0xff] }
 0x625   : > { %22120 = vmatprep.mubr.msk.f32.mxu1 %vm1751_vm4, %v10984_v1  ;;  %v11382_v1 = vld [vmem:[#allocation4 + $0x153] sm:$0xff] }
 0x628   : > { %22121 = vmatmul.mubr.msk.f32.gmra.mrb[4].mxu1 %vm1751_vm4, %v10985_v26  ;;  %v11383_v26 = vld [vmem:[#allocation4 + $0x15b] sm:$0xff] }
 0x629   : > { %22123 = vmatprep.mubr.msk.f32.mxu1 %vm1751_vm4, %v10986_v29  ;;  %v11384_v29 = vld [vmem:[#allocation4 + $0x16b] sm:$0xff] }
 0x62c   : > { %22124 = vmatmul.mubr.msk.f32.gmra.mrb[6].mxu1 %vm1751_vm4, %v10987_v35  ;;  %v11385_v35 = vld [vmem:[#allocation4 + $0x173] sm:$0xff] }
 0x62d   : > { %22126 = vmatprep.mubr.msk.f32.mxu1 %vm1751_vm4, %v10988_v39  ;;  %v11386_v39 = vld [vmem:[#allocation4 + $0x183] sm:$0xff] }
 0x630   : > { %22127 = vmatmul.mubr.msk.f32.gmra.mrb[8].mxu1 %vm1751_vm4, %v10989_v14  ;;  %v11387_v14 = vld [vmem:[#allocation4 + $0x18b] sm:$0xff] }
 0x631   : > { %22129 = vmatprep.mubr.msk.f32.mxu1 %vm1751_vm4, %v10990_v22  ;;  %v11388_v22 = vld [vmem:[#allocation4 + $0x19b] sm:$0xff] }
 0x634   : > { %22130 = vmatmul.mubr.msk.f32.gmra.mrb[10].mxu1 %vm1751_vm4, %v10991_v23  ;;  %v11389_v23 = vld [vmem:[#allocation4 + $0x1a3] sm:$0xff] }
 0x635   : > { %22132 = vmatprep.mubr.msk.f32.mxu1 %vm1751_vm4, %v10992_v24  ;;  %v11392_v24 = vld [vmem:[#allocation4 + $0x1cb] sm:$0xff] }
 0x638   : > { %22133 = vmatmul.mubr.msk.f32.gmra.mrb[12].mxu1 %vm1751_vm4, %v10993_v52  ;;  %v11393_v52 = vld [vmem:[#allocation4 + $0x1d3] sm:$0xff] }
 0x639   : > { %22135 = vmatprep.mubr.msk.f32.mxu1 %vm1751_vm4, %v10994_v25  ;;  %v11752_v25 = vld [vmem:[#allocation4 + $0x64] sm:$0xff] }
 0x63c   : > { %22136 = vmatmul.mubr.msk.f32.gmra.mrb[14].mxu1 %vm1751_vm4, %v10995_v28  ;;  %v11753_v28 = vld [vmem:[#allocation4 + $0x6c] sm:$0xff] }
 0x63d   : > { %22138 = vmatprep.mubr.msk.f32.mxu1 %vm1751_vm4, %v10996_v32  ;;  %v11754_v32 = vld [vmem:[#allocation4 + $0x7c] sm:$0xff] }
 0x640   : > { %22139 = vmatmul.mubr.msk.f32.gmra.mrb[16].mxu1 %vm1751_vm4, %v10997_v53  ;;  %v11755_v53 = vld [vmem:[#allocation4 + $0x84] sm:$0xff] }
 0x641   : > { %22141 = vmatprep.mubr.msk.f32.mxu1 %vm1751_vm4, %v10998_v0  ;;  %v11758_v0 = vld [vmem:[#allocation4 + $0xac] sm:$0xff] }
 0x644   : > { %22142 = vmatmul.mubr.msk.f32.gmra.mrb[18].mxu1 %vm1751_vm4, %v10999_v4 }
 0x645   : > { %22144 = vmatprep.mubr.msk.f32.mxu1 %vm1751_vm4, %v27367_v21  ;;  %v23303_v21 = vpack.c.bf16 %v18687_v17, %v18686_v16 }
 0x648   : > { %22145 = vmatmul.mubr.msk.f32.gmra.mrb[20].mxu1 %vm1751_vm4, %v27373_v27  ;;  %v11364_v27 = vld [vmem:[#allocation4 + $0x7b] sm:$0xff] }
 0x649   : > { %22147 = vmatprep.mubr.msk.f32.mxu1 %vm1751_vm4, %v11002_v49  ;;  %v27859_v49 = vld [vmem:[%s29331_s4] ss:$0 sm:$0xff] }
 0x64c   : > { %22148 = vmatmul.mubr.msk.f32.gmra.mrb[22].mxu1 %vm1751_vm4, %v11003_v62  ;;  %v29631_v62 = vld [vmem:[#allocation96_spill] sm:$0xff] }
 0x64d   : > { %22158 = vmatprep.mubr.msk.f32.mxu1 %vm1751_vm4, %v11362_v57  ;;  %v29632_v57 = vld [vmem:[#allocation98_spill] sm:$0xff] }
 0x650   : > { %22159 = vmatmul.mubr.msk.f32.vlgmr.msra.gmra.mrb[24].mxu1 %vm1751_vm4, %v11363_v61 }
 0x651   : > { %23302 = vmatpush3.bf16.msra.mxu1 %v27690_v20  ;;  %22161 = vmatprep.mubr.msk.f32.mxu1 %vm1751_vm4, %v11364_v27  ;;  %v11372_v20 = vld [vmem:[#allocation4 + $0xdb] sm:$0xff] }
 0x652   : > { %23304 = vmatprep.subr.bf16.mxu1 %v23303_v21 }
 0x654   : > { %22162 = vmatmul.mubr.msk.f32.gmra.mrb[26].mxu1 %vm1751_vm4, %v11365_v44 }
 0x655   : > { %22164 = vmatprep.mubr.msk.f32.mxu1 %vm1751_vm4, %v11366_v41  ;;  %23306 = vmatpush3.bf16.msra.mxu1 %v23303_v21  ;;  %v29633_v41 = vld [vmem:[#allocation99_spill] sm:$0xff] }
 0x658   : > { %22165 = vmatmul.mubr.msk.f32.gmra.mrb[28].mxu1 %vm1751_vm4, %v11367_v3 }
 0x659   : > { %22167 = vmatprep.mubr.msk.f32.mxu1 %vm1751_vm4, %v11368_v59 }
 0x65c   : > { %22168 = vmatmul.mubr.msk.f32.gmra.mrb[30].mxu1 %vm1751_vm4, %v11369_v42  ;;  %v29634_v42 = vld [vmem:[#allocation101_spill] sm:$0xff] }
 0x65d   : > { %22170 = vmatprep.mubr.msk.f32.mxu1 %vm1751_vm4, %v11370_v19 }
 0x660   : > { %22171 = vmatmul.mubr.msk.f32.gmra.mrb[0].mxu1 %vm1751_vm4, %v11371_v51 }
 0x661   : > { %22173 = vmatprep.mubr.msk.f32.mxu1 %vm1751_vm4, %v11372_v20 }
 0x664   : > { %22174 = vmatmul.mubr.msk.f32.gmra.mrb[2].mxu1 %vm1751_vm4, %v11373_v38 }
 0x665   : > { %22176 = vmatprep.mubr.msk.f32.mxu1 %vm1751_vm4, %v11374_v54  ;;  %v29635_v54 = vld [vmem:[#allocation103_spill] sm:$0xff] }
 0x668   : > { %22177 = vmatmul.mubr.msk.f32.gmra.mrb[4].mxu1 %vm1751_vm4, %v11375_v36 }
 0x669   : > { %22179 = vmatprep.mubr.msk.f32.mxu1 %vm1751_vm4, %v11376_v48 }
 0x66c   : > { %22180 = vmatmul.mubr.msk.f32.gmra.mrb[6].mxu1 %vm1751_vm4, %v11377_v58  ;;  %v29636_v58 = vld [vmem:[#allocation105_spill] sm:$0xff] }
 0x66d   : > { %22182 = vmatprep.mubr.msk.f32.mxu1 %vm1751_vm4, %v11378_v6 }
 0x670   : > { %22183 = vmatmul.mubr.msk.f32.gmra.mrb[8].mxu1 %vm1751_vm4, %v11379_v8 }
 0x671   : > { %22185 = vmatprep.mubr.msk.f32.mxu1 %vm1751_vm4, %v11380_v33 }
 0x674   : > { %22186 = vmatmul.mubr.msk.f32.gmra.mrb[10].mxu1 %vm1751_vm4, %v11381_v34 }
 0x675   : > { %22188 = vmatprep.mubr.msk.f32.mxu1 %vm1751_vm4, %v11382_v1 }
 0x678   : > { %22189 = vmatmul.mubr.msk.f32.gmra.mrb[12].mxu1 %vm1751_vm4, %v11383_v26 }
 0x679   : > { %22191 = vmatprep.mubr.msk.f32.mxu1 %vm1751_vm4, %v11384_v29  ;;  %v29637_v29 = vld [vmem:[#allocation107_spill] sm:$0xff] }
 0x67c   : > { %22192 = vmatmul.mubr.msk.f32.gmra.mrb[14].mxu1 %vm1751_vm4, %v11385_v35 }
 0x67d   : > { %22194 = vmatprep.mubr.msk.f32.mxu1 %vm1751_vm4, %v11386_v39 }
 0x680   : > { %22195 = vmatmul.mubr.msk.f32.gmra.mrb[16].mxu1 %vm1751_vm4, %v11387_v14 }
 0x681   : > { %22197 = vmatprep.mubr.msk.f32.mxu1 %vm1751_vm4, %v11388_v22  ;;  %v29638_v22 = vld [vmem:[#allocation109_spill] sm:$0xff] }
 0x684   : > { %22198 = vmatmul.mubr.msk.f32.gmra.mrb[18].mxu1 %vm1751_vm4, %v11389_v23 }
 0x685   : > { %22200 = vmatprep.mubr.msk.f32.mxu1 %vm1751_vm4, %v27447_v55  ;;  %v11756_v55 = vld [vmem:[#allocation4 + $0x94] sm:$0xff] }
 0x688   : > { %22201 = vmatmul.mubr.msk.f32.gmra.mrb[20].mxu1 %vm1751_vm4, %v27453_v60  ;;  %v11757_v60 = vld [vmem:[#allocation4 + $0x9c] sm:$0xff] }
 0x689   : > { %22203 = vmatprep.mubr.msk.f32.mxu1 %vm1751_vm4, %v11392_v24 }
 0x68c   : > { %22204 = vmatmul.mubr.msk.f32.gmra.mrb[22].mxu1 %vm1751_vm4, %v11393_v52 }
 0x68d   : > { %22214 = vmatprep.mubr.msk.f32.mxu1 %vm1751_vm4, %v11752_v25 }
 0x690   : > { %22215 = vmatmul.mubr.msk.f32.vlgmr.msra.gmra.mrb[24].mxu1 %vm1751_vm4, %v11753_v28 }
 0x691   : > { %22217 = vmatprep.mubr.msk.f32.mxu1 %vm1751_vm4, %v11754_v32 }
 0x694   : > { %22218 = vmatmul.mubr.msk.f32.gmra.mrb[26].mxu1 %vm1751_vm4, %v11755_v53  ;;  %v29639_v53 = vld [vmem:[#allocation51_spill] sm:$0xff] }
 0x695   : > { %22220 = vmatprep.mubr.msk.f32.mxu1 %vm1751_vm4, %v11756_v55 }
 0x698   : > { %22221 = vmatmul.mubr.msk.f32.gmra.mrb[28].mxu1 %vm1751_vm4, %v11757_v60 }
 0x699   : > { %22223 = vmatprep.mubr.msk.f32.mxu1 %vm1751_vm4, %v11758_v0 }
 0x69c   : > { %22224 = vmatmul.mubr.msk.f32.gmra.mrb[30].mxu1 %vm1751_vm4, %v27487_v31  ;;  %v11778_v31 = vld [vmem:[#allocation4 + $0x19c] sm:$0xff] }
 0x69d   : > { %22226 = vmatprep.mubr.msk.f32.mxu1 %vm1751_vm4, %v27491_v11  ;;  %v11779_v11 = vld [vmem:[#allocation4 + $0x1a4] sm:$0xff] }
 0x6a0   : > { %22227 = vmatmul.mubr.msk.f32.gmra.mrb[0].mxu1 %vm1751_vm4, %v27495_v2  ;;  %v11782_v2 = vld [vmem:[#allocation4 + $0x1cc] sm:$0xff] }
 0x6a1   : > { %22229 = vmatprep.mubr.msk.f32.mxu1 %vm1751_vm4, %v27499_v15  ;;  %v11783_v15 = vld [vmem:[#allocation4 + $0x1d4] sm:$0xff] }
 0x6a4   : > { %22230 = vmatmul.mubr.msk.f32.gmra.mrb[2].mxu1 %vm1751_vm4, %v27503_v56  ;;  %v18721_v56 = vld [vmem:[%s29332_s5 + $0x20] sm:$0xff] }
 0x6a5   : > { %22232 = vmatprep.mubr.msk.f32.mxu1 %vm1751_vm4, %v27507_v5  ;;  %v18722_v5 = vld [vmem:[%s29332_s5 + $0x28] sm:$0xff] }
 0x6a8   : > { %22233 = vmatmul.mubr.msk.f32.gmra.mrb[4].mxu1 %vm1751_vm4, %v27511_v12  ;;  %v23307_v12 = vpack.c.bf16 %v18722_v5, %v18721_v56 }
 0x6a9   : > { %22235 = vmatprep.mubr.msk.f32.mxu1 %vm1751_vm4, %v27515_v10  ;;  %v18723_v10 = vld [vmem:[%s29332_s5 + $0x30] sm:$0xff] }
 0x6aa   : > { %23308 = vmatprep.subr.bf16.mxu0 %v23307_v12 }
 0x6ab   : > { %23310 = vmatpush3.bf16.msra.mxu0 %v23307_v12 }
 0x6ac   : > { %22236 = vmatmul.mubr.msk.f32.gmra.mrb[6].mxu1 %vm1751_vm4, %v27519_v40  ;;  %v18724_v40 = vld [vmem:[%s29332_s5 + $0x38] sm:$0xff] }
 0x6ad   : > { %22238 = vmatprep.mubr.msk.f32.mxu1 %vm1751_vm4, %v27523_v50  ;;  %v12378_v50 = vld [vmem:[#allocation7 + $0x1] sm:$0xff] }
 0x6ae   : > { %22270 = vmatprep.mubr.msk.f32.mxu0 %vm1751_vm4, %v12378_v50 }
 0x6b0   : > { %22239 = vmatmul.mubr.msk.f32.gmra.mrb[8].mxu1 %vm1751_vm4, %v27527_v37  ;;  %v23311_v37 = vpack.c.bf16 %v18724_v40, %v18723_v10  ;;  %v29641_v10 = vld [vmem:[#allocation55_spill] sm:$0xff] }
 0x6b1   : > { %22241 = vmatprep.mubr.msk.f32.mxu1 %vm1751_vm4, %v27531_v47  ;;  %v27831_v47 = vld [vmem:[#allocation7 + $0x11] sm:$0xff] }
 0x6b2   : > { %23312 = vmatprep.subr.bf16.mxu0 %v23311_v37 }
 0x6b3   : > { %23314 = vmatpush3.bf16.msra.mxu0 %v23311_v37 }
 0x6b4   : > { %22242 = vmatmul.mubr.msk.f32.gmra.mrb[10].mxu1 %vm1751_vm4, %v27535_v18  ;;  %v12374_v18 = vld [vmem:[%s29332_s5] sm:$0xff] }
 0x6b5   : > { %22244 = vmatprep.mubr.msk.f32.mxu1 %vm1751_vm4, %v27539_v30  ;;  %v12375_v30 = vld [vmem:[%s29332_s5 + $0x8] sm:$0xff] }
 0x6b6   : > { %22271 = vmatmul.mubr.msk.f32.vlgmr.msra.gmra.mrb[160].mxu0 %vm1751_vm4, %v27831_v47 }
 0x6b8   : > { %22245 = vmatmul.mubr.msk.f32.gmra.mrb[12].mxu1 %vm1751_vm4, %v27543_v63  ;;  %v12376_v63 = vld [vmem:[%s29332_s5 + $0x10] sm:$0xff] }
 0x6b9   : > { %22247 = vmatprep.mubr.msk.f32.mxu1 %vm1751_vm4, %v27547_v43  ;;  %v23315_v43 = vpack.c.bf16 %v12375_v30, %v12374_v18  ;;  %v29642_v18 = vld [vmem:[#allocation57_spill] sm:$0xff] }
 0x6bb   : > { %23316 = vmatprep.subr.bf16.mxu0 %v23315_v43 }
 0x6bc   : > { %22248 = vmatmul.mubr.msk.f32.gmra.mrb[14].mxu1 %vm1751_vm4, %v27551_v9  ;;  %v12377_v9 = vld [vmem:[%s29332_s5 + $0x18] sm:$0xff]  ;;  %23318 = vmatpush3.bf16.msra.mxu0 %v23315_v43 }
 0x6bd   : > { %22250 = vmatprep.mubr.msk.f32.mxu1 %vm1751_vm4, %v27555_v13  ;;  %v23319_v13 = vpack.c.bf16 %v12377_v9, %v12376_v63 }
 0x6bf   : > { %23320 = vmatprep.subr.bf16.mxu0 %v23319_v13 }
 0x6c0   : > { %22251 = vmatmul.mubr.msk.f32.gmra.mrb[16].mxu1 %vm1751_vm4, %v27559_v46  ;;  %v18741_v46 = vld [vmem:[%s29332_s5 + $0x40] sm:$0xff]  ;;  %23322 = vmatpush3.bf16.msra.mxu0 %v23319_v13 }
 0x6c1   : > { %22253 = vmatprep.mubr.msk.f32.mxu1 %vm1751_vm4, %v11778_v31  ;;  %v29640_v31 = vld [vmem:[#allocation53_spill] sm:$0xff] }
 0x6c4   : > { %22254 = vmatmul.mubr.msk.f32.gmra.mrb[18].mxu1 %vm1751_vm4, %v11779_v11 }
 0x6c5   : > { %22256 = vmatprep.mubr.msk.f32.mxu1 %vm1751_vm4, %v27565_v45  ;;  %v18742_v45 = vld [vmem:[%s29332_s5 + $0x48] sm:$0xff] }
 0x6c8   : > { %22257 = vmatmul.mubr.msk.f32.gmra.mrb[20].mxu1 %vm1751_vm4, %v27571_v7  ;;  %v27853_v7 = vpack.c.bf16 %v18742_v45, %v18741_v46  ;;  %v29643_v45 = vld [vmem:[#allocation59_spill] sm:$0xff] }
 0x6c9   : > { %22259 = vmatprep.mubr.msk.f32.mxu1 %vm1751_vm4, %v11782_v2 }
 0x6ca   : > { %23324 = vmatprep.subr.bf16.mxu0 %v27853_v7 }
 0x6cc   : > { %22260 = vmatmul.mubr.msk.f32.gmra.mrb[22].mxu1 %vm1751_vm4, %v11783_v15 }
 0x763   : > { %v22216_v4 = vpop.f32.mrb[24].mxu1 }
 0x764   : > { %v23715_v16 = vadd.f32 %v22216_v4, %v29631_v62  ;;  %v11951_v17 = vpop.f32.mrb[25].mxu1 }
 0x765   : > { %v23716_v21 = vadd.f32 %v11951_v17, %v29632_v57  ;;  %v29644_v17 = vld [vmem:[#allocation61_spill] sm:$0xff] }
 0x766   : > { %v12150_v61 = vadd.f32 %v23715_v16, %v27859_v49 }
 0x767   : > { %v12149_v27 = vadd.f32 %v23716_v21, %v27859_v49  ;;  %v22219_v44 = vpop.f32.mrb[26].mxu1 }
 0x768   : > { %12182 = vst.msk [vmem:[#allocation5 + $0x8] sm:$0xff] %vm1751_vm4, %v12150_v61  ;;  %v23717_v3 = vadd.f32 %v22219_v44, %v29633_v41  ;;  %v11961_v59 = vpop.f32.mrb[27].mxu1 }
 0x769   : > { %12181 = vst.msk [vmem:[#allocation5] sm:$0xff] %vm1751_vm4, %v12149_v27  ;;  %v23718_v19 = vadd.f32 %v11961_v59, %v29634_v42 }
 0x76a   : > { %v12152_v51 = vadd.f32 %v23717_v3, %v27859_v49 }
 0x76b   : > { %v12151_v20 = vadd.f32 %v23718_v19, %v27859_v49  ;;  %v22222_v38 = vpop.f32.mrb[28].mxu1  ;;  %v29645_v19 = vld [vmem:[#allocation63_spill] sm:$0xff] }
 0x76c   : > { %12184 = vst.msk [vmem:[#allocation5 + $0x18] sm:$0xff] %vm1751_vm4, %v12152_v51  ;;  %v23719_v36 = vadd.f32 %v22222_v38, %v29635_v54  ;;  %v11971_v48 = vpop.f32.mrb[29].mxu1  ;;  %v29646_v54 = vld [vmem:[#allocation65_spill] sm:$0xff] }
 0x76d   : > { %12183 = vst.msk [vmem:[#allocation5 + $0x10] sm:$0xff] %vm1751_vm4, %v12151_v20  ;;  %v23720_v6 = vadd.f32 %v11971_v48, %v29636_v58 }
 0x76e   : > { %v12154_v8 = vadd.f32 %v23719_v36, %v27859_v49 }
 0x76f   : > { %v12153_v33 = vadd.f32 %v23720_v6, %v27859_v49  ;;  %v22225_v34 = vpop.f32.mrb[30].mxu1 }
 0x770   : > { %v12237_v1 = vld [vmem:[#allocation5] ss:$2 sm:$0xff]  ;;  %v12269_v26 = vld [vmem:[#allocation5 + $0x1] ss:$2 sm:$0xff]  ;;  %12186 = vst.msk [vmem:[#allocation5 + $0x28] sm:$0xff] %vm1751_vm4, %v12154_v8  ;;  %v23721_v35 = vadd.f32 %v22225_v34, %v29637_v29  ;;  %v11981_v39 = vpop.f32.mrb[31].mxu1 }
 0x771   : > { %v12300_v14 = vmax.f32 %v12237_v1, %v12269_v26  ;;  %12185 = vst.msk [vmem:[#allocation5 + $0x20] sm:$0xff] %vm1751_vm4, %v12153_v33  ;;  %v23722_v23 = vadd.f32 %v11981_v39, %v29638_v22  ;;  %v29647_v34 = vld [vmem:[#allocation67_spill] sm:$0xff] }
 0x772   : > { %v12156_v24 = vadd.f32 %v23721_v35, %v27859_v49  ;;  %v29648_v35 = vld [vmem:[#allocation69_spill] sm:$0xff] }
 0x773   : > { %12316 = vst.msk [vmem:[#allocation6] sm:$0xff] %vm1751_vm4, %v12300_v14  ;;  %v12155_v52 = vadd.f32 %v23722_v23, %v27859_v49  ;;  %v22228_v25 = vpop.f32.mrb[0].mxu1 }
 0x774   : > { %v12239_v28 = vld [vmem:[#allocation5 + $0x10] ss:$2 sm:$0xff]  ;;  %v12271_v32 = vld [vmem:[#allocation5 + $0x11] ss:$2 sm:$0xff]  ;;  %12188 = vst.msk [vmem:[#allocation5 + $0x38] sm:$0xff] %vm1751_vm4, %v12156_v24  ;;  %v23723_v55 = vadd.f32 %v22228_v25, %v29639_v53  ;;  %v11991_v60 = vpop.f32.mrb[1].mxu1 }
 0x775   : > { %v12301_v0 = vmax.f32 %v12239_v28, %v12271_v32  ;;  %12187 = vst.msk [vmem:[#allocation5 + $0x30] sm:$0xff] %vm1751_vm4, %v12155_v52  ;;  %v23724_v11 = vadd.f32 %v11991_v60, %v29640_v31  ;;  %v29649_v53 = vld [vmem:[#allocation71_spill] sm:$0xff] }
 0x776   : > { %v12158_v2 = vadd.f32 %v23723_v55, %v27859_v49 }
 0x777   : > { %12317 = vst.msk [vmem:[#allocation6 + $0x8] sm:$0xff] %vm1751_vm4, %v12301_v0  ;;  %v12157_v15 = vadd.f32 %v23724_v11, %v27859_v49  ;;  %v22231_v56 = vpop.f32.mrb[2].mxu1  ;;  %v29650_v11 = vld [vmem:[#allocation73_spill] sm:$0xff] }
 0x778   : > { %v12241_v5 = vld [vmem:[#allocation5 + $0x20] ss:$2 sm:$0xff]  ;;  %v12273_v12 = vld [vmem:[#allocation5 + $0x21] ss:$2 sm:$0xff]  ;;  %12190 = vst.msk [vmem:[#allocation5 + $0x48] sm:$0xff] %vm1751_vm4, %v12158_v2  ;;  %v23725_v40 = vadd.f32 %v22231_v56, %v29641_v10  ;;  %v12001_v50 = vpop.f32.mrb[3].mxu1 }
 0x779   : > { %v12302_v37 = vmax.f32 %v12241_v5, %v12273_v12  ;;  %12189 = vst.msk [vmem:[#allocation5 + $0x40] sm:$0xff] %vm1751_vm4, %v12157_v15  ;;  %v23726_v30 = vadd.f32 %v12001_v50, %v29642_v18 }
 0x77a   : > { %v12160_v63 = vadd.f32 %v23725_v40, %v27859_v49  ;;  %v12332_v61 = vld [vmem:[#allocation6] sm:$0xff]  ;;  %v29651_v40 = vld [vmem:[#allocation75_spill] sm:$0xff] }
 0x77b   : > { %12318 = vst.msk [vmem:[#allocation6 + $0x10] sm:$0xff] %vm1751_vm4, %v12302_v37  ;;  %v12159_v43 = vadd.f32 %v23726_v30, %v27859_v49  ;;  %v22234_v9 = vpop.f32.mrb[4].mxu1  ;;  %v29652_v30 = vld [vmem:[#allocation77_spill] sm:$0xff] }
 0x77c   : > { %v12243_v13 = vld [vmem:[#allocation5 + $0x30] ss:$2 sm:$0xff]  ;;  %v12275_v46 = vld [vmem:[#allocation5 + $0x31] ss:$2 sm:$0xff]  ;;  %12192 = vst.msk [vmem:[#allocation5 + $0x58] sm:$0xff] %vm1751_vm4, %v12160_v63  ;;  %v23727_v4 = vadd.f32 %v22234_v9, %v29643_v45  ;;  %v12011_v62 = vpop.f32.mrb[5].mxu1 }
 0x77d   : > { %v12303_v16 = vmax.f32 %v12243_v13, %v12275_v46  ;;  %12191 = vst.msk [vmem:[#allocation5 + $0x50] sm:$0xff] %vm1751_vm4, %v12159_v43  ;;  %v23728_v57 = vadd.f32 %v12011_v62, %v29644_v17  ;;  %v29653_v17 = vld [vmem:[#allocation79_spill] sm:$0xff] }
 0x77e   : > { %v12162_v21 = vadd.f32 %v23727_v4, %v27859_v49  ;;  %v12341_v27 = vld [vmem:[#allocation6 + $0x8] sm:$0xff] }
 0x77f   : > { %12319 = vst.msk [vmem:[#allocation6 + $0x18] sm:$0xff] %vm1751_vm4, %v12303_v16  ;;  %v12161_v44 = vadd.f32 %v23728_v57, %v27859_v49  ;;  %v22237_v41 = vpop.f32.mrb[6].mxu1  ;;  %v12349_v3 = vmax.f32 %v12332_v61, %v12341_v27 }
 0x780   : > { %v12245_v59 = vld [vmem:[#allocation5 + $0x40] ss:$2 sm:$0xff]  ;;  %v12277_v42 = vld [vmem:[#allocation5 + $0x41] ss:$2 sm:$0xff]  ;;  %12194 = vst.msk [vmem:[#allocation5 + $0x68] sm:$0xff] %vm1751_vm4, %v12162_v21  ;;  %v23729_v51 = vadd.f32 %v22237_v41, %v29645_v19  ;;  %v12021_v20 = vpop.f32.mrb[7].mxu1 }
 0x781   : > { %v12304_v38 = vmax.f32 %v12245_v59, %v12277_v42  ;;  %12193 = vst.msk [vmem:[#allocation5 + $0x60] sm:$0xff] %vm1751_vm4, %v12161_v44  ;;  %v23730_v36 = vadd.f32 %v12021_v20, %v29646_v54  ;;  %12358 = vst.msk [vmem:[#allocation7 + $0x22] sm:$0xff] %vm1751_vm4, %v12349_v3  ;;  %v29654_v44 = vld [vmem:[#allocation81_spill] sm:$0xff]  ;;  %v29655_v20 = vld [vmem:[#allocation83_spill] sm:$0xff] }
 0x782   : > { %v12164_v48 = vadd.f32 %v23729_v51, %v27859_v49  ;;  %v12333_v22 = vld [vmem:[#allocation6 + $0x10] sm:$0xff] }
 0x783   : > { %12320 = vst.msk [vmem:[#allocation6 + $0x20] sm:$0xff] %vm1751_vm4, %v12304_v38  ;;  %v12163_v58 = vadd.f32 %v23730_v36, %v27859_v49  ;;  %v22240_v6 = vpop.f32.mrb[8].mxu1 }
 0x784   : > { %v12247_v8 = vld [vmem:[#allocation5 + $0x50] ss:$2 sm:$0xff]  ;;  %v12279_v33 = vld [vmem:[#allocation5 + $0x51] ss:$2 sm:$0xff]  ;;  %12196 = vst.msk [vmem:[#allocation5 + $0x78] sm:$0xff] %vm1751_vm4, %v12164_v48  ;;  %v23731_v1 = vadd.f32 %v22240_v6, %v29647_v34  ;;  %v12031_v26 = vpop.f32.mrb[9].mxu1 }
 0x785   : > { %v12305_v29 = vmax.f32 %v12247_v8, %v12279_v33  ;;  %12195 = vst.msk [vmem:[#allocation5 + $0x70] sm:$0xff] %vm1751_vm4, %v12163_v58  ;;  %v23732_v39 = vadd.f32 %v12031_v26, %v29648_v35  ;;  %v29656_v48 = vld [vmem:[#allocation85_spill] sm:$0xff] }
 0x786   : > { %v12166_v14 = vadd.f32 %v23731_v1, %v27859_v49  ;;  %v12342_v23 = vld [vmem:[#allocation6 + $0x18] sm:$0xff] }
 0x787   : > { %12321 = vst.msk [vmem:[#allocation6 + $0x28] sm:$0xff] %vm1751_vm4, %v12305_v29  ;;  %v12165_v24 = vadd.f32 %v23732_v39, %v27859_v49  ;;  %v22243_v52 = vpop.f32.mrb[10].mxu1  ;;  %v12350_v25 = vmax.f32 %v12333_v22, %v12342_v23  ;;  %v29657_v39 = vld [vmem:[#allocation87_spill] sm:$0xff] }
 0x788   : > { %v12249_v28 = vld [vmem:[#allocation5 + $0x60] ss:$2 sm:$0xff]  ;;  %v12281_v32 = vld [vmem:[#allocation5 + $0x61] ss:$2 sm:$0xff]  ;;  %12198 = vst.msk [vmem:[#allocation5 + $0x88] sm:$0xff] %vm1751_vm4, %v12166_v14  ;;  %v23733_v55 = vadd.f32 %v22243_v52, %v29649_v53  ;;  %v12041_v60 = vpop.f32.mrb[11].mxu1 }
 0x789   : > { %v27922_v0 = vld [vmem:[#allocation7 + $0x21] sm:$0xff]  ;;  %v12306_v31 = vmax.f32 %v12249_v28, %v12281_v32  ;;  %12197 = vst.msk [vmem:[#allocation5 + $0x80] sm:$0xff] %vm1751_vm4, %v12165_v24  ;;  %v23734_v2 = vadd.f32 %v12041_v60, %v29650_v11  ;;  %12359 = vst.msk [vmem:[#allocation7 + $0x32] sm:$0xff] %vm1751_vm4, %v12350_v25 }
 0x78a   : > { %22273 = vmatprep.mubr.msk.f32.mxu0 %vm1751_vm4, %v27922_v0  ;;  %v12168_v15 = vadd.f32 %v23733_v55, %v27859_v49  ;;  %v12334_v9 = vld [vmem:[#allocation6 + $0x20] sm:$0xff] }
 0x78b   : > { %12322 = vst.msk [vmem:[#allocation6 + $0x30] sm:$0xff] %vm1751_vm4, %v12306_v31  ;;  %v12167_v56 = vadd.f32 %v23734_v2, %v27859_v49  ;;  %v22246_v5 = vpop.f32.mrb[12].mxu1  ;;  %v29658_v52 = vld [vmem:[#allocation89_spill] sm:$0xff]  ;;  %v29659_v31 = vld [vmem:[#allocation91_spill] sm:$0xff] }
 0x78c   : > { %v12251_v12 = vld [vmem:[#allocation5 + $0x70] ss:$2 sm:$0xff]  ;;  %v12283_v10 = vld [vmem:[#allocation5 + $0x71] ss:$2 sm:$0xff]  ;;  %12200 = vst.msk [vmem:[#allocation5 + $0x98] sm:$0xff] %vm1751_vm4, %v12168_v15  ;;  %v23735_v50 = vadd.f32 %v22246_v5, %v29651_v40  ;;  %v12051_v37 = vpop.f32.mrb[13].mxu1 }
 0x78d   : > { %v12307_v18 = vmax.f32 %v12251_v12, %v12283_v10  ;;  %12199 = vst.msk [vmem:[#allocation5 + $0x90] sm:$0xff] %vm1751_vm4, %v12167_v56  ;;  %v23736_v63 = vadd.f32 %v12051_v37, %v29652_v30  ;;  %v29660_v56 = vld [vmem:[#allocation92_spill] sm:$0xff] }
 0x78e   : > { %v12170_v43 = vadd.f32 %v23735_v50, %v27859_v49  ;;  %v12343_v13 = vld [vmem:[#allocation6 + $0x28] sm:$0xff] }
 0x78f   : > { %12323 = vst.msk [vmem:[#allocation6 + $0x38] sm:$0xff] %vm1751_vm4, %v12307_v18  ;;  %v12169_v46 = vadd.f32 %v23736_v63, %v27859_v49  ;;  %v22249_v45 = vpop.f32.mrb[14].mxu1  ;;  %v12351_v4 = vmax.f32 %v12334_v9, %v12343_v13 }
 0x790   : > { %v12253_v62 = vld [vmem:[#allocation5 + $0x80] ss:$2 sm:$0xff]  ;;  %v12285_v16 = vld [vmem:[#allocation5 + $0x81] ss:$2 sm:$0xff]  ;;  %12202 = vst.msk [vmem:[#allocation5 + $0xa8] sm:$0xff] %vm1751_vm4, %v12170_v43  ;;  %v23737_v57 = vadd.f32 %v22249_v45, %v29653_v17  ;;  %v12061_v21 = vpop.f32.mrb[15].mxu1 }
 0x791   : > { %v27941_v61 = vld [vmem:[#allocation7 + $0x31] sm:$0xff]  ;;  %v12308_v27 = vmax.f32 %v12253_v62, %v12285_v16  ;;  %12201 = vst.msk [vmem:[#allocation5 + $0xa0] sm:$0xff] %vm1751_vm4, %v12169_v46  ;;  %v23738_v41 = vadd.f32 %v12061_v21, %v29654_v44  ;;  %12360 = vst.msk [vmem:[#allocation7 + $0x42] sm:$0xff] %vm1751_vm4, %v12351_v4  ;;  %v29661_v43 = vld [vmem:[#allocation93_spill] sm:$0xff] }
 0x792   : > { %22274 = vmatmul.mubr.msk.f32.gmra.mrb[162].mxu0 %vm1751_vm4, %v27941_v61  ;;  %v12172_v3 = vadd.f32 %v23737_v57, %v27859_v49  ;;  %v12335_v8 = vld [vmem:[#allocation6 + $0x30] sm:$0xff] }
 0x793   : > { %12324 = vst.msk [vmem:[#allocation6 + $0x40] sm:$0xff] %vm1751_vm4, %v12308_v27  ;;  %v12171_v59 = vadd.f32 %v23738_v41, %v27859_v49  ;;  %v22252_v42 = vpop.f32.mrb[16].mxu1  ;;  %v29662_v4 = vld [vmem:[#allocation94_spill] sm:$0xff] }
 0x794   : > { %v12255_v19 = vld [vmem:[#allocation5 + $0x90] ss:$2 sm:$0xff]  ;;  %v12287_v51 = vld [vmem:[#allocation5 + $0x91] ss:$2 sm:$0xff]  ;;  %12204 = vst.msk [vmem:[#allocation5 + $0xb8] sm:$0xff] %vm1751_vm4, %v12172_v3  ;;  %v23739_v38 = vadd.f32 %v22252_v42, %v29655_v20  ;;  %v12071_v54 = vpop.f32.mrb[17].mxu1 }
 0x795   : > { %v12309_v36 = vmax.f32 %v12255_v19, %v12287_v51  ;;  %12203 = vst.msk [vmem:[#allocation5 + $0xb0] sm:$0xff] %vm1751_vm4, %v12171_v59  ;;  %v23740_v58 = vadd.f32 %v12071_v54, %v29656_v48  ;;  %v12366_v48 = vld [vmem:[#allocation7] sm:$0xff] }
 0x796   : > { %v12174_v6 = vadd.f32 %v23739_v38, %v27859_v49  ;;  %v12344_v33 = vld [vmem:[#allocation6 + $0x38] sm:$0xff] }
 0x797   : > { %12325 = vst.msk [vmem:[#allocation6 + $0x48] sm:$0xff] %vm1751_vm4, %v12309_v36  ;;  %v12173_v34 = vadd.f32 %v23740_v58, %v27859_v49  ;;  %v22255_v1 = vpop.f32.mrb[18].mxu1  ;;  %v12352_v26 = vmax.f32 %v12335_v8, %v12344_v33  ;;  %v18743_v8 = vld [vmem:[%s29332_s5 + $0x50] sm:$0xff]  ;;  %v18744_v33 = vld [vmem:[%s29332_s5 + $0x58] sm:$0xff] }
 0x798   : > { %v12257_v29 = vld [vmem:[#allocation5 + $0xa0] ss:$2 sm:$0xff]  ;;  %v12289_v35 = vld [vmem:[#allocation5 + $0xa1] ss:$2 sm:$0xff]  ;;  %12206 = vst.msk [vmem:[#allocation5 + $0xc8] sm:$0xff] %vm1751_vm4, %v12174_v6  ;;  %v23741_v14 = vadd.f32 %v22255_v1, %v29657_v39  ;;  %v12081_v22 = vpop.f32.mrb[19].mxu1  ;;  %v23327_v1 = vpack.c.bf16 %v18744_v33, %v18743_v8 }
 0x799   : > { %v27960_v23 = vld [vmem:[#allocation7 + $0x41] sm:$0xff]  ;;  %v12310_v24 = vmax.f32 %v12257_v29, %v12289_v35  ;;  %12205 = vst.msk [vmem:[#allocation5 + $0xc0] sm:$0xff] %vm1751_vm4, %v12173_v34  ;;  %v23742_v25 = vadd.f32 %v12081_v22, %v29658_v52  ;;  %12361 = vst.msk [vmem:[#allocation7 + $0x52] sm:$0xff] %vm1751_vm4, %v12352_v26  ;;  %v28011_v34 = vld [vmem:[#allocation7 + $0x10] sm:$0xff] }
 0x79a   : > { %22276 = vmatprep.mubr.msk.f32.mxu0 %vm1751_vm4, %v27960_v23  ;;  %v12176_v28 = vadd.f32 %v23741_v14, %v27859_v49  ;;  %v12336_v10 = vld [vmem:[#allocation6 + $0x40] sm:$0xff]  ;;  %v18754_v29 = vld [vmem:[%s29332_s5 + $0x68] sm:$0xff]  ;;  %v28026_v52 = vld [vmem:[#allocation7 + $0x30] sm:$0xff] }
 0x79b   : > { %12326 = vst.msk [vmem:[#allocation6 + $0x50] sm:$0xff] %vm1751_vm4, %v12310_v24  ;;  %v12175_v32 = vadd.f32 %v23742_v25, %v27859_v49  ;;  %v22258_v53 = vpop.f32.mrb[20].mxu1  ;;  %v18753_v26 = vld [vmem:[%s29332_s5 + $0x60] sm:$0xff]  ;;  %v18791_v33 = vld [vmem:[%s29332_s5 + $0xd0] sm:$0xff] }
 0x79c   : > { %v12259_v55 = vld [vmem:[#allocation5 + $0xb0] ss:$2 sm:$0xff]  ;;  %v12291_v60 = vld [vmem:[#allocation5 + $0xb1] ss:$2 sm:$0xff]  ;;  %12208 = vst.msk [vmem:[#allocation5 + $0xd8] sm:$0xff] %vm1751_vm4, %v12176_v28  ;;  %v23743_v11 = vadd.f32 %v22258_v53, %v29659_v31  ;;  %v12091_v2 = vpop.f32.mrb[21].mxu1  ;;  %v23331_v22 = vpack.c.bf16 %v18754_v29, %v18753_v26 }
 0x79d   : > { %v12311_v15 = vmax.f32 %v12259_v55, %v12291_v60  ;;  %12207 = vst.msk [vmem:[#allocation5 + $0xd0] sm:$0xff] %vm1751_vm4, %v12175_v32  ;;  %v23744_v5 = vadd.f32 %v12091_v2, %v29660_v56  ;;  %v28021_v35 = vld [vmem:[#allocation7 + $0x20] sm:$0xff]  ;;  %v18755_v55 = vld [vmem:[%s29332_s5 + $0x70] sm:$0xff]  ;;  %v18756_v60 = vld [vmem:[%s29332_s5 + $0x78] sm:$0xff] }
 0x79e   : > { %v12178_v12 = vadd.f32 %v23743_v11, %v27859_v49  ;;  %v12345_v40 = vld [vmem:[#allocation6 + $0x48] sm:$0xff]  ;;  %v28030_v25 = vld [vmem:[#allocation7 + $0x40] sm:$0xff]  ;;  %v28054_v31 = vld [vmem:[#allocation7 + $0x12] sm:$0xff]  ;;  %v23335_v11 = vpack.c.bf16 %v18756_v60, %v18755_v55 }
 0x79f   : > { %12327 = vst.msk [vmem:[#allocation6 + $0x58] sm:$0xff] %vm1751_vm4, %v12311_v15  ;;  %v12177_v50 = vadd.f32 %v23744_v5, %v27859_v49  ;;  %v22261_v37 = vpop.f32.mrb[22].mxu1  ;;  %v12353_v18 = vmax.f32 %v12336_v10, %v12345_v40  ;;  %v12649_v32 = vld [vmem:[#allocation7 + $0x2] sm:$0xff] }
 0x7a0   : > { %v12261_v30 = vld [vmem:[#allocation5 + $0xc0] ss:$2 sm:$0xff]  ;;  %v12293_v63 = vld [vmem:[#allocation5 + $0xc1] ss:$2 sm:$0xff]  ;;  %12210 = vst.msk [vmem:[#allocation5 + $0xe8] sm:$0xff] %vm1751_vm4, %v12178_v12  ;;  %v23745_v9 = vadd.f32 %v22261_v37, %v29661_v43  ;;  %v12101_v13 = vpop.f32.mrb[23].mxu1 }
 0x7a1   : > { %v27979_v46 = vld [vmem:[#allocation7 + $0x51] sm:$0xff]  ;;  %v12312_v45 = vmax.f32 %v12261_v30, %v12293_v63  ;;  %12209 = vst.msk [vmem:[#allocation5 + $0xe0] sm:$0xff] %vm1751_vm4, %v12177_v50  ;;  %v23746_v62 = vadd.f32 %v12101_v13, %v29662_v4  ;;  %12362 = vst.msk [vmem:[#allocation7 + $0x62] sm:$0xff] %vm1751_vm4, %v12353_v18  ;;  %v18765_v2 = vld [vmem:[%s29332_s5 + $0x80] sm:$0xff] }
 0x7a2   : > { %22277 = vmatmul.mubr.msk.f32.gmra.mrb[164].mxu0 %vm1751_vm4, %v27979_v46  ;;  %v12180_v16 = vadd.f32 %v23745_v9, %v27859_v49  ;;  %v12337_v44 = vld [vmem:[#allocation6 + $0x50] sm:$0xff]  ;;  %v18766_v15 = vld [vmem:[%s29332_s5 + $0x88] sm:$0xff]  ;;  %v18768_v63 = vld [vmem:[%s29332_s5 + $0x98] sm:$0xff] }
 0x7a3   : > { %12328 = vst.msk [vmem:[#allocation6 + $0x60] sm:$0xff] %vm1751_vm4, %v12312_v45  ;;  %v12179_v17 = vadd.f32 %v23746_v62, %v27859_v49  ;;  %v28064_v56 = vld [vmem:[#allocation7 + $0x22] sm:$0xff]  ;;  %v23339_v5 = vpack.c.bf16 %v18766_v15, %v18765_v2  ;;  %v28068_v12 = vld [vmem:[#allocation7 + $0x32] sm:$0xff] }
 0x7a4   : > { %v12263_v57 = vld [vmem:[#allocation5 + $0xd0] ss:$2 sm:$0xff]  ;;  %v12295_v21 = vld [vmem:[#allocation5 + $0xd1] ss:$2 sm:$0xff]  ;;  %12212 = vst.msk [vmem:[#allocation5 + $0xf8] sm:$0xff] %vm1751_vm4, %v12180_v16  ;;  %v28072_v10 = vld [vmem:[#allocation7 + $0x42] sm:$0xff] }
 0x7a5   : > { %v12313_v27 = vmax.f32 %v12263_v57, %v12295_v21  ;;  %12211 = vst.msk [vmem:[#allocation5 + $0xf0] sm:$0xff] %vm1751_vm4, %v12179_v17  ;;  %v28076_v40 = vld [vmem:[#allocation7 + $0x52] sm:$0xff]  ;;  %v12799_v37 = vld [vmem:[#allocation7 + $0x3] sm:$0xff] }
 0x7a6   : > { %v12346_v41 = vld [vmem:[#allocation6 + $0x58] sm:$0xff]  ;;  %v18767_v30 = vld [vmem:[%s29332_s5 + $0x90] sm:$0xff]  ;;  %v18777_v13 = vld [vmem:[%s29332_s5 + $0xa0] sm:$0xff] }
 0x7a7   : > { %12329 = vst.msk [vmem:[#allocation6 + $0x68] sm:$0xff] %vm1751_vm4, %v12313_v27  ;;  %v12354_v3 = vmax.f32 %v12337_v44, %v12346_v41  ;;  %v28095_v43 = vld [vmem:[#allocation7 + $0x13] sm:$0xff]  ;;  %v23343_v9 = vpack.c.bf16 %v18768_v63, %v18767_v30  ;;  %v18778_v45 = vld [vmem:[%s29332_s5 + $0xa8] sm:$0xff]  ;;  %v18801_v29 = vld [vmem:[%s29332_s5 + $0xe0] sm:$0xff] }
 0x7a8   : > { %v12265_v59 = vld [vmem:[#allocation5 + $0xe0] ss:$2 sm:$0xff]  ;;  %v12297_v42 = vld [vmem:[#allocation5 + $0xe1] ss:$2 sm:$0xff]  ;;  %v23347_v62 = vpack.c.bf16 %v18778_v45, %v18777_v13  ;;  %v28109_v16 = vld [vmem:[#allocation7 + $0x33] sm:$0xff] }
 0x7a9   : > { %v27992_v19 = vld [vmem:[#allocation7 + $0x61] sm:$0xff]  ;;  %v12314_v51 = vmax.f32 %v12265_v59, %v12297_v42  ;;  %12363 = vst.msk [vmem:[#allocation7 + $0x72] sm:$0xff] %vm1751_vm4, %v12354_v3  ;;  %v28117_v57 = vld [vmem:[#allocation7 + $0x53] sm:$0xff] }
 0x7aa   : > { %22279 = vmatprep.mubr.msk.f32.mxu0 %vm1751_vm4, %v27992_v19  ;;  %v12338_v54 = vld [vmem:[#allocation6 + $0x60] sm:$0xff]  ;;  %v18779_v41 = vld [vmem:[%s29332_s5 + $0xb0] sm:$0xff]  ;;  %v18780_v3 = vld [vmem:[%s29332_s5 + $0xb8] sm:$0xff] }
 0x7ab   : > { %12330 = vst.msk [vmem:[#allocation6 + $0x70] sm:$0xff] %vm1751_vm4, %v12314_v51  ;;  %v28039_v28 = vld [vmem:[#allocation7 + $0x60] sm:$0xff]  ;;  %v28136_v59 = vld [vmem:[#allocation7 + $0x14] sm:$0xff]  ;;  %v23351_v42 = vpack.c.bf16 %v18780_v3, %v18779_v41  ;;  %v18814_v60 = vld [vmem:[%s29332_s5 + $0x108] sm:$0xff] }
 0x7ac   : > { %v12267_v49 = vld [vmem:[#allocation5 + $0xf0] ss:$2 sm:$0xff]  ;;  %v12299_v20 = vld [vmem:[#allocation5 + $0xf1] ss:$2 sm:$0xff]  ;;  %v28080_v50 = vld [vmem:[#allocation7 + $0x62] sm:$0xff] }
 0x7ad   : > { %v12315_v38 = vmax.f32 %v12267_v49, %v12299_v20  ;;  %v28105_v4 = vld [vmem:[#allocation7 + $0x23] sm:$0xff]  ;;  %v18815_v2 = vld [vmem:[%s29332_s5 + $0x110] sm:$0xff]  ;;  %v18816_v15 = vld [vmem:[%s29332_s5 + $0x118] sm:$0xff] }
 0x7ae   : > { %v12347_v36 = vld [vmem:[#allocation6 + $0x68] sm:$0xff]  ;;  %v18789_v51 = vld [vmem:[%s29332_s5 + $0xc0] sm:$0xff]  ;;  %v18828_v13 = vld [vmem:[%s29332_s5 + $0x138] sm:$0xff] }
 0x7af   : > { %12331 = vst.msk [vmem:[#allocation6 + $0x78] sm:$0xff] %vm1751_vm4, %v12315_v38  ;;  %v12355_v58 = vmax.f32 %v12338_v54, %v12347_v36  ;;  %v28113_v17 = vld [vmem:[#allocation7 + $0x43] sm:$0xff]  ;;  %v28150_v54 = vld [vmem:[#allocation7 + $0x34] sm:$0xff] }
 0x7b0   : > { %v27999_v6 = vld [vmem:[#allocation7 + $0x71] sm:$0xff]  ;;  %v28121_v21 = vld [vmem:[#allocation7 + $0x63] sm:$0xff] }
 0x7b1   : > { %22280 = vmatmul.mubr.msk.f32.gmra.mrb[166].mxu0 %vm1751_vm4, %v27999_v6  ;;  %12364 = vst.msk [vmem:[#allocation7 + $0x82] sm:$0xff] %vm1751_vm4, %v12355_v58  ;;  %v28043_v53 = vld [vmem:[#allocation7 + $0x70] sm:$0xff]  ;;  %v12949_v27 = vld [vmem:[#allocation7 + $0x4] sm:$0xff] }
 0x7b2   : > { %22290 = vmatprep.mubr.msk.f32.mxu0 %vm1751_vm4, %v12366_v48  ;;  %v12339_v39 = vld [vmem:[#allocation6 + $0x70] sm:$0xff]  ;;  %v18790_v49 = vld [vmem:[%s29332_s5 + $0xc8] sm:$0xff]  ;;  %v18813_v55 = vld [vmem:[%s29332_s5 + $0x100] sm:$0xff] }
 0x7b3   : > { %v28084_v18 = vld [vmem:[#allocation7 + $0x72] sm:$0xff]  ;;  %v28146_v20 = vld [vmem:[#allocation7 + $0x24] sm:$0xff]  ;;  %v23355_v38 = vpack.c.bf16 %v18790_v49, %v18789_v51 }
 0x7b4   : > { %v28125_v44 = vld [vmem:[#allocation7 + $0x73] sm:$0xff]  ;;  %v28154_v36 = vld [vmem:[#allocation7 + $0x44] sm:$0xff] }
 0x7b5   : > { %22291 = vmatmul.mubr.msk.f32.vlgmr.msra.gmra.mrb[160].mxu0 %vm1751_vm4, %v28011_v34  ;;  %v28158_v48 = vld [vmem:[#allocation7 + $0x54] sm:$0xff]  ;;  %v28162_v58 = vld [vmem:[#allocation7 + $0x64] sm:$0xff] }
 0x7b6   : > { %23326 = vmatpush3.bf16.msra.mxu0 %v27853_v7  ;;  %22293 = vmatprep.mubr.msk.f32.mxu0 %vm1751_vm4, %v28021_v35  ;;  %v12348_v14 = vld [vmem:[#allocation6 + $0x78] sm:$0xff]  ;;  %v28035_v7 = vld [vmem:[#allocation7 + $0x50] sm:$0xff]  ;;  %v18826_v30 = vld [vmem:[%s29332_s5 + $0x128] sm:$0xff] }
 0x7b7   : > { %23328 = vmatprep.subr.bf16.mxu0 %v23327_v1  ;;  %v12356_v24 = vmax.f32 %v12339_v39, %v12348_v14  ;;  %v28166_v8 = vld [vmem:[#allocation7 + $0x74] sm:$0xff]  ;;  %v18802_v39 = vld [vmem:[%s29332_s5 + $0xe8] sm:$0xff]  ;;  %v18849_v49 = vld [vmem:[%s29332_s5 + $0x160] sm:$0xff] }
 0x7b8   : > { %v23363_v14 = vpack.c.bf16 %v18802_v39, %v18801_v29  ;;  %v18839_v3 = vld [vmem:[%s29332_s5 + $0x150] sm:$0xff]  ;;  %v18861_v39 = vld [vmem:[%s29332_s5 + $0x180] sm:$0xff] }
 0x7b9   : > { %22294 = vmatmul.mubr.msk.f32.gmra.mrb[162].mxu0 %vm1751_vm4, %v28026_v52  ;;  %12365 = vst.msk [vmem:[#allocation7 + $0x92] sm:$0xff] %vm1751_vm4, %v12356_v24  ;;  %v18804_v24 = vld [vmem:[%s29332_s5 + $0xf8] sm:$0xff] }
 0x7ba   : > { %22296 = vmatprep.mubr.msk.f32.mxu0 %vm1751_vm4, %v28030_v25  ;;  %23330 = vmatpush3.bf16.msra.mxu0 %v23327_v1  ;;  %v18792_v1 = vld [vmem:[%s29332_s5 + $0xd8] sm:$0xff] }
 0x7bb   : > { %23332 = vmatprep.subr.bf16.mxu0 %v23331_v22  ;;  %v23359_v26 = vpack.c.bf16 %v18792_v1, %v18791_v33  ;;  %v18851_v1 = vld [vmem:[%s29332_s5 + $0x170] sm:$0xff] }
 0x7bd   : > { %22297 = vmatmul.mubr.msk.f32.gmra.mrb[164].mxu0 %vm1751_vm4, %v28035_v7 }
 0x7be   : > { %22299 = vmatprep.mubr.msk.f32.mxu0 %vm1751_vm4, %v28039_v28 }
 0x7c1   : > { %22300 = vmatmul.mubr.msk.f32.gmra.mrb[166].mxu0 %vm1751_vm4, %v28043_v53 }
 0x7c2   : > { %22310 = vmatprep.mubr.msk.f32.mxu0 %vm1751_vm4, %v12649_v32 }
 0x7c5   : > { %22311 = vmatmul.mubr.msk.f32.vlgmr.msra.gmra.mrb[160].mxu0 %vm1751_vm4, %v28054_v31 }
 0x7c6   : > { %23334 = vmatpush3.bf16.msra.mxu0 %v23331_v22  ;;  %22313 = vmatprep.mubr.msk.f32.mxu0 %vm1751_vm4, %v28064_v56  ;;  %v18803_v22 = vld [vmem:[%s29332_s5 + $0xf0] sm:$0xff] }
 0x7c7   : > { %23336 = vmatprep.subr.bf16.mxu0 %v23335_v11  ;;  %v23367_v32 = vpack.c.bf16 %v18804_v24, %v18803_v22  ;;  %v18863_v24 = vld [vmem:[%s29332_s5 + $0x190] sm:$0xff] }
 0x7c9   : > { %22314 = vmatmul.mubr.msk.f32.gmra.mrb[162].mxu0 %vm1751_vm4, %v28068_v12 }
 0x7ca   : > { %22316 = vmatprep.mubr.msk.f32.mxu0 %vm1751_vm4, %v28072_v10  ;;  %23338 = vmatpush3.bf16.msra.mxu0 %v23335_v11  ;;  %v23371_v11 = vpack.c.bf16 %v18814_v60, %v18813_v55  ;;  %v18873_v60 = vld [vmem:[%s29332_s5 + $0x1a0] sm:$0xff] }
 0x7cb   : > { %23340 = vmatprep.subr.bf16.mxu0 %v23339_v5 }
 0x7cd   : > { %22317 = vmatmul.mubr.msk.f32.gmra.mrb[164].mxu0 %vm1751_vm4, %v28076_v40 }
 0x7ce   : > { %22319 = vmatprep.mubr.msk.f32.mxu0 %vm1751_vm4, %v28080_v50 }
 0x7d1   : > { %22320 = vmatmul.mubr.msk.f32.gmra.mrb[166].mxu0 %vm1751_vm4, %v28084_v18 }
 0x7d2   : > { %22330 = vmatprep.mubr.msk.f32.mxu0 %vm1751_vm4, %v12799_v37  ;;  %v18825_v37 = vld [vmem:[%s29332_s5 + $0x120] sm:$0xff] }
 0x7d3   : > { %v23379_v63 = vpack.c.bf16 %v18826_v30, %v18825_v37  ;;  %v18885_v30 = vld [vmem:[%s29332_s5 + $0x1c0] sm:$0xff] }
 0x7d5   : > { %22331 = vmatmul.mubr.msk.f32.vlgmr.msra.gmra.mrb[160].mxu0 %vm1751_vm4, %v28095_v43 }
 0x7d6   : > { %23342 = vmatpush3.bf16.msra.mxu0 %v23339_v5  ;;  %22333 = vmatprep.mubr.msk.f32.mxu0 %vm1751_vm4, %v28105_v4  ;;  %v23375_v5 = vpack.c.bf16 %v18816_v15, %v18815_v2  ;;  %v18875_v15 = vld [vmem:[%s29332_s5 + $0x1b0] sm:$0xff] }
 0x7d7   : > { %23344 = vmatprep.subr.bf16.mxu0 %v23343_v9 }
 0x7d9   : > { %22334 = vmatmul.mubr.msk.f32.gmra.mrb[162].mxu0 %vm1751_vm4, %v28109_v16 }
 0x7da   : > { %22336 = vmatprep.mubr.msk.f32.mxu0 %vm1751_vm4, %v28113_v17  ;;  %23346 = vmatpush3.bf16.msra.mxu0 %v23343_v9  ;;  %v18827_v9 = vld [vmem:[%s29332_s5 + $0x130] sm:$0xff] }
 0x7db   : > { %23348 = vmatprep.subr.bf16.mxu0 %v23347_v62  ;;  %v23383_v45 = vpack.c.bf16 %v18828_v13, %v18827_v9  ;;  %v18887_v13 = vld [vmem:[%s29332_s5 + $0x1d0] sm:$0xff] }
 0x7dd   : > { %22337 = vmatmul.mubr.msk.f32.gmra.mrb[164].mxu0 %vm1751_vm4, %v28117_v57 }
 0x7de   : > { %22339 = vmatprep.mubr.msk.f32.mxu0 %vm1751_vm4, %v28121_v21 }
 0x7e1   : > { %22340 = vmatmul.mubr.msk.f32.gmra.mrb[166].mxu0 %vm1751_vm4, %v28125_v44 }
 0x7e2   : > { %22350 = vmatprep.mubr.msk.f32.mxu0 %vm1751_vm4, %v12949_v27  ;;  %v18838_v27 = vld [vmem:[%s29332_s5 + $0x148] sm:$0xff] }
 0x7e5   : > { %22351 = vmatmul.mubr.msk.f32.vlgmr.msra.gmra.mrb[160].mxu0 %vm1751_vm4, %v28136_v59 }
 0x7e6   : > { %23350 = vmatpush3.bf16.msra.mxu0 %v23347_v62  ;;  %22353 = vmatprep.mubr.msk.f32.mxu0 %vm1751_vm4, %v28146_v20  ;;  %v18837_v62 = vld [vmem:[%s29332_s5 + $0x140] sm:$0xff] }
 0x7e7   : > { %23352 = vmatprep.subr.bf16.mxu0 %v23351_v42  ;;  %v23387_v41 = vpack.c.bf16 %v18838_v27, %v18837_v62  ;;  %v18897_v27 = vld [vmem:[%s29332_s5 + $0x1e0] sm:$0xff] }
 0x7e9   : > { %22354 = vmatmul.mubr.msk.f32.gmra.mrb[162].mxu0 %vm1751_vm4, %v28150_v54 }
 0x7ea   : > { %22356 = vmatprep.mubr.msk.f32.mxu0 %vm1751_vm4, %v28154_v36  ;;  %23354 = vmatpush3.bf16.msra.mxu0 %v23351_v42  ;;  %v18840_v42 = vld [vmem:[%s29332_s5 + $0x158] sm:$0xff] }
 0x7eb   : > { %23356 = vmatprep.subr.bf16.mxu0 %v23355_v38  ;;  %v23391_v51 = vpack.c.bf16 %v18840_v42, %v18839_v3  ;;  %v18899_v42 = vld [vmem:[%s29332_s5 + $0x1f0] sm:$0xff] }
 0x7ed   : > { %22357 = vmatmul.mubr.msk.f32.gmra.mrb[164].mxu0 %vm1751_vm4, %v28158_v48 }
 0x7ee   : > { %22359 = vmatprep.mubr.msk.f32.mxu0 %vm1751_vm4, %v28162_v58 }
 0x7f1   : > { %22360 = vmatmul.mubr.msk.f32.gmra.mrb[166].mxu0 %vm1751_vm4, %v28166_v8 }
 0x7f2   : > { %22370 = vmatprep.mubr.msk.f32.mxu0 %vm1751_vm4, %v28011_v34  ;;  %v28196_v34 = vld [vmem:[#allocation7 + $0x80] sm:$0xff] }
 0x7f5   : > { %22371 = vmatmul.mubr.msk.f32.vlgmr.msra.gmra.mrb[160].mxu0 %vm1751_vm4, %v28021_v35 }
 0x7f6   : > { %23358 = vmatpush3.bf16.msra.mxu0 %v23355_v38  ;;  %22373 = vmatprep.mubr.msk.f32.mxu0 %vm1751_vm4, %v28026_v52  ;;  %v18850_v38 = vld [vmem:[%s29332_s5 + $0x168] sm:$0xff] }
 0x7f7   : > { %23360 = vmatprep.subr.bf16.mxu0 %v23359_v26  ;;  %v23395_v33 = vpack.c.bf16 %v18850_v38, %v18849_v49  ;;  %v18909_v38 = vld [vmem:[%s29332_s5 + $0x200] sm:$0xff] }
 0x7f9   : > { %22374 = vmatmul.mubr.msk.f32.gmra.mrb[162].mxu0 %vm1751_vm4, %v28030_v25 }
 0x7fa   : > { %22376 = vmatprep.mubr.msk.f32.mxu0 %vm1751_vm4, %v28035_v7  ;;  %23362 = vmatpush3.bf16.msra.mxu0 %v23359_v26  ;;  %v18852_v26 = vld [vmem:[%s29332_s5 + $0x178] sm:$0xff] }
 0x7fb   : > { %23364 = vmatprep.subr.bf16.mxu0 %v23363_v14  ;;  %v23399_v29 = vpack.c.bf16 %v18852_v26, %v18851_v1  ;;  %v18911_v26 = vld [vmem:[%s29332_s5 + $0x210] sm:$0xff] }
 0x7fd   : > { %22377 = vmatmul.mubr.msk.f32.gmra.mrb[164].mxu0 %vm1751_vm4, %v28039_v28 }
 0x7fe   : > { %22379 = vmatprep.mubr.msk.f32.mxu0 %vm1751_vm4, %v28043_v53 }
 0x801   : > { %22380 = vmatmul.mubr.msk.f32.gmra.mrb[166].mxu0 %vm1751_vm4, %v28196_v34 }
 0x802   : > { %22390 = vmatprep.mubr.msk.f32.mxu0 %vm1751_vm4, %v27831_v47  ;;  %v28226_v47 = vld [vmem:[#allocation7 + $0x81] sm:$0xff] }
 0x805   : > { %22391 = vmatmul.mubr.msk.f32.vlgmr.msra.gmra.mrb[160].mxu0 %vm1751_vm4, %v27922_v0 }
 0x806   : > { %23366 = vmatpush3.bf16.msra.mxu0 %v23363_v14  ;;  %22393 = vmatprep.mubr.msk.f32.mxu0 %vm1751_vm4, %v27941_v61  ;;  %v18862_v14 = vld [vmem:[%s29332_s5 + $0x188] sm:$0xff] }
 0x807   : > { %23368 = vmatprep.subr.bf16.mxu0 %v23367_v32  ;;  %v23403_v22 = vpack.c.bf16 %v18862_v14, %v18861_v39  ;;  %v18921_v14 = vld [vmem:[%s29332_s5 + $0x220] sm:$0xff] }
 0x809   : > { %22394 = vmatmul.mubr.msk.f32.gmra.mrb[162].mxu0 %vm1751_vm4, %v27960_v23 }
 0x80a   : > { %22396 = vmatprep.mubr.msk.f32.mxu0 %vm1751_vm4, %v27979_v46  ;;  %23370 = vmatpush3.bf16.msra.mxu0 %v23367_v32  ;;  %v18864_v32 = vld [vmem:[%s29332_s5 + $0x198] sm:$0xff] }
 0x80b   : > { %23372 = vmatprep.subr.bf16.mxu0 %v23371_v11  ;;  %v23407_v55 = vpack.c.bf16 %v18864_v32, %v18863_v24  ;;  %v18923_v32 = vld [vmem:[%s29332_s5 + $0x230] sm:$0xff] }
 0x80d   : > { %22397 = vmatmul.mubr.msk.f32.gmra.mrb[164].mxu0 %vm1751_vm4, %v27992_v19 }
 0x80e   : > { %22399 = vmatprep.mubr.msk.f32.mxu0 %vm1751_vm4, %v27999_v6 }
 0x811   : > { %22400 = vmatmul.mubr.msk.f32.gmra.mrb[166].mxu0 %vm1751_vm4, %v28226_v47 }
 0x812   : > { %22410 = vmatprep.mubr.msk.f32.mxu0 %vm1751_vm4, %v28054_v31  ;;  %v28256_v31 = vld [vmem:[#allocation7 + $0x82] sm:$0xff] }
 0x815   : > { %22411 = vmatmul.mubr.msk.f32.vlgmr.msra.gmra.mrb[160].mxu0 %vm1751_vm4, %v28064_v56 }
 0x816   : > { %23374 = vmatpush3.bf16.msra.mxu0 %v23371_v11  ;;  %22413 = vmatprep.mubr.msk.f32.mxu0 %vm1751_vm4, %v28068_v12  ;;  %v18874_v11 = vld [vmem:[%s29332_s5 + $0x1a8] sm:$0xff] }
 0x817   : > { %23376 = vmatprep.subr.bf16.mxu0 %v23375_v5  ;;  %v23411_v2 = vpack.c.bf16 %v18874_v11, %v18873_v60  ;;  %v18933_v11 = vld [vmem:[%s29332_s5 + $0x240] sm:$0xff] }
 0x819   : > { %22414 = vmatmul.mubr.msk.f32.gmra.mrb[162].mxu0 %vm1751_vm4, %v28072_v10 }
 0x81a   : > { %22416 = vmatprep.mubr.msk.f32.mxu0 %vm1751_vm4, %v28076_v40  ;;  %23378 = vmatpush3.bf16.msra.mxu0 %v23375_v5  ;;  %v18876_v5 = vld [vmem:[%s29332_s5 + $0x1b8] sm:$0xff] }
 0x81b   : > { %23380 = vmatprep.subr.bf16.mxu0 %v23379_v63  ;;  %v23415_v37 = vpack.c.bf16 %v18876_v5, %v18875_v15  ;;  %v18946_v5 = vld [vmem:[%s29332_s5 + $0x268] sm:$0xff] }
 0x81d   : > { %22417 = vmatmul.mubr.msk.f32.gmra.mrb[164].mxu0 %vm1751_vm4, %v28080_v50 }
 0x81e   : > { %22419 = vmatprep.mubr.msk.f32.mxu0 %vm1751_vm4, %v28084_v18 }
 0x821   : > { %22420 = vmatmul.mubr.msk.f32.gmra.mrb[166].mxu0 %vm1751_vm4, %v28256_v31 }
 0x822   : > { %22430 = vmatprep.mubr.msk.f32.mxu0 %vm1751_vm4, %v28095_v43  ;;  %v28286_v43 = vld [vmem:[#allocation7 + $0x83] sm:$0xff] }
 0x825   : > { %22431 = vmatmul.mubr.msk.f32.vlgmr.msra.gmra.mrb[160].mxu0 %vm1751_vm4, %v28105_v4 }
 0x826   : > { %23382 = vmatpush3.bf16.msra.mxu0 %v23379_v63  ;;  %22433 = vmatprep.mubr.msk.f32.mxu0 %vm1751_vm4, %v28109_v16  ;;  %v18886_v63 = vld [vmem:[%s29332_s5 + $0x1c8] sm:$0xff] }
 0x827   : > { %23384 = vmatprep.subr.bf16.mxu0 %v23383_v45  ;;  %v23419_v9 = vpack.c.bf16 %v18886_v63, %v18885_v30  ;;  %v18958_v30 = vld [vmem:[%s29332_s5 + $0x288] sm:$0xff] }
 0x829   : > { %22434 = vmatmul.mubr.msk.f32.gmra.mrb[162].mxu0 %vm1751_vm4, %v28113_v17 }
 0x82a   : > { %22436 = vmatprep.mubr.msk.f32.mxu0 %vm1751_vm4, %v28117_v57  ;;  %23386 = vmatpush3.bf16.msra.mxu0 %v23383_v45  ;;  %v18888_v45 = vld [vmem:[%s29332_s5 + $0x1d8] sm:$0xff] }
 0x82b   : > { %23388 = vmatprep.subr.bf16.mxu0 %v23387_v41  ;;  %v23423_v62 = vpack.c.bf16 %v18888_v45, %v18887_v13  ;;  %v18972_v45 = vld [vmem:[%s29332_s5 + $0x2b8] sm:$0xff] }
 0x82d   : > { %22437 = vmatmul.mubr.msk.f32.gmra.mrb[164].mxu0 %vm1751_vm4, %v28121_v21 }
 0x82e   : > { %22439 = vmatprep.mubr.msk.f32.mxu0 %vm1751_vm4, %v28125_v44 }
 0x831   : > { %22440 = vmatmul.mubr.msk.f32.gmra.mrb[166].mxu0 %vm1751_vm4, %v28286_v43 }
 0x832   : > { %22450 = vmatprep.mubr.msk.f32.mxu0 %vm1751_vm4, %v28136_v59  ;;  %v28316_v59 = vld [vmem:[#allocation7 + $0x84] sm:$0xff] }
 0x835   : > { %22451 = vmatmul.mubr.msk.f32.vlgmr.msra.gmra.mrb[160].mxu0 %vm1751_vm4, %v28146_v20 }
 0x836   : > { %23390 = vmatpush3.bf16.msra.mxu0 %v23387_v41  ;;  %22453 = vmatprep.mubr.msk.f32.mxu0 %vm1751_vm4, %v28150_v54  ;;  %v18898_v41 = vld [vmem:[%s29332_s5 + $0x1e8] sm:$0xff] }
 0x837   : > { %23392 = vmatprep.subr.bf16.mxu0 %v23391_v51  ;;  %v23427_v3 = vpack.c.bf16 %v18898_v41, %v18897_v27  ;;  %v18981_v27 = vld [vmem:[%s29332_s5 + $0x2c0] sm:$0xff]  ;;  %v18982_v41 = vld [vmem:[%s29332_s5 + $0x2c8] sm:$0xff] }
 0x839   : > { %22454 = vmatmul.mubr.msk.f32.gmra.mrb[162].mxu0 %vm1751_vm4, %v28154_v36 }
 0x83a   : > { %22456 = vmatprep.mubr.msk.f32.mxu0 %vm1751_vm4, %v28158_v48  ;;  %23394 = vmatpush3.bf16.msra.mxu0 %v23391_v51  ;;  %v18900_v51 = vld [vmem:[%s29332_s5 + $0x1f8] sm:$0xff] }
 0x83b   : > { %23396 = vmatprep.subr.bf16.mxu0 %v23395_v33  ;;  %v23431_v49 = vpack.c.bf16 %v18900_v51, %v18899_v42  ;;  %v15503_v42 = vld [vmem:[#allocation7 + $0x51] sm:$0xff]  ;;  %v18994_v51 = vld [vmem:[%s29332_s5 + $0x2e8] sm:$0xff] }
 0x83d   : > { %22457 = vmatmul.mubr.msk.f32.gmra.mrb[164].mxu0 %vm1751_vm4, %v28162_v58 }
 0x83e   : > { %22459 = vmatprep.mubr.msk.f32.mxu0 %vm1751_vm4, %v28166_v8 }
 0x841   : > { %22460 = vmatmul.mubr.msk.f32.gmra.mrb[166].mxu0 %vm1751_vm4, %v28316_v59 }
 0x842   : > { %22470 = vmatprep.mubr.msk.f32.mxu0 %vm1751_vm4, %v28021_v35  ;;  %v28346_v35 = vld [vmem:[#allocation7 + $0x90] sm:$0xff] }
 0x845   : > { %22471 = vmatmul.mubr.msk.f32.vlgmr.msra.gmra.mrb[160].mxu0 %vm1751_vm4, %v28026_v52 }
 0x846   : > { %23398 = vmatpush3.bf16.msra.mxu0 %v23395_v33  ;;  %22473 = vmatprep.mubr.msk.f32.mxu0 %vm1751_vm4, %v28030_v25  ;;  %v18910_v33 = vld [vmem:[%s29332_s5 + $0x208] sm:$0xff] }
 0x847   : > { %23400 = vmatprep.subr.bf16.mxu0 %v23399_v29  ;;  %v23435_v1 = vpack.c.bf16 %v18910_v33, %v18909_v38  ;;  %v15505_v33 = vld [vmem:[#allocation7 + $0x71] sm:$0xff] }
 0x849   : > { %22474 = vmatmul.mubr.msk.f32.gmra.mrb[162].mxu0 %vm1751_vm4, %v28035_v7 }
 0x84a   : > { %22476 = vmatprep.mubr.msk.f32.mxu0 %vm1751_vm4, %v28039_v28  ;;  %23402 = vmatpush3.bf16.msra.mxu0 %v23399_v29  ;;  %v18912_v29 = vld [vmem:[%s29332_s5 + $0x218] sm:$0xff] }
 0x84b   : > { %23404 = vmatprep.subr.bf16.mxu0 %v23403_v22  ;;  %v23439_v39 = vpack.c.bf16 %v18912_v29, %v18911_v26  ;;  %v18995_v26 = vld [vmem:[%s29332_s5 + $0x2f0] sm:$0xff]  ;;  %v18996_v29 = vld [vmem:[%s29332_s5 + $0x2f8] sm:$0xff] }
 0x84d   : > { %22477 = vmatmul.mubr.msk.f32.gmra.mrb[164].mxu0 %vm1751_vm4, %v28043_v53 }
 0x84e   : > { %22479 = vmatprep.mubr.msk.f32.mxu0 %vm1751_vm4, %v28196_v34 }
 0x851   : > { %22480 = vmatmul.mubr.msk.f32.gmra.mrb[166].mxu0 %vm1751_vm4, %v28346_v35 }
 0x852   : > { %22490 = vmatprep.mubr.msk.f32.mxu0 %vm1751_vm4, %v27922_v0  ;;  %v28376_v0 = vld [vmem:[#allocation7 + $0x91] sm:$0xff] }
 0x855   : > { %22491 = vmatmul.mubr.msk.f32.vlgmr.msra.gmra.mrb[160].mxu0 %vm1751_vm4, %v27941_v61 }
 0x856   : > { %23406 = vmatpush3.bf16.msra.mxu0 %v23403_v22  ;;  %22493 = vmatprep.mubr.msk.f32.mxu0 %vm1751_vm4, %v27960_v23  ;;  %v18922_v22 = vld [vmem:[%s29332_s5 + $0x228] sm:$0xff] }
 0x857   : > { %23408 = vmatprep.subr.bf16.mxu0 %v23407_v55  ;;  %v23443_v24 = vpack.c.bf16 %v18922_v22, %v18921_v14  ;;  %v15653_v14 = vld [vmem:[#allocation7 + $0x52] sm:$0xff]  ;;  %v19006_v22 = vld [vmem:[%s29332_s5 + $0x308] sm:$0xff] }
 0x859   : > { %22494 = vmatmul.mubr.msk.f32.gmra.mrb[162].mxu0 %vm1751_vm4, %v27979_v46 }
 0x85a   : > { %22496 = vmatprep.mubr.msk.f32.mxu0 %vm1751_vm4, %v27992_v19  ;;  %23410 = vmatpush3.bf16.msra.mxu0 %v23407_v55  ;;  %v18924_v55 = vld [vmem:[%s29332_s5 + $0x238] sm:$0xff] }
 0x85b   : > { %23412 = vmatprep.subr.bf16.mxu0 %v23411_v2  ;;  %v23447_v60 = vpack.c.bf16 %v18924_v55, %v18923_v32  ;;  %v15655_v32 = vld [vmem:[#allocation7 + $0x72] sm:$0xff] }
 0x85c   : > { %v15659_v55 = vld [vmem:[#allocation7 + $0xb2] sm:$0xff] }
 0x85d   : > { %22497 = vmatmul.mubr.msk.f32.gmra.mrb[164].mxu0 %vm1751_vm4, %v27999_v6 }
 0x85e   : > { %22499 = vmatprep.mubr.msk.f32.mxu0 %vm1751_vm4, %v28226_v47 }
 0x861   : > { %22500 = vmatmul.mubr.msk.f32.gmra.mrb[166].mxu0 %vm1751_vm4, %v28376_v0 }
 0x862   : > { %22510 = vmatprep.mubr.msk.f32.mxu0 %vm1751_vm4, %v28064_v56  ;;  %v28406_v56 = vld [vmem:[#allocation7 + $0x92] sm:$0xff] }
 0x865   : > { %22511 = vmatmul.mubr.msk.f32.vlgmr.msra.gmra.mrb[160].mxu0 %vm1751_vm4, %v28068_v12 }
 0x866   : > { %23414 = vmatpush3.bf16.msra.mxu0 %v23411_v2  ;;  %22513 = vmatprep.mubr.msk.f32.mxu0 %vm1751_vm4, %v28072_v10  ;;  %v18934_v2 = vld [vmem:[%s29332_s5 + $0x248] sm:$0xff] }
 0x867   : > { %23416 = vmatprep.subr.bf16.mxu0 %v23415_v37  ;;  %v23451_v15 = vpack.c.bf16 %v18934_v2, %v18933_v11  ;;  %v19008_v11 = vld [vmem:[%s29332_s5 + $0x318] sm:$0xff] }
 0x869   : > { %22514 = vmatmul.mubr.msk.f32.gmra.mrb[162].mxu0 %vm1751_vm4, %v28076_v40 }
 0x86a   : > { %22516 = vmatprep.mubr.msk.f32.mxu0 %vm1751_vm4, %v28080_v50  ;;  %23418 = vmatpush3.bf16.msra.mxu0 %v23415_v37 }
 0x86b   : > { %23420 = vmatprep.subr.bf16.mxu0 %v23419_v9 }
 0x86d   : > { %22517 = vmatmul.mubr.msk.f32.gmra.mrb[164].mxu0 %vm1751_vm4, %v28084_v18 }
 0x86e   : > { %22519 = vmatprep.mubr.msk.f32.mxu0 %vm1751_vm4, %v28256_v31 }
 0x871   : > { %22520 = vmatmul.mubr.msk.f32.gmra.mrb[166].mxu0 %vm1751_vm4, %v28406_v56 }
 0x872   : > { %22530 = vmatprep.mubr.msk.f32.mxu0 %vm1751_vm4, %v28105_v4  ;;  %v28436_v4 = vld [vmem:[#allocation7 + $0x93] sm:$0xff] }
 0x875   : > { %22531 = vmatmul.mubr.msk.f32.vlgmr.msra.gmra.mrb[160].mxu0 %vm1751_vm4, %v28109_v16 }
 0x876   : > { %23422 = vmatpush3.bf16.msra.mxu0 %v23419_v9  ;;  %22533 = vmatprep.mubr.msk.f32.mxu0 %vm1751_vm4, %v28113_v17  ;;  %v18970_v9 = vld [vmem:[%s29332_s5 + $0x2a8] sm:$0xff] }
 0x877   : > { %23424 = vmatprep.subr.bf16.mxu0 %v23423_v62 }
 0x879   : > { %22534 = vmatmul.mubr.msk.f32.gmra.mrb[162].mxu0 %vm1751_vm4, %v28117_v57 }
 0x87a   : > { %22536 = vmatprep.mubr.msk.f32.mxu0 %vm1751_vm4, %v28121_v21  ;;  %23426 = vmatpush3.bf16.msra.mxu0 %v23423_v62 }
 0x87b   : > { %23428 = vmatprep.subr.bf16.mxu0 %v23427_v3 }
 0x87d   : > { %22537 = vmatmul.mubr.msk.f32.gmra.mrb[164].mxu0 %vm1751_vm4, %v28125_v44 }
 0x87e   : > { %22539 = vmatprep.mubr.msk.f32.mxu0 %vm1751_vm4, %v28286_v43 }
 0x881   : > { %22540 = vmatmul.mubr.msk.f32.gmra.mrb[166].mxu0 %vm1751_vm4, %v28436_v4 }
 0x882   : > { %22550 = vmatprep.mubr.msk.f32.mxu0 %vm1751_vm4, %v28146_v20  ;;  %v28466_v20 = vld [vmem:[#allocation7 + $0x94] sm:$0xff] }
 0x885   : > { %22551 = vmatmul.mubr.msk.f32.vlgmr.msra.gmra.mrb[160].mxu0 %vm1751_vm4, %v28150_v54 }
 0x886   : > { %23430 = vmatpush3.bf16.msra.mxu0 %v23427_v3  ;;  %22553 = vmatprep.mubr.msk.f32.mxu0 %vm1751_vm4, %v28154_v36  ;;  %v23483_v3 = vpack.c.bf16 %v18982_v41, %v18981_v27 }
 0x887   : > { %23432 = vmatprep.subr.bf16.mxu0 %v23431_v49 }
 0x889   : > { %22554 = vmatmul.mubr.msk.f32.gmra.mrb[162].mxu0 %vm1751_vm4, %v28158_v48 }
 0x88a   : > { %22556 = vmatprep.mubr.msk.f32.mxu0 %vm1751_vm4, %v28162_v58  ;;  %23434 = vmatpush3.bf16.msra.mxu0 %v23431_v49  ;;  %v15504_v49 = vld [vmem:[#allocation7 + $0x61] sm:$0xff] }
 0x88b   : > { %23436 = vmatprep.subr.bf16.mxu0 %v23435_v1 }
 0x88d   : > { %22557 = vmatmul.mubr.msk.f32.gmra.mrb[164].mxu0 %vm1751_vm4, %v28166_v8 }
 0x88e   : > { %22559 = vmatprep.mubr.msk.f32.mxu0 %vm1751_vm4, %v28316_v59 }
 0x891   : > { %22560 = vmatmul.mubr.msk.f32.gmra.mrb[166].mxu0 %vm1751_vm4, %v28466_v20 }
 0x892   : > { %22570 = vmatprep.mubr.msk.f32.mxu0 %vm1751_vm4, %v28026_v52  ;;  %v28496_v52 = vld [vmem:[#allocation7 + $0xa0] sm:$0xff] }
 0x895   : > { %22571 = vmatmul.mubr.msk.f32.vlgmr.msra.gmra.mrb[160].mxu0 %vm1751_vm4, %v28030_v25 }
 0x896   : > { %23438 = vmatpush3.bf16.msra.mxu0 %v23435_v1  ;;  %22573 = vmatprep.mubr.msk.f32.mxu0 %vm1751_vm4, %v28035_v7  ;;  %v15509_v1 = vld [vmem:[#allocation7 + $0xb1] sm:$0xff] }
 0x897   : > { %23440 = vmatprep.subr.bf16.mxu0 %v23439_v39 }
 0x899   : > { %22574 = vmatmul.mubr.msk.f32.gmra.mrb[162].mxu0 %vm1751_vm4, %v28039_v28 }
 0x89a   : > { %22576 = vmatprep.mubr.msk.f32.mxu0 %vm1751_vm4, %v28043_v53  ;;  %23442 = vmatpush3.bf16.msra.mxu0 %v23439_v39  ;;  %v23495_v39 = vpack.c.bf16 %v18996_v29, %v18995_v26 }
 0x89b   : > { %23444 = vmatprep.subr.bf16.mxu0 %v23443_v24 }
 0x89d   : > { %22577 = vmatmul.mubr.msk.f32.gmra.mrb[164].mxu0 %vm1751_vm4, %v28196_v34 }
 0x89e   : > { %22579 = vmatprep.mubr.msk.f32.mxu0 %vm1751_vm4, %v28346_v35 }
 0x8a1   : > { %22580 = vmatmul.mubr.msk.f32.gmra.mrb[166].mxu0 %vm1751_vm4, %v28496_v52 }
 0x8a2   : > { %22590 = vmatprep.mubr.msk.f32.mxu0 %vm1751_vm4, %v27941_v61  ;;  %v28526_v61 = vld [vmem:[#allocation7 + $0xa1] sm:$0xff] }
 0x8a5   : > { %22591 = vmatmul.mubr.msk.f32.vlgmr.msra.gmra.mrb[160].mxu0 %vm1751_vm4, %v27960_v23  ;;  %v18935_v23 = vld [vmem:[%s29332_s5 + $0x250] sm:$0xff] }
 0x8a6   : > { %23446 = vmatpush3.bf16.msra.mxu0 %v23443_v24  ;;  %22593 = vmatprep.mubr.msk.f32.mxu0 %vm1751_vm4, %v27979_v46  ;;  %v18936_v46 = vld [vmem:[%s29332_s5 + $0x258] sm:$0xff]  ;;  %v15654_v24 = vld [vmem:[#allocation7 + $0x62] sm:$0xff] }
 0x8a7   : > { %23448 = vmatprep.subr.bf16.mxu0 %v23447_v60 }
 0x8a9   : > { %22594 = vmatmul.mubr.msk.f32.gmra.mrb[162].mxu0 %vm1751_vm4, %v27992_v19  ;;  %v23455_v19 = vpack.c.bf16 %v18936_v46, %v18935_v23  ;;  %v15809_v23 = vld [vmem:[#allocation7 + $0xb3] sm:$0xff]  ;;  %v15952_v46 = vld [vmem:[#allocation7 + $0x44] sm:$0xff] }
 0x8aa   : > { %22596 = vmatprep.mubr.msk.f32.mxu0 %vm1751_vm4, %v27999_v6  ;;  %23450 = vmatpush3.bf16.msra.mxu0 %v23447_v60  ;;  %v18945_v6 = vld [vmem:[%s29332_s5 + $0x260] sm:$0xff]  ;;  %v19007_v60 = vld [vmem:[%s29332_s5 + $0x310] sm:$0xff] }
 0x8ab   : > { %23452 = vmatprep.subr.bf16.mxu0 %v23451_v15  ;;  %v23459_v37 = vpack.c.bf16 %v18946_v5, %v18945_v6  ;;  %v23503_v2 = vpack.c.bf16 %v19008_v11, %v19007_v60  ;;  %v19022_v5 = vld [vmem:[%s29334_s7 + $0x60] sm:$0xff] }
 0x8ad   : > { %22597 = vmatmul.mubr.msk.f32.gmra.mrb[164].mxu0 %vm1751_vm4, %v28226_v47 }
 0x8ae   : > { %22599 = vmatprep.mubr.msk.f32.mxu0 %vm1751_vm4, %v28376_v0 }
 0x8b1   : > { %22600 = vmatmul.mubr.msk.f32.gmra.mrb[166].mxu0 %vm1751_vm4, %v28526_v61 }
 0x8b2   : > { %22610 = vmatprep.mubr.msk.f32.mxu0 %vm1751_vm4, %v28068_v12  ;;  %v28556_v12 = vld [vmem:[#allocation7 + $0xa2] sm:$0xff] }
 0x8b5   : > { %22611 = vmatmul.mubr.msk.f32.vlgmr.msra.gmra.mrb[160].mxu0 %vm1751_vm4, %v28072_v10  ;;  %v18947_v10 = vld [vmem:[%s29332_s5 + $0x270] sm:$0xff] }
 0x8b6   : > { %23454 = vmatpush3.bf16.msra.mxu0 %v23451_v15  ;;  %22613 = vmatprep.mubr.msk.f32.mxu0 %vm1751_vm4, %v28076_v40  ;;  %v18948_v40 = vld [vmem:[%s29332_s5 + $0x278] sm:$0xff] }
 0x8b7   : > { %23456 = vmatprep.subr.bf16.mxu0 %v23455_v19  ;;  %v15803_v15 = vld [vmem:[#allocation7 + $0x53] sm:$0xff] }
 0x8b9   : > { %22614 = vmatmul.mubr.msk.f32.gmra.mrb[162].mxu0 %vm1751_vm4, %v28080_v50  ;;  %v23463_v50 = vpack.c.bf16 %v18948_v40, %v18947_v10  ;;  %v19024_v10 = vld [vmem:[%s29334_s7 + $0x70] sm:$0xff]  ;;  %v19025_v40 = vld [vmem:[%s29334_s7 + $0x78] sm:$0xff] }
 0x8ba   : > { %22616 = vmatprep.mubr.msk.f32.mxu0 %vm1751_vm4, %v28084_v18  ;;  %23458 = vmatpush3.bf16.msra.mxu0 %v23455_v19  ;;  %v18957_v18 = vld [vmem:[%s29332_s5 + $0x280] sm:$0xff]  ;;  %v29663_v19 = vmov 0.0  }
 0x8bb   : > { %23460 = vmatprep.subr.bf16.mxu0 %v23459_v37  ;;  %v23467_v63 = vpack.c.bf16 %v18958_v30, %v18957_v18  ;;  %v19017_v18 = vld [vmem:[%s29333_s6] ss:$0 sm:$0xff] }
 0x8bd   : > { %22617 = vmatmul.mubr.msk.f32.gmra.mrb[164].mxu0 %vm1751_vm4, %v28256_v31 }
 0x8be   : > { %22619 = vmatprep.mubr.msk.f32.mxu0 %vm1751_vm4, %v28406_v56 }
 0x8c1   : > { %22620 = vmatmul.mubr.msk.f32.gmra.mrb[166].mxu0 %vm1751_vm4, %v28556_v12 }
 0x8c2   : > { %22630 = vmatprep.mubr.msk.f32.mxu0 %vm1751_vm4, %v28109_v16  ;;  %v28586_v16 = vld [vmem:[#allocation7 + $0xa3] sm:$0xff] }
 0x8c5   : > { %22631 = vmatmul.mubr.msk.f32.vlgmr.msra.gmra.mrb[160].mxu0 %vm1751_vm4, %v28113_v17  ;;  %v18959_v17 = vld [vmem:[%s29332_s5 + $0x290] sm:$0xff] }
 0x8c6   : > { %23462 = vmatpush3.bf16.msra.mxu0 %v23459_v37  ;;  %22633 = vmatprep.mubr.msk.f32.mxu0 %vm1751_vm4, %v28117_v57  ;;  %v18960_v57 = vld [vmem:[%s29332_s5 + $0x298] sm:$0xff]  ;;  %v19023_v37 = vld [vmem:[%s29334_s7 + $0x68] sm:$0xff] }
 0x8c7   : > { %23464 = vmatprep.subr.bf16.mxu0 %v23463_v50 }
 0x8c9   : > { %22634 = vmatmul.mubr.msk.f32.gmra.mrb[162].mxu0 %vm1751_vm4, %v28121_v21  ;;  %v23471_v21 = vpack.c.bf16 %v18960_v57, %v18959_v17 }
 0x8ca   : > { %22636 = vmatprep.mubr.msk.f32.mxu0 %vm1751_vm4, %v28125_v44  ;;  %23466 = vmatpush3.bf16.msra.mxu0 %v23463_v50  ;;  %v18969_v44 = vld [vmem:[%s29332_s5 + $0x2a0] sm:$0xff]  ;;  %v23517_v50 = vpack.c.bf16 %v19025_v40, %v19024_v10  ;;  %v16197_v40 = vld [vmem:[%s29334_s7 + $0x28] sm:$0xff] }
 0x8cb   : > { %23468 = vmatprep.subr.bf16.mxu0 %v23467_v63  ;;  %v23475_v13 = vpack.c.bf16 %v18970_v9, %v18969_v44  ;;  %v16196_v10 = vld [vmem:[%s29334_s7 + $0x20] sm:$0xff] }
 0x8cd   : > { %22637 = vmatmul.mubr.msk.f32.gmra.mrb[164].mxu0 %vm1751_vm4, %v28286_v43 }
 0x8ce   : > { %22639 = vmatprep.mubr.msk.f32.mxu0 %vm1751_vm4, %v28436_v4 }
 0x8d1   : > { %22640 = vmatmul.mubr.msk.f32.gmra.mrb[166].mxu0 %vm1751_vm4, %v28586_v16 }
 0x8d2   : > { %22650 = vmatprep.mubr.msk.f32.mxu0 %vm1751_vm4, %v28150_v54  ;;  %v28616_v54 = vld [vmem:[#allocation7 + $0xa4] sm:$0xff] }
 0x8d5   : > { %22651 = vmatmul.mubr.msk.f32.vlgmr.msra.gmra.mrb[160].mxu0 %vm1751_vm4, %v28154_v36  ;;  %v18971_v36 = vld [vmem:[%s29332_s5 + $0x2b0] sm:$0xff] }
 0x8d6   : > { %23470 = vmatpush3.bf16.msra.mxu0 %v23467_v63  ;;  %22653 = vmatprep.mubr.msk.f32.mxu0 %vm1751_vm4, %v28158_v48  ;;  %v23479_v62 = vpack.c.bf16 %v18972_v45, %v18971_v36 }
 0x8d7   : > { %23472 = vmatprep.subr.bf16.mxu0 %v23471_v21 }
 0x8d9   : > { %22654 = vmatmul.mubr.msk.f32.gmra.mrb[162].mxu0 %vm1751_vm4, %v28162_v58 }
 0x8da   : > { %22656 = vmatprep.mubr.msk.f32.mxu0 %vm1751_vm4, %v28166_v8  ;;  %23474 = vmatpush3.bf16.msra.mxu0 %v23471_v21 }
 0x8db   : > { %23476 = vmatprep.subr.bf16.mxu0 %v23475_v13 }
 0x8dd   : > { %22657 = vmatmul.mubr.msk.f32.gmra.mrb[164].mxu0 %vm1751_vm4, %v28316_v59 }
 0x8de   : > { %22659 = vmatprep.mubr.msk.f32.mxu0 %vm1751_vm4, %v28466_v20 }
 0x8e1   : > { %22660 = vmatmul.mubr.msk.f32.gmra.mrb[166].mxu0 %vm1751_vm4, %v28616_v54 }
 0x8e2   : > { %22670 = vmatprep.mubr.msk.f32.mxu0 %vm1751_vm4, %v28030_v25  ;;  %v15359_v25 = vld [vmem:[#allocation7 + $0xb0] sm:$0xff] }
 0x8e5   : > { %22671 = vmatmul.mubr.msk.f32.vlgmr.msra.gmra.mrb[160].mxu0 %vm1751_vm4, %v28035_v7  ;;  %v18983_v7 = vld [vmem:[%s29332_s5 + $0x2d0] sm:$0xff] }
 0x8e6   : > { %23478 = vmatpush3.bf16.msra.mxu0 %v23475_v13  ;;  %22673 = vmatprep.mubr.msk.f32.mxu0 %vm1751_vm4, %v28039_v28  ;;  %v18984_v28 = vld [vmem:[%s29332_s5 + $0x2d8] sm:$0xff] }
 0x8e7   : > { %23480 = vmatprep.subr.bf16.mxu0 %v23479_v62 }
 0x8e9   : > { %22674 = vmatmul.mubr.msk.f32.gmra.mrb[162].mxu0 %vm1751_vm4, %v28043_v53  ;;  %v15502_v53 = vld [vmem:[#allocation7 + $0x41] sm:$0xff] }
 0x8ea   : > { %22676 = vmatprep.mubr.msk.f32.mxu0 %vm1751_vm4, %v28196_v34  ;;  %23482 = vmatpush3.bf16.msra.mxu0 %v23479_v62  ;;  %v23487_v34 = vpack.c.bf16 %v18984_v28, %v18983_v7 }
 0x8eb   : > { %23484 = vmatprep.subr.bf16.mxu0 %v23483_v3 }
 0x8ed   : > { %22677 = vmatmul.mubr.msk.f32.gmra.mrb[164].mxu0 %vm1751_vm4, %v28346_v35  ;;  %v18993_v35 = vld [vmem:[%s29332_s5 + $0x2e0] sm:$0xff] }
 0x8ee   : > { %22679 = vmatprep.mubr.msk.f32.mxu0 %vm1751_vm4, %v28496_v52  ;;  %v23491_v38 = vpack.c.bf16 %v18994_v51, %v18993_v35 }
 0x8f1   : > { %22680 = vmatmul.mubr.msk.f32.gmra.mrb[166].mxu0 %vm1751_vm4, %v15359_v25 }
 0x8f2   : > { %22690 = vmatprep.mubr.msk.f32.mxu0 %vm1751_vm4, %v15502_v53 }
 0x8f5   : > { %22691 = vmatmul.mubr.msk.f32.vlgmr.msra.gmra.mrb[160].mxu0 %vm1751_vm4, %v15503_v42 }
 0x8f6   : > { %23486 = vmatpush3.bf16.msra.mxu0 %v23483_v3  ;;  %22693 = vmatprep.mubr.msk.f32.mxu0 %vm1751_vm4, %v15504_v49 }
 0x8f7   : > { %23488 = vmatprep.subr.bf16.mxu0 %v23487_v34 }
 0x8f9   : > { %22694 = vmatmul.mubr.msk.f32.gmra.mrb[162].mxu0 %vm1751_vm4, %v15505_v33 }
 0x8fa   : > { %22696 = vmatprep.mubr.msk.f32.mxu0 %vm1751_vm4, %v28226_v47  ;;  %23490 = vmatpush3.bf16.msra.mxu0 %v23487_v34  ;;  %v15652_v47 = vld [vmem:[#allocation7 + $0x42] sm:$0xff] }
 0x8fb   : > { %23492 = vmatprep.subr.bf16.mxu0 %v23491_v38 }
 0x8fd   : > { %22697 = vmatmul.mubr.msk.f32.gmra.mrb[164].mxu0 %vm1751_vm4, %v28376_v0  ;;  %v19005_v0 = vld [vmem:[%s29332_s5 + $0x300] sm:$0xff] }
 0x8fe   : > { %22699 = vmatprep.mubr.msk.f32.mxu0 %vm1751_vm4, %v28526_v61  ;;  %v23499_v52 = vpack.c.bf16 %v19006_v22, %v19005_v0  ;;  %v15805_v61 = vld [vmem:[#allocation7 + $0x73] sm:$0xff] }
 0x901   : > { %22700 = vmatmul.mubr.msk.f32.gmra.mrb[166].mxu0 %vm1751_vm4, %v15509_v1 }
 0x902   : > { %22710 = vmatprep.mubr.msk.f32.mxu0 %vm1751_vm4, %v15652_v47 }
 0x905   : > { %22711 = vmatmul.mubr.msk.f32.vlgmr.msra.gmra.mrb[160].mxu0 %vm1751_vm4, %v15653_v14 }
 0x906   : > { %23494 = vmatpush3.bf16.msra.mxu0 %v23491_v38  ;;  %22713 = vmatprep.mubr.msk.f32.mxu0 %vm1751_vm4, %v15654_v24 }
 0x907   : > { %23496 = vmatprep.subr.bf16.mxu0 %v23495_v39 }
 0x909   : > { %22714 = vmatmul.mubr.msk.f32.gmra.mrb[162].mxu0 %vm1751_vm4, %v15655_v32 }
 0x90a   : > { %22716 = vmatprep.mubr.msk.f32.mxu0 %vm1751_vm4, %v28256_v31  ;;  %23498 = vmatpush3.bf16.msra.mxu0 %v23495_v39  ;;  %v15802_v31 = vld [vmem:[#allocation7 + $0x43] sm:$0xff] }
 0x90b   : > { %23500 = vmatprep.subr.bf16.mxu0 %v23499_v52 }
 0x90d   : > { %22717 = vmatmul.mubr.msk.f32.gmra.mrb[164].mxu0 %vm1751_vm4, %v28406_v56  ;;  %v15804_v56 = vld [vmem:[#allocation7 + $0x63] sm:$0xff] }
 0x90e   : > { %22719 = vmatprep.mubr.msk.f32.mxu0 %vm1751_vm4, %v28556_v12  ;;  %v23514_v12 = vpack.c.bf16 %v19023_v37, %v19022_v5 }
 0x911   : > { %22720 = vmatmul.mubr.msk.f32.gmra.mrb[166].mxu0 %vm1751_vm4, %v15659_v55 }
 0x912   : > { %22730 = vmatprep.mubr.msk.f32.mxu0 %vm1751_vm4, %v15802_v31 }
 0x915   : > { %22731 = vmatmul.mubr.msk.f32.vlgmr.msra.gmra.mrb[160].mxu0 %vm1751_vm4, %v15803_v15 }
 0x916   : > { %23502 = vmatpush3.bf16.msra.mxu0 %v23499_v52  ;;  %22733 = vmatprep.mubr.msk.f32.mxu0 %vm1751_vm4, %v15804_v56 }
 0x917   : > { %23504 = vmatprep.subr.bf16.mxu0 %v23503_v2 }
 0x919   : > { %22734 = vmatmul.mubr.msk.f32.gmra.mrb[162].mxu0 %vm1751_vm4, %v15805_v61  ;;  %v16192_v61 = vld [vmem:[%s29334_s7] sm:$0xff] }
 0x91a   : > { %22736 = vmatprep.mubr.msk.f32.mxu0 %vm1751_vm4, %v28286_v43  ;;  %23506 = vmatpush3.bf16.msra.mxu0 %v23503_v2  ;;  %v15959_v43 = vld [vmem:[#allocation7 + $0xb4] sm:$0xff] }
 0x91d   : > { %22737 = vmatmul.mubr.msk.f32.gmra.mrb[164].mxu0 %vm1751_vm4, %v28436_v4 }
 0x91e   : > { %22739 = vmatprep.mubr.msk.f32.mxu0 %vm1751_vm4, %v28586_v16 }
 0x921   : > { %22740 = vmatmul.mubr.msk.f32.gmra.mrb[166].mxu0 %vm1751_vm4, %v15809_v23  ;;  %v16193_v23 = vld [vmem:[%s29334_s7 + $0x8] sm:$0xff] }
 0x922   : > { %22750 = vmatprep.mubr.msk.f32.mxu0 %vm1751_vm4, %v15952_v46 }
 0x925   : > { %22751 = vmatmul.mubr.msk.f32.vlgmr.msra.gmra.mrb[160].mxu0 %vm1751_vm4, %v28158_v48  ;;  %v19018_v48 = vld [vmem:[%s29334_s7 + $0x40] sm:$0xff] }
 0x926   : > { %22753 = vmatprep.mubr.msk.f32.mxu0 %vm1751_vm4, %v28162_v58  ;;  %v19019_v58 = vld [vmem:[%s29334_s7 + $0x48] sm:$0xff] }
 0x927   : > { %v23508_v4 = vpack.c.bf16 %v19019_v58, %v19018_v48  ;;  %v23520_v48 = vpack.c.bf16 %v16193_v23, %v16192_v61  ;;  %v19057_v61 = vld [vmem:[%s29334_s7 + $0x150] sm:$0xff]  ;;  %v19058_v23 = vld [vmem:[%s29334_s7 + $0x158] sm:$0xff] }
 0x929   : > { %22754 = vmatmul.mubr.msk.f32.gmra.mrb[162].mxu0 %vm1751_vm4, %v28166_v8  ;;  %v19020_v8 = vld [vmem:[%s29334_s7 + $0x50] sm:$0xff] }
 0x92a   : > { %22756 = vmatprep.mubr.msk.f32.mxu0 %vm1751_vm4, %v28316_v59  ;;  %v24788_v59 = vmov 0.0|0.0  }
 0x92b   : > { %23507 = vmatprep.subr.bf16.mxu0 %v24788_v59 }
 0x92c   : > { %23509 = vmatpush3.bf16.msra.mxu0 %v23508_v4  ;;  %v16195_v4 = vld [vmem:[%s29334_s7 + $0x18] sm:$0xff] }
 0x92d   : > { %22757 = vmatmul.mubr.msk.f32.gmra.mrb[164].mxu0 %vm1751_vm4, %v28466_v20  ;;  %v19021_v20 = vld [vmem:[%s29334_s7 + $0x58] sm:$0xff]  ;;  %23510 = vmatprep.subr.bf16.mxu0 %v24788_v59 }
 0x92e   : > { %22759 = vmatprep.mubr.msk.f32.mxu0 %vm1751_vm4, %v28616_v54  ;;  %v23511_v6 = vpack.c.bf16 %v19021_v20, %v19020_v8  ;;  %v16194_v8 = vld [vmem:[%s29334_s7 + $0x10] sm:$0xff] }
 0x92f   : > { %v23523_v5 = vpack.c.bf16 %v16195_v4, %v16194_v8  ;;  %v19061_v4 = vld [vmem:[%s29334_s7 + $0x170] sm:$0xff] }
 0x930   : > { %23512 = vmatpush3.bf16.msra.mxu0 %v23511_v6 }
 0x931   : > { %22760 = vmatmul.mubr.msk.f32.gmra.mrb[166].mxu0 %vm1751_vm4, %v15959_v43  ;;  %23513 = vmatprep.subr.bf16.mxu0 %v24788_v59 }
 0x932   : > { %22778 = vmatprep.mubr.msk.f32.mxu0 %vm24789_vm6, %v29663_v19 }
 0x934   : > { %23515 = vmatpush3.bf16.msra.mxu0 %v23514_v12 }
 0x935   : > { %23516 = vmatprep.subr.bf16.mxu0 %v24788_v59 }
 0x938   : > { %23518 = vmatpush3.bf16.msra.mxu0 %v23517_v50 }
 0x939   : > { %23519 = vmatprep.subr.bf16.mxu0 %v24788_v59 }
 0x9f8   : > { %v22752_v30 = vpop.f32.mrb[160].mxu0 }
 0x9f9   : > { %v16110_v63 = vadd.f32 %v22752_v30, %v19017_v18  ;;  %v16055_v16 = vpop.f32.mrb[161].mxu0  ;;  %v16198_v30 = vld [vmem:[%s29334_s7 + $0x30] sm:$0xff] }
 0x9fa   : > { %v16109_v17 = vadd.f32 %v19017_v18, %v16055_v16 }
 0x9fb   : > { %16119 = vst.msk [vmem:[#allocation8 + $0x8] sm:$0xff] %vm16117_vm7, %v16110_v63  ;;  %v16199_v63 = vld [vmem:[%s29334_s7 + $0x38] sm:$0xff] }
 0x9fc   : > { %16118 = vst.msk [vmem:[#allocation8] sm:$0xff] %vm16117_vm7, %v16109_v17  ;;  %v22755_v57 = vpop.f32.mrb[162].mxu0  ;;  %v23529_v16 = vpack.c.bf16 %v16199_v63, %v16198_v30  ;;  %v19028_v17 = vld [vmem:[%s29334_s7 + $0x80] sm:$0xff]  ;;  %v19069_v63 = vld [vmem:[%s29334_s7 + $0x1a8] sm:$0xff] }
 0x9fd   : > { %v16112_v21 = vadd.f32 %v22755_v57, %v19017_v18  ;;  %v16065_v44 = vpop.f32.mrb[163].mxu0  ;;  %v19029_v57 = vld [vmem:[%s29334_s7 + $0x88] sm:$0xff]  ;;  %v19068_v30 = vld [vmem:[%s29334_s7 + $0x1a0] sm:$0xff] }
 0x9fe   : > { %v16111_v9 = vadd.f32 %v19017_v18, %v16065_v44  ;;  %v19030_v44 = vld [vmem:[%s29334_s7 + $0x90] sm:$0xff] }
 0x9ff   : > { %16121 = vst.msk [vmem:[#allocation8 + $0x18] sm:$0xff] %vm16117_vm7, %v16112_v21  ;;  %v23532_v21 = vpack.c.bf16 %v19029_v57, %v19028_v17  ;;  %v19070_v17 = vld [vmem:[%s29334_s7 + $0x1b0] sm:$0xff]  ;;  %v19071_v57 = vld [vmem:[%s29334_s7 + $0x1b8] sm:$0xff] }
 0xa00   : > { %16120 = vst.msk [vmem:[#allocation8 + $0x10] sm:$0xff] %vm16117_vm7, %v16111_v9  ;;  %v22758_v13 = vpop.f32.mrb[164].mxu0  ;;  %v19031_v9 = vld [vmem:[%s29334_s7 + $0x98] sm:$0xff] }
 0xa01   : > { %v16114_v54 = vadd.f32 %v22758_v13, %v19017_v18  ;;  %v16075_v36 = vpop.f32.mrb[165].mxu0 }
 0xa02   : > { %v16128_v45 = vld [vmem:[#allocation8 + $0x8] ss:$2 sm:$0xf]  ;;  %v16144_v62 = vld [vmem:[#allocation8 + $0x9] ss:$2 sm:$0xf]  ;;  %v16113_v27 = vadd.f32 %v19017_v18, %v16075_v36 }
 0xa03   : > { %v16158_v41 = vmax.f32 %v16128_v45, %v16144_v62  ;;  %v16126_v3 = vld [vmem:[#allocation8] ss:$2 sm:$0xf]  ;;  %v16142_v25 = vld [vmem:[#allocation8 + $0x1] ss:$2 sm:$0xf] }
 0xa04   : > { %16123 = vst.msk [vmem:[#allocation8 + $0x28] sm:$0xff] %vm16117_vm7, %v16114_v54  ;;  %v16157_v7 = vmax.f32 %v16126_v3, %v16142_v25  ;;  %16122 = vst.msk [vmem:[#allocation8 + $0x20] sm:$0xff] %vm16117_vm7, %v16113_v27  ;;  %v22761_v28 = vpop.f32.mrb[166].mxu0  ;;  %v23535_v54 = vpack.c.bf16 %v19031_v9, %v19030_v44  ;;  %v19032_v36 = vld [vmem:[%s29334_s7 + $0xa0] sm:$0xff]  ;;  %v19033_v45 = vld [vmem:[%s29334_s7 + $0xa8] sm:$0xff] }
 0xa05   : > { %16167 = vst.msk [vmem:[#allocation9 + $0x4] sm:$0xf] %vm16165_vm8, %v16158_v41  ;;  %v16116_v53 = vadd.f32 %v22761_v28, %v19017_v18  ;;  %v16085_v34 = vpop.f32.mrb[167].mxu0  ;;  %v23538_v62 = vpack.c.bf16 %v19033_v45, %v19032_v36  ;;  %v19034_v27 = vld [vmem:[%s29334_s7 + $0xb0] sm:$0xff]  ;;  %v19035_v41 = vld [vmem:[%s29334_s7 + $0xb8] sm:$0xff]  ;;  %v19037_v25 = vld [vmem:[%s29334_s7 + $0xc0] sm:$0xff] }
 0xa06   : > { %16166 = vst.msk [vmem:[#allocation9] sm:$0xf] %vm16165_vm8, %v16157_v7  ;;  %v16132_v42 = vld [vmem:[#allocation8 + $0x18] ss:$2 sm:$0xf]  ;;  %v16115_v51 = vadd.f32 %v19017_v18, %v16085_v34  ;;  %v23526_v18 = vpack.c.bf16 %v16197_v40, %v16196_v10  ;;  %v23541_v3 = vpack.c.bf16 %v19035_v41, %v19034_v27  ;;  %v19038_v7 = vld [vmem:[%s29334_s7 + $0xc8] sm:$0xff] }
 0xa07   : > { %v16148_v35 = vld [vmem:[#allocation8 + $0x19] ss:$2 sm:$0xf]  ;;  %v16130_v38 = vld [vmem:[#allocation8 + $0x10] ss:$2 sm:$0xf]  ;;  %v23544_v28 = vpack.c.bf16 %v19038_v7, %v19037_v25 }
 0xa08   : > { %v16160_v49 = vmax.f32 %v16132_v42, %v16148_v35  ;;  %v16146_v33 = vld [vmem:[#allocation8 + $0x11] ss:$2 sm:$0xf]  ;;  %16125 = vst.msk [vmem:[#allocation8 + $0x38] sm:$0xff] %vm16117_vm7, %v16116_v53  ;;  %16124 = vst.msk [vmem:[#allocation8 + $0x30] sm:$0xff] %vm16117_vm7, %v16115_v51  ;;  %v19040_v34 = vld [vmem:[%s29334_s7 + $0xd8] sm:$0xff] }
 0xa09   : > { %v16159_v1 = vmax.f32 %v16130_v38, %v16146_v33  ;;  %v19039_v53 = vld [vmem:[%s29334_s7 + $0xd0] sm:$0xff]  ;;  %v19041_v51 = vld [vmem:[%s29334_s7 + $0xe0] sm:$0xff]  ;;  %v19067_v40 = vld [vmem:[%s29334_s7 + $0x198] sm:$0xff] }
 0xa0a   : > { %16169 = vst.msk [vmem:[#allocation9 + $0xc] sm:$0xf] %vm16165_vm8, %v16160_v49  ;;  %v23547_v35 = vpack.c.bf16 %v19040_v34, %v19039_v53  ;;  %v19042_v49 = vld [vmem:[%s29334_s7 + $0xe8] sm:$0xff]  ;;  %v19043_v33 = vld [vmem:[%s29334_s7 + $0xf0] sm:$0xff]  ;;  %v19073_v44 = vld [vmem:[%s29334_s7 + $0x1c0] sm:$0xff] }
 0xa0b   : > { %16168 = vst.msk [vmem:[#allocation9 + $0x8] sm:$0xf] %vm16165_vm8, %v16159_v1  ;;  %v16136_v26 = vld [vmem:[#allocation8 + $0x28] ss:$2 sm:$0xf]  ;;  %v23550_v38 = vpack.c.bf16 %v19042_v49, %v19041_v51  ;;  %v19044_v1 = vld [vmem:[%s29334_s7 + $0xf8] sm:$0xff] }
 0xa0c   : > { %v16152_v29 = vld [vmem:[#allocation8 + $0x29] ss:$2 sm:$0xf]  ;;  %v16134_v39 = vld [vmem:[#allocation8 + $0x20] ss:$2 sm:$0xf] }
 0xa0d   : > { %v16162_v47 = vmax.f32 %v16136_v26, %v16152_v29  ;;  %v16150_v14 = vld [vmem:[#allocation8 + $0x21] ss:$2 sm:$0xf]  ;;  %v23553_v26 = vpack.c.bf16 %v19044_v1, %v19043_v33  ;;  %v19066_v10 = vld [vmem:[%s29334_s7 + $0x190] sm:$0xff]  ;;  %v19074_v9 = vld [vmem:[%s29334_s7 + $0x1c8] sm:$0xff] }
 0xa0e   : > { %v16161_v0 = vmax.f32 %v16134_v39, %v16150_v14  ;;  %v16179_v22 = vld [vmem:[#allocation9 + $0x4] sm:$0xf]  ;;  %v16174_v24 = vld [vmem:[#allocation9] sm:$0xf]  ;;  %v19048_v14 = vld [vmem:[%s29334_s7 + $0x110] sm:$0xff] }
 0xa0f   : > { %16171 = vst.msk [vmem:[#allocation9 + $0x14] sm:$0xf] %vm16165_vm8, %v16162_v47  ;;  %v16140_v52 = vld [vmem:[#allocation8 + $0x38] ss:$2 sm:$0xf]  ;;  %v16183_v55 = vmax.f32 %v16174_v24, %v16179_v22  ;;  %v19046_v29 = vld [vmem:[%s29334_s7 + $0x100] sm:$0xff] }
 0xa10   : > { %16170 = vst.msk [vmem:[#allocation9 + $0x10] sm:$0xf] %vm16165_vm8, %v16161_v0  ;;  %v16156_v32 = vld [vmem:[#allocation8 + $0x39] ss:$2 sm:$0xf]  ;;  %v19047_v47 = vld [vmem:[%s29334_s7 + $0x108] sm:$0xff] }
 0xa11   : > { %v16164_v60 = vmax.f32 %v16140_v52, %v16156_v32  ;;  %v16138_v11 = vld [vmem:[#allocation8 + $0x30] ss:$2 sm:$0xf]  ;;  %v16154_v31 = vld [vmem:[#allocation8 + $0x31] ss:$2 sm:$0xf]  ;;  %v23556_v39 = vpack.c.bf16 %v19047_v47, %v19046_v29 }
 0xa12   : > { %v16163_v2 = vmax.f32 %v16138_v11, %v16154_v31  ;;  %16187 = vst.msk [vmem:[#allocation10] sm:$0xf] %vm16165_vm8, %v16183_v55  ;;  %v16180_v15 = vld [vmem:[#allocation9 + $0xc] sm:$0xf]  ;;  %v16175_v56 = vld [vmem:[#allocation9 + $0x8] sm:$0xf] }
 0xa13   : > { %16173 = vst.msk [vmem:[#allocation9 + $0x1c] sm:$0xf] %vm16165_vm8, %v16164_v60  ;;  %v16184_v46 = vmax.f32 %v16175_v56, %v16180_v15  ;;  %v19049_v0 = vld [vmem:[%s29334_s7 + $0x118] sm:$0xff]  ;;  %v19050_v52 = vld [vmem:[%s29334_s7 + $0x120] sm:$0xff]  ;;  %v19051_v32 = vld [vmem:[%s29334_s7 + $0x128] sm:$0xff] }
 0xa14   : > { %16172 = vst.msk [vmem:[#allocation9 + $0x18] sm:$0xf] %vm16165_vm8, %v16163_v2  ;;  %v23559_v24 = vpack.c.bf16 %v19049_v0, %v19048_v14  ;;  %v23562_v55 = vpack.c.bf16 %v19051_v32, %v19050_v52  ;;  %v19052_v60 = vld [vmem:[%s29334_s7 + $0x130] sm:$0xff]  ;;  %v19053_v11 = vld [vmem:[%s29334_s7 + $0x138] sm:$0xff]  ;;  %v19055_v2 = vld [vmem:[%s29334_s7 + $0x140] sm:$0xff] }
 0xa15   : > { %16188 = vst.msk [vmem:[#allocation10 + $0x4] sm:$0xf] %vm16165_vm8, %v16184_v46  ;;  %v23565_v31 = vpack.c.bf16 %v19053_v11, %v19052_v60  ;;  %v19056_v15 = vld [vmem:[%s29334_s7 + $0x148] sm:$0xff]  ;;  %v19076_v36 = vld [vmem:[%s29334_s7 + $0x1d8] sm:$0xff]  ;;  %v19077_v27 = vld [vmem:[%s29334_s7 + $0x1e0] sm:$0xff] }
 0xa16   : > { %v16181_v43 = vld [vmem:[#allocation9 + $0x14] sm:$0xf]  ;;  %v23568_v56 = vpack.c.bf16 %v19056_v15, %v19055_v2  ;;  %v19078_v41 = vld [vmem:[%s29334_s7 + $0x1e8] sm:$0xff]  ;;  %v19080_v7 = vld [vmem:[%s29334_s7 + $0x1f8] sm:$0xff] }
 0xa17   : > { %v16176_v58 = vld [vmem:[#allocation9 + $0x10] sm:$0xf]  ;;  %v19082_v53 = vld [vmem:[%s29334_s7 + $0x200] sm:$0xff]  ;;  %v19083_v34 = vld [vmem:[%s29334_s7 + $0x208] sm:$0xff] }
 0xa18   : > { %v16185_v20 = vmax.f32 %v16176_v58, %v16181_v43  ;;  %v23571_v43 = vpack.c.bf16 %v19058_v23, %v19057_v61  ;;  %v19060_v58 = vld [vmem:[%s29334_s7 + $0x168] sm:$0xff]  ;;  %v19079_v25 = vld [vmem:[%s29334_s7 + $0x1f0] sm:$0xff]  ;;  %v19085_v51 = vld [vmem:[%s29334_s7 + $0x218] sm:$0xff] }
 0xa19   : > { %v16200_v6 = vld [vmem:[#allocation10 + $0x1] sm:$0x1]  ;;  %v16191_v13 = vld [vmem:[#allocation10] sm:$0x1]  ;;  %v16356_v42 = vld [vmem:[#allocation10 + $0x2] sm:$0x1] }
 0xa1a   : > { %22779 = vmatmul.mubr.msk.f32.vlgmr.msra.gmra.mrb[168].mxu0 %vm16117_vm7, %v16200_v6  ;;  %16189 = vst.msk [vmem:[#allocation10 + $0x8] sm:$0xf] %vm16165_vm8, %v16185_v20  ;;  %v16182_v12 = vld [vmem:[#allocation9 + $0x1c] sm:$0xf]  ;;  %v16440_v22 = vld [vmem:[#allocation10 + $0x3] sm:$0x1] }
 0xa1b   : > { %23521 = vmatpush3.bf16.msra.mxu0 %v23520_v48  ;;  %22797 = vmatprep.mubr.msk.f32.mxu0 %vm24789_vm6, %v29663_v19  ;;  %v16177_v37 = vld [vmem:[#allocation9 + $0x18] sm:$0xf]  ;;  %v19059_v48 = vld [vmem:[%s29334_s7 + $0x160] sm:$0xff]  ;;  %v19087_v1 = vld [vmem:[%s29334_s7 + $0x228] sm:$0xff] }
 0xa1c   : > { %23522 = vmatprep.subr.bf16.mxu0 %v24788_v59  ;;  %v16186_v50 = vmax.f32 %v16177_v37, %v16182_v12  ;;  %v16525_v46 = vld [vmem:[#allocation10 + $0x4] sm:$0x1]  ;;  %v23574_v8 = vpack.c.bf16 %v19060_v58, %v19059_v48  ;;  %v19062_v20 = vld [vmem:[%s29334_s7 + $0x178] sm:$0xff]  ;;  %v19065_v37 = vld [vmem:[%s29334_s7 + $0x188] sm:$0xff] }
 0xa1d   : > { %v23577_v6 = vpack.c.bf16 %v19062_v20, %v19061_v4  ;;  %v16693_v45 = vld [vmem:[#allocation10 + $0x6] sm:$0x1]  ;;  %v16777_v49 = vld [vmem:[#allocation10 + $0x7] sm:$0x1]  ;;  %v19088_v29 = vld [vmem:[%s29334_s7 + $0x230] sm:$0xff] }
 0xa1e   : > { %16190 = vst.msk [vmem:[#allocation10 + $0xc] sm:$0xf] %vm16165_vm8, %v16186_v50  ;;  %v16609_v50 = vld [vmem:[#allocation10 + $0x5] sm:$0x1]  ;;  %v19089_v47 = vld [vmem:[%s29334_s7 + $0x238] sm:$0xff]  ;;  %v19092_v0 = vld [vmem:[%s29334_s7 + $0x248] sm:$0xff] }
 0xa1f   : > { %23524 = vmatpush3.bf16.msra.mxu0 %v23523_v5  ;;  %v19064_v5 = vld [vmem:[%s29334_s7 + $0x180] sm:$0xff]  ;;  %v19094_v52 = vld [vmem:[%s29334_s7 + $0x258] sm:$0xff]  ;;  %v19096_v11 = vld [vmem:[%s29334_s7 + $0x268] sm:$0xff] }
 0xa20   : > { %23525 = vmatprep.subr.bf16.mxu0 %v24788_v59  ;;  %v23580_v12 = vpack.c.bf16 %v19065_v37, %v19064_v5  ;;  %v19086_v33 = vld [vmem:[%s29334_s7 + $0x220] sm:$0xff]  ;;  %v19097_v2 = vld [vmem:[%s29334_s7 + $0x270] sm:$0xff]  ;;  %v19098_v15 = vld [vmem:[%s29334_s7 + $0x278] sm:$0xff] }
 0xa21   : > { %v19091_v14 = vld [vmem:[%s29334_s7 + $0x240] sm:$0xff]  ;;  %v16862_v32 = vld [vmem:[#allocation10 + $0x8] sm:$0x1]  ;;  %v19103_v48 = vld [vmem:[%s29334_s7 + $0x298] sm:$0xff] }
 0xa22   : > { %v19095_v60 = vld [vmem:[%s29334_s7 + $0x260] sm:$0xff]  ;;  %v19101_v23 = vld [vmem:[%s29334_s7 + $0x288] sm:$0xff]  ;;  %v19106_v5 = vld [vmem:[%s29334_s7 + $0x2b0] sm:$0xff] }
 0xa23   : > { %23527 = vmatpush3.bf16.msra.mxu0 %v23526_v18  ;;  %v23583_v18 = vpack.c.bf16 %v19067_v40, %v19066_v10  ;;  %v19100_v61 = vld [vmem:[%s29334_s7 + $0x280] sm:$0xff]  ;;  %v16946_v58 = vld [vmem:[#allocation10 + $0x9] sm:$0x1]  ;;  %v19107_v37 = vld [vmem:[%s29334_s7 + $0x2b8] sm:$0xff] }
 0xa24   : > { %23528 = vmatprep.subr.bf16.mxu0 %v24788_v59  ;;  %v19104_v4 = vld [vmem:[%s29334_s7 + $0x2a0] sm:$0xff]  ;;  %v19105_v20 = vld [vmem:[%s29334_s7 + $0x2a8] sm:$0xff] }
 0xa25   : > { %v19109_v10 = vld [vmem:[%s29334_s7 + $0x2c0] sm:$0xff]  ;;  %v19110_v40 = vld [vmem:[%s29334_s7 + $0x2c8] sm:$0xff] }
 0xa27   : > { %23530 = vmatpush3.bf16.msra.mxu0 %v23529_v16  ;;  %v23586_v16 = vpack.c.bf16 %v19069_v63, %v19068_v30  ;;  %v19112_v30 = vld [vmem:[%s29334_s7 + $0x2d8] sm:$0xff]  ;;  %v17030_v63 = vld [vmem:[#allocation10 + $0xa] sm:$0x1] }
 0xa28   : > { %23531 = vmatprep.subr.bf16.mxu0 %v24788_v59 }
 0xa2a   : > { %22798 = vmatmul.mubr.msk.f32.vlgmr.msra.gmra.mrb[170].mxu0 %vm16117_vm7, %v16191_v13  ;;  %v23592_v13 = vpack.c.bf16 %v19074_v9, %v19073_v44  ;;  %v19115_v44 = vld [vmem:[%s29334_s7 + $0x2f0] sm:$0xff]  ;;  %v19116_v9 = vld [vmem:[%s29334_s7 + $0x2f8] sm:$0xff] }
 0xa2b   : > { %23533 = vmatpush3.bf16.msra.mxu0 %v23532_v21  ;;  %22816 = vmatprep.mubr.msk.f32.mxu0 %vm24789_vm6, %v29663_v19  ;;  %v23589_v21 = vpack.c.bf16 %v19071_v57, %v19070_v17  ;;  %v19113_v17 = vld [vmem:[%s29334_s7 + $0x2e0] sm:$0xff]  ;;  %v19114_v57 = vld [vmem:[%s29334_s7 + $0x2e8] sm:$0xff] }
 0xa2c   : > { %23534 = vmatprep.subr.bf16.mxu0 %v24788_v59 }
 0xa2f   : > { %23536 = vmatpush3.bf16.msra.mxu0 %v23535_v54  ;;  %v19075_v54 = vld [vmem:[%s29334_s7 + $0x1d0] sm:$0xff] }
 0xa30   : > { %23537 = vmatprep.subr.bf16.mxu0 %v24788_v59 }
 0xa33   : > { %23539 = vmatpush3.bf16.msra.mxu0 %v23538_v62  ;;  %v23595_v62 = vpack.c.bf16 %v19076_v36, %v19075_v54  ;;  %v19118_v54 = vld [vmem:[%s29334_s7 + $0x300] sm:$0xff]  ;;  %v19119_v36 = vld [vmem:[%s29334_s7 + $0x308] sm:$0xff] }
 0xa34   : > { %23540 = vmatprep.subr.bf16.mxu0 %v24788_v59 }
 0xa37   : > { %23542 = vmatpush3.bf16.msra.mxu0 %v23541_v3  ;;  %v23598_v3 = vpack.c.bf16 %v19078_v41, %v19077_v27  ;;  %v19121_v27 = vld [vmem:[%s29334_s7 + $0x318] sm:$0xff]  ;;  %v17114_v41 = vld [vmem:[#allocation10 + $0xb] sm:$0x1] }
 0xa38   : > { %23543 = vmatprep.subr.bf16.mxu0 %v24788_v59 }
 0xa3a   : > { %22817 = vmatmul.mubr.msk.f32.vlgmr.msra.gmra.mrb[172].mxu0 %vm16117_vm7, %v16356_v42  ;;  %v23604_v42 = vpack.c.bf16 %v19083_v34, %v19082_v53  ;;  %v19124_v53 = vld [vmem:[%s29334_s7 + $0x330] sm:$0xff]  ;;  %v19125_v34 = vld [vmem:[%s29334_s7 + $0x338] sm:$0xff] }
 0xa3b   : > { %23545 = vmatpush3.bf16.msra.mxu0 %v23544_v28  ;;  %22835 = vmatprep.mubr.msk.f32.mxu0 %vm24789_vm6, %v29663_v19  ;;  %v23601_v28 = vpack.c.bf16 %v19080_v7, %v19079_v25  ;;  %v19122_v25 = vld [vmem:[%s29334_s7 + $0x320] sm:$0xff]  ;;  %v19123_v7 = vld [vmem:[%s29334_s7 + $0x328] sm:$0xff] }
 0xa3c   : > { %23546 = vmatprep.subr.bf16.mxu0 %v24788_v59 }
 0xa3f   : > { %23548 = vmatpush3.bf16.msra.mxu0 %v23547_v35  ;;  %v19084_v35 = vld [vmem:[%s29334_s7 + $0x210] sm:$0xff] }
 0xa40   : > { %23549 = vmatprep.subr.bf16.mxu0 %v24788_v59 }
 0xa43   : > { %23551 = vmatpush3.bf16.msra.mxu0 %v23550_v38  ;;  %v23607_v38 = vpack.c.bf16 %v19085_v51, %v19084_v35  ;;  %v19127_v35 = vld [vmem:[%s29334_s7 + $0x340] sm:$0xff]  ;;  %v19128_v51 = vld [vmem:[%s29334_s7 + $0x348] sm:$0xff] }
 0xa44   : > { %23552 = vmatprep.subr.bf16.mxu0 %v24788_v59 }
 0xa47   : > { %23554 = vmatpush3.bf16.msra.mxu0 %v23553_v26  ;;  %v23610_v26 = vpack.c.bf16 %v19087_v1, %v19086_v33  ;;  %v19130_v33 = vld [vmem:[%s29334_s7 + $0x358] sm:$0xff]  ;;  %v17199_v1 = vld [vmem:[#allocation10 + $0xc] sm:$0x1] }
 0xa48   : > { %23555 = vmatprep.subr.bf16.mxu0 %v24788_v59 }
 0xa4a   : > { %22836 = vmatmul.mubr.msk.f32.vlgmr.msra.gmra.mrb[174].mxu0 %vm16117_vm7, %v16440_v22  ;;  %v23616_v22 = vpack.c.bf16 %v19092_v0, %v19091_v14  ;;  %v19133_v14 = vld [vmem:[%s29334_s7 + $0x370] sm:$0xff]  ;;  %v19134_v0 = vld [vmem:[%s29334_s7 + $0x378] sm:$0xff] }
 0xa4b   : > { %23557 = vmatpush3.bf16.msra.mxu0 %v23556_v39  ;;  %22854 = vmatprep.mubr.msk.f32.mxu0 %vm24789_vm6, %v29663_v19  ;;  %v23613_v39 = vpack.c.bf16 %v19089_v47, %v19088_v29  ;;  %v19131_v29 = vld [vmem:[%s29334_s7 + $0x360] sm:$0xff]  ;;  %v19132_v47 = vld [vmem:[%s29334_s7 + $0x368] sm:$0xff] }
 0xa4c   : > { %23558 = vmatprep.subr.bf16.mxu0 %v24788_v59 }
 0xa4f   : > { %23560 = vmatpush3.bf16.msra.mxu0 %v23559_v24  ;;  %v19093_v24 = vld [vmem:[%s29334_s7 + $0x250] sm:$0xff] }
 0xa50   : > { %23561 = vmatprep.subr.bf16.mxu0 %v24788_v59 }
 0xa53   : > { %23563 = vmatpush3.bf16.msra.mxu0 %v23562_v55  ;;  %v23619_v55 = vpack.c.bf16 %v19094_v52, %v19093_v24  ;;  %v19136_v24 = vld [vmem:[%s29334_s7 + $0x380] sm:$0xff]  ;;  %v19137_v52 = vld [vmem:[%s29334_s7 + $0x388] sm:$0xff] }
 0xa54   : > { %23564 = vmatprep.subr.bf16.mxu0 %v24788_v59 }
 0xa57   : > { %23566 = vmatpush3.bf16.msra.mxu0 %v23565_v31  ;;  %v23622_v31 = vpack.c.bf16 %v19096_v11, %v19095_v60  ;;  %v19139_v60 = vld [vmem:[%s29334_s7 + $0x398] sm:$0xff]  ;;  %v17283_v11 = vld [vmem:[#allocation10 + $0xd] sm:$0x1] }
 0xa58   : > { %23567 = vmatprep.subr.bf16.mxu0 %v24788_v59 }
 0xa5a   : > { %22855 = vmatmul.mubr.msk.f32.vlgmr.msra.gmra.mrb[176].mxu0 %vm16117_vm7, %v16525_v46  ;;  %v23628_v46 = vpack.c.bf16 %v19101_v23, %v19100_v61 }
 0xa5b   : > { %23569 = vmatpush3.bf16.msra.mxu0 %v23568_v56  ;;  %22873 = vmatprep.mubr.msk.f32.mxu0 %vm24789_vm6, %v29663_v19  ;;  %v23625_v56 = vpack.c.bf16 %v19098_v15, %v19097_v2  ;;  %v19140_v2 = vld [vmem:[%s29334_s7 + $0x3a0] sm:$0xff]  ;;  %v19141_v15 = vld [vmem:[%s29334_s7 + $0x3a8] sm:$0xff] }
 0xa5c   : > { %23570 = vmatprep.subr.bf16.mxu0 %v24788_v59  ;;  %v23682_v23 = vpack.c.bf16 %v19141_v15, %v19140_v2 }
 0xa5f   : > { %23572 = vmatpush3.bf16.msra.mxu0 %v23571_v43  ;;  %v19102_v43 = vld [vmem:[%s29334_s7 + $0x290] sm:$0xff] }
 0xa60   : > { %23573 = vmatprep.subr.bf16.mxu0 %v24788_v59 }
 0xa63   : > { %23575 = vmatpush3.bf16.msra.mxu0 %v23574_v8  ;;  %v23631_v8 = vpack.c.bf16 %v19103_v48, %v19102_v43  ;;  %v19143_v43 = vld [vmem:[%s29334_s7 + $0x3b8] sm:$0xff] }
 0xa64   : > { %23576 = vmatprep.subr.bf16.mxu0 %v24788_v59 }
 0xa67   : > { %23578 = vmatpush3.bf16.msra.mxu0 %v23577_v6  ;;  %v23634_v6 = vpack.c.bf16 %v19105_v20, %v19104_v4  ;;  %v19147_v20 = vld [vmem:[%s29334_s7 + $0x3d0] sm:$0xff] }
 0xa68   : > { %23579 = vmatprep.subr.bf16.mxu0 %v24788_v59 }
 0xa6a   : > { %22874 = vmatmul.mubr.msk.f32.vlgmr.msra.gmra.mrb[178].mxu0 %vm16117_vm7, %v16609_v50  ;;  %v23640_v50 = vpack.c.bf16 %v19110_v40, %v19109_v10  ;;  %v19150_v10 = vld [vmem:[%s29334_s7 + $0x3e8] sm:$0xff] }
 0xa6b   : > { %23581 = vmatpush3.bf16.msra.mxu0 %v23580_v12  ;;  %22892 = vmatprep.mubr.msk.f32.mxu0 %vm24789_vm6, %v29663_v19  ;;  %v23637_v12 = vpack.c.bf16 %v19107_v37, %v19106_v5  ;;  %v17367_v5 = vld [vmem:[#allocation10 + $0xe] sm:$0x1] }
 0xa6c   : > { %23582 = vmatprep.subr.bf16.mxu0 %v24788_v59 }
 0xa6f   : > { %23584 = vmatpush3.bf16.msra.mxu0 %v23583_v18  ;;  %v19111_v18 = vld [vmem:[%s29334_s7 + $0x2d0] sm:$0xff] }
 0xa70   : > { %23585 = vmatprep.subr.bf16.mxu0 %v24788_v59 }
 0xa73   : > { %23587 = vmatpush3.bf16.msra.mxu0 %v23586_v16  ;;  %v23643_v16 = vpack.c.bf16 %v19112_v30, %v19111_v18 }
 0xa74   : > { %23588 = vmatprep.subr.bf16.mxu0 %v24788_v59 }
 0xa77   : > { %23590 = vmatpush3.bf16.msra.mxu0 %v23589_v21  ;;  %v23646_v21 = vpack.c.bf16 %v19114_v57, %v19113_v17  ;;  %v17451_v57 = vld [vmem:[#allocation10 + $0xf] sm:$0x1] }
 0xa78   : > { %23591 = vmatprep.subr.bf16.mxu0 %v24788_v59 }
 0xa7a   : > { %22893 = vmatmul.mubr.msk.f32.vlgmr.msra.gmra.mrb[180].mxu0 %vm16117_vm7, %v16693_v45  ;;  %v23652_v45 = vpack.c.bf16 %v19119_v36, %v19118_v54 }
 0xa7b   : > { %23593 = vmatpush3.bf16.msra.mxu0 %v23592_v13  ;;  %22911 = vmatprep.mubr.msk.f32.mxu0 %vm24789_vm6, %v29663_v19  ;;  %v23649_v13 = vpack.c.bf16 %v19116_v9, %v19115_v44 }
 0xa7c   : > { %23594 = vmatprep.subr.bf16.mxu0 %v24788_v59 }
 0xa7f   : > { %23596 = vmatpush3.bf16.msra.mxu0 %v23595_v62  ;;  %v19120_v62 = vld [vmem:[%s29334_s7 + $0x310] sm:$0xff] }
 0xa80   : > { %23597 = vmatprep.subr.bf16.mxu0 %v24788_v59 }
 0xa83   : > { %23599 = vmatpush3.bf16.msra.mxu0 %v23598_v3  ;;  %v23655_v3 = vpack.c.bf16 %v19121_v27, %v19120_v62 }
 0xa84   : > { %23600 = vmatprep.subr.bf16.mxu0 %v24788_v59 }
 0xa87   : > { %23602 = vmatpush3.bf16.msra.mxu0 %v23601_v28  ;;  %v23658_v28 = vpack.c.bf16 %v19123_v7, %v19122_v25 }
 0xa88   : > { %23603 = vmatprep.subr.bf16.mxu0 %v24788_v59 }
 0xa8a   : > { %22912 = vmatmul.mubr.msk.f32.vlgmr.msra.gmra.mrb[182].mxu0 %vm16117_vm7, %v16777_v49  ;;  %v23664_v49 = vpack.c.bf16 %v19128_v51, %v19127_v35  ;;  %v17540_v51 = vld [vmem:[%s29336_s9 + $0x18] sm:$0xff] }
 0xa8b   : > { %23605 = vmatpush3.bf16.msra.mxu0 %v23604_v42  ;;  %22930 = vmatprep.mubr.msk.f32.mxu0 %vm24789_vm6, %v29663_v19  ;;  %v23661_v42 = vpack.c.bf16 %v19125_v34, %v19124_v53  ;;  %v17537_v34 = vld [vmem:[%s29336_s9] sm:$0xff] }
 0xa8c   : > { %23606 = vmatprep.subr.bf16.mxu0 %v24788_v59 }
 0xa8f   : > { %23608 = vmatpush3.bf16.msra.mxu0 %v23607_v38  ;;  %v19129_v38 = vld [vmem:[%s29334_s7 + $0x350] sm:$0xff] }
 0xa90   : > { %23609 = vmatprep.subr.bf16.mxu0 %v24788_v59 }
 0xa93   : > { %23611 = vmatpush3.bf16.msra.mxu0 %v23610_v26  ;;  %v23667_v26 = vpack.c.bf16 %v19130_v33, %v19129_v38  ;;  %v17541_v38 = vld [vmem:[%s29336_s9 + $0x20] sm:$0xff]  ;;  %v17542_v33 = vld [vmem:[%s29336_s9 + $0x28] sm:$0xff] }
 0xa94   : > { %23612 = vmatprep.subr.bf16.mxu0 %v24788_v59 }
 0xa97   : > { %23614 = vmatpush3.bf16.msra.mxu0 %v23613_v39  ;;  %v23670_v39 = vpack.c.bf16 %v19132_v47, %v19131_v29 }
 0xa98   : > { %23615 = vmatprep.subr.bf16.mxu0 %v24788_v59 }
 0xa9a   : > { %22931 = vmatmul.mubr.msk.f32.vlgmr.msra.gmra.mrb[184].mxu0 %vm16117_vm7, %v16862_v32  ;;  %v23676_v32 = vpack.c.bf16 %v19137_v52, %v19136_v24 }
 0xa9b   : > { %23617 = vmatpush3.bf16.msra.mxu0 %v23616_v22  ;;  %22949 = vmatprep.mubr.msk.f32.mxu0 %vm24789_vm6, %v29663_v19  ;;  %v23673_v22 = vpack.c.bf16 %v19134_v0, %v19133_v14  ;;  %v17544_v14 = vld [vmem:[%s29336_s9 + $0x38] sm:$0xff] }
 0xa9c   : > { %23618 = vmatprep.subr.bf16.mxu0 %v24788_v59 }
 0xa9f   : > { %23620 = vmatpush3.bf16.msra.mxu0 %v23619_v55  ;;  %v19138_v55 = vld [vmem:[%s29334_s7 + $0x390] sm:$0xff] }
 0xaa0   : > { %23621 = vmatprep.subr.bf16.mxu0 %v24788_v59 }
 0xaa3   : > { %23623 = vmatpush3.bf16.msra.mxu0 %v23622_v31  ;;  %v23679_v31 = vpack.c.bf16 %v19139_v60, %v19138_v55 }
 0xaa4   : > { %23624 = vmatprep.subr.bf16.mxu0 %v24788_v59 }
 0xaa7   : > { %23626 = vmatpush3.bf16.msra.mxu0 %v23625_v56 }
 0xaa8   : > { %23627 = vmatprep.subr.bf16.mxu0 %v24788_v59 }
 0xaaa   : > { %22950 = vmatmul.mubr.msk.f32.vlgmr.msra.gmra.mrb[186].mxu0 %vm16117_vm7, %v16946_v58  ;;  %v19145_v58 = vld [vmem:[%s29334_s7 + $0x3c0] sm:$0xff] }
 0xaab   : > { %23629 = vmatpush3.bf16.msra.mxu0 %v23628_v46  ;;  %22968 = vmatprep.mubr.msk.f32.mxu0 %vm24789_vm6, %v29663_v19  ;;  %v19142_v46 = vld [vmem:[%s29334_s7 + $0x3b0] sm:$0xff] }
 0xaac   : > { %23630 = vmatprep.subr.bf16.mxu0 %v24788_v59  ;;  %v23685_v48 = vpack.c.bf16 %v19143_v43, %v19142_v46 }
 0xaaf   : > { %23632 = vmatpush3.bf16.msra.mxu0 %v23631_v8  ;;  %v19146_v8 = vld [vmem:[%s29334_s7 + $0x3c8] sm:$0xff] }
 0xab0   : > { %23633 = vmatprep.subr.bf16.mxu0 %v24788_v59  ;;  %v23688_v4 = vpack.c.bf16 %v19146_v8, %v19145_v58 }
 0xab3   : > { %23635 = vmatpush3.bf16.msra.mxu0 %v23634_v6  ;;  %v19148_v6 = vld [vmem:[%s29334_s7 + $0x3d8] sm:$0xff] }
 0xab4   : > { %23636 = vmatprep.subr.bf16.mxu0 %v24788_v59  ;;  %v23691_v37 = vpack.c.bf16 %v19148_v6, %v19147_v20 }
 0xab7   : > { %23638 = vmatpush3.bf16.msra.mxu0 %v23637_v12  ;;  %v19149_v12 = vld [vmem:[%s29334_s7 + $0x3e0] sm:$0xff] }
 0xab8   : > { %23639 = vmatprep.subr.bf16.mxu0 %v24788_v59  ;;  %v23694_v30 = vpack.c.bf16 %v19150_v10, %v19149_v12 }
 0xaba   : > { %22969 = vmatmul.mubr.msk.f32.vlgmr.msra.gmra.mrb[188].mxu0 %vm16117_vm7, %v17030_v63  ;;  %v19151_v63 = vld [vmem:[%s29334_s7 + $0x3f0] sm:$0xff] }
 0xabb   : > { %23641 = vmatpush3.bf16.msra.mxu0 %v23640_v50  ;;  %22987 = vmatprep.mubr.msk.f32.mxu0 %vm24789_vm6, %v29663_v19 }
 0xabc   : > { %23642 = vmatprep.subr.bf16.mxu0 %v24788_v59 }
 0xabf   : > { %23644 = vmatpush3.bf16.msra.mxu0 %v23643_v16  ;;  %v19152_v16 = vld [vmem:[%s29334_s7 + $0x3f8] sm:$0xff] }
 0xac0   : > { %23645 = vmatprep.subr.bf16.mxu0 %v24788_v59  ;;  %v23697_v17 = vpack.c.bf16 %v19152_v16, %v19151_v63 }
 0xac3   : > { %23647 = vmatpush3.bf16.msra.mxu0 %v23646_v21 }
 0xac4   : > { %23648 = vmatprep.subr.bf16.mxu0 %v24788_v59 }
 0xac7   : > { %23650 = vmatpush3.bf16.msra.mxu0 %v23649_v13 }
 0xac8   : > { %23651 = vmatprep.subr.bf16.mxu0 %v24788_v59 }
 0xaca   : > { %22988 = vmatmul.mubr.msk.f32.vlgmr.msra.gmra.mrb[190].mxu0 %vm16117_vm7, %v17114_v41 }
 0xacb   : > { %23653 = vmatpush3.bf16.msra.mxu0 %v23652_v45  ;;  %23006 = vmatprep.mubr.msk.f32.mxu0 %vm24789_vm6, %v29663_v19 }
 0xacc   : > { %23654 = vmatprep.subr.bf16.mxu0 %v24788_v59 }
 0xacf   : > { %23656 = vmatpush3.bf16.msra.mxu0 %v23655_v3 }
 0xad0   : > { %23657 = vmatprep.subr.bf16.mxu0 %v24788_v59 }
 0xad3   : > { %23659 = vmatpush3.bf16.msra.mxu0 %v23658_v28 }
 0xad4   : > { %23660 = vmatprep.subr.bf16.mxu0 %v24788_v59 }
 0xad7   : > { %23662 = vmatpush3.bf16.msra.mxu0 %v23661_v42  ;;  %v17539_v42 = vld [vmem:[%s29336_s9 + $0x10] sm:$0xff] }
 0xad8   : > { %23663 = vmatprep.subr.bf16.mxu0 %v24788_v59 }
 0xada   : > { %23007 = vmatmul.mubr.msk.f32.vlgmr.msra.gmra.mrb[192].mxu0 %vm16117_vm7, %v17199_v1  ;;  %v23706_v1 = vpack.c.bf16 %v17542_v33, %v17541_v38 }
 0xadb   : > { %23665 = vmatpush3.bf16.msra.mxu0 %v23664_v49  ;;  %23025 = vmatprep.mubr.msk.f32.mxu0 %vm24789_vm6, %v29663_v19  ;;  %v23703_v49 = vpack.c.bf16 %v17540_v51, %v17539_v42 }
 0xadc   : > { %23666 = vmatprep.subr.bf16.mxu0 %v24788_v59 }
 0xadf   : > { %23668 = vmatpush3.bf16.msra.mxu0 %v23667_v26 }
 0xae0   : > { %23669 = vmatprep.subr.bf16.mxu0 %v24788_v59 }
 0xae3   : > { %23671 = vmatpush3.bf16.msra.mxu0 %v23670_v39  ;;  %v17543_v39 = vld [vmem:[%s29336_s9 + $0x30] sm:$0xff] }
 0xae4   : > { %23672 = vmatprep.subr.bf16.mxu0 %v24788_v59  ;;  %v23709_v0 = vpack.c.bf16 %v17544_v14, %v17543_v39 }
 0xae7   : > { %23674 = vmatpush3.bf16.msra.mxu0 %v23673_v22 }
 0xae8   : > { %23675 = vmatprep.subr.bf16.mxu0 %v24788_v59 }
 0xaea   : > { %23026 = vmatmul.mubr.msk.f32.vlgmr.msra.gmra.mrb[194].mxu0 %vm16117_vm7, %v17283_v11 }
 0xaeb   : > { %23677 = vmatpush3.bf16.msra.mxu0 %v23676_v32  ;;  %23044 = vmatprep.mubr.msk.f32.mxu0 %vm24789_vm6, %v29663_v19 }
 0xaec   : > { %23678 = vmatprep.subr.bf16.mxu0 %v24788_v59 }
 0xaed   : > { %v16279_v56 = vpop.f32.mrb[168].mxu0 }
 0xaee   : > { %v22780_v61 = vpop.f32.mrb[169].mxu0 }
 0xaef   : > { %23680 = vmatpush3.bf16.msra.mxu0 %v23679_v31 }
 0xaf0   : > { %23681 = vmatprep.subr.bf16.mxu0 %v24788_v59 }
 0xaf3   : > { %23683 = vmatpush3.bf16.msra.mxu0 %v23682_v23 }
 0xaf4   : > { %23684 = vmatprep.subr.bf16.mxu0 %v24788_v59 }
 0xaf7   : > { %23686 = vmatpush3.bf16.msra.mxu0 %v23685_v48 }
 0xaf8   : > { %23687 = vmatprep.subr.bf16.mxu0 %v24788_v59 }
 0xafa   : > { %23045 = vmatmul.mubr.msk.f32.vlgmr.msra.gmra.mrb[196].mxu0 %vm16117_vm7, %v17367_v5  ;;  %v17535_v5 = vld [vmem:[%s29335_s8] sm:$0x1] }
 0xafb   : > { %23689 = vmatpush3.bf16.msra.mxu0 %v23688_v4  ;;  %23063 = vmatprep.mubr.msk.f32.mxu0 %vm24789_vm6, %v29663_v19 }
 0xafc   : > { %23690 = vmatprep.subr.bf16.mxu0 %v24788_v59 }
 0xafd   : > { %v16352_v40 = vpop.f32.mrb[170].mxu0 }
 0xafe   : > { %v16353_v50 = vadd.f32 %v16352_v40, %v16279_v56  ;;  %v22799_v18 = vpop.f32.mrb[171].mxu0  ;;  %v17545_v40 = vld [vmem:[%s29337_s10] sm:$0x1] }
 0xaff   : > { %23692 = vmatpush3.bf16.msra.mxu0 %v23691_v37 }
 0xb00   : > { %23693 = vmatprep.subr.bf16.mxu0 %v24788_v59 }
 0xb03   : > { %23695 = vmatpush3.bf16.msra.mxu0 %v23694_v30 }
 0xb04   : > { %23696 = vmatprep.subr.bf16.mxu0 %v24788_v59 }
 0xb07   : > { %23698 = vmatpush3.bf16.msra.mxu0 %v23697_v17 }
 0xb08   : > { %23699 = vmatprep.subr.bf16.mxu0 %v24788_v59 }
 0xb0a   : > { %23064 = vmatmul.mubr.msk.f32.vlgmr.msra.gmra.mrb[198].mxu0 %vm16117_vm7, %v17451_v57 }
 0xb0b   : > { %23082 = vmatprep.mubr.msk.f32.mxu0 %vm24789_vm6, %v29663_v19  ;;  %v17538_v19 = vld [vmem:[%s29336_s9 + $0x8] sm:$0xff] }
 0xb0c   : > { %v23700_v35 = vpack.c.bf16 %v17538_v19, %v17537_v34 }
 0xb0d   : > { %v16435_v21 = vpop.f32.mrb[172].mxu0 }
 0xb0e   : > { %v16439_v44 = vadd.f32 %v16435_v21, %v16353_v50  ;;  %v22818_v9 = vpop.f32.mrb[173].mxu0  ;;  %23701 = vmatpush3.bf16.msra.mxu0 %v23700_v35 }
 0xb0f   : > { %23702 = vmatprep.subr.bf16.mxu0 %v24788_v59 }
 0xb12   : > { %23704 = vmatpush3.bf16.msra.mxu0 %v23703_v49 }
 0xb13   : > { %23705 = vmatprep.subr.bf16.mxu0 %v24788_v59 }
 0xb16   : > { %23707 = vmatpush3.bf16.msra.mxu0 %v23706_v1 }
 0xb17   : > { %23708 = vmatprep.subr.bf16.mxu0 %v24788_v59 }
 0xb1a   : > { %23710 = vmatpush3.bf16.msra.mxu0 %v23709_v0 }
 0xb1d   : > { %v16519_v13 = vpop.f32.mrb[174].mxu0 }
 0xb1e   : > { %v16523_v54 = vadd.f32 %v16519_v13, %v16439_v44  ;;  %v22837_v36 = vpop.f32.mrb[175].mxu0 }
 0xb2d   : > { %v16604_v45 = vpop.f32.mrb[176].mxu0 }
 0xb2e   : > { %v16608_v62 = vadd.f32 %v16604_v45, %v16523_v54  ;;  %v22856_v27 = vpop.f32.mrb[177].mxu0 }
 0xb3d   : > { %v16688_v41 = vpop.f32.mrb[178].mxu0 }
 0xb3e   : > { %v16692_v3 = vadd.f32 %v16688_v41, %v16608_v62  ;;  %v22875_v25 = vpop.f32.mrb[179].mxu0 }
 0xb4d   : > { %v16772_v7 = vpop.f32.mrb[180].mxu0 }
 0xb4e   : > { %v16776_v28 = vadd.f32 %v16772_v7, %v16692_v3  ;;  %v22894_v53 = vpop.f32.mrb[181].mxu0 }
 0xb5d   : > { %v16856_v26 = vpop.f32.mrb[182].mxu0 }
 0xb5e   : > { %v16860_v29 = vadd.f32 %v16856_v26, %v16776_v28  ;;  %v22913_v47 = vpop.f32.mrb[183].mxu0 }
 0xb6d   : > { %v16941_v22 = vpop.f32.mrb[184].mxu0 }
 0xb6e   : > { %v16945_v24 = vadd.f32 %v16941_v22, %v16860_v29  ;;  %v22932_v52 = vpop.f32.mrb[185].mxu0 }
 0xb7d   : > { %v17025_v32 = vpop.f32.mrb[186].mxu0 }
 0xb7e   : > { %v17029_v55 = vadd.f32 %v17025_v32, %v16945_v24  ;;  %v22951_v60 = vpop.f32.mrb[187].mxu0 }
 0xb8d   : > { %v17109_v59 = vpop.f32.mrb[188].mxu0 }
 0xb8e   : > { %v17113_v11 = vadd.f32 %v17109_v59, %v17029_v55  ;;  %v22970_v31 = vpop.f32.mrb[189].mxu0 }
 0xb9d   : > { %v17193_v2 = vpop.f32.mrb[190].mxu0 }
 0xb9e   : > { %v17197_v15 = vadd.f32 %v17193_v2, %v17113_v11  ;;  %v22989_v56 = vpop.f32.mrb[191].mxu0 }
 0xbad   : > { %v17278_v61 = vpop.f32.mrb[192].mxu0 }
 0xbae   : > { %v17282_v23 = vadd.f32 %v17278_v61, %v17197_v15  ;;  %v23008_v46 = vpop.f32.mrb[193].mxu0 }
 0xbbd   : > { %v17362_v43 = vpop.f32.mrb[194].mxu0 }
 0xbbe   : > { %v17366_v48 = vadd.f32 %v17362_v43, %v17282_v23  ;;  %v23027_v58 = vpop.f32.mrb[195].mxu0 }
 0xbcd   : > { %v17446_v8 = vpop.f32.mrb[196].mxu0 }
 0xbce   : > { %v17450_v4 = vadd.f32 %v17446_v8, %v17366_v48  ;;  %v23046_v20 = vpop.f32.mrb[197].mxu0 }
 0xbdd   : > { %v17530_v6 = vpop.f32.mrb[198].mxu0 }
 0xbde   : > { %v17534_v37 = vadd.f32 %v17530_v6, %v17450_v4  ;;  %v23065_v12 = vpop.f32.mrb[199].mxu0 }
 0xbe0   : > { %v17536_v10 = vadd.f32 %v17535_v5, %v17534_v37 }
 0xbe2   : > { %23083 = vmatmul.mubr.msk.f32.vlgmr.msra.gmra.mrb[200].mxu0 %vm16117_vm7, %v17536_v10 }
 0xcb5   : > { %v17615_v50 = vpop.f32.mrb[200].mxu0 }
 0xcb6   : > { %v17616_v18 = vadd.f32 %v17615_v50, %v17545_v40  ;;  %v23084_v30 = vpop.f32.mrb[201].mxu0 }
 0xcb8   : > { %17619 = vst [vmem:[%s378_s30] sm:$0x1] %v17616_v18 }
 0xcb9   : > { %24735 = shalt.err (!%p24732_p3)
}
 0xcba   : > { %s24736_s22 = scalar_lea.hbm %s29285_s13, 16  ;;  %s24740_s26 = scalar_lea.hbm %s29338_s11, 32 }
 0xcbb   : > { %p24737_p4 = scmp.ne.s32.totalorder %s29285_s13, %s24736_s22  ;;  %p24741_p9 = scmp.lt.u32.totalorder %s29285_s13, %s29338_s11 }
 0xcbc   : > { %p24742_p10 = scmp.lt.u32.totalorder %s24740_s26, %s24736_s22  ;;  %p24744_p12 = scmp.lt.u32.totalorder %s24736_s22, %s29285_s13 }
 0xcbd   : > { %p24738_p7 = pnand %p24737_p4, %p24889_p5 }
 0xcbe   : > { %p24743_p11 = por %p24742_p10, %p24741_p9 }
 0xcbf   : > { %p24739_p8 = pneg %p24738_p7 }
 0xcc0   : > { %p24745_p13 = por %p24744_p12, %p24743_p11 }
 0xcc2   : > { %p24746_p0 = pnand %p24745_p13, %p24739_p8 }
 0xcc4   : > { %24749 = shalt.err (!%p24746_p0)
}
 0xcc5   : > { %24675 = dma.vmem_to_hbm [thread:$0]  (%p24889_p5), %s29287_s16, 16, %s29285_s13, %s17621_s14  }
 0xcc6 PF: > { %p24681_p1 = scmp.ge.s32.totalorder %s24784_s20, 2  ;;  %s17645_s15 = sand.u32 1, %s24772_s17  }
 0xcc7   : > { %s17646_s24 = scalar_lea.sflag [#allocation12], %s17645_s15 }
 0xcc8   : > { %p24678_p2 = pnand %p24681_p1, %p24893_p6 }
 0xcca   : > { %24767 = dma.done.wait (!%p24678_p2), %s17646_s24, 16  }
 0xccb   : > { %24769 = vsyncadd (!%p24678_p2), %s17646_s24, 4294967280  ;;  %s29664_s25 = sld [smem:[#allocation14_spill]]  ;;  %p21_p3 = scmp.ge.s32.totalorder %s24876_s23, 4  }
 0xccc   : > { %s29665_s17 = smov %s24776_s18  ;;  %s29666_s18 = smov %s24780_s19 }
 0xccd   : > { %s29668_s20 = smov %s24876_s23  ;;  %23 = sbr.rel (!%p21_p3) target bundleno = 3 (0x3), region = 349 }
 0xcd1   : > { %s29667_s19 = smov %s29664_s25 }
 0xcd4   :  { %17650 = vsyncpa [#allocation12], 1 }
 0xcd5   :  { %17652 = vsyncpa [#allocation12 + $0x1], 1 }

</bundles_post_ra>
